<compile_context>
chip_gen: v6e
topology: v6e:2x2x1
jax: 0.10.0
libtpu: 0.0.40
codegen_flags: <defaults>
</compile_context>

<pallas_src>
import functools
import math

import jax
import jax.numpy as jnp
from jax.experimental import pallas as pl
from jax.experimental.pallas import tpu as pltpu

HIDDEN = 300   # real hidden size (PyTorch module)
HP = 384       # padded hidden size (multiple of 128)
FCP = 128      # padded fc output width (real output lives in column 0)


def _gru_kernel(x_ref, wih_ref, whh_ref, bih_ref, bhhn_ref, wfc_ref, bfc_ref,
                out_ref, h_scratch, gi_scratch, *, tt, bt, t_real, needs_mask):
    # x_ref:     [tt*Bt, Ep]    bf16  (one time block of one batch tile;
    #                                  row = t_local*Bt + b_local)
    # wih_ref:   [Ep, 3*Hp]     bf16  (resident across grid)
    # whh_ref:   [Hp, 3*Hp]     bf16  (resident across grid)
    # bih_ref:   [1, 3*Hp]      f32   (r,z slots already include b_hh_r/b_hh_z)
    # bhhn_ref:  [1, Hp]        f32   (b_hh n-gate slot, applied inside r*(...))
    # wfc_ref:   [1, Hp]        f32
    # bfc_ref:   [1, 1]         f32
    # out_ref:   [Bt, FCP]      f32   (resident across the time axis)
    # h_scratch: [Bt, Hp]       f32   (persists across time blocks)
    # gi_scratch:[tt*Bt, 3*Hp]  bf16
    hp = h_scratch.shape[-1]
    tb = pl.program_id(1)
    nb = pl.num_programs(1)

    @pl.when(tb == 0)
    def _():
        h_scratch[...] = jnp.zeros_like(h_scratch)

    # Input projection for the whole time block: one big MXU matmul with
    # M = tt*Bt (>= 256 when possible).  Fused bias (b_ih with b_hh folded in
    # for r,z) is added once per block, then the result is stored as bf16.
    gi_scratch[...] = (
        jnp.dot(x_ref[...], wih_ref[...], preferred_element_type=jnp.float32)
        + bih_ref[...]).astype(jnp.bfloat16)

    # Hoisted broadcasts (JAX does not CSE broadcast_in_dim across the unroll).
    bhhn = jnp.broadcast_to(bhhn_ref[...], (bt, hp))   # [Bt, Hp]
    h = h_scratch[...]              # carried in vregs through the unrolled loop

    # Serial recurrence over the block, fully unrolled (tt <= 32) so the LLO
    # scheduler can overlap gate VPU/EUP work with the next MXU push.
    # TODO(synk): optional per-step split gh_rz / gh_n (v5e/v6e MRF overlap
    # experiment) left out pending a per-iteration bundle-delta check.
    for t in range(tt):
        gi_t = gi_scratch[pl.ds(t * bt, bt), :]                  # [Bt, 3Hp] bf16
        gh = jnp.dot(h.astype(jnp.bfloat16), whh_ref[...],
                     preferred_element_type=jnp.float32)         # [Bt, 3Hp] f32
        # PyTorch GRU gate order: r, z, n  (bf16 gi upcasts to f32 in the adds)
        r = jax.nn.sigmoid(gi_t[:, 0:hp] + gh[:, 0:hp])
        z = jax.nn.sigmoid(gi_t[:, hp:2 * hp] + gh[:, hp:2 * hp])
        n = jnp.tanh(gi_t[:, 2 * hp:] + r * (gh[:, 2 * hp:] + bhhn))
        h_new = (1.0 - z) * n + z * h
        if needs_mask:
            # Padded (beyond-T) timesteps leave h unchanged.
            h = jnp.where(tb * tt + t < t_real, h_new, h)
        else:
            h = h_new

    h_scratch[...] = h

    @pl.when(tb == nb - 1)
    def _():
        # Final Linear(300,1) + sigmoid: only 1 output column is live, so do a
        # VPU multiply + cross-lane reduce instead of a 128-wide MXU pass.
        logit = jnp.sum(h * wfc_ref[...], axis=-1, keepdims=True) + bfc_ref[...]
        out_ref[...] = jnp.broadcast_to(jax.nn.sigmoid(logit), out_ref.shape)


def gru_forward(x, params):
    """x: [B, T, E] float32 (batch_first, like the PyTorch module)."""
    B, T, E = x.shape
    H = HIDDEN
    w_ih, w_hh, b_ih, b_hh, w_fc, b_fc = params

    Ep = max(128, ((E + 127) // 128) * 128)

    # Batch padding / tiling.  The per-step h@W_hh matmul cost is nearly flat
    # in Bt (it is dominated by re-streaming the 384x1152 RHS), so packing
    # more sequences per call — up to Bt = 128 (v5e) / 256 (v6e/v7x) — is
    # essentially free throughput.  Batch tiles beyond Bt go on the leading
    # "parallel" grid axis so v7x's two TensorCores split them.
    Bp = max(8, ((B + 7) // 8) * 8)
    Bt = min(Bp, 256)
    n_bt = -(-Bp // Bt)
    Bp = n_bt * Bt

    # Time block: aim for tt*Bt >= 256 so the input-projection matmul fills
    # the 256-wide MXU on v6e/v7x; keep tt even (bf16 second-minor packing),
    # cap the unroll at 32, and never exceed (padded) T.
    tt = -(-256 // Bt)
    tt = min(32, ((tt + 1) // 2) * 2)
    tt = min(tt, ((T + 1) // 2) * 2)
    tt = max(2, tt)

    # VMEM budget: gi (bf16) + 2x x block + 2x resident weights + h + out.
    def vmem_bytes(tt_):
        gi = tt_ * Bt * 3 * HP * 2                     # bf16 gi scratch
        xb = 2 * tt_ * Bt * Ep * 2                     # double-buffered x block
        w = 2 * (Ep + HP) * 3 * HP * 2                 # double-buffered weights
        misc = 2 * (3 * HP + 2 * HP + 1) * 4           # biases / fc params
        h = Bt * HP * 4
        out = 2 * Bt * FCP * 4
        return gi + xb + w + misc + h + out

    VMEM_BUDGET = 48 * 1024 * 1024   # leaves headroom on v7x's 64 MiB VMEM
    while tt > 2 and vmem_bytes(tt) > VMEM_BUDGET:
        tt = max(2, (tt // 2) - ((tt // 2) % 2))

    t_pad = -(-T // tt) * tt
    nb = t_pad // tt
    needs_mask = (t_pad != T)

    vmem_limit = int(min(64 * 1024 * 1024,
                         max(32 * 1024 * 1024, 2 * vmem_bytes(tt))))

    # --- parameter packing (plain JAX glue) ---
    def pack_w(w, K, Kp, dtype):
        # w: (3H, K) PyTorch layout -> (Kp, 3*HP), per-gate zero-padded.
        out = jnp.zeros((Kp, 3 * HP), jnp.float32)
        for g in range(3):
            out = out.at[:K, g * HP:g * HP + H].set(w[g * H:(g + 1) * H, :].T)
        return out.astype(dtype)

    wih_p = pack_w(w_ih, E, Ep, jnp.bfloat16)
    whh_p = pack_w(w_hh, H, HP, jnp.bfloat16)

    # Bias folding: r,z gates get b_ih+b_hh; n gate keeps b_ih only here and
    # b_hh_n separately (it sits inside the r*(...) term).
    bih_p = jnp.zeros((1, 3 * HP), jnp.float32)
    bih_p = bih_p.at[0, 0:H].set(b_ih[0:H] + b_hh[0:H])                    # r
    bih_p = bih_p.at[0, HP:HP + H].set(b_ih[H:2 * H] + b_hh[H:2 * H])      # z
    bih_p = bih_p.at[0, 2 * HP:2 * HP + H].set(b_ih[2 * H:3 * H])          # n
    bhhn_p = jnp.zeros((1, HP), jnp.float32).at[0, :H].set(b_hh[2 * H:3 * H])

    wfc_p = jnp.zeros((1, HP), jnp.float32).at[0, :H].set(w_fc[0, :])
    bfc_p = b_fc.astype(jnp.float32).reshape(1, 1)

    # x: [B,T,E] -> bf16 FIRST (halves prologue HBM traffic), then time-major,
    # pad (time, batch, emb), group by batch tile, flatten per-tile to
    # [n_bt, t_pad*Bt, Ep] with row = t*Bt + b_local.
    xt = jnp.transpose(x.astype(jnp.bfloat16), (1, 0, 2))          # [T, B, E]
    xt = jnp.pad(xt, ((0, t_pad - T), (0, Bp - B), (0, Ep - E)))
    xt = xt.reshape(t_pad, n_bt, Bt, Ep).transpose(1, 0, 2, 3)
    xt = xt.reshape(n_bt, t_pad * Bt, Ep)

    kernel = functools.partial(_gru_kernel, tt=tt, bt=Bt, t_real=T,
                               needs_mask=needs_mask)

    out = pl.pallas_call(
        kernel,
        out_shape=jax.ShapeDtypeStruct((Bp, FCP), jnp.float32),
        grid_spec=pltpu.PrefetchScalarGridSpec(
            num_scalar_prefetch=0,
            grid=(n_bt, nb),
            in_specs=[
                # streamed time block of x for the current batch tile
                pl.BlockSpec((None, tt * Bt, Ep), lambda b, t: (b, t, 0)),
                # weights / biases: constant index_map -> DMA'd once, resident
                pl.BlockSpec((Ep, 3 * HP), lambda b, t: (0, 0)),
                pl.BlockSpec((HP, 3 * HP), lambda b, t: (0, 0)),
                pl.BlockSpec((1, 3 * HP), lambda b, t: (0, 0)),
                pl.BlockSpec((1, HP), lambda b, t: (0, 0)),
                pl.BlockSpec((1, HP), lambda b, t: (0, 0)),
                pl.BlockSpec((1, 1), lambda b, t: (0, 0)),
            ],
            out_specs=pl.BlockSpec((Bt, FCP), lambda b, t: (b, 0)),
            scratch_shapes=[
                pltpu.VMEM((Bt, HP), jnp.float32),            # h (persists)
                pltpu.VMEM((tt * Bt, 3 * HP), jnp.bfloat16),  # gi block (bf16)
            ]),
        compiler_params=pltpu.CompilerParams(
            dimension_semantics=("parallel", "arbitrary"),
            vmem_limit_bytes=vmem_limit),
    )(xt, wih_p, whh_p, bih_p, bhhn_p, wfc_p, bfc_p)

    return out[:B, 0:1]   # [B, 1], matches torch.sigmoid(fc(h_n[0]))


def init_params(key, embedding_size):
    """Deterministic init with PyTorch-style uniform(-1/sqrt(H), 1/sqrt(H))."""
    H = HIDDEN
    k_gru = 1.0 / math.sqrt(H)
    k_fc = 1.0 / math.sqrt(H)
    ks = jax.random.split(key, 6)
    w_ih = jax.random.uniform(ks[0], (3 * H, embedding_size), jnp.float32, -k_gru, k_gru)
    w_hh = jax.random.uniform(ks[1], (3 * H, H), jnp.float32, -k_gru, k_gru)
    b_ih = jax.random.uniform(ks[2], (3 * H,), jnp.float32, -k_gru, k_gru)
    b_hh = jax.random.uniform(ks[3], (3 * H,), jnp.float32, -k_gru, k_gru)
    w_fc = jax.random.uniform(ks[4], (1, H), jnp.float32, -k_fc, k_fc)
    b_fc = jax.random.uniform(ks[5], (1,), jnp.float32, -k_fc, k_fc)
    return (w_ih, w_hh, b_ih, b_hh, w_fc, b_fc)


def ref_forward(x, params):
    """Pure-JAX f32 reference implementing PyTorch GRU + Linear + sigmoid."""
    w_ih, w_hh, b_ih, b_hh, w_fc, b_fc = params
    B, T, E = x.shape
    H = HIDDEN
    h = jnp.zeros((B, H), jnp.float32)
    for t in range(T):
        x_t = x[:, t, :]
        gi = x_t @ w_ih.T + b_ih
        gh = h @ w_hh.T + b_hh
        r = jax.nn.sigmoid(gi[:, :H] + gh[:, :H])
        z = jax.nn.sigmoid(gi[:, H:2 * H] + gh[:, H:2 * H])
        n = jnp.tanh(gi[:, 2 * H:] + r * gh[:, 2 * H:])
        h = (1.0 - z) * n + z * h
    return jax.nn.sigmoid(h @ w_fc.T + b_fc)


if __name__ == "__main__":
    embedding_size = 64
    B, T = 2, 8

    key = jax.random.PRNGKey(0)
    k_x, k_p = jax.random.split(key)
    x = jax.random.normal(k_x, (B, T, embedding_size), jnp.float32)
    params = init_params(k_p, embedding_size)

    out = jax.block_until_ready(gru_forward(x, params))
    ref = ref_forward(x, params)

    assert out.shape == (B, 1), out.shape
    assert bool(jnp.all(jnp.isfinite(out)))
    # bf16 matmul weights (f32 accumulation/gate math) -> slightly looser tol.
    assert bool(jnp.allclose(out, ref, rtol=2e-2, atol=2e-2)), (out, ref)

    print("KERNEL_OK")
</pallas_src>

<mosaic_0001>
module attributes {stable_mosaic.version = 11 : i64} {
  func.func @_gru_kernel(%arg0: i32, %arg1: i32, %arg2: memref<1x64x128xbf16, #tpu.memory_space<vmem>>, %arg3: memref<128x1152xbf16, #tpu.memory_space<vmem>>, %arg4: memref<384x1152xbf16, #tpu.memory_space<vmem>>, %arg5: memref<1x1152xf32, #tpu.memory_space<vmem>>, %arg6: memref<1x384xf32, #tpu.memory_space<vmem>>, %arg7: memref<1x384xf32, #tpu.memory_space<vmem>>, %arg8: memref<1x1xf32, #tpu.memory_space<vmem>>, %arg9: memref<8x128xf32, #tpu.memory_space<vmem>>, %arg10: memref<8x384xf32, #tpu.memory_space<vmem>>, %arg11: memref<64x1152xbf16, #tpu.memory_space<vmem>>) attributes {dimension_semantics = [#tpu.dimension_semantics<parallel>, #tpu.dimension_semantics<arbitrary>], iteration_bounds = array<i64: 1, 1>, scalar_prefetch = 0 : i64, scratch_operands = 2 : i64, tpu.core_type = #tpu.core_type<tc>, window_params = [{transform_indices = @transform_0, window_bounds = array<i64: 1, 64, 128>}, {pipeline_mode = #tpu.pipeline_mode<synchronous>, transform_indices = @transform_1, window_bounds = array<i64: 128, 1152>}, {pipeline_mode = #tpu.pipeline_mode<synchronous>, transform_indices = @transform_2, window_bounds = array<i64: 384, 1152>}, {pipeline_mode = #tpu.pipeline_mode<synchronous>, transform_indices = @transform_3, window_bounds = array<i64: 1, 1152>}, {pipeline_mode = #tpu.pipeline_mode<synchronous>, transform_indices = @transform_4, window_bounds = array<i64: 1, 384>}, {pipeline_mode = #tpu.pipeline_mode<synchronous>, transform_indices = @transform_5, window_bounds = array<i64: 1, 384>}, {pipeline_mode = #tpu.pipeline_mode<synchronous>, transform_indices = @transform_6, window_bounds = array<i64: 1, 1>}, {transform_indices = @transform_7, window_bounds = array<i64: 8, 128>}]} {
    %c0_i32 = arith.constant 0 : i32
    %0 = arith.cmpi eq, %arg1, %c0_i32 : i32
    %1 = arith.extui %0 : i1 to i32
    %c0_i32_0 = arith.constant 0 : i32
    %2 = arith.cmpi ne, %1, %c0_i32_0 : i32
    scf.if %2 {
      %cst_74 = arith.constant 0.000000e+00 : f32
      %292 = vector.broadcast %cst_74 : f32 to vector<8x384xf32>
      %c0_75 = arith.constant 0 : index
      %c0_76 = arith.constant 0 : index
      %293 = vector.load %arg10[%c0_75, %c0_76] : memref<8x384xf32, #tpu.memory_space<vmem>>, vector<8x384xf32>
      tpu.vector_store %arg10[%c0_75, %c0_76], %292 {strides = array<i32>} : memref<8x384xf32, #tpu.memory_space<vmem>>, vector<8x384xf32>,
    } else {
    }
    %c0 = arith.constant 0 : index
    %c0_1 = arith.constant 0 : index
    %c0_2 = arith.constant 0 : index
    %3 = vector.load %arg2[%c0, %c0_1, %c0_2] : memref<1x64x128xbf16, #tpu.memory_space<vmem>>, vector<1x64x128xbf16>
    %4 = vector.shape_cast %3 : vector<1x64x128xbf16> to vector<64x128xbf16>
    %c0_3 = arith.constant 0 : index
    %c0_4 = arith.constant 0 : index
    %5 = vector.load %arg3[%c0_3, %c0_4] : memref<128x1152xbf16, #tpu.memory_space<vmem>>, vector<128x1152xbf16>
    %cst = arith.constant dense<0.000000e+00> : vector<64x1152xf32>
    %6 = tpu.matmul %4, %5, %cst {dimension_numbers = #tpu.dot_dimension_numbers<[1], [0], [0], [1], [0, 0, 1, 1], [], []>} : vector<64x128xbf16>, vector<128x1152xbf16>, vector<64x1152xf32> -> vector<64x1152xf32>
    %c0_5 = arith.constant 0 : index
    %c0_6 = arith.constant 0 : index
    %7 = vector.load %arg5[%c0_5, %c0_6] : memref<1x1152xf32, #tpu.memory_space<vmem>>, vector<1x1152xf32>
    %8 = vector.broadcast %7 : vector<1x1152xf32> to vector<64x1152xf32>
    %9 = arith.addf %6, %8 : vector<64x1152xf32>
    %10 = arith.truncf %9 : vector<64x1152xf32> to vector<64x1152xbf16>
    %c0_7 = arith.constant 0 : index
    %c0_8 = arith.constant 0 : index
    %11 = vector.load %arg11[%c0_7, %c0_8] : memref<64x1152xbf16, #tpu.memory_space<vmem>>, vector<64x1152xbf16>
    tpu.vector_store %arg11[%c0_7, %c0_8], %10 {strides = array<i32>} : memref<64x1152xbf16, #tpu.memory_space<vmem>>, vector<64x1152xbf16>,
    %c0_9 = arith.constant 0 : index
    %c0_10 = arith.constant 0 : index
    %12 = vector.load %arg6[%c0_9, %c0_10] : memref<1x384xf32, #tpu.memory_space<vmem>>, vector<1x384xf32>
    %13 = vector.shape_cast %12 : vector<1x384xf32> to vector<1x384xf32>
    %14 = vector.broadcast %13 : vector<1x384xf32> to vector<8x384xf32>
    %c0_11 = arith.constant 0 : index
    %c0_12 = arith.constant 0 : index
    %15 = vector.load %arg10[%c0_11, %c0_12] : memref<8x384xf32, #tpu.memory_space<vmem>>, vector<8x384xf32>
    %c0_13 = arith.constant 0 : index
    %c0_14 = arith.constant 0 : index
    %16 = vector.load %arg11[%c0_13, %c0_14] : memref<64x1152xbf16, #tpu.memory_space<vmem>>, vector<8x1152xbf16>
    %17 = arith.truncf %15 : vector<8x384xf32> to vector<8x384xbf16>
    %c0_15 = arith.constant 0 : index
    %c0_16 = arith.constant 0 : index
    %18 = vector.load %arg4[%c0_15, %c0_16] : memref<384x1152xbf16, #tpu.memory_space<vmem>>, vector<384x1152xbf16>
    %cst_17 = arith.constant dense<0.000000e+00> : vector<8x1152xf32>
    %19 = tpu.matmul %17, %18, %cst_17 {dimension_numbers = #tpu.dot_dimension_numbers<[1], [0], [0], [1], [0, 0, 1, 1], [], []>} : vector<8x384xbf16>, vector<384x1152xbf16>, vector<8x1152xf32> -> vector<8x1152xf32>
    %20 = vector.extract_strided_slice %16 {offsets = [0, 0], sizes = [8, 384], strides = [1, 1]} : vector<8x1152xbf16> to vector<8x384xbf16>
    %21 = vector.extract_strided_slice %19 {offsets = [0, 0], sizes = [8, 384], strides = [1, 1]} : vector<8x1152xf32> to vector<8x384xf32>
    %22 = arith.extf %20 : vector<8x384xbf16> to vector<8x384xf32>
    %23 = arith.addf %22, %21 : vector<8x384xf32>
    %24 = arith.negf %23 : vector<8x384xf32>
    %25 = math.exp %24 : vector<8x384xf32>
    %cst_18 = arith.constant 1.000000e+00 : f32
    %26 = vector.broadcast %cst_18 : f32 to vector<8x384xf32>
    %27 = arith.addf %26, %25 : vector<8x384xf32>
    %28 = arith.divf %26, %27 : vector<8x384xf32>
    %29 = vector.extract_strided_slice %16 {offsets = [0, 384], sizes = [8, 384], strides = [1, 1]} : vector<8x1152xbf16> to vector<8x384xbf16>
    %30 = vector.extract_strided_slice %19 {offsets = [0, 384], sizes = [8, 384], strides = [1, 1]} : vector<8x1152xf32> to vector<8x384xf32>
    %31 = arith.extf %29 : vector<8x384xbf16> to vector<8x384xf32>
    %32 = arith.addf %31, %30 : vector<8x384xf32>
    %33 = arith.negf %32 : vector<8x384xf32>
    %34 = math.exp %33 : vector<8x384xf32>
    %cst_19 = arith.constant 1.000000e+00 : f32
    %35 = vector.broadcast %cst_19 : f32 to vector<8x384xf32>
    %36 = arith.addf %35, %34 : vector<8x384xf32>
    %37 = arith.divf %35, %36 : vector<8x384xf32>
    %38 = vector.extract_strided_slice %16 {offsets = [0, 768], sizes = [8, 384], strides = [1, 1]} : vector<8x1152xbf16> to vector<8x384xbf16>
    %39 = vector.extract_strided_slice %19 {offsets = [0, 768], sizes = [8, 384], strides = [1, 1]} : vector<8x1152xf32> to vector<8x384xf32>
    %40 = arith.addf %39, %14 : vector<8x384xf32>
    %41 = arith.mulf %28, %40 : vector<8x384xf32>
    %42 = arith.extf %38 : vector<8x384xbf16> to vector<8x384xf32>
    %43 = arith.addf %42, %41 : vector<8x384xf32>
    %44 = math.tanh %43 : vector<8x384xf32>
    %cst_20 = arith.constant 1.000000e+00 : f32
    %45 = vector.broadcast %cst_20 : f32 to vector<8x384xf32>
    %46 = arith.subf %45, %37 : vector<8x384xf32>
    %47 = arith.mulf %46, %44 : vector<8x384xf32>
    %48 = arith.mulf %37, %15 : vector<8x384xf32>
    %49 = arith.addf %47, %48 : vector<8x384xf32>
    %c8 = arith.constant 8 : index
    %c0_21 = arith.constant 0 : index
    %50 = vector.load %arg11[%c8, %c0_21] : memref<64x1152xbf16, #tpu.memory_space<vmem>>, vector<8x1152xbf16>
    %51 = arith.truncf %49 : vector<8x384xf32> to vector<8x384xbf16>
    %c0_22 = arith.constant 0 : index
    %c0_23 = arith.constant 0 : index
    %52 = vector.load %arg4[%c0_22, %c0_23] : memref<384x1152xbf16, #tpu.memory_space<vmem>>, vector<384x1152xbf16>
    %cst_24 = arith.constant dense<0.000000e+00> : vector<8x1152xf32>
    %53 = tpu.matmul %51, %52, %cst_24 {dimension_numbers = #tpu.dot_dimension_numbers<[1], [0], [0], [1], [0, 0, 1, 1], [], []>} : vector<8x384xbf16>, vector<384x1152xbf16>, vector<8x1152xf32> -> vector<8x1152xf32>
    %54 = vector.extract_strided_slice %50 {offsets = [0, 0], sizes = [8, 384], strides = [1, 1]} : vector<8x1152xbf16> to vector<8x384xbf16>
    %55 = vector.extract_strided_slice %53 {offsets = [0, 0], sizes = [8, 384], strides = [1, 1]} : vector<8x1152xf32> to vector<8x384xf32>
    %56 = arith.extf %54 : vector<8x384xbf16> to vector<8x384xf32>
    %57 = arith.addf %56, %55 : vector<8x384xf32>
    %58 = arith.negf %57 : vector<8x384xf32>
    %59 = math.exp %58 : vector<8x384xf32>
    %cst_25 = arith.constant 1.000000e+00 : f32
    %60 = vector.broadcast %cst_25 : f32 to vector<8x384xf32>
    %61 = arith.addf %60, %59 : vector<8x384xf32>
    %62 = arith.divf %60, %61 : vector<8x384xf32>
    %63 = vector.extract_strided_slice %50 {offsets = [0, 384], sizes = [8, 384], strides = [1, 1]} : vector<8x1152xbf16> to vector<8x384xbf16>
    %64 = vector.extract_strided_slice %53 {offsets = [0, 384], sizes = [8, 384], strides = [1, 1]} : vector<8x1152xf32> to vector<8x384xf32>
    %65 = arith.extf %63 : vector<8x384xbf16> to vector<8x384xf32>
    %66 = arith.addf %65, %64 : vector<8x384xf32>
    %67 = arith.negf %66 : vector<8x384xf32>
    %68 = math.exp %67 : vector<8x384xf32>
    %cst_26 = arith.constant 1.000000e+00 : f32
    %69 = vector.broadcast %cst_26 : f32 to vector<8x384xf32>
    %70 = arith.addf %69, %68 : vector<8x384xf32>
    %71 = arith.divf %69, %70 : vector<8x384xf32>
    %72 = vector.extract_strided_slice %50 {offsets = [0, 768], sizes = [8, 384], strides = [1, 1]} : vector<8x1152xbf16> to vector<8x384xbf16>
    %73 = vector.extract_strided_slice %53 {offsets = [0, 768], sizes = [8, 384], strides = [1, 1]} : vector<8x1152xf32> to vector<8x384xf32>
    %74 = arith.addf %73, %14 : vector<8x384xf32>
    %75 = arith.mulf %62, %74 : vector<8x384xf32>
    %76 = arith.extf %72 : vector<8x384xbf16> to vector<8x384xf32>
    %77 = arith.addf %76, %75 : vector<8x384xf32>
    %78 = math.tanh %77 : vector<8x384xf32>
    %cst_27 = arith.constant 1.000000e+00 : f32
    %79 = vector.broadcast %cst_27 : f32 to vector<8x384xf32>
    %80 = arith.subf %79, %71 : vector<8x384xf32>
    %81 = arith.mulf %80, %78 : vector<8x384xf32>
    %82 = arith.mulf %71, %49 : vector<8x384xf32>
    %83 = arith.addf %81, %82 : vector<8x384xf32>
    %c16 = arith.constant 16 : index
    %c0_28 = arith.constant 0 : index
    %84 = vector.load %arg11[%c16, %c0_28] : memref<64x1152xbf16, #tpu.memory_space<vmem>>, vector<8x1152xbf16>
    %85 = arith.truncf %83 : vector<8x384xf32> to vector<8x384xbf16>
    %c0_29 = arith.constant 0 : index
    %c0_30 = arith.constant 0 : index
    %86 = vector.load %arg4[%c0_29, %c0_30] : memref<384x1152xbf16, #tpu.memory_space<vmem>>, vector<384x1152xbf16>
    %cst_31 = arith.constant dense<0.000000e+00> : vector<8x1152xf32>
    %87 = tpu.matmul %85, %86, %cst_31 {dimension_numbers = #tpu.dot_dimension_numbers<[1], [0], [0], [1], [0, 0, 1, 1], [], []>} : vector<8x384xbf16>, vector<384x1152xbf16>, vector<8x1152xf32> -> vector<8x1152xf32>
    %88 = vector.extract_strided_slice %84 {offsets = [0, 0], sizes = [8, 384], strides = [1, 1]} : vector<8x1152xbf16> to vector<8x384xbf16>
    %89 = vector.extract_strided_slice %87 {offsets = [0, 0], sizes = [8, 384], strides = [1, 1]} : vector<8x1152xf32> to vector<8x384xf32>
    %90 = arith.extf %88 : vector<8x384xbf16> to vector<8x384xf32>
    %91 = arith.addf %90, %89 : vector<8x384xf32>
    %92 = arith.negf %91 : vector<8x384xf32>
    %93 = math.exp %92 : vector<8x384xf32>
    %cst_32 = arith.constant 1.000000e+00 : f32
    %94 = vector.broadcast %cst_32 : f32 to vector<8x384xf32>
    %95 = arith.addf %94, %93 : vector<8x384xf32>
    %96 = arith.divf %94, %95 : vector<8x384xf32>
    %97 = vector.extract_strided_slice %84 {offsets = [0, 384], sizes = [8, 384], strides = [1, 1]} : vector<8x1152xbf16> to vector<8x384xbf16>
    %98 = vector.extract_strided_slice %87 {offsets = [0, 384], sizes = [8, 384], strides = [1, 1]} : vector<8x1152xf32> to vector<8x384xf32>
    %99 = arith.extf %97 : vector<8x384xbf16> to vector<8x384xf32>
    %100 = arith.addf %99, %98 : vector<8x384xf32>
    %101 = arith.negf %100 : vector<8x384xf32>
    %102 = math.exp %101 : vector<8x384xf32>
    %cst_33 = arith.constant 1.000000e+00 : f32
    %103 = vector.broadcast %cst_33 : f32 to vector<8x384xf32>
    %104 = arith.addf %103, %102 : vector<8x384xf32>
    %105 = arith.divf %103, %104 : vector<8x384xf32>
    %106 = vector.extract_strided_slice %84 {offsets = [0, 768], sizes = [8, 384], strides = [1, 1]} : vector<8x1152xbf16> to vector<8x384xbf16>
    %107 = vector.extract_strided_slice %87 {offsets = [0, 768], sizes = [8, 384], strides = [1, 1]} : vector<8x1152xf32> to vector<8x384xf32>
    %108 = arith.addf %107, %14 : vector<8x384xf32>
    %109 = arith.mulf %96, %108 : vector<8x384xf32>
    %110 = arith.extf %106 : vector<8x384xbf16> to vector<8x384xf32>
    %111 = arith.addf %110, %109 : vector<8x384xf32>
    %112 = math.tanh %111 : vector<8x384xf32>
    %cst_34 = arith.constant 1.000000e+00 : f32
    %113 = vector.broadcast %cst_34 : f32 to vector<8x384xf32>
    %114 = arith.subf %113, %105 : vector<8x384xf32>
    %115 = arith.mulf %114, %112 : vector<8x384xf32>
    %116 = arith.mulf %105, %83 : vector<8x384xf32>
    %117 = arith.addf %115, %116 : vector<8x384xf32>
    %c24 = arith.constant 24 : index
    %c0_35 = arith.constant 0 : index
    %118 = vector.load %arg11[%c24, %c0_35] : memref<64x1152xbf16, #tpu.memory_space<vmem>>, vector<8x1152xbf16>
    %119 = arith.truncf %117 : vector<8x384xf32> to vector<8x384xbf16>
    %c0_36 = arith.constant 0 : index
    %c0_37 = arith.constant 0 : index
    %120 = vector.load %arg4[%c0_36, %c0_37] : memref<384x1152xbf16, #tpu.memory_space<vmem>>, vector<384x1152xbf16>
    %cst_38 = arith.constant dense<0.000000e+00> : vector<8x1152xf32>
    %121 = tpu.matmul %119, %120, %cst_38 {dimension_numbers = #tpu.dot_dimension_numbers<[1], [0], [0], [1], [0, 0, 1, 1], [], []>} : vector<8x384xbf16>, vector<384x1152xbf16>, vector<8x1152xf32> -> vector<8x1152xf32>
    %122 = vector.extract_strided_slice %118 {offsets = [0, 0], sizes = [8, 384], strides = [1, 1]} : vector<8x1152xbf16> to vector<8x384xbf16>
    %123 = vector.extract_strided_slice %121 {offsets = [0, 0], sizes = [8, 384], strides = [1, 1]} : vector<8x1152xf32> to vector<8x384xf32>
    %124 = arith.extf %122 : vector<8x384xbf16> to vector<8x384xf32>
    %125 = arith.addf %124, %123 : vector<8x384xf32>
    %126 = arith.negf %125 : vector<8x384xf32>
    %127 = math.exp %126 : vector<8x384xf32>
    %cst_39 = arith.constant 1.000000e+00 : f32
    %128 = vector.broadcast %cst_39 : f32 to vector<8x384xf32>
    %129 = arith.addf %128, %127 : vector<8x384xf32>
    %130 = arith.divf %128, %129 : vector<8x384xf32>
    %131 = vector.extract_strided_slice %118 {offsets = [0, 384], sizes = [8, 384], strides = [1, 1]} : vector<8x1152xbf16> to vector<8x384xbf16>
    %132 = vector.extract_strided_slice %121 {offsets = [0, 384], sizes = [8, 384], strides = [1, 1]} : vector<8x1152xf32> to vector<8x384xf32>
    %133 = arith.extf %131 : vector<8x384xbf16> to vector<8x384xf32>
    %134 = arith.addf %133, %132 : vector<8x384xf32>
    %135 = arith.negf %134 : vector<8x384xf32>
    %136 = math.exp %135 : vector<8x384xf32>
    %cst_40 = arith.constant 1.000000e+00 : f32
    %137 = vector.broadcast %cst_40 : f32 to vector<8x384xf32>
    %138 = arith.addf %137, %136 : vector<8x384xf32>
    %139 = arith.divf %137, %138 : vector<8x384xf32>
    %140 = vector.extract_strided_slice %118 {offsets = [0, 768], sizes = [8, 384], strides = [1, 1]} : vector<8x1152xbf16> to vector<8x384xbf16>
    %141 = vector.extract_strided_slice %121 {offsets = [0, 768], sizes = [8, 384], strides = [1, 1]} : vector<8x1152xf32> to vector<8x384xf32>
    %142 = arith.addf %141, %14 : vector<8x384xf32>
    %143 = arith.mulf %130, %142 : vector<8x384xf32>
    %144 = arith.extf %140 : vector<8x384xbf16> to vector<8x384xf32>
    %145 = arith.addf %144, %143 : vector<8x384xf32>
    %146 = math.tanh %145 : vector<8x384xf32>
    %cst_41 = arith.constant 1.000000e+00 : f32
    %147 = vector.broadcast %cst_41 : f32 to vector<8x384xf32>
    %148 = arith.subf %147, %139 : vector<8x384xf32>
    %149 = arith.mulf %148, %146 : vector<8x384xf32>
    %150 = arith.mulf %139, %117 : vector<8x384xf32>
    %151 = arith.addf %149, %150 : vector<8x384xf32>
    %c32 = arith.constant 32 : index
    %c0_42 = arith.constant 0 : index
    %152 = vector.load %arg11[%c32, %c0_42] : memref<64x1152xbf16, #tpu.memory_space<vmem>>, vector<8x1152xbf16>
    %153 = arith.truncf %151 : vector<8x384xf32> to vector<8x384xbf16>
    %c0_43 = arith.constant 0 : index
    %c0_44 = arith.constant 0 : index
    %154 = vector.load %arg4[%c0_43, %c0_44] : memref<384x1152xbf16, #tpu.memory_space<vmem>>, vector<384x1152xbf16>
    %cst_45 = arith.constant dense<0.000000e+00> : vector<8x1152xf32>
    %155 = tpu.matmul %153, %154, %cst_45 {dimension_numbers = #tpu.dot_dimension_numbers<[1], [0], [0], [1], [0, 0, 1, 1], [], []>} : vector<8x384xbf16>, vector<384x1152xbf16>, vector<8x1152xf32> -> vector<8x1152xf32>
    %156 = vector.extract_strided_slice %152 {offsets = [0, 0], sizes = [8, 384], strides = [1, 1]} : vector<8x1152xbf16> to vector<8x384xbf16>
    %157 = vector.extract_strided_slice %155 {offsets = [0, 0], sizes = [8, 384], strides = [1, 1]} : vector<8x1152xf32> to vector<8x384xf32>
    %158 = arith.extf %156 : vector<8x384xbf16> to vector<8x384xf32>
    %159 = arith.addf %158, %157 : vector<8x384xf32>
    %160 = arith.negf %159 : vector<8x384xf32>
    %161 = math.exp %160 : vector<8x384xf32>
    %cst_46 = arith.constant 1.000000e+00 : f32
    %162 = vector.broadcast %cst_46 : f32 to vector<8x384xf32>
    %163 = arith.addf %162, %161 : vector<8x384xf32>
    %164 = arith.divf %162, %163 : vector<8x384xf32>
    %165 = vector.extract_strided_slice %152 {offsets = [0, 384], sizes = [8, 384], strides = [1, 1]} : vector<8x1152xbf16> to vector<8x384xbf16>
    %166 = vector.extract_strided_slice %155 {offsets = [0, 384], sizes = [8, 384], strides = [1, 1]} : vector<8x1152xf32> to vector<8x384xf32>
    %167 = arith.extf %165 : vector<8x384xbf16> to vector<8x384xf32>
    %168 = arith.addf %167, %166 : vector<8x384xf32>
    %169 = arith.negf %168 : vector<8x384xf32>
    %170 = math.exp %169 : vector<8x384xf32>
    %cst_47 = arith.constant 1.000000e+00 : f32
    %171 = vector.broadcast %cst_47 : f32 to vector<8x384xf32>
    %172 = arith.addf %171, %170 : vector<8x384xf32>
    %173 = arith.divf %171, %172 : vector<8x384xf32>
    %174 = vector.extract_strided_slice %152 {offsets = [0, 768], sizes = [8, 384], strides = [1, 1]} : vector<8x1152xbf16> to vector<8x384xbf16>
    %175 = vector.extract_strided_slice %155 {offsets = [0, 768], sizes = [8, 384], strides = [1, 1]} : vector<8x1152xf32> to vector<8x384xf32>
    %176 = arith.addf %175, %14 : vector<8x384xf32>
    %177 = arith.mulf %164, %176 : vector<8x384xf32>
    %178 = arith.extf %174 : vector<8x384xbf16> to vector<8x384xf32>
    %179 = arith.addf %178, %177 : vector<8x384xf32>
    %180 = math.tanh %179 : vector<8x384xf32>
    %cst_48 = arith.constant 1.000000e+00 : f32
    %181 = vector.broadcast %cst_48 : f32 to vector<8x384xf32>
    %182 = arith.subf %181, %173 : vector<8x384xf32>
    %183 = arith.mulf %182, %180 : vector<8x384xf32>
    %184 = arith.mulf %173, %151 : vector<8x384xf32>
    %185 = arith.addf %183, %184 : vector<8x384xf32>
    %c40 = arith.constant 40 : index
    %c0_49 = arith.constant 0 : index
    %186 = vector.load %arg11[%c40, %c0_49] : memref<64x1152xbf16, #tpu.memory_space<vmem>>, vector<8x1152xbf16>
    %187 = arith.truncf %185 : vector<8x384xf32> to vector<8x384xbf16>
    %c0_50 = arith.constant 0 : index
    %c0_51 = arith.constant 0 : index
    %188 = vector.load %arg4[%c0_50, %c0_51] : memref<384x1152xbf16, #tpu.memory_space<vmem>>, vector<384x1152xbf16>
    %cst_52 = arith.constant dense<0.000000e+00> : vector<8x1152xf32>
    %189 = tpu.matmul %187, %188, %cst_52 {dimension_numbers = #tpu.dot_dimension_numbers<[1], [0], [0], [1], [0, 0, 1, 1], [], []>} : vector<8x384xbf16>, vector<384x1152xbf16>, vector<8x1152xf32> -> vector<8x1152xf32>
    %190 = vector.extract_strided_slice %186 {offsets = [0, 0], sizes = [8, 384], strides = [1, 1]} : vector<8x1152xbf16> to vector<8x384xbf16>
    %191 = vector.extract_strided_slice %189 {offsets = [0, 0], sizes = [8, 384], strides = [1, 1]} : vector<8x1152xf32> to vector<8x384xf32>
    %192 = arith.extf %190 : vector<8x384xbf16> to vector<8x384xf32>
    %193 = arith.addf %192, %191 : vector<8x384xf32>
    %194 = arith.negf %193 : vector<8x384xf32>
    %195 = math.exp %194 : vector<8x384xf32>
    %cst_53 = arith.constant 1.000000e+00 : f32
    %196 = vector.broadcast %cst_53 : f32 to vector<8x384xf32>
    %197 = arith.addf %196, %195 : vector<8x384xf32>
    %198 = arith.divf %196, %197 : vector<8x384xf32>
    %199 = vector.extract_strided_slice %186 {offsets = [0, 384], sizes = [8, 384], strides = [1, 1]} : vector<8x1152xbf16> to vector<8x384xbf16>
    %200 = vector.extract_strided_slice %189 {offsets = [0, 384], sizes = [8, 384], strides = [1, 1]} : vector<8x1152xf32> to vector<8x384xf32>
    %201 = arith.extf %199 : vector<8x384xbf16> to vector<8x384xf32>
    %202 = arith.addf %201, %200 : vector<8x384xf32>
    %203 = arith.negf %202 : vector<8x384xf32>
    %204 = math.exp %203 : vector<8x384xf32>
    %cst_54 = arith.constant 1.000000e+00 : f32
    %205 = vector.broadcast %cst_54 : f32 to vector<8x384xf32>
    %206 = arith.addf %205, %204 : vector<8x384xf32>
    %207 = arith.divf %205, %206 : vector<8x384xf32>
    %208 = vector.extract_strided_slice %186 {offsets = [0, 768], sizes = [8, 384], strides = [1, 1]} : vector<8x1152xbf16> to vector<8x384xbf16>
    %209 = vector.extract_strided_slice %189 {offsets = [0, 768], sizes = [8, 384], strides = [1, 1]} : vector<8x1152xf32> to vector<8x384xf32>
    %210 = arith.addf %209, %14 : vector<8x384xf32>
    %211 = arith.mulf %198, %210 : vector<8x384xf32>
    %212 = arith.extf %208 : vector<8x384xbf16> to vector<8x384xf32>
    %213 = arith.addf %212, %211 : vector<8x384xf32>
    %214 = math.tanh %213 : vector<8x384xf32>
    %cst_55 = arith.constant 1.000000e+00 : f32
    %215 = vector.broadcast %cst_55 : f32 to vector<8x384xf32>
    %216 = arith.subf %215, %207 : vector<8x384xf32>
    %217 = arith.mulf %216, %214 : vector<8x384xf32>
    %218 = arith.mulf %207, %185 : vector<8x384xf32>
    %219 = arith.addf %217, %218 : vector<8x384xf32>
    %c48 = arith.constant 48 : index
    %c0_56 = arith.constant 0 : index
    %220 = vector.load %arg11[%c48, %c0_56] : memref<64x1152xbf16, #tpu.memory_space<vmem>>, vector<8x1152xbf16>
    %221 = arith.truncf %219 : vector<8x384xf32> to vector<8x384xbf16>
    %c0_57 = arith.constant 0 : index
    %c0_58 = arith.constant 0 : index
    %222 = vector.load %arg4[%c0_57, %c0_58] : memref<384x1152xbf16, #tpu.memory_space<vmem>>, vector<384x1152xbf16>
    %cst_59 = arith.constant dense<0.000000e+00> : vector<8x1152xf32>
    %223 = tpu.matmul %221, %222, %cst_59 {dimension_numbers = #tpu.dot_dimension_numbers<[1], [0], [0], [1], [0, 0, 1, 1], [], []>} : vector<8x384xbf16>, vector<384x1152xbf16>, vector<8x1152xf32> -> vector<8x1152xf32>
    %224 = vector.extract_strided_slice %220 {offsets = [0, 0], sizes = [8, 384], strides = [1, 1]} : vector<8x1152xbf16> to vector<8x384xbf16>
    %225 = vector.extract_strided_slice %223 {offsets = [0, 0], sizes = [8, 384], strides = [1, 1]} : vector<8x1152xf32> to vector<8x384xf32>
    %226 = arith.extf %224 : vector<8x384xbf16> to vector<8x384xf32>
    %227 = arith.addf %226, %225 : vector<8x384xf32>
    %228 = arith.negf %227 : vector<8x384xf32>
    %229 = math.exp %228 : vector<8x384xf32>
    %cst_60 = arith.constant 1.000000e+00 : f32
    %230 = vector.broadcast %cst_60 : f32 to vector<8x384xf32>
    %231 = arith.addf %230, %229 : vector<8x384xf32>
    %232 = arith.divf %230, %231 : vector<8x384xf32>
    %233 = vector.extract_strided_slice %220 {offsets = [0, 384], sizes = [8, 384], strides = [1, 1]} : vector<8x1152xbf16> to vector<8x384xbf16>
    %234 = vector.extract_strided_slice %223 {offsets = [0, 384], sizes = [8, 384], strides = [1, 1]} : vector<8x1152xf32> to vector<8x384xf32>
    %235 = arith.extf %233 : vector<8x384xbf16> to vector<8x384xf32>
    %236 = arith.addf %235, %234 : vector<8x384xf32>
    %237 = arith.negf %236 : vector<8x384xf32>
    %238 = math.exp %237 : vector<8x384xf32>
    %cst_61 = arith.constant 1.000000e+00 : f32
    %239 = vector.broadcast %cst_61 : f32 to vector<8x384xf32>
    %240 = arith.addf %239, %238 : vector<8x384xf32>
    %241 = arith.divf %239, %240 : vector<8x384xf32>
    %242 = vector.extract_strided_slice %220 {offsets = [0, 768], sizes = [8, 384], strides = [1, 1]} : vector<8x1152xbf16> to vector<8x384xbf16>
    %243 = vector.extract_strided_slice %223 {offsets = [0, 768], sizes = [8, 384], strides = [1, 1]} : vector<8x1152xf32> to vector<8x384xf32>
    %244 = arith.addf %243, %14 : vector<8x384xf32>
    %245 = arith.mulf %232, %244 : vector<8x384xf32>
    %246 = arith.extf %242 : vector<8x384xbf16> to vector<8x384xf32>
    %247 = arith.addf %246, %245 : vector<8x384xf32>
    %248 = math.tanh %247 : vector<8x384xf32>
    %cst_62 = arith.constant 1.000000e+00 : f32
    %249 = vector.broadcast %cst_62 : f32 to vector<8x384xf32>
    %250 = arith.subf %249, %241 : vector<8x384xf32>
    %251 = arith.mulf %250, %248 : vector<8x384xf32>
    %252 = arith.mulf %241, %219 : vector<8x384xf32>
    %253 = arith.addf %251, %252 : vector<8x384xf32>
    %c56 = arith.constant 56 : index
    %c0_63 = arith.constant 0 : index
    %254 = vector.load %arg11[%c56, %c0_63] : memref<64x1152xbf16, #tpu.memory_space<vmem>>, vector<8x1152xbf16>
    %255 = arith.truncf %253 : vector<8x384xf32> to vector<8x384xbf16>
    %c0_64 = arith.constant 0 : index
    %c0_65 = arith.constant 0 : index
    %256 = vector.load %arg4[%c0_64, %c0_65] : memref<384x1152xbf16, #tpu.memory_space<vmem>>, vector<384x1152xbf16>
    %cst_66 = arith.constant dense<0.000000e+00> : vector<8x1152xf32>
    %257 = tpu.matmul %255, %256, %cst_66 {dimension_numbers = #tpu.dot_dimension_numbers<[1], [0], [0], [1], [0, 0, 1, 1], [], []>} : vector<8x384xbf16>, vector<384x1152xbf16>, vector<8x1152xf32> -> vector<8x1152xf32>
    %258 = vector.extract_strided_slice %254 {offsets = [0, 0], sizes = [8, 384], strides = [1, 1]} : vector<8x1152xbf16> to vector<8x384xbf16>
    %259 = vector.extract_strided_slice %257 {offsets = [0, 0], sizes = [8, 384], strides = [1, 1]} : vector<8x1152xf32> to vector<8x384xf32>
    %260 = arith.extf %258 : vector<8x384xbf16> to vector<8x384xf32>
    %261 = arith.addf %260, %259 : vector<8x384xf32>
    %262 = arith.negf %261 : vector<8x384xf32>
    %263 = math.exp %262 : vector<8x384xf32>
    %cst_67 = arith.constant 1.000000e+00 : f32
    %264 = vector.broadcast %cst_67 : f32 to vector<8x384xf32>
    %265 = arith.addf %264, %263 : vector<8x384xf32>
    %266 = arith.divf %264, %265 : vector<8x384xf32>
    %267 = vector.extract_strided_slice %254 {offsets = [0, 384], sizes = [8, 384], strides = [1, 1]} : vector<8x1152xbf16> to vector<8x384xbf16>
    %268 = vector.extract_strided_slice %257 {offsets = [0, 384], sizes = [8, 384], strides = [1, 1]} : vector<8x1152xf32> to vector<8x384xf32>
    %269 = arith.extf %267 : vector<8x384xbf16> to vector<8x384xf32>
    %270 = arith.addf %269, %268 : vector<8x384xf32>
    %271 = arith.negf %270 : vector<8x384xf32>
    %272 = math.exp %271 : vector<8x384xf32>
    %cst_68 = arith.constant 1.000000e+00 : f32
    %273 = vector.broadcast %cst_68 : f32 to vector<8x384xf32>
    %274 = arith.addf %273, %272 : vector<8x384xf32>
    %275 = arith.divf %273, %274 : vector<8x384xf32>
    %276 = vector.extract_strided_slice %254 {offsets = [0, 768], sizes = [8, 384], strides = [1, 1]} : vector<8x1152xbf16> to vector<8x384xbf16>
    %277 = vector.extract_strided_slice %257 {offsets = [0, 768], sizes = [8, 384], strides = [1, 1]} : vector<8x1152xf32> to vector<8x384xf32>
    %278 = arith.addf %277, %14 : vector<8x384xf32>
    %279 = arith.mulf %266, %278 : vector<8x384xf32>
    %280 = arith.extf %276 : vector<8x384xbf16> to vector<8x384xf32>
    %281 = arith.addf %280, %279 : vector<8x384xf32>
    %282 = math.tanh %281 : vector<8x384xf32>
    %cst_69 = arith.constant 1.000000e+00 : f32
    %283 = vector.broadcast %cst_69 : f32 to vector<8x384xf32>
    %284 = arith.subf %283, %275 : vector<8x384xf32>
    %285 = arith.mulf %284, %282 : vector<8x384xf32>
    %286 = arith.mulf %275, %253 : vector<8x384xf32>
    %287 = arith.addf %285, %286 : vector<8x384xf32>
    %c0_70 = arith.constant 0 : index
    %c0_71 = arith.constant 0 : index
    %288 = vector.load %arg10[%c0_70, %c0_71] : memref<8x384xf32, #tpu.memory_space<vmem>>, vector<8x384xf32>
    tpu.vector_store %arg10[%c0_70, %c0_71], %287 {strides = array<i32>} : memref<8x384xf32, #tpu.memory_space<vmem>>, vector<8x384xf32>,
    %c0_i32_72 = arith.constant 0 : i32
    %289 = arith.cmpi eq, %arg1, %c0_i32_72 : i32
    %290 = arith.extui %289 : i1 to i32
    %c0_i32_73 = arith.constant 0 : i32
    %291 = arith.cmpi ne, %290, %c0_i32_73 : i32
    scf.if %291 {
      %c0_74 = arith.constant 0 : index
      %c0_75 = arith.constant 0 : index
      %292 = vector.load %arg7[%c0_74, %c0_75] : memref<1x384xf32, #tpu.memory_space<vmem>>, vector<1x384xf32>
      %293 = vector.broadcast %292 : vector<1x384xf32> to vector<8x384xf32>
      %294 = arith.mulf %287, %293 : vector<8x384xf32>
      %cst_76 = arith.constant dense<0.000000e+00> : vector<8xf32>
      %295 = vector.multi_reduction <add>, %294, %cst_76 [1] : vector<8x384xf32> to vector<8xf32>
      %296 = vector.shape_cast %295 : vector<8xf32> to vector<8x1xf32>
      %c0_77 = arith.constant 0 : index
      %c0_78 = arith.constant 0 : index
      %297 = vector.load %arg8[%c0_77, %c0_78] : memref<1x1xf32, #tpu.memory_space<vmem>>, vector<1x1xf32>
      %298 = vector.broadcast %297 : vector<1x1xf32> to vector<8x1xf32>
      %299 = arith.addf %296, %298 : vector<8x1xf32>
      %300 = arith.negf %299 : vector<8x1xf32>
      %301 = math.exp %300 : vector<8x1xf32>
      %cst_79 = arith.constant 1.000000e+00 : f32
      %302 = vector.broadcast %cst_79 : f32 to vector<8x1xf32>
      %303 = arith.addf %302, %301 : vector<8x1xf32>
      %304 = arith.divf %302, %303 : vector<8x1xf32>
      %305 = vector.shape_cast %304 : vector<8x1xf32> to vector<8x1xf32>
      %306 = vector.broadcast %305 : vector<8x1xf32> to vector<8x128xf32>
      %c0_80 = arith.constant 0 : index
      %c0_81 = arith.constant 0 : index
      %307 = vector.load %arg9[%c0_80, %c0_81] : memref<8x128xf32, #tpu.memory_space<vmem>>, vector<8x128xf32>
      tpu.vector_store %arg9[%c0_80, %c0_81], %306 {strides = array<i32>} : memref<8x128xf32, #tpu.memory_space<vmem>>, vector<8x128xf32>,
    } else {
    }
    return
  }
  func.func @transform_0(%arg0: i32, %arg1: i32) -> (i32, i32, i32) {
    %c0_i32 = arith.constant 0 : i32
    %c0_i32_0 = arith.constant 0 : i32
    return %arg0, %arg1, %c0_i32 : i32, i32, i32
  }
  func.func @transform_1(%arg0: i32, %arg1: i32) -> (i32, i32) {
    %c0_i32 = arith.constant 0 : i32
    %c0_i32_0 = arith.constant 0 : i32
    %c0_i32_1 = arith.constant 0 : i32
    return %c0_i32, %c0_i32_0 : i32, i32
  }
  func.func @transform_2(%arg0: i32, %arg1: i32) -> (i32, i32) {
    %c0_i32 = arith.constant 0 : i32
    %c0_i32_0 = arith.constant 0 : i32
    %c0_i32_1 = arith.constant 0 : i32
    return %c0_i32, %c0_i32_0 : i32, i32
  }
  func.func @transform_3(%arg0: i32, %arg1: i32) -> (i32, i32) {
    %c0_i32 = arith.constant 0 : i32
    %c0_i32_0 = arith.constant 0 : i32
    %c0_i32_1 = arith.constant 0 : i32
    return %c0_i32, %c0_i32_0 : i32, i32
  }
  func.func @transform_4(%arg0: i32, %arg1: i32) -> (i32, i32) {
    %c0_i32 = arith.constant 0 : i32
    %c0_i32_0 = arith.constant 0 : i32
    %c0_i32_1 = arith.constant 0 : i32
    return %c0_i32, %c0_i32_0 : i32, i32
  }
  func.func @transform_5(%arg0: i32, %arg1: i32) -> (i32, i32) {
    %c0_i32 = arith.constant 0 : i32
    %c0_i32_0 = arith.constant 0 : i32
    %c0_i32_1 = arith.constant 0 : i32
    return %c0_i32, %c0_i32_0 : i32, i32
  }
  func.func @transform_6(%arg0: i32, %arg1: i32) -> (i32, i32) {
    %c0_i32 = arith.constant 0 : i32
    %c0_i32_0 = arith.constant 0 : i32
    %c0_i32_1 = arith.constant 0 : i32
    return %c0_i32, %c0_i32_0 : i32, i32
  }
  func.func @transform_7(%arg0: i32, %arg1: i32) -> (i32, i32) {
    %c0_i32 = arith.constant 0 : i32
    %c0_i32_0 = arith.constant 0 : i32
    return %arg0, %c0_i32 : i32, i32
  }
}

</mosaic_0001>

<bundles_post_ra>
// kernel: tpu_custom_call.1
= control target key start
LH: loop header
LB: loop body
LE: loop exit
PB: predicated region body
PF: predicated region fallthrough
CT: control target
= control target key end

     0   :  { %s12642_s0 = inlined_call_operand.hbm [shape: bf16[1,64,128], index: 0, kind: input, shape index: {}]   ;;  %s12643_s1 = inlined_call_operand.hbm [shape: bf16[128,1152], index: 1, kind: input, shape index: {}]   ;;  %s12644_s2 = inlined_call_operand.hbm [shape: bf16[384,1152], index: 2, kind: input, shape index: {}]   ;;  %s12645_s3 = inlined_call_operand.hbm [shape: f32[1,1152], index: 3, kind: input, shape index: {}]   ;;  %s12646_s4 = inlined_call_operand.vmem [shape: f32[1,384], index: 4, kind: input, shape index: {}]   ;;  %s12647_s5 = inlined_call_operand.vmem [shape: f32[1,384], index: 5, kind: input, shape index: {}]   ;;  %s12648_s6 = inlined_call_operand.<no memory space> [shape: f32[1,1], index: 6, kind: input, shape index: {}]   ;;  %s12649_s7 = inlined_call_operand.hbm [shape: f32[8,128], index: 7, kind: output, shape index: {}]  }
   0x1   :  { %v12_v0 = vstv %s12648_s6 }
   0x2   :  { %13 = vst [vmem:[#allocation4] sm:$0x1] %v12_v0 }
   0x3   :  { %14 = vsyncpa [#allocation6], 0 }
   0x4   :  { %15 = vsyncpa [#allocation9], 0 }
   0x5   :  { %16 = vsyncpa [#allocation12], 0 }
   0x6   :  { %17 = vsyncpa [#allocation7], 0  ;;  %s9149_s26 = smov [#allocation8]  }
   0x7   :  { %s35_s27 = sshll.u32 %s9149_s26, 4  ;;  %s36_s27 = int_to_ptr.vmem [resolvable:$true] %s35_s27 }
   0x8   :  { %s9049_s28 = scalar_lea.vmem %s36_s27, 9216  ;;  %p9054_p1 = scmp.lt.s32.totalorder %s36_s27, %s36_s27 }
   0x9   :  { %p9050_p0 = scmp.ne.s32.totalorder %s36_s27, %s9049_s28  ;;  %p9055_p2 = scmp.lt.s32.totalorder %s9049_s28, %s9049_s28 }
   0xb   :  { %p9056_p3 = por %p9055_p2, %p9054_p1 }
   0xd   :  { %p9057_p4 = pnand %p9056_p3, %p9050_p0 }
   0xf   :  { %9060 = shalt.err (!%p9057_p4)
}
  0x10   :  { %s9150_s29 = smov 576   ;;  %s9151_s30 = smov 36  }
  0x11   :  { %41 = dma.hbm_to_vmem [thread:$0]  %s12643_s1, 9216, %s36_s27, [#allocation9], %s9150_s29, %s9150_s29, %s9151_s30  }
  0x12   :  { %s9152_s9 = smov [#allocation5]  }
  0x13   :  { %s23_s10 = sshll.u32 %s9152_s9, 4  ;;  %s24_s10 = int_to_ptr.vmem [resolvable:$true] %s23_s10 }
  0x14   :  { %s9069_s11 = scalar_lea.vmem %s24_s10, 512  ;;  %p9074_p6 = scmp.lt.s32.totalorder %s24_s10, %s24_s10 }
  0x15   :  { %p9070_p5 = scmp.ne.s32.totalorder %s24_s10, %s9069_s11  ;;  %p9075_p7 = scmp.lt.s32.totalorder %s9069_s11, %s9069_s11 }
  0x17   :  { %p9076_p8 = por %p9075_p7, %p9074_p6 }
  0x19   :  { %p9077_p9 = pnand %p9076_p8, %p9070_p5 }
  0x1b   :  { %9080 = shalt.err (!%p9077_p9)
}
  0x1c   :  { %s9153_s12 = smov 64   ;;  %s9154_s13 = smov 4  }
  0x1d   :  { %29 = dma.hbm_to_vmem [thread:$0]  %s12642_s0, 512, %s24_s10, [#allocation6], %s9153_s12, %s9153_s12, %s9154_s13  }
  0x1e   :  { %s9155_s16 = smov [#allocation10]   ;;  %s9156_s18 = smov [#allocation11]  }
  0x1f   :  { %s47_s17 = sshll.u32 %s9155_s16, 4  ;;  %s60_s1 = sshll.u32 %s9156_s18, 4  ;;  %s48_s17 = int_to_ptr.vmem [resolvable:$true] %s47_s17  ;;  %s61_s1 = int_to_ptr.vmem [resolvable:$true] %s60_s1 }
  0x20   :  { %s9089_s19 = scalar_lea.vmem %s48_s17, 27648  ;;  %p9094_p11 = scmp.lt.s32.totalorder %s48_s17, %s48_s17 }
  0x21   :  { %p9090_p10 = scmp.ne.s32.totalorder %s48_s17, %s9089_s19  ;;  %p9095_p12 = scmp.lt.s32.totalorder %s9089_s19, %s9089_s19 }
  0x23   :  { %p9096_p13 = por %p9095_p12, %p9094_p11 }
  0x25   :  { %p9097_p0 = pnand %p9096_p13, %p9090_p10 }
  0x27   :  { %9100 = shalt.err (!%p9097_p0)
}
  0x28   :  { %53 = dma.hbm_to_vmem [thread:$0]  %s12644_s2, 27648, %s48_s17, [#allocation9], %s9150_s29, %s9150_s29, %s9151_s30  }
  0x29   :  { %s9109_s0 = scalar_lea.vmem %s61_s1, 144  ;;  %s9113_s22 = scalar_lea.vmem %s61_s1, 160 }
  0x2a   :  { %p9110_p1 = scmp.ne.s32.totalorder %s61_s1, %s9109_s0  ;;  %p9114_p2 = scmp.lt.s32.totalorder %s61_s1, %s61_s1 }
  0x2b   :  { %p9115_p3 = scmp.lt.s32.totalorder %s9113_s22, %s9109_s0 }
  0x2d   :  { %p9116_p4 = por %p9115_p3, %p9114_p2 }
  0x2f   :  { %p9117_p5 = pnand %p9116_p4, %p9110_p1 }
  0x31   :  { %9120 = shalt.err (!%p9117_p5)
}
  0x32   :  { %63 = dma.hbm_to_vmem [thread:$0]  %s12645_s3, 144, %s61_s1, [#allocation12]  }
  0x33   :  { %9141 = dma.done.wait [#allocation6], 512  }
  0x34   :  { %9142 = vsyncadd [#allocation6], 4294966784 }
  0x35   :  { %9143 = dma.done.wait [#allocation9], 36864  }
  0x36   :  { %9144 = vsyncadd [#allocation9], 4294930432 }
  0x37   :  { %9145 = dma.done.wait [#allocation12], 144  }
  0x38   :  { %9146 = vsyncadd [#allocation12], 4294967152  ;;  %v12652_v1 = vmov 0   ;;  %v7537_v2 = vld [vmem:[#allocation8 + $0x1fc] ss:$36 sps:$4 sm:$0xff]   ;;  %v9231_v45 = vld [vmem:[#allocation5 + $0x8] sm:$0xff]  }
  0x39   :  { %651 = vmatprep.mubr.bf16.mxu0 %v12652_v1  ;;  %724 = vmatprep.mubr.bf16.mxu1 %v12652_v1  ;;  %v7539_v3 = vld [vmem:[#allocation8 + $0x204] ss:$36 sps:$4 sm:$0xff]   ;;  %v7541_v4 = vld [vmem:[#allocation8 + $0x1f8] ss:$36 sps:$4 sm:$0xff]   ;;  %v7547_v8 = vld [vmem:[#allocation8 + $0x1b0] ss:$36 sps:$4 sm:$0xff]  }
  0x3a   :  { %7536 = vset.pattern.permute.xlu0 %v12652_v1  ;;  %619 = vmatprep.subr.bf16.mxu0 %v7537_v2  ;;  %v7542_v5 = vld [vmem:[#allocation8 + $0x200] ss:$36 sps:$4 sm:$0xff]   ;;  %v7543_v6 = vld [vmem:[#allocation8 + $0x1b4] ss:$36 sps:$4 sm:$0xff]   ;;  %v7549_v10 = vld [vmem:[#allocation8 + $0x16c] ss:$36 sps:$4 sm:$0xff]  }
  0x3b   :  { %692 = vmatprep.subr.bf16.mxu1 %v7539_v3  ;;  %620 = vmatpush1.bf16.msra.mxu0 %v7541_v4  ;;  %v7545_v7 = vld [vmem:[#allocation8 + $0x1bc] ss:$36 sps:$4 sm:$0xff]   ;;  %v7551_v11 = vld [vmem:[#allocation8 + $0x174] ss:$36 sps:$4 sm:$0xff]   ;;  %v7553_v12 = vld [vmem:[#allocation8 + $0x168] ss:$36 sps:$4 sm:$0xff]  }
  0x3c   :  { %693 = vmatpush1.bf16.msra.mxu1 %v7542_v5  ;;  %621 = vmatprep.subr.bf16.mxu0 %v7543_v6  ;;  %v7548_v9 = vld [vmem:[#allocation8 + $0x1b8] ss:$36 sps:$4 sm:$0xff]   ;;  %v7554_v13 = vld [vmem:[#allocation8 + $0x170] ss:$36 sps:$4 sm:$0xff]   ;;  %v7555_v14 = vld [vmem:[#allocation8 + $0x124] ss:$36 sps:$4 sm:$0xff]  }
  0x3d   :  { %694 = vmatprep.subr.bf16.mxu1 %v7545_v7  ;;  %v7557_v15 = vld [vmem:[#allocation8 + $0x12c] ss:$36 sps:$4 sm:$0xff]   ;;  %v7559_v16 = vld [vmem:[#allocation8 + $0x120] ss:$36 sps:$4 sm:$0xff]   ;;  %v7565_v20 = vld [vmem:[#allocation8 + $0xd8] ss:$36 sps:$4 sm:$0xff]  }
  0x3e   :  { %v7560_v17 = vld [vmem:[#allocation8 + $0x128] ss:$36 sps:$4 sm:$0xff]   ;;  %v7561_v18 = vld [vmem:[#allocation8 + $0xdc] ss:$36 sps:$4 sm:$0xff]   ;;  %v7567_v22 = vld [vmem:[#allocation8 + $0x94] ss:$36 sps:$4 sm:$0xff]  }
  0x3f   :  { %622 = vmatpush1.bf16.msra.mxu0 %v7547_v8  ;;  %v7563_v19 = vld [vmem:[#allocation8 + $0xe4] ss:$36 sps:$4 sm:$0xff]   ;;  %v7569_v23 = vld [vmem:[#allocation8 + $0x9c] ss:$36 sps:$4 sm:$0xff]   ;;  %v7571_v24 = vld [vmem:[#allocation8 + $0x90] ss:$36 sps:$4 sm:$0xff]  }
  0x40   :  { %695 = vmatpush1.bf16.msra.mxu1 %v7548_v9  ;;  %623 = vmatprep.subr.bf16.mxu0 %v7549_v10  ;;  %v7566_v21 = vld [vmem:[#allocation8 + $0xe0] ss:$36 sps:$4 sm:$0xff]   ;;  %v7572_v25 = vld [vmem:[#allocation8 + $0x98] ss:$36 sps:$4 sm:$0xff]   ;;  %v7573_v26 = vld [vmem:[#allocation8 + $0x4c] ss:$36 sps:$4 sm:$0xff]  }
  0x41   :  { %696 = vmatprep.subr.bf16.mxu1 %v7551_v11  ;;  %v7575_v27 = vld [vmem:[#allocation8 + $0x54] ss:$36 sps:$4 sm:$0xff]   ;;  %v7577_v28 = vld [vmem:[#allocation8 + $0x48] ss:$36 sps:$4 sm:$0xff]   ;;  %v7583_v32 = vld [vmem:[#allocation8] ss:$36 sps:$4 sm:$0xff]  }
  0x42   :  { %v7578_v29 = vld [vmem:[#allocation8 + $0x50] ss:$36 sps:$4 sm:$0xff]   ;;  %v7579_v30 = vld [vmem:[#allocation8 + $0x4] ss:$36 sps:$4 sm:$0xff]   ;;  %v7601_v43 = vld [vmem:[#allocation8 + $0x17c] ss:$36 sps:$4 sm:$0xff]  }
  0x43   :  { %624 = vmatpush1.bf16.msra.mxu0 %v7553_v12  ;;  %v7581_v31 = vld [vmem:[#allocation8 + $0xc] ss:$36 sps:$4 sm:$0xff]   ;;  %v7591_v35 = vld [vmem:[#allocation8 + $0x214] ss:$36 sps:$4 sm:$0xff]   ;;  %v9226_v36 = vld [vmem:[#allocation5] sm:$0xff]   ;;  %vm3048_vm0 = vcmask 1043456  }
  0x44   :  { %697 = vmatpush1.bf16.msra.mxu1 %v7554_v13  ;;  %625 = vmatprep.subr.bf16.mxu0 %v7555_v14  ;;  %v7584_v33 = vld [vmem:[#allocation8 + $0x8] ss:$36 sps:$4 sm:$0xff]   ;;  %v7589_v38 = vld [vmem:[#allocation8 + $0x210] ss:$36 sps:$4 sm:$0xff]   ;;  %v7592_v41 = vld [vmem:[#allocation8 + $0x1c0] ss:$36 sps:$4 sm:$0xff]  }
  0x45   :  { %698 = vmatprep.subr.bf16.mxu1 %v7557_v15  ;;  %v7588_v34 = vld [vmem:[#allocation8 + $0x20c] ss:$36 sps:$4 sm:$0xff]   ;;  %v7594_v39 = vld [vmem:[#allocation8 + $0x1c4] ss:$36 sps:$4 sm:$0xff]   ;;  %v7599_v46 = vld [vmem:[#allocation8 + $0x178] ss:$36 sps:$4 sm:$0xff]  }
  0x46   :  { %v7586_v37 = vld [vmem:[#allocation8 + $0x208] ss:$36 sps:$4 sm:$0xff]   ;;  %v7602_v47 = vld [vmem:[#allocation8 + $0x180] ss:$36 sps:$4 sm:$0xff]   ;;  %v7607_v48 = vld [vmem:[#allocation8 + $0x134] ss:$36 sps:$4 sm:$0xff]  }
  0x47   :  { %626 = vmatpush1.bf16.msra.mxu0 %v7559_v16  ;;  %v7597_v40 = vld [vmem:[#allocation8 + $0x1cc] ss:$36 sps:$4 sm:$0xff]   ;;  %v7604_v44 = vld [vmem:[#allocation8 + $0x184] ss:$36 sps:$4 sm:$0xff]   ;;  %v7610_v49 = vld [vmem:[#allocation8 + $0x13c] ss:$36 sps:$4 sm:$0xff]  }
  0x48   :  { %699 = vmatpush1.bf16.msra.mxu1 %v7560_v17  ;;  %627 = vmatprep.subr.bf16.mxu0 %v7561_v18  ;;  %v7595_v42 = vld [vmem:[#allocation8 + $0x1c8] ss:$36 sps:$4 sm:$0xff]   ;;  %v7605_v50 = vld [vmem:[#allocation8 + $0x130] ss:$36 sps:$4 sm:$0xff]   ;;  %v7608_v51 = vld [vmem:[#allocation8 + $0x138] ss:$36 sps:$4 sm:$0xff]  }
  0x49   :  { %700 = vmatprep.subr.bf16.mxu1 %v7563_v19  ;;  %v7614_v52 = vld [vmem:[#allocation8 + $0xec] ss:$36 sps:$4 sm:$0xff]   ;;  %v7617_v53 = vld [vmem:[#allocation8 + $0xf4] ss:$36 sps:$4 sm:$0xff]   ;;  %v7620_v57 = vld [vmem:[#allocation8 + $0xa4] ss:$36 sps:$4 sm:$0xff]  }
  0x4a   :  { %v9237_v54 = vld [vmem:[#allocation5 + $0x10] sm:$0xff]   ;;  %v7612_v55 = vld [vmem:[#allocation8 + $0xe8] ss:$36 sps:$4 sm:$0xff]   ;;  %v7618_v59 = vld [vmem:[#allocation8 + $0xa0] ss:$36 sps:$4 sm:$0xff]   ;;  %vm9160_vm1 = vmmov 0  }
  0x4b   :  { %628 = vmatpush1.bf16.msra.mxu0 %v7565_v20  ;;  %v7615_v56 = vld [vmem:[#allocation8 + $0xf0] ss:$36 sps:$4 sm:$0xff]   ;;  %v7621_v60 = vld [vmem:[#allocation8 + $0xa8] ss:$36 sps:$4 sm:$0xff]   ;;  %v7627_v61 = vld [vmem:[#allocation8 + $0x5c] ss:$36 sps:$4 sm:$0xff]  }
  0x4c   :  { %701 = vmatpush1.bf16.msra.mxu1 %v7566_v21  ;;  %629 = vmatprep.subr.bf16.mxu0 %v7567_v22  ;;  %v7623_v58 = vld [vmem:[#allocation8 + $0xac] ss:$36 sps:$4 sm:$0xff]   ;;  %v7630_v62 = vld [vmem:[#allocation8 + $0x64] ss:$36 sps:$4 sm:$0xff]   ;;  %v9243_v63 = vld [vmem:[#allocation5 + $0x18] sm:$0xff]  }
  0x4d   :  { %702 = vmatprep.subr.bf16.mxu1 %v7569_v23  ;;  %v7625_v0 = vld [vmem:[#allocation8 + $0x58] ss:$36 sps:$4 sm:$0xff]   ;;  %v7628_v2 = vld [vmem:[#allocation8 + $0x60] ss:$36 sps:$4 sm:$0xff]   ;;  %v7631_v5 = vld [vmem:[#allocation8 + $0x10] ss:$36 sps:$4 sm:$0xff]  }
  0x4e   :  { %v7633_v3 = vld [vmem:[#allocation8 + $0x14] ss:$36 sps:$4 sm:$0xff]   ;;  %v7636_v4 = vld [vmem:[#allocation8 + $0x1c] ss:$36 sps:$4 sm:$0xff]   ;;  %v7645_v13 = vld [vmem:[#allocation8 + $0x188] ss:$36 sps:$4 sm:$0xff]  }
  0x4f   :  { %630 = vmatpush1.bf16.msra.mxu0 %v7571_v24  ;;  %v7634_v6 = vld [vmem:[#allocation8 + $0x18] ss:$36 sps:$4 sm:$0xff]   ;;  %v7641_v10 = vld [vmem:[#allocation8 + $0x1d0] ss:$36 sps:$4 sm:$0xff]   ;;  %v7648_v15 = vld [vmem:[#allocation10 + $0x168] ss:$36 sps:$4 sm:$0xff]  }
  0x50   :  { %703 = vmatpush1.bf16.msra.mxu1 %v7572_v25  ;;  %631 = vmatprep.subr.bf16.mxu0 %v7573_v26  ;;  %v7637_v7 = vld [vmem:[#allocation8 + $0x218] ss:$36 sps:$4 sm:$0xff]   ;;  %v7644_v12 = vld [vmem:[#allocation10 + $0x1b0] ss:$36 sps:$4 sm:$0xff]   ;;  %v7649_v16 = vld [vmem:[#allocation8 + $0x140] ss:$36 sps:$4 sm:$0xff]  }
  0x51   :  { %704 = vmatprep.subr.bf16.mxu1 %v7575_v27  ;;  %v7638_v8 = vld [vmem:[#allocation10 + $0x1fc] ss:$36 sps:$4 sm:$0xff]   ;;  %v7642_v11 = vld [vmem:[#allocation10 + $0x1b4] ss:$36 sps:$4 sm:$0xff]   ;;  %v7646_v14 = vld [vmem:[#allocation10 + $0x16c] ss:$36 sps:$4 sm:$0xff]  }
  0x52   :  { %v7640_v9 = vld [vmem:[#allocation10 + $0x1f8] ss:$36 sps:$4 sm:$0xff]   ;;  %v7650_v17 = vld [vmem:[#allocation10 + $0x124] ss:$36 sps:$4 sm:$0xff]   ;;  %v7657_v22 = vld [vmem:[#allocation8 + $0xb0] ss:$36 sps:$4 sm:$0xff]  }
  0x53   :  { %632 = vmatpush1.bf16.msra.mxu0 %v7577_v28  ;;  %v7652_v18 = vld [vmem:[#allocation10 + $0x120] ss:$36 sps:$4 sm:$0xff]   ;;  %v7653_v19 = vld [vmem:[#allocation8 + $0xf8] ss:$36 sps:$4 sm:$0xff]   ;;  %v7660_v24 = vld [vmem:[#allocation10 + $0x90] ss:$36 sps:$4 sm:$0xff]  }
  0x54   :  { %705 = vmatpush1.bf16.msra.mxu1 %v7578_v29  ;;  %633 = vmatprep.subr.bf16.mxu0 %v7579_v30  ;;  %v7654_v20 = vld [vmem:[#allocation10 + $0xdc] ss:$36 sps:$4 sm:$0xff]   ;;  %v7658_v23 = vld [vmem:[#allocation10 + $0x94] ss:$36 sps:$4 sm:$0xff]   ;;  %v7661_v25 = vld [vmem:[#allocation8 + $0x68] ss:$36 sps:$4 sm:$0xff]  }
  0x55   :  { %706 = vmatprep.subr.bf16.mxu1 %v7581_v31  ;;  %v7656_v21 = vld [vmem:[#allocation10 + $0xd8] ss:$36 sps:$4 sm:$0xff]   ;;  %v7662_v26 = vld [vmem:[#allocation10 + $0x4c] ss:$36 sps:$4 sm:$0xff]   ;;  %v7665_v28 = vld [vmem:[#allocation8 + $0x20] ss:$36 sps:$4 sm:$0xff]  }
  0x56   :  { %v7664_v27 = vld [vmem:[#allocation10 + $0x48] ss:$36 sps:$4 sm:$0xff]   ;;  %v7668_v30 = vld [vmem:[#allocation10] ss:$36 sps:$4 sm:$0xff]  }
  0x57   :  { %634 = vmatpush1.bf16.msra.mxu0 %v7583_v32  ;;  %v7666_v29 = vld [vmem:[#allocation10 + $0x4] ss:$36 sps:$4 sm:$0xff]   ;;  %v7669_v31 = vld [vmem:[#allocation10 + $0x43c] ss:$36 sps:$4 sm:$0xff]  }
  0x58   :  { %707 = vmatpush1.bf16.msra.mxu1 %v7584_v33  ;;  %765 = vmatprep.subr.bf16.mxu0 %v7588_v34  ;;  %v7671_v32 = vld [vmem:[#allocation10 + $0x67c] ss:$36 sps:$4 sm:$0xff]   ;;  %v9158_v33 = vmov 0.0|0.0  }
  0x59   :  { %838 = vmatprep.subr.bf16.mxu1 %v7591_v35  ;;  %v7673_v34 = vld [vmem:[#allocation10 + $0x438] ss:$36 sps:$4 sm:$0xff]  }
  0x5a   :  { %652 = vmatmul.mubr.bf16.vlgmr.msra.gmra.mxu0 %v9226_v36  ;;  %v7674_v35 = vld [vmem:[#allocation10 + $0x678] ss:$36 sps:$4 sm:$0xff]  }
  0x5b   :  { %725 = vmatmul.mubr.bf16.vlgmr.msra.gmra.mxu1 %v9226_v36  ;;  %766 = vmatpush1.bf16.msra.mxu0 %v7586_v37  ;;  %v7675_v37 = vld [vmem:[#allocation10 + $0x3f4] ss:$36 sps:$4 sm:$0xff]  }
  0x5c   :  { %839 = vmatpush1.bf16.msra.mxu1 %v7589_v38  ;;  %767 = vmatprep.subr.bf16.mxu0 %v7594_v39  ;;  %v7677_v38 = vld [vmem:[#allocation10 + $0x634] ss:$36 sps:$4 sm:$0xff]  }
  0x5d   :  { %840 = vmatprep.subr.bf16.mxu1 %v7597_v40  ;;  %661 = vmatprep.mubr.bf16.mxu0 %v12652_v1  ;;  %v7679_v39 = vld [vmem:[#allocation10 + $0x3f0] ss:$36 sps:$4 sm:$0xff]  }
  0x5e   :  { %734 = vmatprep.mubr.bf16.mxu1 %v12652_v1  ;;  %v7680_v40 = vld [vmem:[#allocation10 + $0x630] ss:$36 sps:$4 sm:$0xff]  }
  0x5f   :  { %768 = vmatpush1.bf16.msra.mxu0 %v7592_v41  ;;  %v7681_v41 = vld [vmem:[#allocation10 + $0x3ac] ss:$36 sps:$4 sm:$0xff]  }
  0x60   :  { %841 = vmatpush1.bf16.msra.mxu1 %v7595_v42  ;;  %769 = vmatprep.subr.bf16.mxu0 %v7601_v43  ;;  %v7685_v42 = vld [vmem:[#allocation10 + $0x3a8] ss:$36 sps:$4 sm:$0xff]  }
  0x61   :  { %842 = vmatprep.subr.bf16.mxu1 %v7604_v44  ;;  %v7686_v43 = vld [vmem:[#allocation10 + $0x5e8] ss:$36 sps:$4 sm:$0xff]  }
  0x62   :  { %662 = vmatmul.mubr.bf16.gmra.mxu0 %v9231_v45  ;;  %v7687_v44 = vld [vmem:[#allocation10 + $0x364] ss:$36 sps:$4 sm:$0xff]  }
  0x63   :  { %735 = vmatmul.mubr.bf16.gmra.mxu1 %v9231_v45  ;;  %770 = vmatpush1.bf16.msra.mxu0 %v7599_v46  ;;  %v7689_v46 = vld [vmem:[#allocation10 + $0x5a4] ss:$36 sps:$4 sm:$0xff]  }
  0x64   :  { %843 = vmatpush1.bf16.msra.mxu1 %v7602_v47  ;;  %771 = vmatprep.subr.bf16.mxu0 %v7607_v48  ;;  %v7691_v47 = vld [vmem:[#allocation10 + $0x360] ss:$36 sps:$4 sm:$0xff]  }
  0x65   :  { %844 = vmatprep.subr.bf16.mxu1 %v7610_v49  ;;  %671 = vmatprep.mubr.bf16.mxu0 %v12652_v1  ;;  %v7693_v48 = vld [vmem:[#allocation10 + $0x31c] ss:$36 sps:$4 sm:$0xff]  }
  0x66   :  { %744 = vmatprep.mubr.bf16.mxu1 %v12652_v1  ;;  %v7695_v49 = vld [vmem:[#allocation10 + $0x55c] ss:$36 sps:$4 sm:$0xff]  }
  0x67   :  { %772 = vmatpush1.bf16.msra.mxu0 %v7605_v50  ;;  %v7697_v50 = vld [vmem:[#allocation10 + $0x318] ss:$36 sps:$4 sm:$0xff]  }
  0x68   :  { %845 = vmatpush1.bf16.msra.mxu1 %v7608_v51  ;;  %773 = vmatprep.subr.bf16.mxu0 %v7614_v52  ;;  %v7698_v51 = vld [vmem:[#allocation10 + $0x558] ss:$36 sps:$4 sm:$0xff]  }
  0x69   :  { %846 = vmatprep.subr.bf16.mxu1 %v7617_v53  ;;  %v7699_v52 = vld [vmem:[#allocation10 + $0x2d4] ss:$36 sps:$4 sm:$0xff]  }
  0x6a   :  { %672 = vmatmul.mubr.bf16.gmra.mxu0 %v9237_v54  ;;  %v7701_v53 = vld [vmem:[#allocation10 + $0x514] ss:$36 sps:$4 sm:$0xff]  }
  0x6b   :  { %745 = vmatmul.mubr.bf16.gmra.mxu1 %v9237_v54  ;;  %774 = vmatpush1.bf16.msra.mxu0 %v7612_v55  ;;  %v7704_v55 = vld [vmem:[#allocation10 + $0x510] ss:$36 sps:$4 sm:$0xff]  }
  0x6c   :  { %847 = vmatpush1.bf16.msra.mxu1 %v7615_v56  ;;  %775 = vmatprep.subr.bf16.mxu0 %v7620_v57  ;;  %v7705_v56 = vld [vmem:[#allocation10 + $0x28c] ss:$36 sps:$4 sm:$0xff]  }
  0x6d   :  { %848 = vmatprep.subr.bf16.mxu1 %v7623_v58  ;;  %681 = vmatprep.mubr.bf16.mxu0 %v12652_v1  ;;  %v7707_v57 = vld [vmem:[#allocation10 + $0x4cc] ss:$36 sps:$4 sm:$0xff]  }
  0x6e   :  { %754 = vmatprep.mubr.bf16.mxu1 %v12652_v1  ;;  %v7709_v58 = vld [vmem:[#allocation10 + $0x288] ss:$36 sps:$4 sm:$0xff]  }
  0x6f   :  { %776 = vmatpush1.bf16.msra.mxu0 %v7618_v59  ;;  %v7710_v59 = vld [vmem:[#allocation10 + $0x4c8] ss:$36 sps:$4 sm:$0xff]  }
  0x70   :  { %849 = vmatpush1.bf16.msra.mxu1 %v7621_v60  ;;  %777 = vmatprep.subr.bf16.mxu0 %v7627_v61  ;;  %v7711_v60 = vld [vmem:[#allocation10 + $0x244] ss:$36 sps:$4 sm:$0xff]  }
  0x71   :  { %850 = vmatprep.subr.bf16.mxu1 %v7630_v62  ;;  %v7713_v61 = vld [vmem:[#allocation10 + $0x484] ss:$36 sps:$4 sm:$0xff]  }
  0x72   :  { %682 = vmatmul.mubr.bf16.gmra.mxu0 %v9243_v63  ;;  %v7715_v62 = vld [vmem:[#allocation10 + $0x240] ss:$36 sps:$4 sm:$0xff]  }
  0x73   :  { %755 = vmatmul.mubr.bf16.gmra.mxu1 %v9243_v63  ;;  %778 = vmatpush1.bf16.msra.mxu0 %v7625_v0  ;;  %v7717_v0 = vld [vmem:[#allocation10 + $0x204] ss:$36 sps:$4 sm:$0xff]  }
  0x74   :  { %851 = vmatpush1.bf16.msra.mxu1 %v7628_v2  ;;  %779 = vmatprep.subr.bf16.mxu0 %v7633_v3  ;;  %v7719_v2 = vld [vmem:[#allocation10 + $0x684] ss:$36 sps:$4 sm:$0xff]  }
  0x75   :  { %852 = vmatprep.subr.bf16.mxu1 %v7636_v4  ;;  %797 = vmatprep.mubr.bf16.mxu0 %v12652_v1  ;;  %v7721_v3 = vld [vmem:[#allocation10 + $0x200] ss:$36 sps:$4 sm:$0xff]  }
  0x76   :  { %870 = vmatprep.mubr.bf16.mxu1 %v12652_v1  ;;  %v7722_v4 = vld [vmem:[#allocation10 + $0x680] ss:$36 sps:$4 sm:$0xff]  }
  0x77   :  { %780 = vmatpush1.bf16.msra.mxu0 %v7631_v5  ;;  %v7723_v5 = vld [vmem:[#allocation10 + $0x1bc] ss:$36 sps:$4 sm:$0xff]  }
  0x78   :  { %853 = vmatpush1.bf16.msra.mxu1 %v7634_v6  ;;  %7339 = vmatprep.subr.bf16.mxu0 %v7637_v7  ;;  %v7725_v6 = vld [vmem:[#allocation10 + $0x63c] ss:$36 sps:$4 sm:$0xff]  }
  0x79   :  { %2612 = vmatprep.subr.bf16.mxu1 %v7638_v8  ;;  %v7728_v8 = vld [vmem:[#allocation10 + $0x638] ss:$36 sps:$4 sm:$0xff]  }
  0x7a   :  { %798 = vmatmul.mubr.bf16.vlgmr.msra.gmra.mxu0 %v9226_v36 }
  0x7b   :  { %871 = vmatmul.mubr.bf16.vlgmr.msra.gmra.mxu1 %v9226_v36  ;;  %7340 = vmatpush3.bf16.msra.mxu0 %v7637_v7  ;;  %v7727_v7 = vld [vmem:[#allocation10 + $0x1b8] ss:$36 sps:$4 sm:$0xff]  }
  0x7c   :  { %2613 = vmatpush1.bf16.msra.mxu1 %v7640_v9  ;;  %7341 = vmatprep.subr.bf16.mxu0 %v7641_v10  ;;  %v7729_v9 = vld [vmem:[#allocation10 + $0x174] ss:$36 sps:$4 sm:$0xff]  }
  0x7d   :  { %2614 = vmatprep.subr.bf16.mxu1 %v7642_v11  ;;  %807 = vmatprep.mubr.bf16.mxu0 %v12652_v1  ;;  %v7733_v11 = vld [vmem:[#allocation10 + $0x170] ss:$36 sps:$4 sm:$0xff]  }
  0x7e   :  { %880 = vmatprep.mubr.bf16.mxu1 %v12652_v1 }
  0x7f   :  { %7342 = vmatpush3.bf16.msra.mxu0 %v7641_v10  ;;  %v7731_v10 = vld [vmem:[#allocation10 + $0x5f4] ss:$36 sps:$4 sm:$0xff]  }
  0x80   :  { %2615 = vmatpush1.bf16.msra.mxu1 %v7644_v12  ;;  %7343 = vmatprep.subr.bf16.mxu0 %v7645_v13  ;;  %v7734_v12 = vld [vmem:[#allocation10 + $0x5f0] ss:$36 sps:$4 sm:$0xff]  }
  0x81   :  { %2616 = vmatprep.subr.bf16.mxu1 %v7646_v14  ;;  %v7737_v14 = vld [vmem:[#allocation10 + $0x5ac] ss:$36 sps:$4 sm:$0xff]  }
  0x82   :  { %808 = vmatmul.mubr.bf16.gmra.mxu0 %v9231_v45 }
  0x83   :  { %881 = vmatmul.mubr.bf16.gmra.mxu1 %v9231_v45  ;;  %7344 = vmatpush3.bf16.msra.mxu0 %v7645_v13  ;;  %v7735_v13 = vld [vmem:[#allocation10 + $0x12c] ss:$36 sps:$4 sm:$0xff]  }
  0x84   :  { %2617 = vmatpush1.bf16.msra.mxu1 %v7648_v15  ;;  %7345 = vmatprep.subr.bf16.mxu0 %v7649_v16  ;;  %v7739_v15 = vld [vmem:[#allocation10 + $0x128] ss:$36 sps:$4 sm:$0xff]  }
  0x85   :  { %2618 = vmatprep.subr.bf16.mxu1 %v7650_v17  ;;  %817 = vmatprep.mubr.bf16.mxu0 %v12652_v1  ;;  %v7741_v17 = vld [vmem:[#allocation10 + $0xe4] ss:$36 sps:$4 sm:$0xff]  }
  0x86   :  { %890 = vmatprep.mubr.bf16.mxu1 %v12652_v1 }
  0x87   :  { %7346 = vmatpush3.bf16.msra.mxu0 %v7649_v16  ;;  %v7740_v16 = vld [vmem:[#allocation10 + $0x5a8] ss:$36 sps:$4 sm:$0xff]  }
  0x88   :  { %2619 = vmatpush1.bf16.msra.mxu1 %v7652_v18  ;;  %7347 = vmatprep.subr.bf16.mxu0 %v7653_v19  ;;  %v7743_v18 = vld [vmem:[#allocation10 + $0x564] ss:$36 sps:$4 sm:$0xff]  }
  0x89   :  { %2620 = vmatprep.subr.bf16.mxu1 %v7654_v20  ;;  %v7746_v20 = vld [vmem:[#allocation10 + $0x560] ss:$36 sps:$4 sm:$0xff]  }
  0x8a   :  { %818 = vmatmul.mubr.bf16.gmra.mxu0 %v9237_v54 }
  0x8b   :  { %891 = vmatmul.mubr.bf16.gmra.mxu1 %v9237_v54  ;;  %7348 = vmatpush3.bf16.msra.mxu0 %v7653_v19  ;;  %v7745_v19 = vld [vmem:[#allocation10 + $0xe0] ss:$36 sps:$4 sm:$0xff]  }
  0x8c   :  { %2621 = vmatpush1.bf16.msra.mxu1 %v7656_v21  ;;  %7349 = vmatprep.subr.bf16.mxu0 %v7657_v22  ;;  %v7747_v21 = vld [vmem:[#allocation10 + $0x9c] ss:$36 sps:$4 sm:$0xff]  }
  0x8d   :  { %2622 = vmatprep.subr.bf16.mxu1 %v7658_v23  ;;  %827 = vmatprep.mubr.bf16.mxu0 %v12652_v1  ;;  %v7751_v23 = vld [vmem:[#allocation10 + $0x98] ss:$36 sps:$4 sm:$0xff]  }
  0x8e   :  { %900 = vmatprep.mubr.bf16.mxu1 %v12652_v1 }
  0x8f   :  { %7350 = vmatpush3.bf16.msra.mxu0 %v7657_v22  ;;  %v7749_v22 = vld [vmem:[#allocation10 + $0x51c] ss:$36 sps:$4 sm:$0xff]  }
  0x90   :  { %2623 = vmatpush1.bf16.msra.mxu1 %v7660_v24  ;;  %7351 = vmatprep.subr.bf16.mxu0 %v7661_v25  ;;  %v7752_v24 = vld [vmem:[#allocation10 + $0x518] ss:$36 sps:$4 sm:$0xff]  }
  0x91   :  { %2624 = vmatprep.subr.bf16.mxu1 %v7662_v26  ;;  %v7755_v26 = vld [vmem:[#allocation10 + $0x4d4] ss:$36 sps:$4 sm:$0xff]  }
  0x92   :  { %828 = vmatmul.mubr.bf16.gmra.mxu0 %v9243_v63 }
  0x93   :  { %901 = vmatmul.mubr.bf16.gmra.mxu1 %v9243_v63  ;;  %7352 = vmatpush3.bf16.msra.mxu0 %v7661_v25  ;;  %v7753_v25 = vld [vmem:[#allocation10 + $0x54] ss:$36 sps:$4 sm:$0xff]  }
  0x94   :  { %2625 = vmatpush1.bf16.msra.mxu1 %v7664_v27  ;;  %7353 = vmatprep.subr.bf16.mxu0 %v7665_v28  ;;  %v7757_v27 = vld [vmem:[#allocation10 + $0x50] ss:$36 sps:$4 sm:$0xff]  }
  0x95   :  { %2626 = vmatprep.subr.bf16.mxu1 %v7666_v29  ;;  %7355 = vmatprep.mubr.bf16.mxu0 %v9226_v36  ;;  %v7683_v36 = vld [vmem:[#allocation10 + $0x5ec] ss:$36 sps:$4 sm:$0xff]  }
  0x96   :  { %2644 = vmatprep.mubr.bf16.mxu1 %v9158_v33  ;;  %v7759_v29 = vld [vmem:[#allocation10 + $0xc] ss:$36 sps:$4 sm:$0xff]  }
  0x97   :  { %7354 = vmatpush3.bf16.msra.mxu0 %v7665_v28  ;;  %v7758_v28 = vld [vmem:[#allocation10 + $0x4d0] ss:$36 sps:$4 sm:$0xff]  }
  0x98   :  { %2627 = vmatpush1.bf16.msra.mxu1 %v7668_v30  ;;  %2653 = vmatprep.subr.bf16.mxu0 %v7671_v32  ;;  %v7761_v30 = vld [vmem:[#allocation10 + $0x48c] ss:$36 sps:$4 sm:$0xff]  }
  0x99   :  { %2628 = vmatprep.subr.bf16.mxu1 %v7669_v31  ;;  %v7763_v31 = vld [vmem:[#allocation10 + $0x8] ss:$36 sps:$4 sm:$0xff]  }
  0x9a   :  { %7356 = vmatmul.mubr.bf16.vlgmr.msra.gmra.mxu0 %v9231_v45  ;;  %v7692_v45 = vld [vmem:[#allocation10 + $0x5a0] ss:$36 sps:$4 sm:$0xff]   ;;  %v7764_v32 = vld [vmem:[#allocation10 + $0x488] ss:$36 sps:$4 sm:$0xff]  }
  0x9b   :  { %2654 = vmatpush1.bf16.msra.mxu0 %v7674_v35  ;;  %7359 = vmatprep.mubr.bf16.mxu0 %v9237_v54  ;;  %v7703_v54 = vld [vmem:[#allocation10 + $0x2d0] ss:$36 sps:$4 sm:$0xff]  }
  0x9c   :  { %2629 = vmatpush2.bf16.msra.mxu1 %v7673_v34  ;;  %2655 = vmatprep.subr.bf16.mxu0 %v7677_v38  ;;  %v7765_v34 = vld [vmem:[#allocation10 + $0x444] ss:$36 sps:$4 sm:$0xff]   ;;  %v7767_v35 = vld [vmem:[#allocation10 + $0x20c] ss:$36 sps:$4 sm:$0xff]  }
  0x9d   :  { %2630 = vmatprep.subr.bf16.mxu1 %v7675_v37  ;;  %v7769_v37 = vld [vmem:[#allocation10 + $0x440] ss:$36 sps:$4 sm:$0xff]   ;;  %v7770_v38 = vld [vmem:[#allocation10 + $0x208] ss:$36 sps:$4 sm:$0xff]  }
  0x9f   :  { %2656 = vmatpush1.bf16.msra.mxu0 %v7680_v40  ;;  %v7773_v40 = vld [vmem:[#allocation10 + $0x1c4] ss:$36 sps:$4 sm:$0xff]  }
  0xa0   :  { %2631 = vmatpush2.bf16.msra.mxu1 %v7679_v39  ;;  %2657 = vmatprep.subr.bf16.mxu0 %v7683_v36  ;;  %v7771_v39 = vld [vmem:[#allocation10 + $0x3fc] ss:$36 sps:$4 sm:$0xff]  }
  0xa1   :  { %2632 = vmatprep.subr.bf16.mxu1 %v7681_v41  ;;  %v7775_v41 = vld [vmem:[#allocation10 + $0x3f8] ss:$36 sps:$4 sm:$0xff]   ;;  %v7776_v36 = vld [vmem:[#allocation10 + $0x1c0] ss:$36 sps:$4 sm:$0xff]  }
  0xa2   :  { %7360 = vmatmul.mubr.bf16.gmra.mxu0 %v9243_v63  ;;  %v7716_v63 = vld [vmem:[#allocation10 + $0x480] ss:$36 sps:$4 sm:$0xff]  }
  0xa3   :  { %2658 = vmatpush1.bf16.msra.mxu0 %v7686_v43  ;;  %2685 = vmatprep.mubr.bf16.mxu0 %v12652_v1  ;;  %v7779_v43 = vld [vmem:[#allocation10 + $0x17c] ss:$36 sps:$4 sm:$0xff]  }
  0xa4   :  { %2633 = vmatpush2.bf16.msra.mxu1 %v7685_v42  ;;  %2659 = vmatprep.subr.bf16.mxu0 %v7689_v46  ;;  %v7777_v42 = vld [vmem:[#allocation10 + $0x3b4] ss:$36 sps:$4 sm:$0xff]  }
  0xa5   :  { %2634 = vmatprep.subr.bf16.mxu1 %v7687_v44  ;;  %v7781_v44 = vld [vmem:[#allocation10 + $0x3b0] ss:$36 sps:$4 sm:$0xff]   ;;  %v7782_v46 = vld [vmem:[#allocation10 + $0x178] ss:$36 sps:$4 sm:$0xff]  }
  0xa7   :  { %2660 = vmatpush1.bf16.msra.mxu0 %v7692_v45  ;;  %v7785_v45 = vld [vmem:[#allocation10 + $0x134] ss:$36 sps:$4 sm:$0xff]  }
  0xa8   :  { %2635 = vmatpush2.bf16.msra.mxu1 %v7691_v47  ;;  %2661 = vmatprep.subr.bf16.mxu0 %v7695_v49  ;;  %v7783_v47 = vld [vmem:[#allocation10 + $0x36c] ss:$36 sps:$4 sm:$0xff]  }
  0xa9   :  { %2636 = vmatprep.subr.bf16.mxu1 %v7693_v48  ;;  %v7787_v48 = vld [vmem:[#allocation10 + $0x368] ss:$36 sps:$4 sm:$0xff]   ;;  %v7788_v49 = vld [vmem:[#allocation10 + $0x130] ss:$36 sps:$4 sm:$0xff]  }
  0xab   :  { %2662 = vmatpush1.bf16.msra.mxu0 %v7698_v51  ;;  %v7791_v51 = vld [vmem:[#allocation10 + $0xec] ss:$36 sps:$4 sm:$0xff]  }
  0xac   :  { %2637 = vmatpush2.bf16.msra.mxu1 %v7697_v50  ;;  %2663 = vmatprep.subr.bf16.mxu0 %v7701_v53  ;;  %v7789_v50 = vld [vmem:[#allocation10 + $0x324] ss:$36 sps:$4 sm:$0xff]  }
  0xad   :  { %2638 = vmatprep.subr.bf16.mxu1 %v7699_v52  ;;  %v7793_v52 = vld [vmem:[#allocation10 + $0x320] ss:$36 sps:$4 sm:$0xff]   ;;  %v7794_v53 = vld [vmem:[#allocation10 + $0xe8] ss:$36 sps:$4 sm:$0xff]  }
  0xaf   :  { %2664 = vmatpush1.bf16.msra.mxu0 %v7704_v55  ;;  %v7797_v55 = vld [vmem:[#allocation10 + $0xa4] ss:$36 sps:$4 sm:$0xff]  }
  0xb0   :  { %2639 = vmatpush2.bf16.msra.mxu1 %v7703_v54  ;;  %2665 = vmatprep.subr.bf16.mxu0 %v7707_v57  ;;  %v7795_v54 = vld [vmem:[#allocation10 + $0x2dc] ss:$36 sps:$4 sm:$0xff]  }
  0xb1   :  { %2640 = vmatprep.subr.bf16.mxu1 %v7705_v56  ;;  %v7799_v56 = vld [vmem:[#allocation10 + $0x2d8] ss:$36 sps:$4 sm:$0xff]   ;;  %v7800_v57 = vld [vmem:[#allocation10 + $0xa0] ss:$36 sps:$4 sm:$0xff]  }
  0xb3   :  { %2666 = vmatpush1.bf16.msra.mxu0 %v7710_v59  ;;  %v7803_v59 = vld [vmem:[#allocation10 + $0x5c] ss:$36 sps:$4 sm:$0xff]  }
  0xb4   :  { %2641 = vmatpush2.bf16.msra.mxu1 %v7709_v58  ;;  %2667 = vmatprep.subr.bf16.mxu0 %v7713_v61  ;;  %v7801_v58 = vld [vmem:[#allocation10 + $0x294] ss:$36 sps:$4 sm:$0xff]  }
  0xb5   :  { %2642 = vmatprep.subr.bf16.mxu1 %v7711_v60  ;;  %v7805_v60 = vld [vmem:[#allocation10 + $0x290] ss:$36 sps:$4 sm:$0xff]   ;;  %v7806_v61 = vld [vmem:[#allocation10 + $0x58] ss:$36 sps:$4 sm:$0xff]  }
  0xb7   :  { %2668 = vmatpush1.bf16.msra.mxu0 %v7716_v63  ;;  %v7809_v63 = vld [vmem:[#allocation10 + $0x14] ss:$36 sps:$4 sm:$0xff]  }
  0xb8   :  { %2643 = vmatpush2.bf16.msra.mxu1 %v7715_v62  ;;  %2694 = vmatprep.subr.bf16.mxu0 %v7717_v0  ;;  %v7807_v62 = vld [vmem:[#allocation10 + $0x24c] ss:$36 sps:$4 sm:$0xff]  }
  0xb9   :  { %2735 = vmatprep.subr.bf16.mxu1 %v7719_v2  ;;  %v7811_v0 = vld [vmem:[#allocation10 + $0x248] ss:$36 sps:$4 sm:$0xff]   ;;  %v7812_v2 = vld [vmem:[#allocation10 + $0x10] ss:$36 sps:$4 sm:$0xff]  }
  0xba   :  { %2686 = vmatmul.mubr.bf16.vlgmr.msra.gmra.mxu0 %v9158_v33 }
  0xbb   :  { %2645 = vmatmul.mubr.bf16.vlgmr.msra.gmra.mxu1 %v9158_v33  ;;  %2695 = vmatpush1.bf16.msra.mxu0 %v7721_v3  ;;  %v7813_v3 = vld [vmem:[#allocation10 + $0x44c] ss:$36 sps:$4 sm:$0xff]  }
  0xbc   :  { %2736 = vmatpush1.bf16.msra.mxu1 %v7722_v4  ;;  %2696 = vmatprep.subr.bf16.mxu0 %v7723_v5  ;;  %v7815_v4 = vld [vmem:[#allocation10 + $0x68c] ss:$36 sps:$4 sm:$0xff]  }
  0xbd   :  { %2737 = vmatprep.subr.bf16.mxu1 %v7725_v6  ;;  %2767 = vmatprep.mubr.bf16.mxu1 %v12652_v1  ;;  %v7817_v5 = vld [vmem:[#allocation10 + $0x448] ss:$36 sps:$4 sm:$0xff]  }
  0xbe   :  { %2726 = vmatprep.mubr.bf16.mxu0 %v9158_v33  ;;  %v7818_v6 = vld [vmem:[#allocation10 + $0x688] ss:$36 sps:$4 sm:$0xff]  }
  0xbf   :  { %2697 = vmatpush1.bf16.msra.mxu0 %v7727_v7  ;;  %v7819_v7 = vld [vmem:[#allocation10 + $0x404] ss:$36 sps:$4 sm:$0xff]  }
  0xc0   :  { %2738 = vmatpush1.bf16.msra.mxu1 %v7728_v8  ;;  %2698 = vmatprep.subr.bf16.mxu0 %v7729_v9  ;;  %v7821_v8 = vld [vmem:[#allocation10 + $0x644] ss:$36 sps:$4 sm:$0xff]  }
  0xc1   :  { %2739 = vmatprep.subr.bf16.mxu1 %v7731_v10  ;;  %v7823_v9 = vld [vmem:[#allocation10 + $0x400] ss:$36 sps:$4 sm:$0xff]  }
  0xc2   :  { %v7824_v10 = vld [vmem:[#allocation10 + $0x640] ss:$36 sps:$4 sm:$0xff]  }
  0xc3   :  { %2699 = vmatpush1.bf16.msra.mxu0 %v7733_v11  ;;  %v7825_v11 = vld [vmem:[#allocation10 + $0x3bc] ss:$36 sps:$4 sm:$0xff]  }
  0xc4   :  { %2740 = vmatpush1.bf16.msra.mxu1 %v7734_v12  ;;  %2700 = vmatprep.subr.bf16.mxu0 %v7735_v13  ;;  %v7827_v12 = vld [vmem:[#allocation10 + $0x5fc] ss:$36 sps:$4 sm:$0xff]  }
  0xc5   :  { %2741 = vmatprep.subr.bf16.mxu1 %v7737_v14  ;;  %v7829_v13 = vld [vmem:[#allocation10 + $0x3b8] ss:$36 sps:$4 sm:$0xff]  }
  0xc6   :  { %v7830_v14 = vld [vmem:[#allocation10 + $0x5f8] ss:$36 sps:$4 sm:$0xff]  }
  0xc7   :  { %2701 = vmatpush1.bf16.msra.mxu0 %v7739_v15  ;;  %v7831_v15 = vld [vmem:[#allocation10 + $0x374] ss:$36 sps:$4 sm:$0xff]  }
  0xc8   :  { %2742 = vmatpush1.bf16.msra.mxu1 %v7740_v16  ;;  %2702 = vmatprep.subr.bf16.mxu0 %v7741_v17  ;;  %v7833_v16 = vld [vmem:[#allocation10 + $0x5b4] ss:$36 sps:$4 sm:$0xff]  }
  0xc9   :  { %2743 = vmatprep.subr.bf16.mxu1 %v7743_v18  ;;  %v7835_v17 = vld [vmem:[#allocation10 + $0x370] ss:$36 sps:$4 sm:$0xff]  }
  0xca   :  { %v7836_v18 = vld [vmem:[#allocation10 + $0x5b0] ss:$36 sps:$4 sm:$0xff]  }
  0xcb   :  { %2703 = vmatpush1.bf16.msra.mxu0 %v7745_v19  ;;  %v7837_v19 = vld [vmem:[#allocation10 + $0x32c] ss:$36 sps:$4 sm:$0xff]  }
  0xcc   :  { %2744 = vmatpush1.bf16.msra.mxu1 %v7746_v20  ;;  %2704 = vmatprep.subr.bf16.mxu0 %v7747_v21  ;;  %v7839_v20 = vld [vmem:[#allocation10 + $0x56c] ss:$36 sps:$4 sm:$0xff]  }
  0xcd   :  { %2745 = vmatprep.subr.bf16.mxu1 %v7749_v22  ;;  %v7841_v21 = vld [vmem:[#allocation10 + $0x328] ss:$36 sps:$4 sm:$0xff]  }
  0xce   :  { %v7842_v22 = vld [vmem:[#allocation10 + $0x568] ss:$36 sps:$4 sm:$0xff]  }
  0xcf   :  { %2705 = vmatpush1.bf16.msra.mxu0 %v7751_v23  ;;  %v7843_v23 = vld [vmem:[#allocation10 + $0x2e4] ss:$36 sps:$4 sm:$0xff]  }
  0xd0   :  { %2746 = vmatpush1.bf16.msra.mxu1 %v7752_v24  ;;  %2706 = vmatprep.subr.bf16.mxu0 %v7753_v25  ;;  %v7845_v24 = vld [vmem:[#allocation10 + $0x524] ss:$36 sps:$4 sm:$0xff]  }
  0xd1   :  { %2747 = vmatprep.subr.bf16.mxu1 %v7755_v26  ;;  %v7847_v25 = vld [vmem:[#allocation10 + $0x2e0] ss:$36 sps:$4 sm:$0xff]  }
  0xd2   :  { %v7848_v26 = vld [vmem:[#allocation10 + $0x520] ss:$36 sps:$4 sm:$0xff]  }
  0xd3   :  { %2707 = vmatpush1.bf16.msra.mxu0 %v7757_v27  ;;  %v182_v27 = vlaneseq }
  0xd4   :  { %2748 = vmatpush1.bf16.msra.mxu1 %v7758_v28  ;;  %2708 = vmatprep.subr.bf16.mxu0 %v7759_v29  ;;  %v7849_v28 = vld [vmem:[#allocation10 + $0x29c] ss:$36 sps:$4 sm:$0xff]  }
  0xd5   :  { %2749 = vmatprep.subr.bf16.mxu1 %v7761_v30  ;;  %v7851_v29 = vld [vmem:[#allocation10 + $0x4dc] ss:$36 sps:$4 sm:$0xff]  }
  0xd6   :  { %v7853_v30 = vld [vmem:[#allocation10 + $0x298] ss:$36 sps:$4 sm:$0xff]  }
  0xd7   :  { %2709 = vmatpush1.bf16.msra.mxu0 %v7763_v31  ;;  %v7854_v31 = vld [vmem:[#allocation10 + $0x4d8] ss:$36 sps:$4 sm:$0xff]  }
  0xd8   :  { %2750 = vmatpush1.bf16.msra.mxu1 %v7764_v32  ;;  %2710 = vmatprep.subr.bf16.mxu0 %v7765_v34  ;;  %v9278_v32 = vshrl.u32 %v182_v27, 7  ;;  %v7855_v34 = vld [vmem:[#allocation10 + $0x254] ss:$36 sps:$4 sm:$0xff]  }
  0xd9   :  { %2776 = vmatprep.subr.bf16.mxu1 %v7767_v35  ;;  %v7857_v35 = vld [vmem:[#allocation10 + $0x494] ss:$36 sps:$4 sm:$0xff]  }
  0xdb   :  { %2768 = vmatmul.mubr.bf16.vlgmr.msra.gmra.mxu1 %v9158_v33  ;;  %2711 = vmatpush2.bf16.msra.mxu0 %v7769_v37  ;;  %v7859_v37 = vld [vmem:[#allocation10 + $0x250] ss:$36 sps:$4 sm:$0xff]  }
  0xdc   :  { %2777 = vmatpush1.bf16.msra.mxu1 %v7770_v38  ;;  %2712 = vmatprep.subr.bf16.mxu0 %v7771_v39  ;;  %v7860_v38 = vld [vmem:[#allocation10 + $0x490] ss:$36 sps:$4 sm:$0xff]   ;;  %v9281_v39 = vsub.s32 0, %v9278_v32 }
  0xdd   :  { %2778 = vmatprep.subr.bf16.mxu1 %v7773_v40  ;;  %2808 = vmatprep.mubr.bf16.mxu1 %v9158_v33  ;;  %v9284_v40 = vsub.s32 2, %v9278_v32 }
  0xde   :  { %13140 = vst [vmem:[#allocation18_spill] sm:$0xff] %v9281_v39 }
  0xdf   :  { %2713 = vmatpush2.bf16.msra.mxu0 %v7775_v41  ;;  %13141 = vst [vmem:[#allocation19_spill] sm:$0xff] %v9284_v40  ;;  %v9286_v41 = vld [vmem:[#allocation11] sm:$0xff] }
  0xe0   :  { %2779 = vmatpush1.bf16.msra.mxu1 %v7776_v36  ;;  %2714 = vmatprep.subr.bf16.mxu0 %v7777_v42  ;;  %v7861_v36 = vld [vmem:[#allocation10 + $0x214] ss:$36 sps:$4 sm:$0xff]  }
  0xe1   :  { %2780 = vmatprep.subr.bf16.mxu1 %v7779_v43  ;;  %v7879_v42 = vld [vmem:[#allocation10 + $0x694] ss:$36 sps:$4 sm:$0xff]   ;;  %v9289_v43 = vsub.s32 1, %v9278_v32 }
  0xe3   :  { %2715 = vmatpush2.bf16.msra.mxu0 %v7781_v44  ;;  %13142 = vst [vmem:[#allocation20_spill] sm:$0xff] %v9289_v43  ;;  %v196_v44 = vsub.s32 3, %v9278_v32 }
  0xe4   :  { %2781 = vmatpush1.bf16.msra.mxu1 %v7782_v46  ;;  %2716 = vmatprep.subr.bf16.mxu0 %v7783_v47  ;;  %v9294_v46 = vrot.slane %v9286_v41, %v9281_v39  ;;  %v7863_v47 = vld [vmem:[#allocation10 + $0x210] ss:$36 sps:$4 sm:$0xff]  }
  0xe5   :  { %2782 = vmatprep.subr.bf16.mxu1 %v7785_v45  ;;  %v9298_v45 = vrot.slane %v9286_v41, %v9284_v40 }
  0xe7   :  { %2717 = vmatpush2.bf16.msra.mxu0 %v7787_v48  ;;  %v7881_v48 = vld [vmem:[#allocation10 + $0x690] ss:$36 sps:$4 sm:$0xff]  }
  0xe8   :  { %2783 = vmatpush1.bf16.msra.mxu1 %v7788_v49  ;;  %2718 = vmatprep.subr.bf16.mxu0 %v7789_v50  ;;  %v7864_v49 = vld [vmem:[#allocation10 + $0x1cc] ss:$36 sps:$4 sm:$0xff]  }
  0xe9   :  { %2784 = vmatprep.subr.bf16.mxu1 %v7791_v51  ;;  %v7885_v50 = vld [vmem:[#allocation10 + $0x64c] ss:$36 sps:$4 sm:$0xff]   ;;  %v9302_v51 = vrot.slane %v9286_v41, %v9289_v43 }
  0xeb   :  { %2719 = vmatpush2.bf16.msra.mxu0 %v7793_v52  ;;  %v9305_v52 = vrot.slane %v9286_v41, %v196_v44 }
  0xec   :  { %2785 = vmatpush1.bf16.msra.mxu1 %v7794_v53  ;;  %2720 = vmatprep.subr.bf16.mxu0 %v7795_v54 }
  0xed   :  { %2786 = vmatprep.subr.bf16.mxu1 %v7797_v55 }
  0xef   :  { %2721 = vmatpush2.bf16.msra.mxu0 %v7799_v56  ;;  %v7866_v56 = vld [vmem:[#allocation10 + $0x1c8] ss:$36 sps:$4 sm:$0xff]  }
  0xf0   :  { %2787 = vmatpush1.bf16.msra.mxu1 %v7800_v57  ;;  %2722 = vmatprep.subr.bf16.mxu0 %v7801_v58 }
  0xf1   :  { %2788 = vmatprep.subr.bf16.mxu1 %v7803_v59  ;;  %v7867_v59 = vld [vmem:[#allocation10 + $0x184] ss:$36 sps:$4 sm:$0xff]  }
  0xf3   :  { %2723 = vmatpush2.bf16.msra.mxu0 %v7805_v60 }
  0xf4   :  { %2789 = vmatpush1.bf16.msra.mxu1 %v7806_v61  ;;  %2724 = vmatprep.subr.bf16.mxu0 %v7807_v62  ;;  %v7887_v61 = vld [vmem:[#allocation10 + $0x648] ss:$36 sps:$4 sm:$0xff]  }
  0xf5   :  { %2790 = vmatprep.subr.bf16.mxu1 %v7809_v63 }
  0xf7   :  { %2725 = vmatpush2.bf16.msra.mxu0 %v7811_v0  ;;  %v7891_v0 = vld [vmem:[#allocation10 + $0x604] ss:$36 sps:$4 sm:$0xff]  }
  0xf8   :  { %2791 = vmatpush1.bf16.msra.mxu1 %v7812_v2  ;;  %2817 = vmatprep.subr.bf16.mxu0 %v7815_v4 }
  0xf9   :  { %2792 = vmatprep.subr.bf16.mxu1 %v7813_v3 }
  0xfa   :  { %2727 = vmatmul.mubr.bf16.vlgmr.msra.gmra.mxu0 %v9158_v33 }
  0xfb   :  { %2818 = vmatpush1.bf16.msra.mxu0 %v7818_v6  ;;  %2849 = vmatprep.mubr.bf16.mxu0 %v12652_v1 }
  0xfc   :  { %2793 = vmatpush2.bf16.msra.mxu1 %v7817_v5  ;;  %2819 = vmatprep.subr.bf16.mxu0 %v7821_v8  ;;  %v7869_v5 = vld [vmem:[#allocation10 + $0x180] ss:$36 sps:$4 sm:$0xff]  }
  0xfd   :  { %2794 = vmatprep.subr.bf16.mxu1 %v7819_v7 }
  0xff   :  { %2820 = vmatpush1.bf16.msra.mxu0 %v7824_v10 }
 0x100   :  { %2795 = vmatpush2.bf16.msra.mxu1 %v7823_v9  ;;  %2821 = vmatprep.subr.bf16.mxu0 %v7827_v12  ;;  %v7870_v9 = vld [vmem:[#allocation10 + $0x13c] ss:$36 sps:$4 sm:$0xff]  }
 0x101   :  { %2796 = vmatprep.subr.bf16.mxu1 %v7825_v11  ;;  %v7893_v11 = vld [vmem:[#allocation10 + $0x600] ss:$36 sps:$4 sm:$0xff]  }
 0x103   :  { %2822 = vmatpush1.bf16.msra.mxu0 %v7830_v14 }
 0x104   :  { %2797 = vmatpush2.bf16.msra.mxu1 %v7829_v13  ;;  %2823 = vmatprep.subr.bf16.mxu0 %v7833_v16 }
 0x105   :  { %2798 = vmatprep.subr.bf16.mxu1 %v7831_v15  ;;  %v7897_v15 = vld [vmem:[#allocation10 + $0x5bc] ss:$36 sps:$4 sm:$0xff]  }
 0x107   :  { %2824 = vmatpush1.bf16.msra.mxu0 %v7836_v18 }
 0x108   :  { %2799 = vmatpush2.bf16.msra.mxu1 %v7835_v17  ;;  %2825 = vmatprep.subr.bf16.mxu0 %v7839_v20  ;;  %v7872_v20 = vld [vmem:[#allocation10 + $0x138] ss:$36 sps:$4 sm:$0xff]  }
 0x109   :  { %2800 = vmatprep.subr.bf16.mxu1 %v7837_v19 }
 0x10b   :  { %2826 = vmatpush1.bf16.msra.mxu0 %v7842_v22 }
 0x10c   :  { %2801 = vmatpush2.bf16.msra.mxu1 %v7841_v21  ;;  %2827 = vmatprep.subr.bf16.mxu0 %v7845_v24  ;;  %v7873_v24 = vld [vmem:[#allocation10 + $0xf4] ss:$36 sps:$4 sm:$0xff]  }
 0x10d   :  { %2802 = vmatprep.subr.bf16.mxu1 %v7843_v23 }
 0x10f   :  { %2828 = vmatpush1.bf16.msra.mxu0 %v7848_v26  ;;  %v7899_v26 = vld [vmem:[#allocation10 + $0x5b8] ss:$36 sps:$4 sm:$0xff]  }
 0x110   :  { %2803 = vmatpush2.bf16.msra.mxu1 %v7847_v25  ;;  %2829 = vmatprep.subr.bf16.mxu0 %v7851_v29  ;;  %v7903_v29 = vld [vmem:[#allocation10 + $0x574] ss:$36 sps:$4 sm:$0xff]  }
 0x111   :  { %2804 = vmatprep.subr.bf16.mxu1 %v7849_v28 }
 0x113   :  { %2830 = vmatpush1.bf16.msra.mxu0 %v7854_v31 }
 0x114   :  { %2805 = vmatpush2.bf16.msra.mxu1 %v7853_v30  ;;  %2831 = vmatprep.subr.bf16.mxu0 %v7857_v35  ;;  %v7875_v35 = vld [vmem:[#allocation10 + $0xf0] ss:$36 sps:$4 sm:$0xff]  }
 0x115   :  { %2806 = vmatprep.subr.bf16.mxu1 %v7855_v34 }
 0x117   :  { %2832 = vmatpush1.bf16.msra.mxu0 %v7860_v38 }
 0x118   :  { %2807 = vmatpush2.bf16.msra.mxu1 %v7859_v37  ;;  %2858 = vmatprep.subr.bf16.mxu0 %v7861_v36 }
 0x119   :  { %2899 = vmatprep.subr.bf16.mxu1 %v7879_v42  ;;  %v7876_v42 = vld [vmem:[#allocation10 + $0xac] ss:$36 sps:$4 sm:$0xff]  }
 0x11a   :  { %v653_v53 = vpop.f32.mrf.mxu0  ;;  %2850 = vmatmul.mubr.bf16.vlgmr.msra.gmra.mxu0 %v9158_v33 }
 0x11b   :  { %2809 = vmatmul.mubr.bf16.vlgmr.msra.gmra.mxu1 %v9158_v33  ;;  %v726_v54 = vpop.f32.mrf.mxu1  ;;  %v654_v55 = vadd.f32 %v653_v53, %v9294_v46  ;;  %2859 = vmatpush1.bf16.msra.mxu0 %v7863_v47  ;;  %v7905_v47 = vld [vmem:[#allocation10 + $0x570] ss:$36 sps:$4 sm:$0xff]  }
 0x11c   :  { %v727_v57 = vadd.f32 %v726_v54, %v9298_v45  ;;  %2900 = vmatpush1.bf16.msra.mxu1 %v7881_v48  ;;  %v655_v58 = vpop.f32.mrf.mxu0  ;;  %2860 = vmatprep.subr.bf16.mxu0 %v7864_v49  ;;  %v7909_v53 = vld [vmem:[#allocation10 + $0x52c] ss:$36 sps:$4 sm:$0xff]  }
 0x11d   :  { %v728_v60 = vpop.f32.mrf.mxu1  ;;  %2901 = vmatprep.subr.bf16.mxu1 %v7885_v50  ;;  %v656_v62 = vadd.f32 %v655_v58, %v9302_v51  ;;  %2931 = vmatprep.mubr.bf16.mxu1 %v12652_v1  ;;  %v7878_v58 = vld [vmem:[#allocation10 + $0xa8] ss:$36 sps:$4 sm:$0xff]  }
 0x11e   :  { %v729_v63 = vadd.f32 %v728_v60, %v9305_v52  ;;  %2890 = vmatprep.mubr.bf16.mxu0 %v9158_v33  ;;  %v657_v2 = vpop.f32.mrf.mxu0 }
 0x11f   :  { %v730_v3 = vpop.f32.mrf.mxu1  ;;  %v9315_v4 = vpack.c.bf16 %v656_v62, %v654_v55  ;;  %2861 = vmatpush1.bf16.msra.mxu0 %v7866_v56  ;;  %v658_v12 = vadd.f32 %v657_v2, %v9294_v46  ;;  %v7882_v62 = vld [vmem:[#allocation10 + $0x64] ss:$36 sps:$4 sm:$0xff]  }
 0x120   :  { %v9317_v6 = vpack.c.bf16 %v729_v63, %v727_v57  ;;  %v731_v7 = vadd.f32 %v730_v3, %v9298_v45  ;;  %v659_v8 = vpop.f32.mrf.mxu0  ;;  %2862 = vmatprep.subr.bf16.mxu0 %v7867_v59  ;;  %2902 = vmatpush1.bf16.msra.mxu1 %v7887_v61 }
 0x121   :  { %v732_v10 = vpop.f32.mrf.mxu1  ;;  %v660_v13 = vadd.f32 %v659_v8, %v9302_v51  ;;  %2903 = vmatprep.subr.bf16.mxu1 %v7891_v0  ;;  %v7911_v0 = vld [vmem:[#allocation10 + $0x528] ss:$36 sps:$4 sm:$0xff]  }
 0x122   :  { %v733_v14 = vadd.f32 %v732_v10, %v9305_v52  ;;  %v663_v16 = vpop.f32.mrf.mxu0  ;;  %v7884_v10 = vld [vmem:[#allocation10 + $0x60] ss:$36 sps:$4 sm:$0xff]  }
 0x123   :  { %v736_v17 = vpop.f32.mrf.mxu1  ;;  %v7044_v18 = vpack.c.bf16 %v660_v13, %v658_v12  ;;  %v664_v19 = vadd.f32 %v663_v16, %v9294_v46  ;;  %2863 = vmatpush1.bf16.msra.mxu0 %v7869_v5  ;;  %v7915_v5 = vld [vmem:[#allocation10 + $0x4e4] ss:$36 sps:$4 sm:$0xff]  }
 0x124   :  { %v7045_v21 = vpack.c.bf16 %v733_v14, %v731_v7  ;;  %v737_v22 = vadd.f32 %v736_v17, %v9298_v45  ;;  %v665_v23 = vpop.f32.mrf.mxu0  ;;  %2864 = vmatprep.subr.bf16.mxu0 %v7870_v9  ;;  %2904 = vmatpush1.bf16.msra.mxu1 %v7893_v11  ;;  %v7888_v14 = vld [vmem:[#allocation10 + $0x1c] ss:$36 sps:$4 sm:$0xff]  }
 0x125   :  { %v738_v25 = vpop.f32.mrf.mxu1  ;;  %1205 = vst [vmem:[#allocation3 + $0x24] sm:$0xff] %v7044_v18  ;;  %v666_v27 = vadd.f32 %v665_v23, %v9302_v51  ;;  %2905 = vmatprep.subr.bf16.mxu1 %v7897_v15  ;;  %v7917_v16 = vld [vmem:[#allocation10 + $0x4e0] ss:$36 sps:$4 sm:$0xff]  }
 0x126   :  { %1206 = vst [vmem:[#allocation3 + $0x2c] sm:$0xff] %v7045_v21  ;;  %v739_v28 = vadd.f32 %v738_v25, %v9305_v52  ;;  %v667_v30 = vpop.f32.mrf.mxu0 }
 0x127   :  { %v740_v31 = vpop.f32.mrf.mxu1  ;;  %v7049_v34 = vpack.c.bf16 %v666_v27, %v664_v19  ;;  %2865 = vmatpush1.bf16.msra.mxu0 %v7872_v20  ;;  %v668_v48 = vadd.f32 %v667_v30, %v9294_v46  ;;  %v7921_v20 = vld [vmem:[#allocation10 + $0x49c] ss:$36 sps:$4 sm:$0xff]  }
 0x128   :  { %v7050_v37 = vpack.c.bf16 %v739_v28, %v737_v22  ;;  %v741_v38 = vadd.f32 %v740_v31, %v9298_v45  ;;  %v669_v36 = vpop.f32.mrf.mxu0  ;;  %2866 = vmatprep.subr.bf16.mxu0 %v7873_v24  ;;  %2906 = vmatpush1.bf16.msra.mxu1 %v7899_v26  ;;  %v200_v22 = vsub.s32 4, %v9278_v32  ;;  %v208_v24 = vsub.s32 6, %v9278_v32  ;;  %v7890_v27 = vld [vmem:[#allocation10 + $0x18] ss:$36 sps:$4 sm:$0xff]  }
 0x129   :  { %v742_v44 = vpop.f32.mrf.mxu1  ;;  %1210 = vst [vmem:[#allocation3 + $0x48] sm:$0xff] %v7049_v34  ;;  %v670_v49 = vadd.f32 %v669_v36, %v9302_v51  ;;  %2907 = vmatprep.subr.bf16.mxu1 %v7903_v29  ;;  %v7894_v31 = vld [vmem:[#allocation10 + $0x454] ss:$36 sps:$4 sm:$0xff]   ;;  %v204_v34 = vsub.s32 5, %v9278_v32 }
 0x12a   :  { %1211 = vst [vmem:[#allocation3 + $0x50] sm:$0xff] %v7050_v37  ;;  %v743_v50 = vadd.f32 %v742_v44, %v9305_v52  ;;  %v673_v54 = vpop.f32.mrf.mxu0  ;;  %v7923_v37 = vld [vmem:[#allocation10 + $0x498] ss:$36 sps:$4 sm:$0xff]   ;;  %v212_v44 = vsub.s32 7, %v9278_v32  ;;  %v7900_v32 = vld [vmem:[#allocation10 + $0x40c] ss:$36 sps:$4 sm:$0xff]  }
 0x12b   :  { %v746_v55 = vpop.f32.mrf.mxu1  ;;  %v7054_v56 = vpack.c.bf16 %v670_v49, %v668_v48  ;;  %v674_v57 = vadd.f32 %v673_v54, %v9294_v46  ;;  %2867 = vmatpush1.bf16.msra.mxu0 %v7875_v35  ;;  %v9348_v48 = vrot.slane %v9286_v41, %v200_v22 }
 0x12c   :  { %v7055_v59 = vpack.c.bf16 %v743_v50, %v741_v38  ;;  %v747_v60 = vadd.f32 %v746_v55, %v9298_v45  ;;  %v675_v61 = vpop.f32.mrf.mxu0  ;;  %2868 = vmatprep.subr.bf16.mxu0 %v7876_v42  ;;  %2908 = vmatpush1.bf16.msra.mxu1 %v7905_v47  ;;  %v7927_v42 = vld [vmem:[#allocation10 + $0x458] ss:$36 sps:$4 sm:$0xff]  }
 0x12d   :  { %v748_v63 = vpop.f32.mrf.mxu1  ;;  %1215 = vst [vmem:[#allocation3 + $0x6c] sm:$0xff] %v7054_v56  ;;  %v676_v2 = vadd.f32 %v675_v61, %v9302_v51  ;;  %2909 = vmatprep.subr.bf16.mxu1 %v7909_v53  ;;  %v7896_v53 = vld [vmem:[#allocation10 + $0x450] ss:$36 sps:$4 sm:$0xff]   ;;  %v9352_v56 = vrot.slane %v9286_v41, %v208_v24 }
 0x12e   :  { %1216 = vst [vmem:[#allocation3 + $0x74] sm:$0xff] %v7055_v59  ;;  %v749_v3 = vadd.f32 %v748_v63, %v9305_v52  ;;  %v677_v7 = vpop.f32.mrf.mxu0  ;;  %v9361_v63 = vrot.slane %v9286_v41, %v212_v44  ;;  %v7918_v44 = vld [vmem:[#allocation10 + $0x334] ss:$36 sps:$4 sm:$0xff]  }
 0x12f   :  { %v750_v8 = vpop.f32.mrf.mxu1  ;;  %v7059_v9 = vpack.c.bf16 %v676_v2, %v674_v57  ;;  %2869 = vmatpush1.bf16.msra.mxu0 %v7878_v58  ;;  %v678_v17 = vadd.f32 %v677_v7, %v9294_v46  ;;  %v9355_v58 = vrot.slane %v9286_v41, %v204_v34 }
 0x130   :  { %v7060_v11 = vpack.c.bf16 %v749_v3, %v747_v60  ;;  %v751_v12 = vadd.f32 %v750_v8, %v9298_v45  ;;  %v679_v13 = vpop.f32.mrf.mxu0  ;;  %2870 = vmatprep.subr.bf16.mxu0 %v7882_v62  ;;  %2910 = vmatpush1.bf16.msra.mxu1 %v7911_v0  ;;  %v7932_v3 = vld [vmem:[#allocation10 + $0x410] ss:$36 sps:$4 sm:$0xff]   ;;  %v7902_v8 = vld [vmem:[#allocation10 + $0x408] ss:$36 sps:$4 sm:$0xff]  }
 0x131   :  { %v752_v15 = vpop.f32.mrf.mxu1  ;;  %1220 = vst [vmem:[#allocation3 + $0x90] sm:$0xff] %v7059_v9  ;;  %v680_v18 = vadd.f32 %v679_v13, %v9302_v51  ;;  %2911 = vmatprep.subr.bf16.mxu1 %v7915_v5 }
 0x132   :  { %1221 = vst [vmem:[#allocation3 + $0x98] sm:$0xff] %v7060_v11  ;;  %v753_v19 = vadd.f32 %v752_v15, %v9305_v52  ;;  %v683_v21 = vpop.f32.mrf.mxu0  ;;  %v7937_v15 = vld [vmem:[#allocation10 + $0x3c8] ss:$36 sps:$4 sm:$0xff]  }
 0x133   :  { %v756_v23 = vpop.f32.mrf.mxu1  ;;  %v7064_v25 = vpack.c.bf16 %v680_v18, %v678_v17  ;;  %v684_v26 = vadd.f32 %v683_v21, %v9294_v46  ;;  %2871 = vmatpush1.bf16.msra.mxu0 %v7884_v10  ;;  %v7906_v10 = vld [vmem:[#allocation10 + $0x3c4] ss:$36 sps:$4 sm:$0xff]   ;;  %v7912_v21 = vld [vmem:[#allocation10 + $0x37c] ss:$36 sps:$4 sm:$0xff]  }
 0x134   :  { %v7065_v28 = vpack.c.bf16 %v753_v19, %v751_v12  ;;  %v757_v29 = vadd.f32 %v756_v23, %v9298_v45  ;;  %v685_v30 = vpop.f32.mrf.mxu0  ;;  %2872 = vmatprep.subr.bf16.mxu0 %v7888_v14  ;;  %2912 = vmatpush1.bf16.msra.mxu1 %v7917_v16  ;;  %v7933_v12 = vld [vmem:[#allocation10 + $0x1d0] ss:$36 sps:$4 sm:$0xff]   ;;  %v7908_v17 = vld [vmem:[#allocation10 + $0x3c0] ss:$36 sps:$4 sm:$0xff]  }
 0x135   :  { %v758_v35 = vpop.f32.mrf.mxu1  ;;  %1225 = vst [vmem:[#allocation3 + $0xb4] sm:$0xff] %v7064_v25  ;;  %v686_v38 = vadd.f32 %v685_v30, %v9302_v51  ;;  %2913 = vmatprep.subr.bf16.mxu1 %v7921_v20 }
 0x136   :  { %1226 = vst [vmem:[#allocation3 + $0xbc] sm:$0xff] %v7065_v28  ;;  %v759_v36 = vadd.f32 %v758_v35, %v9305_v52  ;;  %v687_v47 = vpop.f32.mrf.mxu0 }
 0x137   :  { %v760_v49 = vpop.f32.mrf.mxu1  ;;  %v7069_v50 = vpack.c.bf16 %v686_v38, %v684_v26  ;;  %2873 = vmatpush1.bf16.msra.mxu0 %v7890_v27  ;;  %v688_v60 = vadd.f32 %v687_v47, %v9294_v46  ;;  %v9375_v26 = vld [vmem:[#allocation10 + $0x188] ss:$36 sps:$4 sm:$0xff]  }
 0x138   :  { %v7070_v54 = vpack.c.bf16 %v759_v36, %v757_v29  ;;  %v761_v55 = vadd.f32 %v760_v49, %v9298_v45  ;;  %v689_v57 = vpop.f32.mrf.mxu0  ;;  %2874 = vmatprep.subr.bf16.mxu0 %v7894_v31  ;;  %2914 = vmatpush1.bf16.msra.mxu1 %v7923_v37  ;;  %v7928_v45 = vld [vmem:[#allocation10 + $0x218] ss:$36 sps:$4 sm:$0xff]   ;;  %v9379_v29 = vld [vmem:[#allocation10 + $0x380] ss:$36 sps:$4 sm:$0xff]   ;;  %v3046_v31 = vrot.slane %v9317_v6, 4 }
 0x139   :  { %v762_v59 = vpop.f32.mrf.mxu1  ;;  %1230 = vst [vmem:[#allocation3 + $0xd8] sm:$0xff] %v7069_v50  ;;  %v690_v61 = vadd.f32 %v689_v57, %v9302_v51  ;;  %7091 = vmatprep.subr.bf16.mxu1 %v7927_v42  ;;  %v7914_v37 = vld [vmem:[#allocation10 + $0x378] ss:$36 sps:$4 sm:$0xff]  }
 0x13a   :  { %1231 = vst [vmem:[#allocation3 + $0xe0] sm:$0xff] %v7070_v54  ;;  %v763_v62 = vadd.f32 %v762_v59, %v9305_v52  ;;  %v799_v0 = vpop.f32.mrf.mxu0  ;;  %v9394_v57 = vld [vmem:[#allocation10 + $0x338] ss:$36 sps:$4 sm:$0xff]  }
 0x13b   :  { %v872_v2 = vpop.f32.mrf.mxu1  ;;  %v7074_v5 = vpack.c.bf16 %v690_v61, %v688_v60  ;;  %v800_v7 = vadd.f32 %v799_v0, %v9348_v48  ;;  %2875 = vmatpush2.bf16.msra.mxu0 %v7896_v53  ;;  %2932 = vmatmul.mubr.bf16.vlgmr.msra.gmra.mxu1 %v9158_v33  ;;  %v9390_v53 = vld [vmem:[#allocation10 + $0x140] ss:$36 sps:$4 sm:$0xff]   ;;  %v7920_v60 = vld [vmem:[#allocation10 + $0x330] ss:$36 sps:$4 sm:$0xff]  }
 0x13c   :  { %v7075_v9 = vpack.c.bf16 %v763_v62, %v761_v55  ;;  %v873_v46 = vadd.f32 %v872_v2, %v9352_v56  ;;  %v801_v51 = vpop.f32.mrf.mxu0  ;;  %2876 = vmatprep.subr.bf16.mxu0 %v7900_v32  ;;  %7092 = vmatpush3.bf16.msra.mxu1 %v7928_v45  ;;  %v7924_v0 = vld [vmem:[#allocation10 + $0x2ec] ss:$36 sps:$4 sm:$0xff]  }
 0x13d   :  { %v874_v52 = vpop.f32.mrf.mxu1  ;;  %1235 = vst [vmem:[#allocation3 + $0xfc] sm:$0xff] %v7074_v5  ;;  %v802_v41 = vadd.f32 %v801_v51, %v9355_v58  ;;  %2972 = vmatprep.mubr.bf16.mxu1 %v9158_v33  ;;  %7093 = vmatprep.subr.bf16.mxu1 %v7932_v3 }
 0x13e   :  { %1236 = vst [vmem:[#allocation3 + $0x104] sm:$0xff] %v7075_v9  ;;  %v875_v11 = vadd.f32 %v874_v52, %v9361_v63  ;;  %v803_v13 = vpop.f32.mrf.mxu0 }
 0x13f   :  { %v876_v14 = vpop.f32.mrf.mxu1  ;;  %v7041_v16 = vpack.c.bf16 %v802_v41, %v800_v7  ;;  %2877 = vmatpush2.bf16.msra.mxu0 %v7902_v8  ;;  %v804_v23 = vadd.f32 %v803_v13, %v9348_v48  ;;  %v9400_v7 = vld [vmem:[#allocation10 + $0xf8] ss:$36 sps:$4 sm:$0xff]   ;;  %v9407_v41 = vld [vmem:[#allocation10 + $0x2e8] ss:$36 sps:$4 sm:$0xff]  }
 0x140   :  { %v9369_v18 = vpack.c.bf16 %v875_v11, %v873_v46  ;;  %v877_v19 = vadd.f32 %v876_v14, %v9352_v56  ;;  %v805_v20 = vpop.f32.mrf.mxu0  ;;  %2878 = vmatprep.subr.bf16.mxu0 %v7906_v10  ;;  %7094 = vmatpush3.bf16.msra.mxu1 %v7933_v12  ;;  %v9404_v46 = vld [vmem:[#allocation10 + $0x2f0] ss:$36 sps:$4 sm:$0xff]   ;;  %v9410_v14 = vld [vmem:[#allocation10 + $0x2a4] ss:$36 sps:$4 sm:$0xff]  }
 0x141   :  { %v878_v22 = vpop.f32.mrf.mxu1  ;;  %v806_v24 = vadd.f32 %v805_v20, %v9355_v58  ;;  %v9377_v27 = vrot.slane %v7041_v16, 4  ;;  %7095 = vmatprep.subr.bf16.mxu1 %v7937_v15 }
 0x142   :  { %v879_v25 = vadd.f32 %v878_v22, %v9361_v63  ;;  %v809_v28 = vpop.f32.mrf.mxu0 }
 0x143   :  { %v882_v30 = vpop.f32.mrf.mxu1  ;;  %v7046_v34 = vpack.c.bf16 %v806_v24, %v804_v23  ;;  %v810_v35 = vadd.f32 %v809_v28, %v9348_v48  ;;  %2879 = vmatpush2.bf16.msra.mxu0 %v7908_v17  ;;  %v9386_v49 = vsel %vm3048_vm0, %v3046_v31, %v9377_v27  ;;  %v9414_v17 = vld [vmem:[#allocation10 + $0xb0] ss:$36 sps:$4 sm:$0xff]   ;;  %v9421_v24 = vld [vmem:[#allocation10 + $0x2a0] ss:$36 sps:$4 sm:$0xff]  }
 0x144   :  { %v7047_v38 = vpack.c.bf16 %v879_v25, %v877_v19  ;;  %v883_v36 = vadd.f32 %v882_v30, %v9352_v56  ;;  %v811_v42 = vpop.f32.mrf.mxu0  ;;  %2880 = vmatprep.subr.bf16.mxu0 %v7912_v21  ;;  %7096 = vmatpush3.bf16.msra.mxu1 %v9375_v26  ;;  %v9418_v21 = vld [vmem:[#allocation10 + $0x2a8] ss:$36 sps:$4 sm:$0xff]   ;;  %v9425_v31 = vld [vmem:[#allocation10 + $0x25c] ss:$36 sps:$4 sm:$0xff]  }
 0x145   :  { %v884_v47 = vpop.f32.mrf.mxu1  ;;  %1207 = vst [vmem:[#allocation3 + $0x34] sm:$0xff] %v7046_v34  ;;  %v812_v50 = vadd.f32 %v811_v42, %v9355_v58  ;;  %7097 = vmatprep.subr.bf16.mxu1 %v9379_v29 }
 0x146   :  { %1208 = vst [vmem:[#allocation3 + $0x3c] sm:$0xff] %v7047_v38  ;;  %v885_v54 = vadd.f32 %v884_v47, %v9361_v63  ;;  %v813_v55 = vpop.f32.mrf.mxu0  ;;  %v9430_v38 = vld [vmem:[#allocation10 + $0x68] ss:$36 sps:$4 sm:$0xff]  }
 0x147   :  { %v886_v32 = vpop.f32.mrf.mxu1  ;;  %v7051_v59 = vpack.c.bf16 %v812_v50, %v810_v35  ;;  %2881 = vmatpush2.bf16.msra.mxu0 %v7914_v37  ;;  %v814_v3 = vadd.f32 %v813_v55, %v9348_v48  ;;  %v9438_v55 = vld [vmem:[#allocation10 + $0x258] ss:$36 sps:$4 sm:$0xff]  }
 0x148   :  { %v7052_v61 = vpack.c.bf16 %v885_v54, %v883_v36  ;;  %v887_v62 = vadd.f32 %v886_v32, %v9352_v56  ;;  %v815_v45 = vpop.f32.mrf.mxu0  ;;  %2882 = vmatprep.subr.bf16.mxu0 %v7918_v44  ;;  %7098 = vmatpush3.bf16.msra.mxu1 %v9390_v53  ;;  %v9434_v44 = vld [vmem:[#allocation10 + $0x260] ss:$36 sps:$4 sm:$0xff]  }
 0x149   :  { %v888_v2 = vpop.f32.mrf.mxu1  ;;  %1212 = vst [vmem:[#allocation3 + $0x58] sm:$0xff] %v7051_v59  ;;  %v816_v5 = vadd.f32 %v815_v45, %v9355_v58  ;;  %7099 = vmatprep.subr.bf16.mxu1 %v9394_v57  ;;  %v9444_v45 = vld [vmem:[#allocation10 + $0x20] ss:$36 sps:$4 sm:$0xff]  }
 0x14a   :  { %1213 = vst [vmem:[#allocation3 + $0x60] sm:$0xff] %v7052_v61  ;;  %v889_v8 = vadd.f32 %v888_v2, %v9361_v63  ;;  %v819_v9 = vpop.f32.mrf.mxu0 }
 0x14b   :  { %v892_v51 = vpop.f32.mrf.mxu1  ;;  %v7056_v10 = vpack.c.bf16 %v816_v5, %v814_v3  ;;  %v820_v52 = vadd.f32 %v819_v9, %v9348_v48  ;;  %2883 = vmatpush2.bf16.msra.mxu0 %v7920_v60 }
 0x14c   :  { %v7057_v11 = vpack.c.bf16 %v889_v8, %v887_v62  ;;  %v893_v12 = vadd.f32 %v892_v51, %v9352_v56  ;;  %v821_v13 = vpop.f32.mrf.mxu0  ;;  %2884 = vmatprep.subr.bf16.mxu0 %v7924_v0  ;;  %7100 = vmatpush3.bf16.msra.mxu1 %v9400_v7  ;;  %v9449_v8 = vld [vmem:[#allocation10 + $0x698] ss:$36 sps:$4 sm:$0xff]  }
 0x14d   :  { %v894_v15 = vpop.f32.mrf.mxu1  ;;  %1217 = vst [vmem:[#allocation3 + $0x7c] sm:$0xff] %v7056_v10  ;;  %v822_v16 = vadd.f32 %v821_v13, %v9355_v58  ;;  %7101 = vmatprep.subr.bf16.mxu1 %v9404_v46 }
 0x14e   :  { %1218 = vst [vmem:[#allocation3 + $0x84] sm:$0xff] %v7057_v11  ;;  %v895_v19 = vadd.f32 %v894_v15, %v9361_v63  ;;  %v823_v20 = vpop.f32.mrf.mxu0  ;;  %v12650_v11 = vmov 0.0  }
 0x14f   :  { %v896_v22 = vpop.f32.mrf.mxu1  ;;  %v7061_v23 = vpack.c.bf16 %v822_v16, %v820_v52  ;;  %2885 = vmatpush2.bf16.msra.mxu0 %v9407_v41  ;;  %v824_v35 = vadd.f32 %v823_v20, %v9348_v48  ;;  %v9452_v52 = vld [vmem:[#allocation11 + $0x8] ss:$0 sm:$0xff] }
 0x150   :  { %v7062_v25 = vpack.c.bf16 %v895_v19, %v893_v12  ;;  %v897_v28 = vadd.f32 %v896_v22, %v9352_v56  ;;  %v825_v30 = vpop.f32.mrf.mxu0  ;;  %2886 = vmatprep.subr.bf16.mxu0 %v9410_v14  ;;  %7102 = vmatpush3.bf16.msra.mxu1 %v9414_v17 }
 0x151   :  { %v898_v34 = vpop.f32.mrf.mxu1  ;;  %1222 = vst [vmem:[#allocation3 + $0xa0] sm:$0xff] %v7061_v23  ;;  %v826_v37 = vadd.f32 %v825_v30, %v9355_v58  ;;  %7103 = vmatprep.subr.bf16.mxu1 %v9418_v21 }
 0x152   :  { %1223 = vst [vmem:[#allocation3 + $0xa8] sm:$0xff] %v7062_v25  ;;  %v899_v36 = vadd.f32 %v898_v34, %v9361_v63  ;;  %v829_v42 = vpop.f32.mrf.mxu0  ;;  %v9475_v34 = vld [vmem:[#allocation10 + $0x1b4] ss:$36 sps:$4 sm:$0xff]  }
 0x153   :  { %v902_v47 = vpop.f32.mrf.mxu1  ;;  %v7066_v50 = vpack.c.bf16 %v826_v37, %v824_v35  ;;  %v830_v54 = vadd.f32 %v829_v42, %v9348_v48  ;;  %2887 = vmatpush2.bf16.msra.mxu0 %v9421_v24 }
 0x154   :  { %v7067_v32 = vpack.c.bf16 %v899_v36, %v897_v28  ;;  %v903_v59 = vadd.f32 %v902_v47, %v9352_v56  ;;  %v831_v60 = vpop.f32.mrf.mxu0  ;;  %2888 = vmatprep.subr.bf16.mxu0 %v9425_v31  ;;  %7104 = vmatpush3.bf16.msra.mxu1 %v9430_v38  ;;  %v9472_v28 = vld [vmem:[#allocation10 + $0x1f8] ss:$36 sps:$4 sm:$0xff]   ;;  %v9480_v36 = vld [vmem:[#allocation10 + $0x608] ss:$36 sps:$4 sm:$0xff]  }
 0x155   :  { %v904_v61 = vpop.f32.mrf.mxu1  ;;  %1227 = vst [vmem:[#allocation3 + $0xc4] sm:$0xff] %v7066_v50  ;;  %v832_v62 = vadd.f32 %v831_v60, %v9355_v58  ;;  %7105 = vmatprep.subr.bf16.mxu1 %v9434_v44  ;;  %13144 = vst [vmem:[#allocation22_spill] sm:$0xff] %v9480_v36 }
 0x156   :  { %1228 = vst [vmem:[#allocation3 + $0xcc] sm:$0xff] %v7067_v32  ;;  %v905_v0 = vadd.f32 %v904_v61, %v9361_v63  ;;  %v833_v2 = vpop.f32.mrf.mxu0  ;;  %v9491_v61 = vld [vmem:[#allocation10 + $0x5c0] ss:$36 sps:$4 sm:$0xff]  }
 0x157   :  { %v906_v3 = vpop.f32.mrf.mxu1  ;;  %v7071_v5 = vpack.c.bf16 %v832_v62, %v830_v54  ;;  %2889 = vmatpush2.bf16.msra.mxu0 %v9438_v55  ;;  %v834_v13 = vadd.f32 %v833_v2, %v9348_v48  ;;  %v9465_v48 = vld [vmem:[#allocation10 + $0x650] ss:$36 sps:$4 sm:$0xff]   ;;  %13145 = vst [vmem:[#allocation23_spill] sm:$0xff] %v9491_v61 }
 0x158   :  { %v7072_v9 = vpack.c.bf16 %v905_v0, %v903_v59  ;;  %v907_v51 = vadd.f32 %v906_v3, %v9352_v56  ;;  %v835_v10 = vpop.f32.mrf.mxu0  ;;  %7363 = vmatprep.subr.bf16.mxu0 %v12650_v11  ;;  %7106 = vmatpush3.bf16.msra.mxu1 %v9444_v45  ;;  %v9460_v56 = vld [vmem:[#allocation10 + $0x1fc] ss:$36 sps:$4 sm:$0xff]   ;;  %13143 = vst [vmem:[#allocation21_spill] sm:$0xff] %v9465_v48  ;;  %v9484_v54 = vld [vmem:[#allocation10 + $0x1b0] ss:$36 sps:$4 sm:$0xff]  }
 0x159   :  { %v908_v12 = vpop.f32.mrf.mxu1  ;;  %1232 = vst [vmem:[#allocation3 + $0xe8] sm:$0xff] %v7071_v5  ;;  %v836_v15 = vadd.f32 %v835_v10, %v9355_v58  ;;  %3111 = vmatprep.subr.bf16.mxu1 %v9460_v56  ;;  %v9487_v59 = vld [vmem:[#allocation10 + $0x16c] ss:$36 sps:$4 sm:$0xff]   ;;  %v9503_v10 = vld [vmem:[#allocation10 + $0x578] ss:$36 sps:$4 sm:$0xff]  }
 0x15a   :  { %1233 = vst [vmem:[#allocation3 + $0xf0] sm:$0xff] %v7072_v9  ;;  %v909_v16 = vadd.f32 %v908_v12, %v9361_v63  ;;  %v7357_v19 = vpop.f32.mrf.mxu0  ;;  %2891 = vmatmul.mubr.bf16.vlgmr.msra.gmra.mxu0 %v9158_v33  ;;  %v9496_v5 = vld [vmem:[#allocation10 + $0x168] ss:$36 sps:$4 sm:$0xff]   ;;  %13146 = vst [vmem:[#allocation24_spill] sm:$0xff] %v9503_v10 }
 0x15b   :  { %v7076_v20 = vpack.c.bf16 %v836_v15, %v834_v13  ;;  %v954_v22 = vadd.f32 %v7357_v19, %v9452_v52  ;;  %7364 = vmatpush3.bf16.msra.mxu0 %v9449_v8  ;;  %7379 = vmatprep.mubr.msk.bf16.mxu0 %vm9160_vm1, %v12650_v11 }
 0x15c   :  { %v7077_v58 = vpack.c.bf16 %v909_v16, %v907_v51  ;;  %v945_v63 = vpop.f32.mrf.mxu0  ;;  %7365 = vmatprep.subr.bf16.mxu0 %v12650_v11  ;;  %2973 = vmatmul.mubr.bf16.vlgmr.msra.gmra.mxu1 %v9158_v33  ;;  %v9499_v51 = vld [vmem:[#allocation10 + $0x124] ss:$36 sps:$4 sm:$0xff]  }
 0x15d   :  { %1237 = vst [vmem:[#allocation3 + $0x10c] sm:$0xff] %v7076_v20  ;;  %v7053_v23 = vpack.c.bf16 %v954_v22, %v954_v22  ;;  %v946_v25 = vadd.f32 %v9452_v52, %v945_v63  ;;  %3112 = vmatpush1.bf16.msra.mxu1 %v9472_v28  ;;  %v9508_v20 = vld [vmem:[#allocation10 + $0x120] ss:$36 sps:$4 sm:$0xff]  }
 0x15e   :  { %1238 = vst [vmem:[#allocation3 + $0x114] sm:$0xff] %v7077_v58  ;;  %v7358_v30 = vpop.f32.mrf.mxu0  ;;  %3113 = vmatprep.subr.bf16.mxu1 %v9475_v34  ;;  %v9511_v22 = vld [vmem:[#allocation10 + $0xdc] ss:$36 sps:$4 sm:$0xff]   ;;  %v9515_v58 = vld [vmem:[#allocation10 + $0x530] ss:$36 sps:$4 sm:$0xff]  }
 0x15f   :  { %1214 = vst [vmem:[#allocation3 + $0x68] sm:$0xf] %v7053_v23  ;;  %v7043_v35 = vpack.c.bf16 %v946_v25, %v946_v25  ;;  %v957_v37 = vadd.f32 %v7358_v30, %v9452_v52  ;;  %7366 = vmatpush3.bf16.msra.mxu0 %v9465_v48  ;;  %13147 = vst [vmem:[#allocation25_spill] sm:$0xff] %v9515_v58  ;;  %v9518_v23 = vld [vmem:[#allocation10 + $0xd8] ss:$36 sps:$4 sm:$0xff]  }
 0x160   :  { %v948_v42 = vpop.f32.mrf.mxu0  ;;  %7367 = vmatprep.subr.bf16.mxu0 %v12650_v11  ;;  %v9525_v25 = vld [vmem:[#allocation10 + $0x4e8] ss:$36 sps:$4 sm:$0xff]   ;;  %v9528_v30 = vld [vmem:[#allocation10 + $0x90] ss:$36 sps:$4 sm:$0xff]  }
 0x161   :  { %1204 = vst [vmem:[#allocation3 + $0x20] sm:$0xf] %v7043_v35  ;;  %v7058_v47 = vpack.c.bf16 %v957_v37, %v957_v37  ;;  %v949_v50 = vadd.f32 %v9452_v52, %v948_v42  ;;  %3114 = vmatpush1.bf16.msra.mxu1 %v9484_v54  ;;  %13148 = vst [vmem:[#allocation26_spill] sm:$0xff] %v9525_v25  ;;  %v9531_v35 = vld [vmem:[#allocation10 + $0x4c] ss:$36 sps:$4 sm:$0xff]  }
 0x162   :  { %v7361_v32 = vpop.f32.mrf.mxu0  ;;  %3115 = vmatprep.subr.bf16.mxu1 %v9487_v59  ;;  %v9535_v37 = vld [vmem:[#allocation10 + $0x4a0] ss:$36 sps:$4 sm:$0xff]   ;;  %v9538_v42 = vld [vmem:[#allocation10 + $0x48] ss:$36 sps:$4 sm:$0xff]  }
 0x163   :  { %1219 = vst [vmem:[#allocation3 + $0x8c] sm:$0xf] %v7058_v47  ;;  %v7048_v60 = vpack.c.bf16 %v949_v50, %v949_v50  ;;  %7368 = vmatpush3.bf16.msra.mxu0 %v9480_v36  ;;  %v970_v62 = vadd.f32 %v7361_v32, %v9452_v52  ;;  %13149 = vst [vmem:[#allocation27_spill] sm:$0xff] %v9535_v37  ;;  %v9541_v47 = vld [vmem:[#allocation10 + $0x4] ss:$36 sps:$4 sm:$0xff]  }
 0x164   :  { %7369 = vmatprep.subr.bf16.mxu0 %v12650_v11  ;;  %v961_v0 = vpop.f32.mrf.mxu0  ;;  %v9545_v50 = vld [vmem:[#allocation10 + $0x67c] ss:$36 sps:$4 sm:$0xff]  }
 0x165   :  { %1209 = vst [vmem:[#allocation3 + $0x44] sm:$0xf] %v7048_v60  ;;  %v7073_v2 = vpack.c.bf16 %v970_v62, %v970_v62  ;;  %v962_v3 = vadd.f32 %v9452_v52, %v961_v0  ;;  %3116 = vmatpush1.bf16.msra.mxu1 %v9496_v5  ;;  %13150 = vst [vmem:[#allocation28_spill] sm:$0xff] %v9545_v50  ;;  %v9548_v32 = vld [vmem:[#allocation10] ss:$36 sps:$4 sm:$0xff]  }
 0x166   :  { %v7362_v9 = vpop.f32.mrf.mxu0  ;;  %3117 = vmatprep.subr.bf16.mxu1 %v9499_v51  ;;  %v9552_v0 = vld [vmem:[#allocation10 + $0x43c] ss:$36 sps:$4 sm:$0xff]  }
 0x167   :  { %7370 = vmatpush3.bf16.msra.mxu0 %v9491_v61  ;;  %1234 = vst [vmem:[#allocation3 + $0xf8] sm:$0xf] %v7073_v2  ;;  %v7063_v12 = vpack.c.bf16 %v962_v3, %v962_v3  ;;  %v973_v13 = vadd.f32 %v7362_v9, %v9452_v52  ;;  %v3020_v3 = vunpack.c.l.bf16 %v9315_v4  ;;  %v9556_v9 = vld [vmem:[#allocation10 + $0x678] ss:$36 sps:$4 sm:$0xff]  }
 0x168   :  { %7371 = vmatprep.subr.bf16.mxu0 %v12650_v11  ;;  %v964_v15 = vpop.f32.mrf.mxu0  ;;  %13151 = vst [vmem:[#allocation29_spill] sm:$0xff] %v9556_v9 }
 0x169   :  { %1224 = vst [vmem:[#allocation3 + $0xb0] sm:$0xf] %v7063_v12  ;;  %v7078_v16 = vpack.c.bf16 %v973_v13, %v973_v13  ;;  %v965_v19 = vadd.f32 %v9452_v52, %v964_v15  ;;  %3118 = vmatpush1.bf16.msra.mxu1 %v9508_v20  ;;  %v9521_v52 = vld [vmem:[#allocation10 + $0x94] ss:$36 sps:$4 sm:$0xff]  }
 0x16a   :  { %3119 = vmatprep.subr.bf16.mxu1 %v9511_v22  ;;  %v9560_v15 = vld [vmem:[#allocation10 + $0x634] ss:$36 sps:$4 sm:$0xff]  }
 0x16b   :  { %7372 = vmatpush3.bf16.msra.mxu0 %v9503_v10  ;;  %1239 = vst [vmem:[#allocation3 + $0x11c] sm:$0xf] %v7078_v16  ;;  %v7068_v63 = vpack.c.bf16 %v965_v19, %v965_v19  ;;  %13152 = vst [vmem:[#allocation30_spill] sm:$0xff] %v9560_v15  ;;  %v3021_v19 = vunpack.c.h.bf16 %v9315_v4  ;;  %v9580_v4 = vld [vmem:[#allocation10 + $0x3f0] ss:$36 sps:$4 sm:$0xff]  }
 0x16c   :  { %7373 = vmatprep.subr.bf16.mxu0 %v12650_v11  ;;  %13156 = vst [vmem:[#allocation34_spill] sm:$0xff] %v9580_v4 }
 0x16d   :  { %1229 = vst [vmem:[#allocation3 + $0xd4] sm:$0xf] %v7068_v63  ;;  %3120 = vmatpush1.bf16.msra.mxu1 %v9518_v23  ;;  %v9566_v63 = vld [vmem:[#allocation10 + $0x438] ss:$36 sps:$4 sm:$0xff]  }
 0x16e   :  { %3121 = vmatprep.subr.bf16.mxu1 %v9521_v52 }
 0x16f   :  { %7374 = vmatpush3.bf16.msra.mxu0 %v9515_v58 }
 0x170   :  { %7375 = vmatprep.subr.bf16.mxu0 %v12650_v11 }
 0x171   :  { %3122 = vmatpush1.bf16.msra.mxu1 %v9528_v30 }
 0x172   :  { %3123 = vmatprep.subr.bf16.mxu1 %v9531_v35 }
 0x173   :  { %7376 = vmatpush3.bf16.msra.mxu0 %v9525_v25  ;;  %v9637_v25 = vld [vmem:[#allocation10 + $0x484] ss:$36 sps:$4 sm:$0xff]  }
 0x174   :  { %7377 = vmatprep.subr.bf16.mxu0 %v12650_v11  ;;  %v9569_v11 = vld [vmem:[#allocation10 + $0x3f4] ss:$36 sps:$4 sm:$0xff]   ;;  %13175 = vst [vmem:[#allocation53_spill] sm:$0xff] %v9637_v25 }
 0x175   :  { %3124 = vmatpush1.bf16.msra.mxu1 %v9538_v42  ;;  %13153 = vst [vmem:[#allocation31_spill] sm:$0xff] %v9569_v11 }
 0x176   :  { %3125 = vmatprep.subr.bf16.mxu1 %v9541_v47 }
 0x177   :  { %7378 = vmatpush3.bf16.msra.mxu0 %v9535_v37  ;;  %v9634_v37 = vld [vmem:[#allocation10 + $0x4c8] ss:$36 sps:$4 sm:$0xff]  }
 0x178   :  { %3152 = vmatprep.subr.bf16.mxu0 %v9545_v50  ;;  %v9625_v50 = vld [vmem:[#allocation10 + $0x4cc] ss:$36 sps:$4 sm:$0xff]   ;;  %13174 = vst [vmem:[#allocation52_spill] sm:$0xff] %v9634_v37 }
 0x179   :  { %3126 = vmatpush1.bf16.msra.mxu1 %v9548_v32  ;;  %13171 = vst [vmem:[#allocation49_spill] sm:$0xff] %v9625_v50 }
 0x17a   :  { %v2687_v62 = vpop.f32.mrf.mxu0  ;;  %7380 = vmatmul.mubr.bf16.vlgmr.msra.gmra.mxu0 %v9158_v33  ;;  %3127 = vmatprep.subr.bf16.mxu1 %v9552_v0 }
 0x17b   :  { %v2646_v60 = vpop.f32.mrf.mxu1  ;;  %3153 = vmatpush1.bf16.msra.mxu0 %v9556_v9  ;;  %3184 = vmatprep.mubr.bf16.mxu0 %v12652_v1  ;;  %v9574_v9 = vld [vmem:[#allocation10 + $0x630] ss:$36 sps:$4 sm:$0xff]  }
 0x17c   :  { %v2688_v2 = vadd.f32 %v2687_v62, %v2646_v60  ;;  %v2689_v13 = vpop.f32.mrf.mxu0  ;;  %3154 = vmatprep.subr.bf16.mxu0 %v9560_v15  ;;  %13154 = vst [vmem:[#allocation32_spill] sm:$0xff] %v9574_v9  ;;  %v9622_v15 = vld [vmem:[#allocation10 + $0x510] ss:$36 sps:$4 sm:$0xff]  }
 0x17d   :  { %v2648_v12 = vpop.f32.mrf.mxu1  ;;  %3128 = vmatpush2.bf16.msra.mxu1 %v9566_v63  ;;  %13170 = vst [vmem:[#allocation48_spill] sm:$0xff] %v9622_v15 }
 0x17e   :  { %v9563_v33 = vadd.f32 %v3020_v3, %v2688_v2  ;;  %v2690_v16 = vadd.f32 %v2689_v13, %v2648_v12  ;;  %v2691_v60 = vpop.f32.mrf.mxu0  ;;  %3129 = vmatprep.subr.bf16.mxu1 %v9569_v11  ;;  %v9577_v12 = vld [vmem:[#allocation10 + $0x5ec] ss:$36 sps:$4 sm:$0xff]  }
 0x17f   :  { %v2650_v62 = vpop.f32.mrf.mxu1  ;;  %3155 = vmatpush1.bf16.msra.mxu0 %v9574_v9  ;;  %13155 = vst [vmem:[#allocation33_spill] sm:$0xff] %v9577_v12  ;;  %v9583_v13 = vld [vmem:[#allocation10 + $0x3ac] ss:$36 sps:$4 sm:$0xff]   ;;  %v9613_v9 = vld [vmem:[#allocation10 + $0x514] ss:$36 sps:$4 sm:$0xff]  }
 0x180   :  { %v9572_v1 = vadd.f32 %v3021_v19, %v2690_v16  ;;  %v2692_v2 = vpop.f32.mrf.mxu0  ;;  %3156 = vmatprep.subr.bf16.mxu0 %v9577_v12  ;;  %13157 = vst [vmem:[#allocation35_spill] sm:$0xff] %v9583_v13  ;;  %v9586_v16 = vld [vmem:[#allocation10 + $0x5e8] ss:$36 sps:$4 sm:$0xff]   ;;  %v9610_v12 = vld [vmem:[#allocation10 + $0x558] ss:$36 sps:$4 sm:$0xff]   ;;  %13167 = vst [vmem:[#allocation45_spill] sm:$0xff] %v9613_v9 }
 0x181   :  { %v2651_v3 = vpop.f32.mrf.mxu1  ;;  %3130 = vmatpush2.bf16.msra.mxu1 %v9580_v4  ;;  %13158 = vst [vmem:[#allocation36_spill] sm:$0xff] %v9586_v16  ;;  %v9589_v19 = vld [vmem:[#allocation10 + $0x5a4] ss:$36 sps:$4 sm:$0xff]   ;;  %13166 = vst [vmem:[#allocation44_spill] sm:$0xff] %v9610_v12 }
 0x182   :  { %3131 = vmatprep.subr.bf16.mxu1 %v9583_v13  ;;  %13159 = vst [vmem:[#allocation37_spill] sm:$0xff] %v9589_v19  ;;  %v9592_v60 = vld [vmem:[#allocation10 + $0x3a8] ss:$36 sps:$4 sm:$0xff]   ;;  %v9598_v2 = vld [vmem:[#allocation10 + $0x5a0] ss:$36 sps:$4 sm:$0xff]  }
 0x183   :  { %3157 = vmatpush1.bf16.msra.mxu0 %v9586_v16  ;;  %13160 = vst [vmem:[#allocation38_spill] sm:$0xff] %v9592_v60  ;;  %v9595_v62 = vld [vmem:[#allocation10 + $0x364] ss:$36 sps:$4 sm:$0xff]   ;;  %13162 = vst [vmem:[#allocation40_spill] sm:$0xff] %v9598_v2  ;;  %v9601_v3 = vld [vmem:[#allocation10 + $0x55c] ss:$36 sps:$4 sm:$0xff]  }
 0x184   :  { %3158 = vmatprep.subr.bf16.mxu0 %v9589_v19  ;;  %13161 = vst [vmem:[#allocation39_spill] sm:$0xff] %v9595_v62  ;;  %13163 = vst [vmem:[#allocation41_spill] sm:$0xff] %v9601_v3  ;;  %v9604_v16 = vld [vmem:[#allocation10 + $0x360] ss:$36 sps:$4 sm:$0xff]  }
 0x185   :  { %3132 = vmatpush2.bf16.msra.mxu1 %v9592_v60  ;;  %13164 = vst [vmem:[#allocation42_spill] sm:$0xff] %v9604_v16  ;;  %v9607_v19 = vld [vmem:[#allocation10 + $0x31c] ss:$36 sps:$4 sm:$0xff]  }
 0x186   :  { %3133 = vmatprep.subr.bf16.mxu1 %v9595_v62  ;;  %13165 = vst [vmem:[#allocation43_spill] sm:$0xff] %v9607_v19 }
 0x187   :  { %3159 = vmatpush1.bf16.msra.mxu0 %v9598_v2  ;;  %v9616_v2 = vld [vmem:[#allocation10 + $0x318] ss:$36 sps:$4 sm:$0xff]  }
 0x188   :  { %3160 = vmatprep.subr.bf16.mxu0 %v9601_v3  ;;  %13168 = vst [vmem:[#allocation46_spill] sm:$0xff] %v9616_v2  ;;  %v9619_v3 = vld [vmem:[#allocation10 + $0x2d4] ss:$36 sps:$4 sm:$0xff]  }
 0x189   :  { %3134 = vmatpush2.bf16.msra.mxu1 %v9604_v16  ;;  %13169 = vst [vmem:[#allocation47_spill] sm:$0xff] %v9619_v3 }
 0x18a   :  { %3135 = vmatprep.subr.bf16.mxu1 %v9607_v19 }
 0x18b   :  { %3161 = vmatpush1.bf16.msra.mxu0 %v9610_v12  ;;  %v9628_v12 = vld [vmem:[#allocation10 + $0x2d0] ss:$36 sps:$4 sm:$0xff]  }
 0x18c   :  { %3162 = vmatprep.subr.bf16.mxu0 %v9613_v9  ;;  %13172 = vst [vmem:[#allocation50_spill] sm:$0xff] %v9628_v12  ;;  %v9631_v9 = vld [vmem:[#allocation10 + $0x28c] ss:$36 sps:$4 sm:$0xff]  }
 0x18d   :  { %3136 = vmatpush2.bf16.msra.mxu1 %v9616_v2  ;;  %13173 = vst [vmem:[#allocation51_spill] sm:$0xff] %v9631_v9 }
 0x18e   :  { %3137 = vmatprep.subr.bf16.mxu1 %v9619_v3  ;;  %v9655_v3 = vld [vmem:[#allocation10 + $0x684] ss:$36 sps:$4 sm:$0xff]  }
 0x18f   :  { %3163 = vmatpush1.bf16.msra.mxu0 %v9622_v15  ;;  %v9640_v15 = vld [vmem:[#allocation10 + $0x288] ss:$36 sps:$4 sm:$0xff]   ;;  %13181 = vst [vmem:[#allocation59_spill] sm:$0xff] %v9655_v3 }
 0x190   :  { %3164 = vmatprep.subr.bf16.mxu0 %v9625_v50  ;;  %13176 = vst [vmem:[#allocation54_spill] sm:$0xff] %v9640_v15  ;;  %v9643_v50 = vld [vmem:[#allocation10 + $0x244] ss:$36 sps:$4 sm:$0xff]  }
 0x191   :  { %3138 = vmatpush2.bf16.msra.mxu1 %v9628_v12  ;;  %13177 = vst [vmem:[#allocation55_spill] sm:$0xff] %v9643_v50  ;;  %v9646_v12 = vld [vmem:[#allocation10 + $0x480] ss:$36 sps:$4 sm:$0xff]  }
 0x192   :  { %3139 = vmatprep.subr.bf16.mxu1 %v9631_v9  ;;  %13178 = vst [vmem:[#allocation56_spill] sm:$0xff] %v9646_v12  ;;  %v9649_v9 = vld [vmem:[#allocation10 + $0x204] ss:$36 sps:$4 sm:$0xff]  }
 0x193   :  { %3165 = vmatpush1.bf16.msra.mxu0 %v9634_v37  ;;  %13179 = vst [vmem:[#allocation57_spill] sm:$0xff] %v9649_v9  ;;  %v9652_v37 = vld [vmem:[#allocation10 + $0x240] ss:$36 sps:$4 sm:$0xff]  }
 0x194   :  { %3166 = vmatprep.subr.bf16.mxu0 %v9637_v25  ;;  %13180 = vst [vmem:[#allocation58_spill] sm:$0xff] %v9652_v37 }
 0x195   :  { %3140 = vmatpush2.bf16.msra.mxu1 %v9640_v15 }
 0x196   :  { %3141 = vmatprep.subr.bf16.mxu1 %v9643_v50 }
 0x197   :  { %3167 = vmatpush1.bf16.msra.mxu0 %v9646_v12  ;;  %v3022_v12 = vunpack.c.l.bf16 %v9317_v6 }
 0x198   :  { %3193 = vmatprep.subr.bf16.mxu0 %v9649_v9  ;;  %v3052_v9 = vunpack.c.l.bf16 %v9386_v49 }
 0x199   :  { %3142 = vmatpush2.bf16.msra.mxu1 %v9652_v37 }
 0x19a   :  { %3234 = vmatprep.subr.bf16.mxu1 %v9655_v3 }
 0x19b   :  { %v2769_v25 = vpop.f32.mrf.mxu1 }
 0x19d   :  { %v2771_v15 = vpop.f32.mrf.mxu1 }
 0x19f   :  { %v2773_v58 = vpop.f32.mrf.mxu1 }
 0x1a0   :  { %v3054_v58 = vunpack.c.l.bf16 %v9377_v27 }
 0x1a1   :  { %v2774_v50 = vpop.f32.mrf.mxu1 }
 0x1ba   :  { %v2728_v2 = vpop.f32.mrf.mxu0 }
 0x1bb   :  { %v2770_v19 = vadd.f32 %v2769_v25, %v2728_v2 }
 0x1bc   :  { %v2730_v10 = vpop.f32.mrf.mxu0 }
 0x1bd   :  { %v3025_v16 = vadd.f32 %v3022_v12, %v2770_v19  ;;  %v2772_v62 = vadd.f32 %v2771_v15, %v2730_v10  ;;  %v6989_v12 = vmul.f32 -1.442695, %v9563_v33  ;;  %v6990_v10 = vmul.f32 -1.442695, %v9572_v1  ;;  %v1240_v1 = vld [vmem:[%s12646_s4] sm:$0x7] }
 0x1be   :  { %v2732_v61 = vpop.f32.mrf.mxu0 }
 0x1bf   :  { %v3055_v60 = vadd.f32 %v3052_v9, %v2772_v62  ;;  %7957 = vpow2.f32 %v6989_v12  ;;  %v9671_v12 = vrot.slane %v1240_v1, %v9289_v43  ;;  %v9737_v43 = vld [vmem:[#allocation10 + $0x48c] ss:$36 sps:$4 sm:$0xff]  }
 0x1c0   :  { %v2733_v37 = vpop.f32.mrf.mxu0  ;;  %7959 = vpow2.f32 %v6990_v10 }
 0x1c1   :  { %v6992_v27 = vmul.f32 -1.442695, %v3055_v60 }
 0x1c3   :  { %7961 = vpow2.f32 %v6992_v27 }
 0x1da   :  { %v2851_v36 = vpop.f32.mrf.mxu0 }
 0x1db   :  { %v2810_v13 = vpop.f32.mrf.mxu1 }
 0x1dc   :  { %v2853_v11 = vpop.f32.mrf.mxu0  ;;  %v2852_v9 = vadd.f32 %v2851_v36, %v2810_v13  ;;  %v6991_v36 = vmul.f32 -1.442695, %v3025_v16  ;;  %v9668_v13 = vrot.slane %v1240_v1, %v9281_v39 }
 0x1dd   :  { %v2812_v4 = vpop.f32.mrf.mxu1 }
 0x1de   :  { %v2854_v3 = vadd.f32 %v2853_v11, %v2812_v4  ;;  %v2855_v50 = vpop.f32.mrf.mxu0  ;;  %v3053_v11 = vunpack.c.h.bf16 %v9386_v49 }
 0x1df   :  { %v2814_v48 = vpop.f32.mrf.mxu1 }
 0x1e0   :  { %v3057_v25 = vadd.f32 %v3054_v58, %v2854_v3  ;;  %v2856_v2 = vpop.f32.mrf.mxu0  ;;  %v3056_v4 = vadd.f32 %v3053_v11, %v2852_v9  ;;  %v7958_v48 = vpop.eup %7957 }
 0x1e1   :  { %v2815_v6 = vpop.f32.mrf.mxu1  ;;  %v7960_v3 = vpop.eup %7959  ;;  %v3035_v58 = vadd.f32 1.0, %v7958_v48  ;;  %v3082_v48 = vunpack.c.l.bf16 %v9369_v18 }
 0x1e2   :  { %v6993_v62 = vmul.f32 -1.442695, %v3056_v4  ;;  %v3036_v33 = vadd.f32 1.0, %v7960_v3  ;;  %v7962_v50 = vpop.eup %7961 }
 0x1e3   :  { %v3067_v2 = vadd.f32 1.0, %v7962_v50 }
 0x1e4   :  { %7963 = vpow2.f32 %v6993_v62 }
 0x1e5   :  { %7965 = vrcp.f32 %v3035_v58 }
 0x1e6   :  { %7967 = vrcp.f32 %v3036_v33 }
 0x1e7   :  { %7969 = vpow2.f32 %v6991_v36  ;;  %v3083_v36 = vunpack.c.h.bf16 %v9369_v18 }
 0x1e8   :  { %7971 = vrcp.f32 %v3067_v2 }
 0x1f1   :  { %v7964_v49 = vpop.eup %7963 }
 0x1f2   :  { %v3068_v9 = vadd.f32 1.0, %v7964_v49  ;;  %v7966_v4 = vpop.eup %7965 }
 0x1f4   :  { %7973 = vrcp.f32 %v3068_v9 }
 0x1fb   :  { %v2933_v15 = vpop.f32.mrf.mxu1 }
 0x1fd   :  { %v2935_v61 = vpop.f32.mrf.mxu1 }
 0x1ff   :  { %v2937_v37 = vpop.f32.mrf.mxu1 }
 0x201   :  { %v2938_v19 = vpop.f32.mrf.mxu1 }
 0x21a   :  { %v2892_v60 = vpop.f32.mrf.mxu0 }
 0x21b   :  { %v2934_v6 = vadd.f32 %v2933_v15, %v2892_v60  ;;  %v7968_v15 = vpop.eup %7967 }
 0x21c   :  { %v2894_v10 = vpop.f32.mrf.mxu0  ;;  %v7107_v37 = vpop.f32.mrf.mxu1 }
 0x21d   :  { %v3076_v19 = vadd.f32 %v2934_v6, %v9668_v13  ;;  %v2936_v11 = vadd.f32 %v2935_v61, %v2894_v10  ;;  %v6994_v6 = vmul.f32 -1.442695, %v3057_v25  ;;  %v7970_v10 = vpop.eup %7969 }
 0x21e   :  { %v2896_v27 = vpop.f32.mrf.mxu0  ;;  %v7108_v16 = vpop.f32.mrf.mxu1 }
 0x21f   :  { %v3079_v62 = vmul.f32 %v7966_v4, %v3076_v19  ;;  %v3077_v3 = vadd.f32 %v2936_v11, %v9671_v12  ;;  %v7972_v2 = vpop.eup %7971  ;;  %v3037_v19 = vadd.f32 1.0, %v7970_v10 }
 0x220   :  { %v2897_v58 = vpop.f32.mrf.mxu0  ;;  %v7110_v33 = vpop.f32.mrf.mxu1  ;;  %v3091_v27 = vsub.f32 1.0, %v7972_v2  ;;  %v3097_v9 = vmul.f32 0.0, %v7972_v2  ;;  %v9694_v2 = vld [vmem:[#allocation10 + $0x680] ss:$36 sps:$4 sm:$0xff]  }
 0x221   :  { %v3085_v50 = vadd.f32 %v3082_v48, %v3079_v62  ;;  %v3080_v60 = vmul.f32 %v7968_v15, %v3077_v3  ;;  %v7974_v4 = vpop.eup %7973 }
 0x222   :  { %v7111_v49 = vpop.f32.mrf.mxu1  ;;  %v3092_v58 = vsub.f32 1.0, %v7974_v4  ;;  %v3098_v3 = vmul.f32 0.0, %v7974_v4  ;;  %v1264_v4 = vld [vmem:[#allocation3 + $0x20] sm:$0xf] }
 0x223   :  { %7975 = vtanh.f32 %v3085_v50  ;;  %v3086_v61 = vadd.f32 %v3083_v36, %v3080_v60  ;;  %v7109_v36 = vadd.f32 %v7108_v16, %v7107_v37  ;;  %v9691_v49 = vrot.slane %v1240_v1, %v9284_v40 }
 0x225   :  { %7977 = vtanh.f32 %v3086_v61 }
 0x226   :  { %7979 = vpow2.f32 %v6994_v6 }
 0x227   :  { %7981 = vrcp.f32 %v3037_v19  ;;  %v13182_v19 = vmov 0  }
 0x230   :  { %v7976_v11 = vpop.eup %7975 }
 0x231   :  { %v3094_v33 = vmul.f32 %v7976_v11, %v3091_v27  ;;  %v9698_v11 = vld [vmem:[#allocation10 + $0x63c] ss:$36 sps:$4 sm:$0xff]  }
 0x232   :  { %v7978_v62 = vpop.eup %7977 }
 0x233   :  { %v3095_v48 = vmul.f32 %v7978_v62, %v3092_v58  ;;  %v9677_v18 = vadd.f32 %v3097_v9, %v3094_v33  ;;  %v7980_v50 = vpop.eup %7979  ;;  %v3084_v33 = vunpack.c.l.bf16 %v1264_v4  ;;  %v9702_v9 = vld [vmem:[#allocation10 + $0x638] ss:$36 sps:$4 sm:$0xff]  }
 0x234   :  { %v3069_v6 = vadd.f32 1.0, %v7980_v50  ;;  %v7982_v37 = vpop.eup %7981  ;;  %v9708_v50 = vld [vmem:[#allocation10 + $0x5f0] ss:$36 sps:$4 sm:$0xff]  }
 0x235   :  { %v9679_v15 = vadd.f32 %v3098_v3, %v3095_v48  ;;  %v9687_v60 = vpack.c.bf16 %v9677_v18, %v9677_v18  ;;  %v9705_v48 = vld [vmem:[#allocation10 + $0x5f4] ss:$36 sps:$4 sm:$0xff]  }
 0x236   :  { %7983 = vrcp.f32 %v3069_v6  ;;  %v9717_v6 = vld [vmem:[#allocation10 + $0x564] ss:$36 sps:$4 sm:$0xff]  }
 0x237   :  { %v9683_v25 = vpack.c.bf16 %v9679_v15, %v9679_v15 }
 0x239   :  { %3143 = vmatprep.mubr.bf16.mxu1 %v9683_v25 }
 0x23a   :  { %v3014_v61 = vpop.f32.mrf.mxu0  ;;  %3144 = vmatmul.mubr.bf16.vlgmr.msra.gmra.mxu1 %v9687_v60 }
 0x23b   :  { %v3015_v10 = vadd.f32 %v7109_v36, %v3014_v61  ;;  %3235 = vmatpush1.bf16.msra.mxu1 %v9694_v2  ;;  %3266 = vmatprep.mubr.bf16.mxu1 %v13182_v19  ;;  %v9711_v36 = vld [vmem:[#allocation10 + $0x5ac] ss:$36 sps:$4 sm:$0xff]  }
 0x23c   :  { %v7381_v27 = vpop.f32.mrf.mxu0  ;;  %3236 = vmatprep.subr.bf16.mxu1 %v9698_v11  ;;  %v9714_v61 = vld [vmem:[#allocation10 + $0x5a8] ss:$36 sps:$4 sm:$0xff]  }
 0x23d   :  { %v3078_v1 = vadd.f32 %v3015_v10, %v9691_v49  ;;  %v9720_v10 = vld [vmem:[#allocation10 + $0x560] ss:$36 sps:$4 sm:$0xff]  }
 0x23e   :  { %v3017_v16 = vpop.f32.mrf.mxu0  ;;  %v9723_v27 = vld [vmem:[#allocation10 + $0x51c] ss:$36 sps:$4 sm:$0xff]  }
 0x23f   :  { %v3081_v58 = vmul.f32 %v7982_v37, %v3078_v1  ;;  %3237 = vmatpush1.bf16.msra.mxu1 %v9702_v9  ;;  %v9726_v1 = vld [vmem:[#allocation10 + $0x518] ss:$36 sps:$4 sm:$0xff]  }
 0x240   :  { %v7382_v62 = vpop.f32.mrf.mxu0  ;;  %3238 = vmatprep.subr.bf16.mxu1 %v9705_v48  ;;  %13183 = vst [vmem:[#allocation60_spill] sm:$0xff] %v9726_v1 }
 0x241   :  { %v3087_v3 = vadd.f32 %v3084_v33, %v3081_v58  ;;  %v9729_v58 = vld [vmem:[#allocation10 + $0x4d4] ss:$36 sps:$4 sm:$0xff]  }
 0x243   :  { %7985 = vtanh.f32 %v3087_v3  ;;  %3239 = vmatpush1.bf16.msra.mxu1 %v9708_v50  ;;  %v7984_v4 = vpop.eup %7983  ;;  %v9732_v3 = vld [vmem:[#allocation10 + $0x4d0] ss:$36 sps:$4 sm:$0xff]  }
 0x244   :  { %3240 = vmatprep.subr.bf16.mxu1 %v9711_v36  ;;  %v3093_v37 = vsub.f32 1.0, %v7984_v4  ;;  %v3099_v62 = vmul.f32 0.0, %v7984_v4  ;;  %v9748_v4 = vld [vmem:[#allocation10 + $0x200] ss:$36 sps:$4 sm:$0xff]  }
 0x245   :  { %13185 = vst [vmem:[#allocation62_spill] sm:$0xff] %v9748_v4 }
 0x247   :  { %3241 = vmatpush1.bf16.msra.mxu1 %v9714_v61 }
 0x248   :  { %3242 = vmatprep.subr.bf16.mxu1 %v9717_v6 }
 0x24b   :  { %3243 = vmatpush1.bf16.msra.mxu1 %v9720_v10 }
 0x24c   :  { %3244 = vmatprep.subr.bf16.mxu1 %v9723_v27 }
 0x24f   :  { %3245 = vmatpush1.bf16.msra.mxu1 %v9726_v1  ;;  %v9744_v1 = vld [vmem:[#allocation10 + $0x488] ss:$36 sps:$4 sm:$0xff]  }
 0x250   :  { %v7986_v16 = vpop.eup %7985  ;;  %3246 = vmatprep.subr.bf16.mxu1 %v9729_v58  ;;  %13184 = vst [vmem:[#allocation61_spill] sm:$0xff] %v9744_v1 }
 0x251   :  { %v3096_v33 = vmul.f32 %v7986_v16, %v3093_v37  ;;  %v9752_v37 = vld [vmem:[#allocation10 + $0x20c] ss:$36 sps:$4 sm:$0xff]   ;;  %v9755_v16 = vld [vmem:[#allocation10 + $0x1bc] ss:$36 sps:$4 sm:$0xff]  }
 0x252   :  { %13186 = vst [vmem:[#allocation63_spill] sm:$0xff] %v9752_v37  ;;  %13187 = vst [vmem:[#allocation64_spill] sm:$0xff] %v9755_v16 }
 0x253   :  { %3247 = vmatpush1.bf16.msra.mxu1 %v9732_v3  ;;  %v9735_v40 = vadd.f32 %v3099_v62, %v3096_v33  ;;  %v9759_v33 = vld [vmem:[#allocation10 + $0x208] ss:$36 sps:$4 sm:$0xff]   ;;  %v9763_v62 = vld [vmem:[#allocation10 + $0x1b8] ss:$36 sps:$4 sm:$0xff]  }
 0x254   :  { %3248 = vmatprep.subr.bf16.mxu1 %v9737_v43  ;;  %13188 = vst [vmem:[#allocation65_spill] sm:$0xff] %v9759_v33  ;;  %13189 = vst [vmem:[#allocation66_spill] sm:$0xff] %v9763_v62 }
 0x255   :  { %v9742_v39 = vpack.c.bf16 %v9735_v40, %v9735_v40 }
 0x257   :  { %3249 = vmatpush1.bf16.msra.mxu1 %v9744_v1  ;;  %3185 = vmatmul.mubr.bf16.vlgmr.msra.gmra.mxu0 %v9742_v39  ;;  %v9775_v1 = vld [vmem:[#allocation10 + $0x170] ss:$36 sps:$4 sm:$0xff]  }
 0x258   :  { %3194 = vmatpush1.bf16.msra.mxu0 %v9748_v4  ;;  %3225 = vmatprep.mubr.bf16.mxu0 %v9683_v25  ;;  %v9766_v4 = vld [vmem:[#allocation10 + $0x1c4] ss:$36 sps:$4 sm:$0xff]   ;;  %13193 = vst [vmem:[#allocation70_spill] sm:$0xff] %v9775_v1 }
 0x259   :  { %3275 = vmatprep.subr.bf16.mxu1 %v9752_v37  ;;  %3195 = vmatprep.subr.bf16.mxu0 %v9755_v16  ;;  %13190 = vst [vmem:[#allocation67_spill] sm:$0xff] %v9766_v4  ;;  %v9769_v37 = vld [vmem:[#allocation10 + $0x174] ss:$36 sps:$4 sm:$0xff]   ;;  %v9772_v16 = vld [vmem:[#allocation10 + $0x1c0] ss:$36 sps:$4 sm:$0xff]  }
 0x25a   :  { %3267 = vmatmul.mubr.bf16.vlgmr.msra.gmra.mxu1 %v9742_v39  ;;  %13191 = vst [vmem:[#allocation68_spill] sm:$0xff] %v9769_v37  ;;  %13192 = vst [vmem:[#allocation69_spill] sm:$0xff] %v9772_v16 }
 0x25b   :  { %3276 = vmatpush1.bf16.msra.mxu1 %v9759_v33  ;;  %3307 = vmatprep.mubr.bf16.mxu1 %v9683_v25  ;;  %v9778_v33 = vld [vmem:[#allocation10 + $0x17c] ss:$36 sps:$4 sm:$0xff]  }
 0x25c   :  { %3196 = vmatpush1.bf16.msra.mxu0 %v9763_v62  ;;  %3277 = vmatprep.subr.bf16.mxu1 %v9766_v4  ;;  %13194 = vst [vmem:[#allocation71_spill] sm:$0xff] %v9778_v33  ;;  %v9781_v62 = vld [vmem:[#allocation10 + $0x12c] ss:$36 sps:$4 sm:$0xff]   ;;  %v9784_v4 = vld [vmem:[#allocation10 + $0x178] ss:$36 sps:$4 sm:$0xff]  }
 0x25d   :  { %3197 = vmatprep.subr.bf16.mxu0 %v9769_v37  ;;  %13195 = vst [vmem:[#allocation72_spill] sm:$0xff] %v9781_v62  ;;  %13196 = vst [vmem:[#allocation73_spill] sm:$0xff] %v9784_v4  ;;  %v9787_v37 = vld [vmem:[#allocation10 + $0x128] ss:$36 sps:$4 sm:$0xff]  }
 0x25e   :  { %13197 = vst [vmem:[#allocation74_spill] sm:$0xff] %v9787_v37 }
 0x25f   :  { %3278 = vmatpush1.bf16.msra.mxu1 %v9772_v16  ;;  %v9790_v16 = vld [vmem:[#allocation10 + $0x134] ss:$36 sps:$4 sm:$0xff]  }
 0x260   :  { %3198 = vmatpush1.bf16.msra.mxu0 %v9775_v1  ;;  %3279 = vmatprep.subr.bf16.mxu1 %v9778_v33  ;;  %13198 = vst [vmem:[#allocation75_spill] sm:$0xff] %v9790_v16  ;;  %v9793_v1 = vld [vmem:[#allocation10 + $0xe4] ss:$36 sps:$4 sm:$0xff]   ;;  %v9796_v33 = vld [vmem:[#allocation10 + $0x130] ss:$36 sps:$4 sm:$0xff]  }
 0x261   :  { %3199 = vmatprep.subr.bf16.mxu0 %v9781_v62  ;;  %13199 = vst [vmem:[#allocation76_spill] sm:$0xff] %v9793_v1  ;;  %13200 = vst [vmem:[#allocation77_spill] sm:$0xff] %v9796_v33  ;;  %v9799_v62 = vld [vmem:[#allocation10 + $0xe0] ss:$36 sps:$4 sm:$0xff]  }
 0x262   :  { %13201 = vst [vmem:[#allocation78_spill] sm:$0xff] %v9799_v62 }
 0x263   :  { %3280 = vmatpush1.bf16.msra.mxu1 %v9784_v4  ;;  %v9802_v4 = vld [vmem:[#allocation10 + $0xec] ss:$36 sps:$4 sm:$0xff]  }
 0x264   :  { %3200 = vmatpush1.bf16.msra.mxu0 %v9787_v37  ;;  %3281 = vmatprep.subr.bf16.mxu1 %v9790_v16  ;;  %13202 = vst [vmem:[#allocation79_spill] sm:$0xff] %v9802_v4  ;;  %v9805_v37 = vld [vmem:[#allocation10 + $0x9c] ss:$36 sps:$4 sm:$0xff]   ;;  %v9808_v16 = vld [vmem:[#allocation10 + $0xe8] ss:$36 sps:$4 sm:$0xff]  }
 0x265   :  { %3201 = vmatprep.subr.bf16.mxu0 %v9793_v1  ;;  %13203 = vst [vmem:[#allocation80_spill] sm:$0xff] %v9805_v37  ;;  %13204 = vst [vmem:[#allocation81_spill] sm:$0xff] %v9808_v16  ;;  %v9811_v1 = vld [vmem:[#allocation10 + $0x98] ss:$36 sps:$4 sm:$0xff]  }
 0x266   :  { %13205 = vst [vmem:[#allocation82_spill] sm:$0xff] %v9811_v1 }
 0x267   :  { %3282 = vmatpush1.bf16.msra.mxu1 %v9796_v33  ;;  %v9814_v33 = vld [vmem:[#allocation10 + $0xa4] ss:$36 sps:$4 sm:$0xff]  }
 0x268   :  { %3202 = vmatpush1.bf16.msra.mxu0 %v9799_v62  ;;  %3283 = vmatprep.subr.bf16.mxu1 %v9802_v4  ;;  %13206 = vst [vmem:[#allocation83_spill] sm:$0xff] %v9814_v33  ;;  %v9817_v62 = vld [vmem:[#allocation10 + $0x54] ss:$36 sps:$4 sm:$0xff]   ;;  %v9820_v4 = vld [vmem:[#allocation10 + $0xa0] ss:$36 sps:$4 sm:$0xff]  }
 0x269   :  { %3203 = vmatprep.subr.bf16.mxu0 %v9805_v37  ;;  %13207 = vst [vmem:[#allocation84_spill] sm:$0xff] %v9817_v62  ;;  %13208 = vst [vmem:[#allocation85_spill] sm:$0xff] %v9820_v4  ;;  %v9823_v37 = vld [vmem:[#allocation10 + $0x50] ss:$36 sps:$4 sm:$0xff]  }
 0x26a   :  { %13209 = vst [vmem:[#allocation86_spill] sm:$0xff] %v9823_v37 }
 0x26b   :  { %3284 = vmatpush1.bf16.msra.mxu1 %v9808_v16  ;;  %v9826_v16 = vld [vmem:[#allocation10 + $0x5c] ss:$36 sps:$4 sm:$0xff]  }
 0x26c   :  { %3204 = vmatpush1.bf16.msra.mxu0 %v9811_v1  ;;  %3285 = vmatprep.subr.bf16.mxu1 %v9814_v33  ;;  %13210 = vst [vmem:[#allocation87_spill] sm:$0xff] %v9826_v16  ;;  %v9829_v1 = vld [vmem:[#allocation10 + $0xc] ss:$36 sps:$4 sm:$0xff]   ;;  %v9832_v33 = vld [vmem:[#allocation10 + $0x58] ss:$36 sps:$4 sm:$0xff]  }
 0x26d   :  { %3205 = vmatprep.subr.bf16.mxu0 %v9817_v62  ;;  %13211 = vst [vmem:[#allocation88_spill] sm:$0xff] %v9829_v1  ;;  %13212 = vst [vmem:[#allocation89_spill] sm:$0xff] %v9832_v33  ;;  %v9835_v62 = vld [vmem:[#allocation10 + $0x8] ss:$36 sps:$4 sm:$0xff]  }
 0x26e   :  { %13213 = vst [vmem:[#allocation90_spill] sm:$0xff] %v9835_v62 }
 0x26f   :  { %3286 = vmatpush1.bf16.msra.mxu1 %v9820_v4  ;;  %v9838_v4 = vld [vmem:[#allocation10 + $0x14] ss:$36 sps:$4 sm:$0xff]  }
 0x270   :  { %3206 = vmatpush1.bf16.msra.mxu0 %v9823_v37  ;;  %3287 = vmatprep.subr.bf16.mxu1 %v9826_v16  ;;  %13214 = vst [vmem:[#allocation91_spill] sm:$0xff] %v9838_v4  ;;  %v9841_v37 = vld [vmem:[#allocation10 + $0x444] ss:$36 sps:$4 sm:$0xff]   ;;  %v9844_v16 = vld [vmem:[#allocation10 + $0x10] ss:$36 sps:$4 sm:$0xff]  }
 0x271   :  { %3207 = vmatprep.subr.bf16.mxu0 %v9829_v1  ;;  %13215 = vst [vmem:[#allocation92_spill] sm:$0xff] %v9841_v37  ;;  %13216 = vst [vmem:[#allocation93_spill] sm:$0xff] %v9844_v16  ;;  %v9847_v1 = vld [vmem:[#allocation10 + $0x440] ss:$36 sps:$4 sm:$0xff]  }
 0x272   :  { %13217 = vst [vmem:[#allocation94_spill] sm:$0xff] %v9847_v1 }
 0x273   :  { %3288 = vmatpush1.bf16.msra.mxu1 %v9832_v33  ;;  %v9850_v33 = vld [vmem:[#allocation10 + $0x44c] ss:$36 sps:$4 sm:$0xff]  }
 0x274   :  { %3208 = vmatpush1.bf16.msra.mxu0 %v9835_v62  ;;  %3289 = vmatprep.subr.bf16.mxu1 %v9838_v4  ;;  %13218 = vst [vmem:[#allocation95_spill] sm:$0xff] %v9850_v33  ;;  %v9853_v62 = vld [vmem:[#allocation10 + $0x3fc] ss:$36 sps:$4 sm:$0xff]   ;;  %v9856_v4 = vld [vmem:[#allocation10 + $0x448] ss:$36 sps:$4 sm:$0xff]  }
 0x275   :  { %3209 = vmatprep.subr.bf16.mxu0 %v9841_v37  ;;  %13219 = vst [vmem:[#allocation96_spill] sm:$0xff] %v9853_v62  ;;  %13220 = vst [vmem:[#allocation97_spill] sm:$0xff] %v9856_v4  ;;  %v9859_v37 = vld [vmem:[#allocation10 + $0x3f8] ss:$36 sps:$4 sm:$0xff]  }
 0x276   :  { %13221 = vst [vmem:[#allocation98_spill] sm:$0xff] %v9859_v37 }
 0x277   :  { %3290 = vmatpush1.bf16.msra.mxu1 %v9844_v16  ;;  %v9862_v16 = vld [vmem:[#allocation10 + $0x404] ss:$36 sps:$4 sm:$0xff]  }
 0x278   :  { %3210 = vmatpush2.bf16.msra.mxu0 %v9847_v1  ;;  %3291 = vmatprep.subr.bf16.mxu1 %v9850_v33  ;;  %13222 = vst [vmem:[#allocation99_spill] sm:$0xff] %v9862_v16  ;;  %v9865_v1 = vld [vmem:[#allocation10 + $0x3b4] ss:$36 sps:$4 sm:$0xff]   ;;  %v9868_v33 = vld [vmem:[#allocation10 + $0x400] ss:$36 sps:$4 sm:$0xff]  }
 0x279   :  { %3211 = vmatprep.subr.bf16.mxu0 %v9853_v62  ;;  %13223 = vst [vmem:[#allocation100_spill] sm:$0xff] %v9865_v1  ;;  %13224 = vst [vmem:[#allocation101_spill] sm:$0xff] %v9868_v33  ;;  %v9871_v62 = vld [vmem:[#allocation10 + $0x3b0] ss:$36 sps:$4 sm:$0xff]  }
 0x27a   :  { %13225 = vst [vmem:[#allocation102_spill] sm:$0xff] %v9871_v62 }
 0x27b   :  { %3292 = vmatpush2.bf16.msra.mxu1 %v9856_v4  ;;  %v9874_v4 = vld [vmem:[#allocation10 + $0x3bc] ss:$36 sps:$4 sm:$0xff]  }
 0x27c   :  { %3212 = vmatpush2.bf16.msra.mxu0 %v9859_v37  ;;  %3293 = vmatprep.subr.bf16.mxu1 %v9862_v16  ;;  %13226 = vst [vmem:[#allocation103_spill] sm:$0xff] %v9874_v4  ;;  %v9877_v37 = vld [vmem:[#allocation10 + $0x36c] ss:$36 sps:$4 sm:$0xff]   ;;  %v9880_v16 = vld [vmem:[#allocation10 + $0x3b8] ss:$36 sps:$4 sm:$0xff]  }
 0x27d   :  { %3213 = vmatprep.subr.bf16.mxu0 %v9865_v1  ;;  %13227 = vst [vmem:[#allocation104_spill] sm:$0xff] %v9877_v37  ;;  %13228 = vst [vmem:[#allocation105_spill] sm:$0xff] %v9880_v16  ;;  %v9883_v1 = vld [vmem:[#allocation10 + $0x368] ss:$36 sps:$4 sm:$0xff]  }
 0x27e   :  { %13229 = vst [vmem:[#allocation106_spill] sm:$0xff] %v9883_v1 }
 0x27f   :  { %3294 = vmatpush2.bf16.msra.mxu1 %v9868_v33  ;;  %v9886_v33 = vld [vmem:[#allocation10 + $0x374] ss:$36 sps:$4 sm:$0xff]  }
 0x280   :  { %3214 = vmatpush2.bf16.msra.mxu0 %v9871_v62  ;;  %3295 = vmatprep.subr.bf16.mxu1 %v9874_v4  ;;  %13230 = vst [vmem:[#allocation107_spill] sm:$0xff] %v9886_v33  ;;  %v9889_v62 = vld [vmem:[#allocation10 + $0x324] ss:$36 sps:$4 sm:$0xff]   ;;  %v9892_v4 = vld [vmem:[#allocation10 + $0x370] ss:$36 sps:$4 sm:$0xff]  }
 0x281   :  { %3215 = vmatprep.subr.bf16.mxu0 %v9877_v37  ;;  %13231 = vst [vmem:[#allocation108_spill] sm:$0xff] %v9889_v62  ;;  %13232 = vst [vmem:[#allocation109_spill] sm:$0xff] %v9892_v4  ;;  %v9895_v37 = vld [vmem:[#allocation10 + $0x320] ss:$36 sps:$4 sm:$0xff]  }
 0x282   :  { %13233 = vst [vmem:[#allocation110_spill] sm:$0xff] %v9895_v37 }
 0x283   :  { %3296 = vmatpush2.bf16.msra.mxu1 %v9880_v16  ;;  %v9898_v16 = vld [vmem:[#allocation10 + $0x32c] ss:$36 sps:$4 sm:$0xff]  }
 0x284   :  { %3216 = vmatpush2.bf16.msra.mxu0 %v9883_v1  ;;  %3297 = vmatprep.subr.bf16.mxu1 %v9886_v33  ;;  %13234 = vst [vmem:[#allocation111_spill] sm:$0xff] %v9898_v16  ;;  %v9901_v1 = vld [vmem:[#allocation10 + $0x2dc] ss:$36 sps:$4 sm:$0xff]   ;;  %v9904_v33 = vld [vmem:[#allocation10 + $0x328] ss:$36 sps:$4 sm:$0xff]  }
 0x285   :  { %3217 = vmatprep.subr.bf16.mxu0 %v9889_v62  ;;  %13235 = vst [vmem:[#allocation112_spill] sm:$0xff] %v9901_v1  ;;  %13236 = vst [vmem:[#allocation113_spill] sm:$0xff] %v9904_v33  ;;  %v9907_v62 = vld [vmem:[#allocation10 + $0x2d8] ss:$36 sps:$4 sm:$0xff]  }
 0x286   :  { %13237 = vst [vmem:[#allocation114_spill] sm:$0xff] %v9907_v62 }
 0x287   :  { %3298 = vmatpush2.bf16.msra.mxu1 %v9892_v4  ;;  %v9910_v4 = vld [vmem:[#allocation10 + $0x2e4] ss:$36 sps:$4 sm:$0xff]  }
 0x288   :  { %3218 = vmatpush2.bf16.msra.mxu0 %v9895_v37  ;;  %3299 = vmatprep.subr.bf16.mxu1 %v9898_v16  ;;  %13238 = vst [vmem:[#allocation115_spill] sm:$0xff] %v9910_v4  ;;  %v9913_v37 = vld [vmem:[#allocation10 + $0x294] ss:$36 sps:$4 sm:$0xff]   ;;  %v9916_v16 = vld [vmem:[#allocation10 + $0x2e0] ss:$36 sps:$4 sm:$0xff]  }
 0x289   :  { %3219 = vmatprep.subr.bf16.mxu0 %v9901_v1  ;;  %13239 = vst [vmem:[#allocation116_spill] sm:$0xff] %v9913_v37  ;;  %13240 = vst [vmem:[#allocation117_spill] sm:$0xff] %v9916_v16  ;;  %v9919_v1 = vld [vmem:[#allocation10 + $0x290] ss:$36 sps:$4 sm:$0xff]  }
 0x28a   :  { %13241 = vst [vmem:[#allocation118_spill] sm:$0xff] %v9919_v1 }
 0x28b   :  { %3300 = vmatpush2.bf16.msra.mxu1 %v9904_v33  ;;  %v9922_v33 = vld [vmem:[#allocation10 + $0x29c] ss:$36 sps:$4 sm:$0xff]  }
 0x28c   :  { %3220 = vmatpush2.bf16.msra.mxu0 %v9907_v62  ;;  %3301 = vmatprep.subr.bf16.mxu1 %v9910_v4  ;;  %13242 = vst [vmem:[#allocation119_spill] sm:$0xff] %v9922_v33  ;;  %v9925_v62 = vld [vmem:[#allocation10 + $0x24c] ss:$36 sps:$4 sm:$0xff]   ;;  %v9928_v4 = vld [vmem:[#allocation10 + $0x298] ss:$36 sps:$4 sm:$0xff]  }
 0x28d   :  { %3221 = vmatprep.subr.bf16.mxu0 %v9913_v37  ;;  %13243 = vst [vmem:[#allocation120_spill] sm:$0xff] %v9925_v62  ;;  %13244 = vst [vmem:[#allocation121_spill] sm:$0xff] %v9928_v4  ;;  %v9931_v37 = vld [vmem:[#allocation10 + $0x248] ss:$36 sps:$4 sm:$0xff]  }
 0x28e   :  { %13245 = vst [vmem:[#allocation122_spill] sm:$0xff] %v9931_v37 }
 0x28f   :  { %3302 = vmatpush2.bf16.msra.mxu1 %v9916_v16  ;;  %v9934_v16 = vld [vmem:[#allocation10 + $0x254] ss:$36 sps:$4 sm:$0xff]  }
 0x290   :  { %3222 = vmatpush2.bf16.msra.mxu0 %v9919_v1  ;;  %3303 = vmatprep.subr.bf16.mxu1 %v9922_v33  ;;  %13246 = vst [vmem:[#allocation123_spill] sm:$0xff] %v9934_v16  ;;  %v9937_v1 = vld [vmem:[#allocation10 + $0x68c] ss:$36 sps:$4 sm:$0xff]  }
 0x291   :  { %3223 = vmatprep.subr.bf16.mxu0 %v9925_v62  ;;  %13247 = vst [vmem:[#allocation124_spill] sm:$0xff] %v9937_v1  ;;  %v9941_v33 = vld [vmem:[#allocation10 + $0x250] ss:$36 sps:$4 sm:$0xff]   ;;  %v9944_v62 = vld [vmem:[#allocation10 + $0x688] ss:$36 sps:$4 sm:$0xff]  }
 0x292   :  { %13248 = vst [vmem:[#allocation125_spill] sm:$0xff] %v9941_v33  ;;  %13249 = vst [vmem:[#allocation126_spill] sm:$0xff] %v9944_v62 }
 0x293   :  { %3304 = vmatpush2.bf16.msra.mxu1 %v9928_v4  ;;  %v9947_v4 = vld [vmem:[#allocation10 + $0x694] ss:$36 sps:$4 sm:$0xff]  }
 0x294   :  { %3224 = vmatpush2.bf16.msra.mxu0 %v9931_v37  ;;  %3305 = vmatprep.subr.bf16.mxu1 %v9934_v16  ;;  %13250 = vst [vmem:[#allocation127_spill] sm:$0xff] %v9947_v4  ;;  %v9950_v37 = vld [vmem:[#allocation10 + $0x644] ss:$36 sps:$4 sm:$0xff]   ;;  %v9971_v16 = vld [vmem:[#allocation10 + $0x5f8] ss:$36 sps:$4 sm:$0xff]  }
 0x295   :  { %3316 = vmatprep.subr.bf16.mxu0 %v9937_v1  ;;  %13251 = vst [vmem:[#allocation128_spill] sm:$0xff] %v9950_v37  ;;  %v9955_v1 = vld [vmem:[#allocation10 + $0x690] ss:$36 sps:$4 sm:$0xff]   ;;  %13257 = vst [vmem:[#allocation134_spill] sm:$0xff] %v9971_v16 }
 0x296   :  { %13252 = vst [vmem:[#allocation129_spill] sm:$0xff] %v9955_v1 }
 0x297   :  { %3226 = vmatmul.mubr.bf16.vlgmr.msra.gmra.mxu0 %v9687_v60  ;;  %3306 = vmatpush2.bf16.msra.mxu1 %v9941_v33  ;;  %v9959_v33 = vld [vmem:[#allocation10 + $0x640] ss:$36 sps:$4 sm:$0xff]  }
 0x298   :  { %3317 = vmatpush1.bf16.msra.mxu0 %v9944_v62  ;;  %3398 = vmatprep.subr.bf16.mxu1 %v9947_v4  ;;  %13253 = vst [vmem:[#allocation130_spill] sm:$0xff] %v9959_v33  ;;  %v9962_v62 = vld [vmem:[#allocation10 + $0x64c] ss:$36 sps:$4 sm:$0xff]   ;;  %v9965_v4 = vld [vmem:[#allocation10 + $0x5fc] ss:$36 sps:$4 sm:$0xff]  }
 0x299   :  { %3318 = vmatprep.subr.bf16.mxu0 %v9950_v37  ;;  %3348 = vmatprep.mubr.bf16.mxu0 %v13182_v19  ;;  %13254 = vst [vmem:[#allocation131_spill] sm:$0xff] %v9962_v62  ;;  %13255 = vst [vmem:[#allocation132_spill] sm:$0xff] %v9965_v4  ;;  %v9968_v37 = vld [vmem:[#allocation10 + $0x648] ss:$36 sps:$4 sm:$0xff]  }
 0x29a   :  { %3308 = vmatmul.mubr.bf16.vlgmr.msra.gmra.mxu1 %v9687_v60  ;;  %13256 = vst [vmem:[#allocation133_spill] sm:$0xff] %v9968_v37 }
 0x29b   :  { %3399 = vmatpush1.bf16.msra.mxu1 %v9955_v1  ;;  %3430 = vmatprep.mubr.bf16.mxu1 %v13182_v19  ;;  %v9974_v1 = vld [vmem:[#allocation10 + $0x604] ss:$36 sps:$4 sm:$0xff]  }
 0x29c   :  { %3319 = vmatpush1.bf16.msra.mxu0 %v9959_v33  ;;  %3400 = vmatprep.subr.bf16.mxu1 %v9962_v62  ;;  %13258 = vst [vmem:[#allocation135_spill] sm:$0xff] %v9974_v1  ;;  %v9977_v33 = vld [vmem:[#allocation10 + $0x5b4] ss:$36 sps:$4 sm:$0xff]   ;;  %v9980_v62 = vld [vmem:[#allocation10 + $0x600] ss:$36 sps:$4 sm:$0xff]  }
 0x29d   :  { %3320 = vmatprep.subr.bf16.mxu0 %v9965_v4  ;;  %13259 = vst [vmem:[#allocation136_spill] sm:$0xff] %v9977_v33  ;;  %13260 = vst [vmem:[#allocation137_spill] sm:$0xff] %v9980_v62  ;;  %v9983_v4 = vld [vmem:[#allocation10 + $0x5b0] ss:$36 sps:$4 sm:$0xff]  }
 0x29e   :  { %13261 = vst [vmem:[#allocation138_spill] sm:$0xff] %v9983_v4 }
 0x29f   :  { %3401 = vmatpush1.bf16.msra.mxu1 %v9968_v37  ;;  %v9986_v37 = vld [vmem:[#allocation10 + $0x5bc] ss:$36 sps:$4 sm:$0xff]  }
 0x2a0   :  { %3321 = vmatpush1.bf16.msra.mxu0 %v9971_v16  ;;  %3402 = vmatprep.subr.bf16.mxu1 %v9974_v1  ;;  %13262 = vst [vmem:[#allocation139_spill] sm:$0xff] %v9986_v37  ;;  %v9989_v16 = vld [vmem:[#allocation10 + $0x56c] ss:$36 sps:$4 sm:$0xff]   ;;  %v9992_v1 = vld [vmem:[#allocation10 + $0x5b8] ss:$36 sps:$4 sm:$0xff]  }
 0x2a1   :  { %3322 = vmatprep.subr.bf16.mxu0 %v9977_v33  ;;  %13263 = vst [vmem:[#allocation140_spill] sm:$0xff] %v9989_v16  ;;  %13264 = vst [vmem:[#allocation141_spill] sm:$0xff] %v9992_v1  ;;  %v9995_v33 = vld [vmem:[#allocation10 + $0x568] ss:$36 sps:$4 sm:$0xff]  }
 0x2a2   :  { %13265 = vst [vmem:[#allocation142_spill] sm:$0xff] %v9995_v33 }
 0x2a3   :  { %3403 = vmatpush1.bf16.msra.mxu1 %v9980_v62  ;;  %v9998_v62 = vld [vmem:[#allocation10 + $0x574] ss:$36 sps:$4 sm:$0xff]  }
 0x2a4   :  { %3323 = vmatpush1.bf16.msra.mxu0 %v9983_v4  ;;  %3404 = vmatprep.subr.bf16.mxu1 %v9986_v37  ;;  %13266 = vst [vmem:[#allocation143_spill] sm:$0xff] %v9998_v62  ;;  %v10001_v4 = vld [vmem:[#allocation10 + $0x524] ss:$36 sps:$4 sm:$0xff]   ;;  %v10004_v37 = vld [vmem:[#allocation10 + $0x570] ss:$36 sps:$4 sm:$0xff]  }
 0x2a5   :  { %3324 = vmatprep.subr.bf16.mxu0 %v9989_v16  ;;  %13267 = vst [vmem:[#allocation144_spill] sm:$0xff] %v10001_v4  ;;  %13268 = vst [vmem:[#allocation145_spill] sm:$0xff] %v10004_v37  ;;  %v10007_v16 = vld [vmem:[#allocation10 + $0x520] ss:$36 sps:$4 sm:$0xff]  }
 0x2a6   :  { %13269 = vst [vmem:[#allocation146_spill] sm:$0xff] %v10007_v16 }
 0x2a7   :  { %3405 = vmatpush1.bf16.msra.mxu1 %v9992_v1  ;;  %v10010_v1 = vld [vmem:[#allocation10 + $0x52c] ss:$36 sps:$4 sm:$0xff]  }
 0x2a8   :  { %3325 = vmatpush1.bf16.msra.mxu0 %v9995_v33  ;;  %3406 = vmatprep.subr.bf16.mxu1 %v9998_v62  ;;  %13270 = vst [vmem:[#allocation147_spill] sm:$0xff] %v10010_v1  ;;  %v10013_v33 = vld [vmem:[#allocation10 + $0x4dc] ss:$36 sps:$4 sm:$0xff]   ;;  %v10016_v62 = vld [vmem:[#allocation10 + $0x528] ss:$36 sps:$4 sm:$0xff]  }
 0x2a9   :  { %3326 = vmatprep.subr.bf16.mxu0 %v10001_v4  ;;  %13271 = vst [vmem:[#allocation148_spill] sm:$0xff] %v10013_v33  ;;  %13272 = vst [vmem:[#allocation149_spill] sm:$0xff] %v10016_v62  ;;  %v10019_v4 = vld [vmem:[#allocation10 + $0x4d8] ss:$36 sps:$4 sm:$0xff]  }
 0x2aa   :  { %13273 = vst [vmem:[#allocation150_spill] sm:$0xff] %v10019_v4 }
 0x2ab   :  { %3407 = vmatpush1.bf16.msra.mxu1 %v10004_v37  ;;  %v10022_v37 = vld [vmem:[#allocation10 + $0x4e4] ss:$36 sps:$4 sm:$0xff]  }
 0x2ac   :  { %3327 = vmatpush1.bf16.msra.mxu0 %v10007_v16  ;;  %3408 = vmatprep.subr.bf16.mxu1 %v10010_v1  ;;  %13274 = vst [vmem:[#allocation151_spill] sm:$0xff] %v10022_v37  ;;  %v10025_v16 = vld [vmem:[#allocation10 + $0x494] ss:$36 sps:$4 sm:$0xff]   ;;  %v10028_v1 = vld [vmem:[#allocation10 + $0x4e0] ss:$36 sps:$4 sm:$0xff]  }
 0x2ad   :  { %3328 = vmatprep.subr.bf16.mxu0 %v10013_v33  ;;  %13275 = vst [vmem:[#allocation152_spill] sm:$0xff] %v10025_v16  ;;  %13276 = vst [vmem:[#allocation153_spill] sm:$0xff] %v10028_v1  ;;  %v10031_v33 = vld [vmem:[#allocation10 + $0x490] ss:$36 sps:$4 sm:$0xff]  }
 0x2ae   :  { %13277 = vst [vmem:[#allocation154_spill] sm:$0xff] %v10031_v33 }
 0x2af   :  { %3409 = vmatpush1.bf16.msra.mxu1 %v10016_v62  ;;  %v10034_v62 = vld [vmem:[#allocation10 + $0x49c] ss:$36 sps:$4 sm:$0xff]  }
 0x2b0   :  { %3329 = vmatpush1.bf16.msra.mxu0 %v10019_v4  ;;  %3410 = vmatprep.subr.bf16.mxu1 %v10022_v37  ;;  %13278 = vst [vmem:[#allocation155_spill] sm:$0xff] %v10034_v62  ;;  %v10037_v4 = vld [vmem:[#allocation10 + $0x214] ss:$36 sps:$4 sm:$0xff]  }
 0x2b1   :  { %3330 = vmatprep.subr.bf16.mxu0 %v10025_v16  ;;  %13279 = vst [vmem:[#allocation156_spill] sm:$0xff] %v10037_v4  ;;  %v10041_v37 = vld [vmem:[#allocation10 + $0x498] ss:$36 sps:$4 sm:$0xff]   ;;  %v10044_v16 = vld [vmem:[#allocation10 + $0x210] ss:$36 sps:$4 sm:$0xff]  }
 0x2b2   :  { %13280 = vst [vmem:[#allocation157_spill] sm:$0xff] %v10041_v37  ;;  %13281 = vst [vmem:[#allocation158_spill] sm:$0xff] %v10044_v16 }
 0x2b3   :  { %3411 = vmatpush1.bf16.msra.mxu1 %v10028_v1  ;;  %v10071_v1 = vld [vmem:[#allocation10 + $0x180] ss:$36 sps:$4 sm:$0xff]  }
 0x2b4   :  { %3331 = vmatpush1.bf16.msra.mxu0 %v10031_v33  ;;  %3412 = vmatprep.subr.bf16.mxu1 %v10034_v62  ;;  %v10048_v33 = vld [vmem:[#allocation10 + $0x458] ss:$36 sps:$4 sm:$0xff]   ;;  %v10051_v62 = vld [vmem:[#allocation10 + $0x1cc] ss:$36 sps:$4 sm:$0xff]   ;;  %13287 = vst [vmem:[#allocation164_spill] sm:$0xff] %v10071_v1 }
 0x2b5   :  { %3357 = vmatprep.subr.bf16.mxu0 %v10037_v4  ;;  %13282 = vst [vmem:[#allocation159_spill] sm:$0xff] %v10048_v33  ;;  %13283 = vst [vmem:[#allocation160_spill] sm:$0xff] %v10051_v62  ;;  %v10055_v4 = vld [vmem:[#allocation10 + $0x218] ss:$36 sps:$4 sm:$0xff]  }
 0x2b7   :  { %3349 = vmatmul.mubr.bf16.vlgmr.msra.gmra.mxu0 %v9742_v39  ;;  %3413 = vmatpush1.bf16.msra.mxu1 %v10041_v37  ;;  %v10059_v37 = vld [vmem:[#allocation10 + $0x1c8] ss:$36 sps:$4 sm:$0xff]  }
 0x2b8   :  { %3358 = vmatpush1.bf16.msra.mxu0 %v10044_v16  ;;  %3389 = vmatprep.mubr.bf16.mxu0 %v9683_v25  ;;  %13284 = vst [vmem:[#allocation161_spill] sm:$0xff] %v10059_v37  ;;  %v10062_v16 = vld [vmem:[#allocation10 + $0x410] ss:$36 sps:$4 sm:$0xff]  }
 0x2b9   :  { %7122 = vmatprep.subr.bf16.mxu1 %v10048_v33  ;;  %3359 = vmatprep.subr.bf16.mxu0 %v10051_v62  ;;  %13285 = vst [vmem:[#allocation162_spill] sm:$0xff] %v10062_v16  ;;  %v10065_v33 = vld [vmem:[#allocation10 + $0x184] ss:$36 sps:$4 sm:$0xff]   ;;  %v10068_v62 = vld [vmem:[#allocation10 + $0x1d0] ss:$36 sps:$4 sm:$0xff]  }
 0x2ba   :  { %3431 = vmatmul.mubr.bf16.vlgmr.msra.gmra.mxu1 %v9742_v39  ;;  %13286 = vst [vmem:[#allocation163_spill] sm:$0xff] %v10068_v62 }
 0x2bb   :  { %7123 = vmatpush3.bf16.msra.mxu1 %v10055_v4  ;;  %3471 = vmatprep.mubr.bf16.mxu1 %v9683_v25  ;;  %v10074_v25 = vld [vmem:[#allocation10 + $0x3c8] ss:$36 sps:$4 sm:$0xff]  }
 0x2bc   :  { %3360 = vmatpush1.bf16.msra.mxu0 %v10059_v37  ;;  %7124 = vmatprep.subr.bf16.mxu1 %v10062_v16  ;;  %v10077_v37 = vld [vmem:[#allocation10 + $0x13c] ss:$36 sps:$4 sm:$0xff]  }
 0x2bd   :  { %3361 = vmatprep.subr.bf16.mxu0 %v10065_v33  ;;  %13288 = vst [vmem:[#allocation165_spill] sm:$0xff] %v10077_v37  ;;  %v10081_v16 = vld [vmem:[#allocation10 + $0x138] ss:$36 sps:$4 sm:$0xff]  }
 0x2bf   :  { %7125 = vmatpush3.bf16.msra.mxu1 %v10068_v62  ;;  %v10085_v62 = vld [vmem:[#allocation10 + $0xf4] ss:$36 sps:$4 sm:$0xff]  }
 0x2c0   :  { %3362 = vmatpush1.bf16.msra.mxu0 %v10071_v1  ;;  %7126 = vmatprep.subr.bf16.mxu1 %v10074_v25  ;;  %v10089_v1 = vld [vmem:[#allocation10 + $0xf0] ss:$36 sps:$4 sm:$0xff]  }
 0x2c1   :  { %3363 = vmatprep.subr.bf16.mxu0 %v10077_v37  ;;  %v10093_v37 = vld [vmem:[#allocation10 + $0xac] ss:$36 sps:$4 sm:$0xff]  }
 0x2c3   :  { %7127 = vmatpush3.bf16.msra.mxu1 %v9375_v26  ;;  %v10097_v26 = vld [vmem:[#allocation10 + $0xa8] ss:$36 sps:$4 sm:$0xff]  }
 0x2c4   :  { %3364 = vmatpush1.bf16.msra.mxu0 %v10081_v16  ;;  %7128 = vmatprep.subr.bf16.mxu1 %v9379_v29  ;;  %v10101_v29 = vld [vmem:[#allocation10 + $0x64] ss:$36 sps:$4 sm:$0xff]  }
 0x2c5   :  { %3365 = vmatprep.subr.bf16.mxu0 %v10085_v62 }
 0x2c7   :  { %7129 = vmatpush3.bf16.msra.mxu1 %v9390_v53  ;;  %v10105_v53 = vld [vmem:[#allocation10 + $0x60] ss:$36 sps:$4 sm:$0xff]  }
 0x2c8   :  { %3366 = vmatpush1.bf16.msra.mxu0 %v10089_v1  ;;  %7130 = vmatprep.subr.bf16.mxu1 %v9394_v57  ;;  %v10109_v57 = vld [vmem:[#allocation10 + $0x1c] ss:$36 sps:$4 sm:$0xff]  }
 0x2c9   :  { %3367 = vmatprep.subr.bf16.mxu0 %v10093_v37 }
 0x2cb   :  { %7131 = vmatpush3.bf16.msra.mxu1 %v9400_v7  ;;  %v10113_v7 = vld [vmem:[#allocation10 + $0x18] ss:$36 sps:$4 sm:$0xff]  }
 0x2cc   :  { %3368 = vmatpush1.bf16.msra.mxu0 %v10097_v26  ;;  %7132 = vmatprep.subr.bf16.mxu1 %v9404_v46  ;;  %v10117_v46 = vld [vmem:[#allocation10 + $0x454] ss:$36 sps:$4 sm:$0xff]  }
 0x2cd   :  { %3369 = vmatprep.subr.bf16.mxu0 %v10101_v29 }
 0x2cf   :  { %7133 = vmatpush3.bf16.msra.mxu1 %v9414_v17  ;;  %v10121_v17 = vld [vmem:[#allocation10 + $0x450] ss:$36 sps:$4 sm:$0xff]  }
 0x2d0   :  { %3370 = vmatpush1.bf16.msra.mxu0 %v10105_v53  ;;  %7134 = vmatprep.subr.bf16.mxu1 %v9418_v21  ;;  %v10125_v21 = vld [vmem:[#allocation10 + $0x40c] ss:$36 sps:$4 sm:$0xff]  }
 0x2d1   :  { %3371 = vmatprep.subr.bf16.mxu0 %v10109_v57 }
 0x2d3   :  { %7135 = vmatpush3.bf16.msra.mxu1 %v9430_v38  ;;  %v10130_v38 = vld [vmem:[#allocation10 + $0x408] ss:$36 sps:$4 sm:$0xff]  }
 0x2d4   :  { %3372 = vmatpush1.bf16.msra.mxu0 %v10113_v7  ;;  %7136 = vmatprep.subr.bf16.mxu1 %v9434_v44  ;;  %13289 = vst [vmem:[#allocation166_spill] sm:$0xff] %v10130_v38  ;;  %v10134_v44 = vld [vmem:[#allocation10 + $0x3c4] ss:$36 sps:$4 sm:$0xff]  }
 0x2d5   :  { %3373 = vmatprep.subr.bf16.mxu0 %v10117_v46  ;;  %13290 = vst [vmem:[#allocation167_spill] sm:$0xff] %v10134_v44 }
 0x2d7   :  { %7137 = vmatpush3.bf16.msra.mxu1 %v9444_v45  ;;  %v10138_v45 = vld [vmem:[#allocation10 + $0x3c0] ss:$36 sps:$4 sm:$0xff]  }
 0x2d8   :  { %3374 = vmatpush2.bf16.msra.mxu0 %v10121_v17  ;;  %3609 = vmatprep.subr.bf16.mxu1 %v9460_v56  ;;  %13291 = vst [vmem:[#allocation168_spill] sm:$0xff] %v10138_v45  ;;  %v10142_v56 = vld [vmem:[#allocation10 + $0x37c] ss:$36 sps:$4 sm:$0xff]  }
 0x2d9   :  { %3375 = vmatprep.subr.bf16.mxu0 %v10125_v21  ;;  %13292 = vst [vmem:[#allocation169_spill] sm:$0xff] %v10142_v56 }
 0x2da   :  { %3472 = vmatmul.mubr.bf16.vlgmr.msra.gmra.mxu1 %v9687_v60 }
 0x2db   :  { %3610 = vmatpush1.bf16.msra.mxu1 %v9472_v28  ;;  %v10146_v28 = vld [vmem:[#allocation10 + $0x378] ss:$36 sps:$4 sm:$0xff]  }
 0x2dc   :  { %3376 = vmatpush2.bf16.msra.mxu0 %v10130_v38  ;;  %3611 = vmatprep.subr.bf16.mxu1 %v9475_v34  ;;  %13293 = vst [vmem:[#allocation170_spill] sm:$0xff] %v10146_v28  ;;  %v10150_v34 = vld [vmem:[#allocation10 + $0x334] ss:$36 sps:$4 sm:$0xff]  }
 0x2dd   :  { %3377 = vmatprep.subr.bf16.mxu0 %v10134_v44  ;;  %13294 = vst [vmem:[#allocation171_spill] sm:$0xff] %v10150_v34 }
 0x2df   :  { %3612 = vmatpush1.bf16.msra.mxu1 %v9484_v54  ;;  %v10154_v54 = vld [vmem:[#allocation10 + $0x330] ss:$36 sps:$4 sm:$0xff]  }
 0x2e0   :  { %3378 = vmatpush2.bf16.msra.mxu0 %v10138_v45  ;;  %3613 = vmatprep.subr.bf16.mxu1 %v9487_v59  ;;  %13295 = vst [vmem:[#allocation172_spill] sm:$0xff] %v10154_v54  ;;  %v10158_v59 = vld [vmem:[#allocation10 + $0x2ec] ss:$36 sps:$4 sm:$0xff]  }
 0x2e1   :  { %3379 = vmatprep.subr.bf16.mxu0 %v10142_v56  ;;  %13296 = vst [vmem:[#allocation173_spill] sm:$0xff] %v10158_v59 }
 0x2e3   :  { %3614 = vmatpush1.bf16.msra.mxu1 %v9496_v5  ;;  %v13297_v5 = vmov 0.0  }
 0x2e4   :  { %3380 = vmatpush2.bf16.msra.mxu0 %v10146_v28  ;;  %3615 = vmatprep.subr.bf16.mxu1 %v9499_v51  ;;  %v13300_v51 = vld [vmem:[#allocation34_spill] sm:$0xff] }
 0x2e5   :  { %3381 = vmatprep.subr.bf16.mxu0 %v10150_v34 }
 0x2e7   :  { %3616 = vmatpush1.bf16.msra.mxu1 %v9508_v20 }
 0x2e8   :  { %3382 = vmatpush2.bf16.msra.mxu0 %v10154_v54  ;;  %3617 = vmatprep.subr.bf16.mxu1 %v9511_v22  ;;  %v13302_v22 = vld [vmem:[#allocation35_spill] sm:$0xff] }
 0x2e9   :  { %3383 = vmatprep.subr.bf16.mxu0 %v10158_v59 }
 0x2eb   :  { %3618 = vmatpush1.bf16.msra.mxu1 %v9518_v23  ;;  %v13303_v23 = vld [vmem:[#allocation38_spill] sm:$0xff] }
 0x2ec   :  { %3384 = vmatpush2.bf16.msra.mxu0 %v9407_v41  ;;  %3619 = vmatprep.subr.bf16.mxu1 %v9521_v52  ;;  %v13304_v52 = vld [vmem:[#allocation23_spill] sm:$0xff] }
 0x2ed   :  { %3385 = vmatprep.subr.bf16.mxu0 %v9410_v14  ;;  %v13298_v14 = vld [vmem:[#allocation21_spill] sm:$0xff] }
 0x2ef   :  { %3620 = vmatpush1.bf16.msra.mxu1 %v9528_v30  ;;  %v13305_v30 = vld [vmem:[#allocation39_spill] sm:$0xff] }
 0x2f0   :  { %3386 = vmatpush2.bf16.msra.mxu0 %v9421_v24  ;;  %3621 = vmatprep.subr.bf16.mxu1 %v9531_v35  ;;  %v13306_v35 = vld [vmem:[#allocation42_spill] sm:$0xff] }
 0x2f1   :  { %3387 = vmatprep.subr.bf16.mxu0 %v9425_v31  ;;  %v13299_v31 = vld [vmem:[#allocation31_spill] sm:$0xff] }
 0x2f3   :  { %3622 = vmatpush1.bf16.msra.mxu1 %v9538_v42  ;;  %v13307_v42 = vld [vmem:[#allocation24_spill] sm:$0xff] }
 0x2f4   :  { %3388 = vmatpush2.bf16.msra.mxu0 %v9438_v55  ;;  %3623 = vmatprep.subr.bf16.mxu1 %v9541_v47  ;;  %v13308_v47 = vld [vmem:[#allocation43_spill] sm:$0xff] }
 0x2f5   :  { %7383 = vmatprep.subr.bf16.mxu0 %v13297_v5 }
 0x2f7   :  { %3390 = vmatmul.mubr.bf16.vlgmr.msra.gmra.mxu0 %v9687_v60  ;;  %3624 = vmatpush1.bf16.msra.mxu1 %v9548_v32  ;;  %v13309_v32 = vld [vmem:[#allocation46_spill] sm:$0xff] }
 0x2f8   :  { %7384 = vmatpush3.bf16.msra.mxu0 %v9449_v8  ;;  %7399 = vmatprep.mubr.msk.bf16.mxu0 %vm9160_vm1, %v13297_v5  ;;  %v13301_v8 = vld [vmem:[#allocation22_spill] sm:$0xff] }
 0x2f9   :  { %7385 = vmatprep.subr.bf16.mxu0 %v13297_v5  ;;  %3625 = vmatprep.subr.bf16.mxu1 %v9552_v0  ;;  %v13310_v0 = vld [vmem:[#allocation25_spill] sm:$0xff]  ;;  %v13312_v60 = vld [vmem:[#allocation50_spill] sm:$0xff] }
 0x2fa   :  { %v3145_v41 = vpop.f32.mrf.mxu1 }
 0x2fb   :  { %3626 = vmatpush2.bf16.msra.mxu1 %v9566_v63  ;;  %v13311_v63 = vld [vmem:[#allocation47_spill] sm:$0xff] }
 0x2fc   :  { %7386 = vmatpush3.bf16.msra.mxu0 %v13298_v14  ;;  %v3147_v24 = vpop.f32.mrf.mxu1  ;;  %3627 = vmatprep.subr.bf16.mxu1 %v13299_v31  ;;  %v13313_v14 = vld [vmem:[#allocation26_spill] sm:$0xff]  ;;  %v13314_v31 = vld [vmem:[#allocation51_spill] sm:$0xff] }
 0x2fd   :  { %7387 = vmatprep.subr.bf16.mxu0 %v13297_v5 }
 0x2fe   :  { %v3149_v55 = vpop.f32.mrf.mxu1 }
 0x2ff   :  { %3628 = vmatpush2.bf16.msra.mxu1 %v13300_v51  ;;  %v13315_v55 = vld [vmem:[#allocation54_spill] sm:$0xff]  ;;  %v13316_v51 = vld [vmem:[#allocation27_spill] sm:$0xff] }
 0x300   :  { %7388 = vmatpush3.bf16.msra.mxu0 %v13301_v8  ;;  %v3150_v20 = vpop.f32.mrf.mxu1  ;;  %3629 = vmatprep.subr.bf16.mxu1 %v13302_v22  ;;  %v13317_v8 = vld [vmem:[#allocation55_spill] sm:$0xff] }
 0x301   :  { %7389 = vmatprep.subr.bf16.mxu0 %v13297_v5  ;;  %v13318_v20 = vld [vmem:[#allocation28_spill] sm:$0xff] }
 0x303   :  { %3630 = vmatpush2.bf16.msra.mxu1 %v13303_v23  ;;  %v13319_v23 = vld [vmem:[#allocation58_spill] sm:$0xff] }
 0x304   :  { %7390 = vmatpush3.bf16.msra.mxu0 %v13304_v52  ;;  %3631 = vmatprep.subr.bf16.mxu1 %v13305_v30  ;;  %v13320_v30 = vld [vmem:[#allocation29_spill] sm:$0xff] }
 0x305   :  { %7391 = vmatprep.subr.bf16.mxu0 %v13297_v5 }
 0x307   :  { %3632 = vmatpush2.bf16.msra.mxu1 %v13306_v35  ;;  %v13321_v35 = vld [vmem:[#allocation59_spill] sm:$0xff] }
 0x308   :  { %7392 = vmatpush3.bf16.msra.mxu0 %v13307_v42  ;;  %3633 = vmatprep.subr.bf16.mxu1 %v13308_v47  ;;  %v13322_v47 = vld [vmem:[#allocation30_spill] sm:$0xff] }
 0x309   :  { %7393 = vmatprep.subr.bf16.mxu0 %v13297_v5 }
 0x30b   :  { %3634 = vmatpush2.bf16.msra.mxu1 %v13309_v32 }
 0x30c   :  { %7394 = vmatpush3.bf16.msra.mxu0 %v13310_v0  ;;  %3635 = vmatprep.subr.bf16.mxu1 %v13311_v63 }
 0x30d   :  { %7395 = vmatprep.subr.bf16.mxu0 %v13297_v5 }
 0x30f   :  { %3636 = vmatpush2.bf16.msra.mxu1 %v13312_v60 }
 0x310   :  { %7396 = vmatpush3.bf16.msra.mxu0 %v13313_v14  ;;  %3637 = vmatprep.subr.bf16.mxu1 %v13314_v31  ;;  %v13323_v14 = vld [vmem:[#allocation32_spill] sm:$0xff]  ;;  %v13324_v31 = vld [vmem:[#allocation33_spill] sm:$0xff] }
 0x311   :  { %7397 = vmatprep.subr.bf16.mxu0 %v13297_v5 }
 0x313   :  { %3638 = vmatpush2.bf16.msra.mxu1 %v13315_v55 }
 0x314   :  { %7398 = vmatpush3.bf16.msra.mxu0 %v13316_v51  ;;  %3639 = vmatprep.subr.bf16.mxu1 %v13317_v8  ;;  %v13325_v51 = vld [vmem:[#allocation36_spill] sm:$0xff]  ;;  %v13326_v8 = vld [vmem:[#allocation37_spill] sm:$0xff] }
 0x315   :  { %3650 = vmatprep.subr.bf16.mxu0 %v13318_v20  ;;  %v13327_v20 = vld [vmem:[#allocation40_spill] sm:$0xff] }
 0x317   :  { %7400 = vmatmul.mubr.bf16.vlgmr.msra.gmra.mxu0 %v9742_v39  ;;  %v3186_v22 = vpop.f32.mrf.mxu0  ;;  %3640 = vmatpush2.bf16.msra.mxu1 %v13319_v23  ;;  %v13329_v23 = vld [vmem:[#allocation44_spill] sm:$0xff] }
 0x318   :  { %v3187_v52 = vadd.f32 %v3186_v22, %v3145_v41  ;;  %3651 = vmatpush1.bf16.msra.mxu0 %v13320_v30  ;;  %3732 = vmatprep.subr.bf16.mxu1 %v13321_v35  ;;  %v13328_v22 = vld [vmem:[#allocation41_spill] sm:$0xff]  ;;  %v13331_v30 = vld [vmem:[#allocation48_spill] sm:$0xff] }
 0x319   :  { %v3188_v42 = vpop.f32.mrf.mxu0  ;;  %3652 = vmatprep.subr.bf16.mxu0 %v13322_v47  ;;  %3682 = vmatprep.mubr.bf16.mxu0 %v13182_v19  ;;  %v13332_v35 = vld [vmem:[#allocation49_spill] sm:$0xff] }
 0x31a   :  { %v3189_v32 = vadd.f32 %v3188_v42, %v3147_v24  ;;  %v3268_v0 = vpop.f32.mrf.mxu1  ;;  %v13330_v24 = vld [vmem:[#allocation45_spill] sm:$0xff]  ;;  %v13333_v42 = vld [vmem:[#allocation52_spill] sm:$0xff] }
 0x31b   :  { %v3190_v63 = vpop.f32.mrf.mxu0  ;;  %v13334_v47 = vld [vmem:[#allocation53_spill] sm:$0xff] }
 0x31c   :  { %v3270_v60 = vpop.f32.mrf.mxu1  ;;  %3653 = vmatpush1.bf16.msra.mxu0 %v13323_v14  ;;  %v13335_v63 = vld [vmem:[#allocation56_spill] sm:$0xff]  ;;  %v13336_v14 = vld [vmem:[#allocation57_spill] sm:$0xff] }
 0x31d   :  { %v3191_v39 = vpop.f32.mrf.mxu0  ;;  %3654 = vmatprep.subr.bf16.mxu0 %v13324_v31  ;;  %v3104_v31 = vld [vmem:[#allocation3 + $0x2c] sm:$0xff] }
 0x31e   :  { %v3272_v55 = vpop.f32.mrf.mxu1  ;;  %v10228_v39 = vld [vmem:[#allocation3 + $0x34] sm:$0xff] }
 0x31f   :  { %v12811_v55 = vrot.slane %v10228_v39, 4 }
 0x320   :  { %v3273_v41 = vpop.f32.mrf.mxu1  ;;  %3655 = vmatpush1.bf16.msra.mxu0 %v13325_v51 }
 0x321   :  { %3656 = vmatprep.subr.bf16.mxu0 %v13326_v8  ;;  %v3545_v41 = vrot.slane %v3104_v31, 4 }
 0x323   :  { %v3547_v8 = vsel %vm3048_vm0, %v3545_v41, %v12811_v55 }
 0x324   :  { %3657 = vmatpush1.bf16.msra.mxu0 %v13327_v20  ;;  %v3551_v34 = vunpack.c.h.bf16 %v3547_v8 }
 0x325   :  { %3658 = vmatprep.subr.bf16.mxu0 %v13328_v22 }
 0x328   :  { %3659 = vmatpush1.bf16.msra.mxu0 %v13329_v23 }
 0x329   :  { %3660 = vmatprep.subr.bf16.mxu0 %v13330_v24  ;;  %v3550_v24 = vunpack.c.l.bf16 %v3547_v8 }
 0x32c   :  { %3661 = vmatpush1.bf16.msra.mxu0 %v13331_v30 }
 0x32d   :  { %3662 = vmatprep.subr.bf16.mxu0 %v13332_v35 }
 0x330   :  { %3663 = vmatpush1.bf16.msra.mxu0 %v13333_v42 }
 0x331   :  { %3664 = vmatprep.subr.bf16.mxu0 %v13334_v47 }
 0x334   :  { %3665 = vmatpush1.bf16.msra.mxu0 %v13335_v63 }
 0x335   :  { %3691 = vmatprep.subr.bf16.mxu0 %v13336_v14 }
 0x357   :  { %v3227_v51 = vpop.f32.mrf.mxu0 }
 0x358   :  { %v3269_v20 = vadd.f32 %v3268_v0, %v3227_v51 }
 0x359   :  { %v3229_v22 = vpop.f32.mrf.mxu0 }
 0x35a   :  { %v3271_v23 = vadd.f32 %v3270_v60, %v3229_v22  ;;  %v3309_v30 = vpop.f32.mrf.mxu1  ;;  %v3103_v22 = vld [vmem:[#allocation3 + $0x24] sm:$0xff] }
 0x35b   :  { %v3231_v35 = vpop.f32.mrf.mxu0  ;;  %v3519_v55 = vunpack.c.l.bf16 %v3103_v22 }
 0x35c   :  { %v3553_v42 = vadd.f32 %v3550_v24, %v3271_v23  ;;  %v3311_v47 = vpop.f32.mrf.mxu1  ;;  %v3520_v23 = vunpack.c.h.bf16 %v3103_v22 }
 0x35d   :  { %v3232_v63 = vpop.f32.mrf.mxu0  ;;  %v3522_v35 = vadd.f32 %v3519_v55, %v3187_v52 }
 0x35e   :  { %v3313_v14 = vpop.f32.mrf.mxu1  ;;  %v3523_v24 = vadd.f32 %v3520_v23, %v3189_v32  ;;  %v3521_v32 = vunpack.c.l.bf16 %v3104_v31 }
 0x35f   :  { %v6995_v63 = vmul.f32 -1.442695, %v3522_v35 }
 0x360   :  { %v3314_v5 = vpop.f32.mrf.mxu1  ;;  %v6996_v14 = vmul.f32 -1.442695, %v3523_v24  ;;  %v3524_v55 = vadd.f32 %v3521_v32, %v3269_v20  ;;  %v3106_v24 = vld [vmem:[#allocation3 + $0x3c] sm:$0xff] }
 0x361   :  { %7987 = vpow2.f32 %v6995_v63 }
 0x362   :  { %7989 = vpow2.f32 %v6996_v14 }
 0x36e   :  { %v7988_v8 = vpop.eup %7987 }
 0x377   :  { %v3350_v59 = vpop.f32.mrf.mxu0 }
 0x378   :  { %v3351_v54 = vadd.f32 %v3350_v59, %v3309_v30  ;;  %v7990_v30 = vpop.eup %7989 }
 0x379   :  { %v3352_v28 = vpop.f32.mrf.mxu0  ;;  %v3535_v52 = vadd.f32 1.0, %v7990_v30 }
 0x37a   :  { %v3554_v56 = vadd.f32 %v3551_v34, %v3351_v54  ;;  %v3353_v45 = vadd.f32 %v3352_v28, %v3311_v47  ;;  %v3432_v44 = vpop.f32.mrf.mxu1  ;;  %v3534_v47 = vadd.f32 1.0, %v7988_v8  ;;  %v3581_v8 = vunpack.c.h.bf16 %v3106_v24 }
 0x37b   :  { %v3354_v38 = vpop.f32.mrf.mxu0 }
 0x37c   :  { %v3434_v41 = vpop.f32.mrf.mxu1  ;;  %v6998_v38 = vmul.f32 -1.442695, %v3553_v42  ;;  %v6999_v54 = vmul.f32 -1.442695, %v3554_v56 }
 0x37d   :  { %v3355_v0 = vpop.f32.mrf.mxu0 }
 0x37e   :  { %v3436_v51 = vpop.f32.mrf.mxu1  ;;  %7991 = vpow2.f32 %v6998_v38 }
 0x37f   :  { %7993 = vpow2.f32 %v6999_v54  ;;  %v6997_v51 = vmul.f32 -1.442695, %v3524_v55  ;;  %v3580_v54 = vunpack.c.l.bf16 %v3106_v24 }
 0x380   :  { %v3437_v60 = vpop.f32.mrf.mxu1  ;;  %7995 = vrcp.f32 %v3534_v47 }
 0x381   :  { %7997 = vrcp.f32 %v3535_v52 }
 0x382   :  { %7999 = vpow2.f32 %v6997_v51 }
 0x38b   :  { %v7992_v0 = vpop.eup %7991 }
 0x38c   :  { %v7994_v60 = vpop.eup %7993  ;;  %v3565_v35 = vadd.f32 1.0, %v7992_v0 }
 0x38d   :  { %v3566_v56 = vadd.f32 1.0, %v7994_v60 }
 0x38e   :  { %8001 = vrcp.f32 %v3565_v35 }
 0x38f   :  { %8003 = vrcp.f32 %v3566_v56 }
 0x39a   :  { %v10234_v5 = vpop.f32.mrf.mxu1 }
 0x39c   :  { %v10236_v59 = vpop.f32.mrf.mxu1 }
 0x39e   :  { %v7141_v28 = vpop.f32.mrf.mxu1 }
 0x39f   :  { %v7996_v28 = vpop.eup %7995 }
 0x3a0   :  { %v7142_v34 = vpop.f32.mrf.mxu1  ;;  %v7998_v20 = vpop.eup %7997 }
 0x3a1   :  { %v8000_v51 = vpop.eup %7999 }
 0x3a2   :  { %v8002_v60 = vpop.eup %8001 }
 0x3a3   :  { %v8004_v35 = vpop.eup %8003 }
 0x3a4   :  { %v3590_v24 = vsub.f32 1.0, %v8004_v35 }
 0x3b7   :  { %v3391_v22 = vpop.f32.mrf.mxu0 }
 0x3b8   :  { %v3433_v23 = vadd.f32 %v3432_v44, %v3391_v22  ;;  %v13337_v44 = vrot.slane %v10228_v39, 4  ;;  %v3536_v22 = vadd.f32 1.0, %v8000_v51  ;;  %v3595_v39 = vmul.f32 %v8002_v60, %v9677_v18  ;;  %v13346_v51 = vld [vmem:[#allocation68_spill] sm:$0xff] }
 0x3b9   :  { %v3393_v63 = vpop.f32.mrf.mxu0  ;;  %v7140_v18 = vadd.f32 %v10236_v59, %v10234_v5 }
 0x3ba   :  { %v3574_v42 = vadd.f32 %v3433_v23, %v9668_v13  ;;  %v3435_v14 = vadd.f32 %v3434_v41, %v3393_v63  ;;  %v3552_v47 = vunpack.c.l.bf16 %v13337_v44  ;;  %v3589_v23 = vsub.f32 1.0, %v8002_v60  ;;  %v13347_v60 = vld [vmem:[#allocation69_spill] sm:$0xff] }
 0x3bb   :  { %v3395_v34 = vpop.f32.mrf.mxu0 }
 0x3bc   :  { %v3577_v38 = vmul.f32 %v7996_v28, %v3574_v42  ;;  %v3575_v31 = vadd.f32 %v3435_v14, %v9671_v12  ;;  %v3555_v55 = vadd.f32 %v3552_v47, %v3353_v45  ;;  %v3596_v45 = vmul.f32 %v8004_v35, %v9679_v15  ;;  %v13349_v35 = vld [vmem:[#allocation71_spill] sm:$0xff] }
 0x3bd   :  { %v3396_v30 = vpop.f32.mrf.mxu0 }
 0x3be   :  { %v3583_v52 = vadd.f32 %v3580_v54, %v3577_v38  ;;  %v3578_v32 = vmul.f32 %v7998_v20, %v3575_v31  ;;  %v7000_v41 = vmul.f32 -1.442695, %v3555_v55  ;;  %v3107_v30 = vld [vmem:[#allocation3 + $0x44] sm:$0xf] }
 0x3bf   :  { %v3582_v59 = vunpack.c.l.bf16 %v3107_v30  ;;  %v13363_v30 = vld [vmem:[#allocation85_spill] sm:$0xff] }
 0x3c0   :  { %8005 = vtanh.f32 %v3583_v52  ;;  %v3584_v0 = vadd.f32 %v3581_v8, %v3578_v32 }
 0x3c2   :  { %8007 = vtanh.f32 %v3584_v0 }
 0x3c3   :  { %8009 = vpow2.f32 %v7000_v41 }
 0x3c4   :  { %8011 = vrcp.f32 %v3536_v22  ;;  %v13348_v22 = vld [vmem:[#allocation70_spill] sm:$0xff] }
 0x3cd   :  { %v8006_v63 = vpop.eup %8005 }
 0x3ce   :  { %v3592_v56 = vmul.f32 %v8006_v63, %v3589_v23  ;;  %v13350_v23 = vld [vmem:[#allocation72_spill] sm:$0xff]  ;;  %v13351_v63 = vld [vmem:[#allocation73_spill] sm:$0xff] }
 0x3cf   :  { %v8008_v42 = vpop.eup %8007 }
 0x3d0   :  { %v3593_v14 = vmul.f32 %v8008_v42, %v3590_v24  ;;  %v10244_v28 = vadd.f32 %v3595_v39, %v3592_v56  ;;  %v8010_v54 = vpop.eup %8009  ;;  %v13352_v24 = vld [vmem:[#allocation74_spill] sm:$0xff]  ;;  %v13353_v56 = vld [vmem:[#allocation75_spill] sm:$0xff]  ;;  %v13354_v39 = vld [vmem:[#allocation76_spill] sm:$0xff] }
 0x3d1   :  { %v3567_v15 = vadd.f32 1.0, %v8010_v54  ;;  %v8012_v52 = vpop.eup %8011  ;;  %v13355_v42 = vld [vmem:[#allocation77_spill] sm:$0xff]  ;;  %v13358_v54 = vld [vmem:[#allocation80_spill] sm:$0xff] }
 0x3d2   :  { %v10246_v34 = vadd.f32 %v3596_v45, %v3593_v14  ;;  %v10254_v31 = vpack.c.bf16 %v10244_v28, %v10244_v28  ;;  %v13356_v14 = vld [vmem:[#allocation78_spill] sm:$0xff]  ;;  %v13357_v45 = vld [vmem:[#allocation79_spill] sm:$0xff] }
 0x3d3   :  { %8013 = vrcp.f32 %v3567_v15  ;;  %v13361_v15 = vld [vmem:[#allocation83_spill] sm:$0xff] }
 0x3d4   :  { %v10250_v38 = vpack.c.bf16 %v10246_v34, %v10246_v34 }
 0x3d6   :  { %3641 = vmatprep.mubr.bf16.mxu1 %v10250_v38 }
 0x3d7   :  { %v3513_v20 = vpop.f32.mrf.mxu0  ;;  %3642 = vmatmul.mubr.bf16.vlgmr.msra.gmra.mxu1 %v10254_v31 }
 0x3d8   :  { %v3514_v8 = vadd.f32 %v7140_v18, %v3513_v20  ;;  %3733 = vmatpush1.bf16.msra.mxu1 %v9694_v2  ;;  %3764 = vmatprep.mubr.bf16.mxu1 %v13182_v19  ;;  %v13359_v18 = vld [vmem:[#allocation81_spill] sm:$0xff]  ;;  %v13360_v20 = vld [vmem:[#allocation82_spill] sm:$0xff] }
 0x3d9   :  { %v7401_v44 = vpop.f32.mrf.mxu0  ;;  %3734 = vmatprep.subr.bf16.mxu1 %v9698_v11  ;;  %v13338_v11 = vld [vmem:[#allocation60_spill] sm:$0xff] }
 0x3da   :  { %v3576_v47 = vadd.f32 %v3514_v8, %v9691_v49  ;;  %v13362_v8 = vld [vmem:[#allocation84_spill] sm:$0xff]  ;;  %v13364_v44 = vld [vmem:[#allocation86_spill] sm:$0xff] }
 0x3db   :  { %v3516_v32 = vpop.f32.mrf.mxu0 }
 0x3dc   :  { %v3579_v5 = vmul.f32 %v8012_v52, %v3576_v47  ;;  %3735 = vmatpush1.bf16.msra.mxu1 %v9702_v9  ;;  %v13365_v47 = vld [vmem:[#allocation87_spill] sm:$0xff]  ;;  %v13366_v52 = vld [vmem:[#allocation88_spill] sm:$0xff]  ;;  %v13367_v32 = vld [vmem:[#allocation89_spill] sm:$0xff] }
 0x3dd   :  { %v7402_v55 = vpop.f32.mrf.mxu0  ;;  %3736 = vmatprep.subr.bf16.mxu1 %v9705_v48 }
 0x3de   :  { %v3585_v0 = vadd.f32 %v3582_v59, %v3579_v5  ;;  %v13368_v5 = vld [vmem:[#allocation90_spill] sm:$0xff]  ;;  %v13369_v59 = vld [vmem:[#allocation91_spill] sm:$0xff]  ;;  %v13370_v55 = vld [vmem:[#allocation92_spill] sm:$0xff] }
 0x3e0   :  { %8015 = vtanh.f32 %v3585_v0  ;;  %3737 = vmatpush1.bf16.msra.mxu1 %v9708_v50  ;;  %v8014_v2 = vpop.eup %8013  ;;  %v13371_v0 = vld [vmem:[#allocation93_spill] sm:$0xff] }
 0x3e1   :  { %3738 = vmatprep.subr.bf16.mxu1 %v9711_v36  ;;  %v3591_v9 = vsub.f32 1.0, %v8014_v2  ;;  %v3597_v50 = vmul.f32 %v8014_v2, %v9735_v40  ;;  %v13342_v40 = vld [vmem:[#allocation64_spill] sm:$0xff]  ;;  %v13372_v2 = vld [vmem:[#allocation94_spill] sm:$0xff] }
 0x3e4   :  { %3739 = vmatpush1.bf16.msra.mxu1 %v9714_v61 }
 0x3e5   :  { %3740 = vmatprep.subr.bf16.mxu1 %v9717_v6  ;;  %v13339_v6 = vld [vmem:[#allocation61_spill] sm:$0xff] }
 0x3e8   :  { %3741 = vmatpush1.bf16.msra.mxu1 %v9720_v10  ;;  %v13340_v10 = vld [vmem:[#allocation62_spill] sm:$0xff] }
 0x3e9   :  { %3742 = vmatprep.subr.bf16.mxu1 %v9723_v27  ;;  %v13341_v27 = vld [vmem:[#allocation63_spill] sm:$0xff] }
 0x3ec   :  { %3743 = vmatpush1.bf16.msra.mxu1 %v13338_v11  ;;  %v13373_v11 = vld [vmem:[#allocation95_spill] sm:$0xff] }
 0x3ed   :  { %v8016_v41 = vpop.eup %8015  ;;  %3744 = vmatprep.subr.bf16.mxu1 %v9729_v58  ;;  %v13343_v58 = vld [vmem:[#allocation65_spill] sm:$0xff] }
 0x3ee   :  { %v3594_v48 = vmul.f32 %v8016_v41, %v3591_v9  ;;  %v13374_v9 = vld [vmem:[#allocation96_spill] sm:$0xff]  ;;  %v13375_v41 = vld [vmem:[#allocation97_spill] sm:$0xff] }
 0x3f0   :  { %3745 = vmatpush1.bf16.msra.mxu1 %v9732_v3  ;;  %v10276_v36 = vadd.f32 %v3597_v50, %v3594_v48  ;;  %v13345_v3 = vld [vmem:[#allocation67_spill] sm:$0xff]  ;;  %v13376_v48 = vld [vmem:[#allocation98_spill] sm:$0xff] }
 0x3f1   :  { %3746 = vmatprep.subr.bf16.mxu1 %v9737_v43  ;;  %v13344_v43 = vld [vmem:[#allocation66_spill] sm:$0xff]  ;;  %v13377_v50 = vld [vmem:[#allocation99_spill] sm:$0xff] }
 0x3f2   :  { %v10281_v61 = vpack.c.bf16 %v10276_v36, %v10276_v36 }
 0x3f4   :  { %3747 = vmatpush1.bf16.msra.mxu1 %v13339_v6  ;;  %3683 = vmatmul.mubr.bf16.vlgmr.msra.gmra.mxu0 %v10281_v61  ;;  %v13378_v6 = vld [vmem:[#allocation100_spill] sm:$0xff] }
 0x3f5   :  { %3692 = vmatpush1.bf16.msra.mxu0 %v13340_v10  ;;  %3723 = vmatprep.mubr.bf16.mxu0 %v10250_v38  ;;  %v13379_v10 = vld [vmem:[#allocation101_spill] sm:$0xff] }
 0x3f6   :  { %3773 = vmatprep.subr.bf16.mxu1 %v13341_v27  ;;  %3693 = vmatprep.subr.bf16.mxu0 %v13342_v40  ;;  %v13380_v27 = vld [vmem:[#allocation102_spill] sm:$0xff]  ;;  %v13381_v40 = vld [vmem:[#allocation103_spill] sm:$0xff] }
 0x3f7   :  { %3765 = vmatmul.mubr.bf16.vlgmr.msra.gmra.mxu1 %v10281_v61 }
 0x3f8   :  { %3774 = vmatpush1.bf16.msra.mxu1 %v13343_v58  ;;  %3805 = vmatprep.mubr.bf16.mxu1 %v10250_v38  ;;  %v13382_v58 = vld [vmem:[#allocation104_spill] sm:$0xff] }
 0x3f9   :  { %3694 = vmatpush1.bf16.msra.mxu0 %v13344_v43  ;;  %3775 = vmatprep.subr.bf16.mxu1 %v13345_v3  ;;  %v13383_v43 = vld [vmem:[#allocation105_spill] sm:$0xff]  ;;  %v13384_v3 = vld [vmem:[#allocation106_spill] sm:$0xff] }
 0x3fa   :  { %3695 = vmatprep.subr.bf16.mxu0 %v13346_v51  ;;  %v13385_v51 = vld [vmem:[#allocation107_spill] sm:$0xff] }
 0x3fc   :  { %3776 = vmatpush1.bf16.msra.mxu1 %v13347_v60  ;;  %v13386_v60 = vld [vmem:[#allocation108_spill] sm:$0xff] }
 0x3fd   :  { %3696 = vmatpush1.bf16.msra.mxu0 %v13348_v22  ;;  %3777 = vmatprep.subr.bf16.mxu1 %v13349_v35  ;;  %v13387_v22 = vld [vmem:[#allocation109_spill] sm:$0xff]  ;;  %v13388_v35 = vld [vmem:[#allocation110_spill] sm:$0xff] }
 0x3fe   :  { %3697 = vmatprep.subr.bf16.mxu0 %v13350_v23  ;;  %v13389_v23 = vld [vmem:[#allocation111_spill] sm:$0xff] }
 0x400   :  { %3778 = vmatpush1.bf16.msra.mxu1 %v13351_v63  ;;  %v13390_v63 = vld [vmem:[#allocation112_spill] sm:$0xff] }
 0x401   :  { %3698 = vmatpush1.bf16.msra.mxu0 %v13352_v24  ;;  %3779 = vmatprep.subr.bf16.mxu1 %v13353_v56  ;;  %v13391_v24 = vld [vmem:[#allocation113_spill] sm:$0xff]  ;;  %v13392_v56 = vld [vmem:[#allocation114_spill] sm:$0xff] }
 0x402   :  { %3699 = vmatprep.subr.bf16.mxu0 %v13354_v39  ;;  %v13393_v39 = vld [vmem:[#allocation115_spill] sm:$0xff] }
 0x404   :  { %3780 = vmatpush1.bf16.msra.mxu1 %v13355_v42  ;;  %v13394_v42 = vld [vmem:[#allocation116_spill] sm:$0xff] }
 0x405   :  { %3700 = vmatpush1.bf16.msra.mxu0 %v13356_v14  ;;  %3781 = vmatprep.subr.bf16.mxu1 %v13357_v45  ;;  %v13395_v14 = vld [vmem:[#allocation117_spill] sm:$0xff]  ;;  %v13396_v45 = vld [vmem:[#allocation118_spill] sm:$0xff] }
 0x406   :  { %3701 = vmatprep.subr.bf16.mxu0 %v13358_v54  ;;  %v13397_v54 = vld [vmem:[#allocation119_spill] sm:$0xff] }
 0x408   :  { %3782 = vmatpush1.bf16.msra.mxu1 %v13359_v18  ;;  %v13398_v18 = vld [vmem:[#allocation120_spill] sm:$0xff] }
 0x409   :  { %3702 = vmatpush1.bf16.msra.mxu0 %v13360_v20  ;;  %3783 = vmatprep.subr.bf16.mxu1 %v13361_v15  ;;  %v13399_v20 = vld [vmem:[#allocation121_spill] sm:$0xff]  ;;  %v13400_v15 = vld [vmem:[#allocation122_spill] sm:$0xff] }
 0x40a   :  { %3703 = vmatprep.subr.bf16.mxu0 %v13362_v8  ;;  %v13401_v8 = vld [vmem:[#allocation123_spill] sm:$0xff] }
 0x40c   :  { %3784 = vmatpush1.bf16.msra.mxu1 %v13363_v30  ;;  %v13402_v30 = vld [vmem:[#allocation124_spill] sm:$0xff] }
 0x40d   :  { %3704 = vmatpush1.bf16.msra.mxu0 %v13364_v44  ;;  %3785 = vmatprep.subr.bf16.mxu1 %v13365_v47  ;;  %v13403_v44 = vld [vmem:[#allocation125_spill] sm:$0xff]  ;;  %v13404_v47 = vld [vmem:[#allocation126_spill] sm:$0xff] }
 0x40e   :  { %3705 = vmatprep.subr.bf16.mxu0 %v13366_v52  ;;  %v13405_v52 = vld [vmem:[#allocation127_spill] sm:$0xff] }
 0x410   :  { %3786 = vmatpush1.bf16.msra.mxu1 %v13367_v32  ;;  %v13406_v32 = vld [vmem:[#allocation128_spill] sm:$0xff] }
 0x411   :  { %3706 = vmatpush1.bf16.msra.mxu0 %v13368_v5  ;;  %3787 = vmatprep.subr.bf16.mxu1 %v13369_v59  ;;  %v13407_v5 = vld [vmem:[#allocation129_spill] sm:$0xff]  ;;  %v13408_v59 = vld [vmem:[#allocation130_spill] sm:$0xff] }
 0x412   :  { %3707 = vmatprep.subr.bf16.mxu0 %v13370_v55  ;;  %v13409_v55 = vld [vmem:[#allocation131_spill] sm:$0xff] }
 0x414   :  { %3788 = vmatpush1.bf16.msra.mxu1 %v13371_v0  ;;  %v13410_v0 = vld [vmem:[#allocation132_spill] sm:$0xff] }
 0x415   :  { %3708 = vmatpush2.bf16.msra.mxu0 %v13372_v2  ;;  %3789 = vmatprep.subr.bf16.mxu1 %v13373_v11  ;;  %v13411_v2 = vld [vmem:[#allocation133_spill] sm:$0xff]  ;;  %v13412_v11 = vld [vmem:[#allocation134_spill] sm:$0xff] }
 0x416   :  { %3709 = vmatprep.subr.bf16.mxu0 %v13374_v9  ;;  %v13413_v9 = vld [vmem:[#allocation135_spill] sm:$0xff] }
 0x418   :  { %3790 = vmatpush2.bf16.msra.mxu1 %v13375_v41  ;;  %v13414_v41 = vld [vmem:[#allocation136_spill] sm:$0xff] }
 0x419   :  { %3710 = vmatpush2.bf16.msra.mxu0 %v13376_v48  ;;  %3791 = vmatprep.subr.bf16.mxu1 %v13377_v50  ;;  %v13415_v48 = vld [vmem:[#allocation137_spill] sm:$0xff]  ;;  %v13416_v50 = vld [vmem:[#allocation138_spill] sm:$0xff] }
 0x41a   :  { %3711 = vmatprep.subr.bf16.mxu0 %v13378_v6  ;;  %v13417_v6 = vld [vmem:[#allocation139_spill] sm:$0xff] }
 0x41c   :  { %3792 = vmatpush2.bf16.msra.mxu1 %v13379_v10  ;;  %v13418_v10 = vld [vmem:[#allocation140_spill] sm:$0xff] }
 0x41d   :  { %3712 = vmatpush2.bf16.msra.mxu0 %v13380_v27  ;;  %3793 = vmatprep.subr.bf16.mxu1 %v13381_v40  ;;  %v13419_v27 = vld [vmem:[#allocation141_spill] sm:$0xff]  ;;  %v13420_v40 = vld [vmem:[#allocation142_spill] sm:$0xff] }
 0x41e   :  { %3713 = vmatprep.subr.bf16.mxu0 %v13382_v58  ;;  %v13421_v58 = vld [vmem:[#allocation143_spill] sm:$0xff] }
 0x420   :  { %3794 = vmatpush2.bf16.msra.mxu1 %v13383_v43  ;;  %v13422_v43 = vld [vmem:[#allocation144_spill] sm:$0xff] }
 0x421   :  { %3714 = vmatpush2.bf16.msra.mxu0 %v13384_v3  ;;  %3795 = vmatprep.subr.bf16.mxu1 %v13385_v51  ;;  %v13423_v3 = vld [vmem:[#allocation145_spill] sm:$0xff]  ;;  %v13424_v51 = vld [vmem:[#allocation146_spill] sm:$0xff] }
 0x422   :  { %3715 = vmatprep.subr.bf16.mxu0 %v13386_v60  ;;  %v13425_v60 = vld [vmem:[#allocation147_spill] sm:$0xff] }
 0x424   :  { %3796 = vmatpush2.bf16.msra.mxu1 %v13387_v22  ;;  %v13426_v22 = vld [vmem:[#allocation148_spill] sm:$0xff] }
 0x425   :  { %3716 = vmatpush2.bf16.msra.mxu0 %v13388_v35  ;;  %3797 = vmatprep.subr.bf16.mxu1 %v13389_v23  ;;  %v13427_v35 = vld [vmem:[#allocation149_spill] sm:$0xff]  ;;  %v13428_v23 = vld [vmem:[#allocation150_spill] sm:$0xff] }
 0x426   :  { %3717 = vmatprep.subr.bf16.mxu0 %v13390_v63  ;;  %v13429_v63 = vld [vmem:[#allocation151_spill] sm:$0xff] }
 0x428   :  { %3798 = vmatpush2.bf16.msra.mxu1 %v13391_v24  ;;  %v13430_v24 = vld [vmem:[#allocation152_spill] sm:$0xff] }
 0x429   :  { %3718 = vmatpush2.bf16.msra.mxu0 %v13392_v56  ;;  %3799 = vmatprep.subr.bf16.mxu1 %v13393_v39  ;;  %v13431_v56 = vld [vmem:[#allocation153_spill] sm:$0xff]  ;;  %v13432_v39 = vld [vmem:[#allocation154_spill] sm:$0xff] }
 0x42a   :  { %3719 = vmatprep.subr.bf16.mxu0 %v13394_v42  ;;  %v13433_v42 = vld [vmem:[#allocation155_spill] sm:$0xff] }
 0x42c   :  { %3800 = vmatpush2.bf16.msra.mxu1 %v13395_v14  ;;  %v13434_v14 = vld [vmem:[#allocation156_spill] sm:$0xff] }
 0x42d   :  { %3720 = vmatpush2.bf16.msra.mxu0 %v13396_v45  ;;  %3801 = vmatprep.subr.bf16.mxu1 %v13397_v54  ;;  %v13435_v45 = vld [vmem:[#allocation157_spill] sm:$0xff]  ;;  %v13436_v54 = vld [vmem:[#allocation158_spill] sm:$0xff] }
 0x42e   :  { %3721 = vmatprep.subr.bf16.mxu0 %v13398_v18  ;;  %v13437_v18 = vld [vmem:[#allocation159_spill] sm:$0xff] }
 0x430   :  { %3802 = vmatpush2.bf16.msra.mxu1 %v13399_v20  ;;  %v13438_v20 = vld [vmem:[#allocation160_spill] sm:$0xff] }
 0x431   :  { %3722 = vmatpush2.bf16.msra.mxu0 %v13400_v15  ;;  %3803 = vmatprep.subr.bf16.mxu1 %v13401_v8  ;;  %v13439_v15 = vld [vmem:[#allocation161_spill] sm:$0xff]  ;;  %v13440_v8 = vld [vmem:[#allocation162_spill] sm:$0xff] }
 0x432   :  { %3814 = vmatprep.subr.bf16.mxu0 %v13402_v30  ;;  %v13441_v30 = vld [vmem:[#allocation163_spill] sm:$0xff] }
 0x434   :  { %3724 = vmatmul.mubr.bf16.vlgmr.msra.gmra.mxu0 %v10254_v31  ;;  %3804 = vmatpush2.bf16.msra.mxu1 %v13403_v44  ;;  %v13442_v44 = vld [vmem:[#allocation164_spill] sm:$0xff] }
 0x435   :  { %3815 = vmatpush1.bf16.msra.mxu0 %v13404_v47  ;;  %3896 = vmatprep.subr.bf16.mxu1 %v13405_v52  ;;  %v13443_v47 = vld [vmem:[#allocation165_spill] sm:$0xff] }
 0x436   :  { %3816 = vmatprep.subr.bf16.mxu0 %v13406_v32  ;;  %3846 = vmatprep.mubr.bf16.mxu0 %v13182_v19  ;;  %v10403_v52 = vld [vmem:[#allocation10 + $0x188] ss:$36 sps:$4 sm:$0xff]   ;;  %v13445_v32 = vld [vmem:[#allocation167_spill] sm:$0xff] }
 0x437   :  { %3806 = vmatmul.mubr.bf16.vlgmr.msra.gmra.mxu1 %v10254_v31 }
 0x438   :  { %3897 = vmatpush1.bf16.msra.mxu1 %v13407_v5  ;;  %3928 = vmatprep.mubr.bf16.mxu1 %v13182_v19  ;;  %v13446_v5 = vld [vmem:[#allocation168_spill] sm:$0xff] }
 0x439   :  { %3817 = vmatpush1.bf16.msra.mxu0 %v13408_v59  ;;  %3898 = vmatprep.subr.bf16.mxu1 %v13409_v55  ;;  %v13447_v59 = vld [vmem:[#allocation169_spill] sm:$0xff] }
 0x43a   :  { %3818 = vmatprep.subr.bf16.mxu0 %v13410_v0  ;;  %v10468_v55 = vld [vmem:[#allocation10 + $0x168] ss:$36 sps:$4 sm:$0xff]   ;;  %v13448_v0 = vld [vmem:[#allocation170_spill] sm:$0xff] }
 0x43c   :  { %3899 = vmatpush1.bf16.msra.mxu1 %v13411_v2  ;;  %v10472_v2 = vld [vmem:[#allocation10 + $0x124] ss:$36 sps:$4 sm:$0xff]  }
 0x43d   :  { %3819 = vmatpush1.bf16.msra.mxu0 %v13412_v11  ;;  %3900 = vmatprep.subr.bf16.mxu1 %v13413_v9  ;;  %v13449_v11 = vld [vmem:[#allocation171_spill] sm:$0xff] }
 0x43e   :  { %3820 = vmatprep.subr.bf16.mxu0 %v13414_v41  ;;  %v10476_v9 = vld [vmem:[#allocation10 + $0x120] ss:$36 sps:$4 sm:$0xff]  }
 0x43f   :  { %v13450_v41 = vld [vmem:[#allocation172_spill] sm:$0xff] }
 0x440   :  { %3901 = vmatpush1.bf16.msra.mxu1 %v13415_v48  ;;  %v10480_v48 = vld [vmem:[#allocation10 + $0xdc] ss:$36 sps:$4 sm:$0xff]  }
 0x441   :  { %3821 = vmatpush1.bf16.msra.mxu0 %v13416_v50  ;;  %3902 = vmatprep.subr.bf16.mxu1 %v13417_v6  ;;  %v13451_v50 = vld [vmem:[#allocation173_spill] sm:$0xff]  ;;  %v10484_v6 = vld [vmem:[#allocation10 + $0xd8] ss:$36 sps:$4 sm:$0xff]  }
 0x442   :  { %3822 = vmatprep.subr.bf16.mxu0 %v13418_v10  ;;  %v10487_v10 = vld [vmem:[#allocation10 + $0x2e8] ss:$36 sps:$4 sm:$0xff]  }
 0x444   :  { %3903 = vmatpush1.bf16.msra.mxu1 %v13419_v27  ;;  %v10490_v27 = vld [vmem:[#allocation10 + $0x94] ss:$36 sps:$4 sm:$0xff]  }
 0x445   :  { %3823 = vmatpush1.bf16.msra.mxu0 %v13420_v40  ;;  %3904 = vmatprep.subr.bf16.mxu1 %v13421_v58  ;;  %v10493_v40 = vld [vmem:[#allocation10 + $0x2a4] ss:$36 sps:$4 sm:$0xff]   ;;  %v10496_v58 = vld [vmem:[#allocation10 + $0x90] ss:$36 sps:$4 sm:$0xff]  }
 0x446   :  { %3824 = vmatprep.subr.bf16.mxu0 %v13422_v43  ;;  %v10499_v43 = vld [vmem:[#allocation10 + $0x2a0] ss:$36 sps:$4 sm:$0xff]  }
 0x448   :  { %3905 = vmatpush1.bf16.msra.mxu1 %v13423_v3  ;;  %v10502_v3 = vld [vmem:[#allocation10 + $0x4c] ss:$36 sps:$4 sm:$0xff]  }
 0x449   :  { %3825 = vmatpush1.bf16.msra.mxu0 %v13424_v51  ;;  %3906 = vmatprep.subr.bf16.mxu1 %v13425_v60  ;;  %v10505_v51 = vld [vmem:[#allocation10 + $0x25c] ss:$36 sps:$4 sm:$0xff]   ;;  %v10508_v60 = vld [vmem:[#allocation10 + $0x48] ss:$36 sps:$4 sm:$0xff]  }
 0x44a   :  { %3826 = vmatprep.subr.bf16.mxu0 %v13426_v22  ;;  %13452 = vst [vmem:[#allocation21_spill] sm:$0xff] %v10508_v60  ;;  %v10511_v22 = vld [vmem:[#allocation10 + $0x258] ss:$36 sps:$4 sm:$0xff]  }
 0x44b   :  { %13453 = vst [vmem:[#allocation31_spill] sm:$0xff] %v10511_v22 }
 0x44c   :  { %3907 = vmatpush1.bf16.msra.mxu1 %v13427_v35  ;;  %v10514_v35 = vld [vmem:[#allocation10 + $0x4] ss:$36 sps:$4 sm:$0xff]  }
 0x44d   :  { %3827 = vmatpush1.bf16.msra.mxu0 %v13428_v23  ;;  %3908 = vmatprep.subr.bf16.mxu1 %v13429_v63  ;;  %13454 = vst [vmem:[#allocation34_spill] sm:$0xff] %v10514_v35  ;;  %v13455_v23 = vmov 0.0   ;;  %v10519_v63 = vld [vmem:[#allocation10] ss:$36 sps:$4 sm:$0xff]  }
 0x44e   :  { %3828 = vmatprep.subr.bf16.mxu0 %v13430_v24  ;;  %13456 = vst [vmem:[#allocation22_spill] sm:$0xff] %v10519_v63  ;;  %v10522_v24 = vld [vmem:[#allocation10 + $0x698] ss:$36 sps:$4 sm:$0xff]  }
 0x44f   :  { %13457 = vst [vmem:[#allocation35_spill] sm:$0xff] %v10522_v24 }
 0x450   :  { %3909 = vmatpush1.bf16.msra.mxu1 %v13431_v56  ;;  %v10528_v56 = vld [vmem:[#allocation10 + $0x43c] ss:$36 sps:$4 sm:$0xff]  }
 0x451   :  { %3829 = vmatpush1.bf16.msra.mxu0 %v13432_v39  ;;  %3910 = vmatprep.subr.bf16.mxu1 %v13433_v42  ;;  %13458 = vst [vmem:[#allocation38_spill] sm:$0xff] %v10528_v56  ;;  %v10531_v42 = vld [vmem:[#allocation10 + $0x438] ss:$36 sps:$4 sm:$0xff]  }
 0x452   :  { %3855 = vmatprep.subr.bf16.mxu0 %v13434_v14  ;;  %13459 = vst [vmem:[#allocation23_spill] sm:$0xff] %v10531_v42 }
 0x454   :  { %3847 = vmatmul.mubr.bf16.vlgmr.msra.gmra.mxu0 %v10281_v61  ;;  %3911 = vmatpush1.bf16.msra.mxu1 %v13435_v45  ;;  %v10537_v45 = vld [vmem:[#allocation10 + $0x3f4] ss:$36 sps:$4 sm:$0xff]  }
 0x455   :  { %3856 = vmatpush1.bf16.msra.mxu0 %v13436_v54  ;;  %3887 = vmatprep.mubr.bf16.mxu0 %v10250_v38  ;;  %13461 = vst [vmem:[#allocation42_spill] sm:$0xff] %v10537_v45 }
 0x456   :  { %7153 = vmatprep.subr.bf16.mxu1 %v13437_v18  ;;  %3857 = vmatprep.subr.bf16.mxu0 %v13438_v20  ;;  %v10541_v18 = vld [vmem:[#allocation10 + $0x3f0] ss:$36 sps:$4 sm:$0xff]   ;;  %v10544_v20 = vld [vmem:[#allocation10 + $0x608] ss:$36 sps:$4 sm:$0xff]  }
 0x457   :  { %3929 = vmatmul.mubr.bf16.vlgmr.msra.gmra.mxu1 %v10281_v61  ;;  %13462 = vst [vmem:[#allocation24_spill] sm:$0xff] %v10541_v18  ;;  %13463 = vst [vmem:[#allocation43_spill] sm:$0xff] %v10544_v20 }
 0x458   :  { %7154 = vmatpush3.bf16.msra.mxu1 %v10055_v4  ;;  %3969 = vmatprep.mubr.bf16.mxu1 %v10250_v38  ;;  %v10407_v4 = vld [vmem:[#allocation10 + $0x380] ss:$36 sps:$4 sm:$0xff]   ;;  %v10419_v38 = vld [vmem:[#allocation10 + $0xf8] ss:$36 sps:$4 sm:$0xff]  }
 0x459   :  { %3858 = vmatpush1.bf16.msra.mxu0 %v13439_v15  ;;  %7155 = vmatprep.subr.bf16.mxu1 %v13440_v8  ;;  %v10547_v8 = vld [vmem:[#allocation10 + $0x3ac] ss:$36 sps:$4 sm:$0xff]  }
 0x45a   :  { %3859 = vmatprep.subr.bf16.mxu0 %v10065_v33  ;;  %v10411_v33 = vld [vmem:[#allocation10 + $0x140] ss:$36 sps:$4 sm:$0xff]   ;;  %13464 = vst [vmem:[#allocation46_spill] sm:$0xff] %v10547_v8 }
 0x45c   :  { %7156 = vmatpush3.bf16.msra.mxu1 %v13441_v30  ;;  %v10551_v30 = vld [vmem:[#allocation10 + $0x3a8] ss:$36 sps:$4 sm:$0xff]  }
 0x45d   :  { %3860 = vmatpush1.bf16.msra.mxu0 %v13442_v44  ;;  %7157 = vmatprep.subr.bf16.mxu1 %v10074_v25  ;;  %v10415_v25 = vld [vmem:[#allocation10 + $0x338] ss:$36 sps:$4 sm:$0xff]   ;;  %13465 = vst [vmem:[#allocation25_spill] sm:$0xff] %v10551_v30  ;;  %v10554_v44 = vld [vmem:[#allocation10 + $0x5c0] ss:$36 sps:$4 sm:$0xff]  }
 0x45e   :  { %3861 = vmatprep.subr.bf16.mxu0 %v13443_v47  ;;  %13466 = vst [vmem:[#allocation47_spill] sm:$0xff] %v10554_v44  ;;  %v10557_v47 = vld [vmem:[#allocation10 + $0x364] ss:$36 sps:$4 sm:$0xff]  }
 0x45f   :  { %13467 = vst [vmem:[#allocation50_spill] sm:$0xff] %v10557_v47 }
 0x460   :  { %7158 = vmatpush3.bf16.msra.mxu1 %v10403_v52 }
 0x461   :  { %3862 = vmatpush1.bf16.msra.mxu0 %v10081_v16  ;;  %7159 = vmatprep.subr.bf16.mxu1 %v10407_v4  ;;  %v10423_v16 = vld [vmem:[#allocation10 + $0x2f0] ss:$36 sps:$4 sm:$0xff]  }
 0x462   :  { %3863 = vmatprep.subr.bf16.mxu0 %v10085_v62  ;;  %v10427_v62 = vld [vmem:[#allocation10 + $0xb0] ss:$36 sps:$4 sm:$0xff]  }
 0x464   :  { %7160 = vmatpush3.bf16.msra.mxu1 %v10411_v33 }
 0x465   :  { %3864 = vmatpush1.bf16.msra.mxu0 %v10089_v1  ;;  %7161 = vmatprep.subr.bf16.mxu1 %v10415_v25  ;;  %v10431_v1 = vld [vmem:[#allocation10 + $0x2a8] ss:$36 sps:$4 sm:$0xff]  }
 0x466   :  { %3865 = vmatprep.subr.bf16.mxu0 %v10093_v37  ;;  %v10435_v37 = vld [vmem:[#allocation10 + $0x68] ss:$36 sps:$4 sm:$0xff]  }
 0x468   :  { %7162 = vmatpush3.bf16.msra.mxu1 %v10419_v38 }
 0x469   :  { %3866 = vmatpush1.bf16.msra.mxu0 %v10097_v26  ;;  %7163 = vmatprep.subr.bf16.mxu1 %v10423_v16  ;;  %v10439_v26 = vld [vmem:[#allocation10 + $0x260] ss:$36 sps:$4 sm:$0xff]  }
 0x46a   :  { %3867 = vmatprep.subr.bf16.mxu0 %v10101_v29  ;;  %v10443_v29 = vld [vmem:[#allocation10 + $0x20] ss:$36 sps:$4 sm:$0xff]  }
 0x46c   :  { %7164 = vmatpush3.bf16.msra.mxu1 %v10427_v62 }
 0x46d   :  { %3868 = vmatpush1.bf16.msra.mxu0 %v10105_v53  ;;  %7165 = vmatprep.subr.bf16.mxu1 %v10431_v1  ;;  %v10447_v53 = vld [vmem:[#allocation10 + $0x1fc] ss:$36 sps:$4 sm:$0xff]  }
 0x46e   :  { %3869 = vmatprep.subr.bf16.mxu0 %v10109_v57  ;;  %v10452_v57 = vld [vmem:[#allocation10 + $0x1f8] ss:$36 sps:$4 sm:$0xff]  }
 0x470   :  { %7166 = vmatpush3.bf16.msra.mxu1 %v10435_v37 }
 0x471   :  { %3870 = vmatpush1.bf16.msra.mxu0 %v10113_v7  ;;  %7167 = vmatprep.subr.bf16.mxu1 %v10439_v26  ;;  %v13444_v7 = vld [vmem:[#allocation166_spill] sm:$0xff] }
 0x472   :  { %3871 = vmatprep.subr.bf16.mxu0 %v10117_v46  ;;  %v10456_v46 = vld [vmem:[#allocation10 + $0x1b4] ss:$36 sps:$4 sm:$0xff]  }
 0x474   :  { %7168 = vmatpush3.bf16.msra.mxu1 %v10443_v29 }
 0x475   :  { %3872 = vmatpush2.bf16.msra.mxu0 %v10121_v17  ;;  %4107 = vmatprep.subr.bf16.mxu1 %v10447_v53  ;;  %v10460_v17 = vld [vmem:[#allocation10 + $0x1b0] ss:$36 sps:$4 sm:$0xff]  }
 0x476   :  { %3873 = vmatprep.subr.bf16.mxu0 %v10125_v21  ;;  %v10464_v21 = vld [vmem:[#allocation10 + $0x16c] ss:$36 sps:$4 sm:$0xff]  }
 0x477   :  { %3970 = vmatmul.mubr.bf16.vlgmr.msra.gmra.mxu1 %v10254_v31 }
 0x478   :  { %4108 = vmatpush1.bf16.msra.mxu1 %v10452_v57 }
 0x479   :  { %3874 = vmatpush2.bf16.msra.mxu0 %v13444_v7  ;;  %4109 = vmatprep.subr.bf16.mxu1 %v10456_v46  ;;  %v10561_v7 = vld [vmem:[#allocation10 + $0x360] ss:$36 sps:$4 sm:$0xff]  }
 0x47a   :  { %3875 = vmatprep.subr.bf16.mxu0 %v13445_v32  ;;  %13468 = vst [vmem:[#allocation26_spill] sm:$0xff] %v10561_v7  ;;  %v10564_v32 = vld [vmem:[#allocation10 + $0x578] ss:$36 sps:$4 sm:$0xff]  }
 0x47b   :  { %13469 = vst [vmem:[#allocation51_spill] sm:$0xff] %v10564_v32 }
 0x47c   :  { %4110 = vmatpush1.bf16.msra.mxu1 %v10460_v17 }
 0x47d   :  { %3876 = vmatpush2.bf16.msra.mxu0 %v13446_v5  ;;  %4111 = vmatprep.subr.bf16.mxu1 %v10464_v21  ;;  %v10567_v5 = vld [vmem:[#allocation10 + $0x31c] ss:$36 sps:$4 sm:$0xff]  }
 0x47e   :  { %3877 = vmatprep.subr.bf16.mxu0 %v13447_v59  ;;  %13470 = vst [vmem:[#allocation54_spill] sm:$0xff] %v10567_v5  ;;  %v10571_v59 = vld [vmem:[#allocation10 + $0x318] ss:$36 sps:$4 sm:$0xff]  }
 0x47f   :  { %13471 = vst [vmem:[#allocation27_spill] sm:$0xff] %v10571_v59 }
 0x480   :  { %4112 = vmatpush1.bf16.msra.mxu1 %v10468_v55 }
 0x481   :  { %3878 = vmatpush2.bf16.msra.mxu0 %v13448_v0  ;;  %4113 = vmatprep.subr.bf16.mxu1 %v10472_v2  ;;  %v10574_v0 = vld [vmem:[#allocation10 + $0x530] ss:$36 sps:$4 sm:$0xff]  }
 0x482   :  { %3879 = vmatprep.subr.bf16.mxu0 %v13449_v11  ;;  %13472 = vst [vmem:[#allocation55_spill] sm:$0xff] %v10574_v0  ;;  %v10577_v11 = vld [vmem:[#allocation10 + $0x2d4] ss:$36 sps:$4 sm:$0xff]  }
 0x483   :  { %13473 = vst [vmem:[#allocation28_spill] sm:$0xff] %v10577_v11 }
 0x484   :  { %4114 = vmatpush1.bf16.msra.mxu1 %v10476_v9 }
 0x485   :  { %3880 = vmatpush2.bf16.msra.mxu0 %v13450_v41  ;;  %4115 = vmatprep.subr.bf16.mxu1 %v10480_v48  ;;  %v10581_v41 = vld [vmem:[#allocation10 + $0x2d0] ss:$36 sps:$4 sm:$0xff]  }
 0x486   :  { %3881 = vmatprep.subr.bf16.mxu0 %v13451_v50  ;;  %13474 = vst [vmem:[#allocation58_spill] sm:$0xff] %v10581_v41  ;;  %v10584_v50 = vld [vmem:[#allocation10 + $0x4e8] ss:$36 sps:$4 sm:$0xff]  }
 0x487   :  { %13475 = vst [vmem:[#allocation29_spill] sm:$0xff] %v10584_v50 }
 0x488   :  { %4116 = vmatpush1.bf16.msra.mxu1 %v10484_v6 }
 0x489   :  { %3882 = vmatpush2.bf16.msra.mxu0 %v10487_v10  ;;  %4117 = vmatprep.subr.bf16.mxu1 %v10490_v27 }
 0x48a   :  { %3883 = vmatprep.subr.bf16.mxu0 %v10493_v40 }
 0x48c   :  { %4118 = vmatpush1.bf16.msra.mxu1 %v10496_v58 }
 0x48d   :  { %3884 = vmatpush2.bf16.msra.mxu0 %v10499_v43  ;;  %4119 = vmatprep.subr.bf16.mxu1 %v10502_v3 }
 0x48e   :  { %3885 = vmatprep.subr.bf16.mxu0 %v10505_v51 }
 0x490   :  { %4120 = vmatpush1.bf16.msra.mxu1 %v10508_v60 }
 0x491   :  { %3886 = vmatpush2.bf16.msra.mxu0 %v10511_v22  ;;  %4121 = vmatprep.subr.bf16.mxu1 %v10514_v35 }
 0x492   :  { %7403 = vmatprep.subr.bf16.mxu0 %v13455_v23 }
 0x494   :  { %3888 = vmatmul.mubr.bf16.vlgmr.msra.gmra.mxu0 %v10254_v31  ;;  %4122 = vmatpush1.bf16.msra.mxu1 %v10519_v63  ;;  %v10534_v31 = vld [vmem:[#allocation10 + $0x650] ss:$36 sps:$4 sm:$0xff]  }
 0x495   :  { %7404 = vmatpush3.bf16.msra.mxu0 %v10522_v24  ;;  %7419 = vmatprep.mubr.msk.bf16.mxu0 %vm9160_vm1, %v13455_v23  ;;  %13460 = vst [vmem:[#allocation39_spill] sm:$0xff] %v10534_v31 }
 0x496   :  { %7405 = vmatprep.subr.bf16.mxu0 %v13455_v23  ;;  %4123 = vmatprep.subr.bf16.mxu1 %v10528_v56 }
 0x497   :  { %v3643_v39 = vpop.f32.mrf.mxu1 }
 0x498   :  { %4124 = vmatpush2.bf16.msra.mxu1 %v10531_v42 }
 0x499   :  { %7406 = vmatpush3.bf16.msra.mxu0 %v10534_v31  ;;  %v3645_v14 = vpop.f32.mrf.mxu1  ;;  %4125 = vmatprep.subr.bf16.mxu1 %v10537_v45 }
 0x49a   :  { %7407 = vmatprep.subr.bf16.mxu0 %v13455_v23 }
 0x49b   :  { %v3647_v54 = vpop.f32.mrf.mxu1 }
 0x49c   :  { %4126 = vmatpush2.bf16.msra.mxu1 %v10541_v18  ;;  %v10587_v54 = vld [vmem:[#allocation10 + $0x28c] ss:$36 sps:$4 sm:$0xff]  }
 0x49d   :  { %7408 = vmatpush3.bf16.msra.mxu0 %v10544_v20  ;;  %v3648_v15 = vpop.f32.mrf.mxu1  ;;  %4127 = vmatprep.subr.bf16.mxu1 %v10547_v8  ;;  %13476 = vst [vmem:[#allocation59_spill] sm:$0xff] %v10587_v54 }
 0x49e   :  { %7409 = vmatprep.subr.bf16.mxu0 %v13455_v23  ;;  %v10591_v15 = vld [vmem:[#allocation10 + $0x288] ss:$36 sps:$4 sm:$0xff]  }
 0x49f   :  { %13477 = vst [vmem:[#allocation30_spill] sm:$0xff] %v10591_v15 }
 0x4a0   :  { %4128 = vmatpush2.bf16.msra.mxu1 %v10551_v30 }
 0x4a1   :  { %7410 = vmatpush3.bf16.msra.mxu0 %v10554_v44  ;;  %4129 = vmatprep.subr.bf16.mxu1 %v10557_v47  ;;  %v10627_v47 = vld [vmem:[#allocation10 + $0x5e8] ss:$36 sps:$4 sm:$0xff]  }
 0x4a2   :  { %7411 = vmatprep.subr.bf16.mxu0 %v13455_v23  ;;  %13487 = vst [vmem:[#allocation49_spill] sm:$0xff] %v10627_v47 }
 0x4a4   :  { %4130 = vmatpush2.bf16.msra.mxu1 %v10561_v7 }
 0x4a5   :  { %7412 = vmatpush3.bf16.msra.mxu0 %v10564_v32  ;;  %4131 = vmatprep.subr.bf16.mxu1 %v10567_v5  ;;  %v10615_v5 = vld [vmem:[#allocation10 + $0x634] ss:$36 sps:$4 sm:$0xff]   ;;  %v10624_v32 = vld [vmem:[#allocation10 + $0x5ec] ss:$36 sps:$4 sm:$0xff]  }
 0x4a6   :  { %7413 = vmatprep.subr.bf16.mxu0 %v13455_v23  ;;  %13484 = vst [vmem:[#allocation44_spill] sm:$0xff] %v10615_v5  ;;  %13486 = vst [vmem:[#allocation48_spill] sm:$0xff] %v10624_v32 }
 0x4a8   :  { %4132 = vmatpush2.bf16.msra.mxu1 %v10571_v59  ;;  %v10609_v59 = vld [vmem:[#allocation10 + $0x678] ss:$36 sps:$4 sm:$0xff]  }
 0x4a9   :  { %7414 = vmatpush3.bf16.msra.mxu0 %v10574_v0  ;;  %4133 = vmatprep.subr.bf16.mxu1 %v10577_v11  ;;  %v10594_v11 = vld [vmem:[#allocation10 + $0x4a0] ss:$36 sps:$4 sm:$0xff]   ;;  %13482 = vst [vmem:[#allocation40_spill] sm:$0xff] %v10609_v59 }
 0x4aa   :  { %7415 = vmatprep.subr.bf16.mxu0 %v13455_v23  ;;  %13478 = vst [vmem:[#allocation32_spill] sm:$0xff] %v10594_v11  ;;  %v10597_v0 = vld [vmem:[#allocation10 + $0x244] ss:$36 sps:$4 sm:$0xff]  }
 0x4ab   :  { %13479 = vst [vmem:[#allocation33_spill] sm:$0xff] %v10597_v0 }
 0x4ac   :  { %4134 = vmatpush2.bf16.msra.mxu1 %v10581_v41  ;;  %v10600_v41 = vld [vmem:[#allocation10 + $0x67c] ss:$36 sps:$4 sm:$0xff]  }
 0x4ad   :  { %7416 = vmatpush3.bf16.msra.mxu0 %v10584_v50  ;;  %4135 = vmatprep.subr.bf16.mxu1 %v10587_v54  ;;  %13480 = vst [vmem:[#allocation36_spill] sm:$0xff] %v10600_v41  ;;  %v10604_v50 = vld [vmem:[#allocation10 + $0x240] ss:$36 sps:$4 sm:$0xff]  }
 0x4ae   :  { %7417 = vmatprep.subr.bf16.mxu0 %v13455_v23  ;;  %13481 = vst [vmem:[#allocation37_spill] sm:$0xff] %v10604_v50 }
 0x4b0   :  { %4136 = vmatpush2.bf16.msra.mxu1 %v10591_v15 }
 0x4b1   :  { %7418 = vmatpush3.bf16.msra.mxu0 %v10594_v11  ;;  %4137 = vmatprep.subr.bf16.mxu1 %v10597_v0  ;;  %v10612_v11 = vld [vmem:[#allocation10 + $0x684] ss:$36 sps:$4 sm:$0xff]  }
 0x4b2   :  { %4148 = vmatprep.subr.bf16.mxu0 %v10600_v41  ;;  %13483 = vst [vmem:[#allocation41_spill] sm:$0xff] %v10612_v11  ;;  %v10621_v41 = vld [vmem:[#allocation10 + $0x630] ss:$36 sps:$4 sm:$0xff]  }
 0x4b3   :  { %13485 = vst [vmem:[#allocation45_spill] sm:$0xff] %v10621_v41 }
 0x4b4   :  { %7420 = vmatmul.mubr.bf16.vlgmr.msra.gmra.mxu0 %v10281_v61  ;;  %v3684_v54 = vpop.f32.mrf.mxu0  ;;  %4138 = vmatpush2.bf16.msra.mxu1 %v10604_v50 }
 0x4b5   :  { %v10607_v15 = vadd.f32 %v3684_v54, %v3643_v39  ;;  %4149 = vmatpush1.bf16.msra.mxu0 %v10609_v59  ;;  %4230 = vmatprep.subr.bf16.mxu1 %v10612_v11 }
 0x4b6   :  { %v3686_v0 = vpop.f32.mrf.mxu0  ;;  %4150 = vmatprep.subr.bf16.mxu0 %v10615_v5  ;;  %4180 = vmatprep.mubr.bf16.mxu0 %v13182_v19 }
 0x4b7   :  { %v10619_v61 = vadd.f32 %v3686_v0, %v3645_v14  ;;  %v3766_v50 = vpop.f32.mrf.mxu1  ;;  %v10630_v14 = vld [vmem:[#allocation10 + $0x5a4] ss:$36 sps:$4 sm:$0xff]  }
 0x4b8   :  { %v3688_v39 = vpop.f32.mrf.mxu0  ;;  %13488 = vst [vmem:[#allocation52_spill] sm:$0xff] %v10630_v14  ;;  %v10633_v0 = vld [vmem:[#allocation10 + $0x5a0] ss:$36 sps:$4 sm:$0xff]  }
 0x4b9   :  { %v3768_v54 = vpop.f32.mrf.mxu1  ;;  %4151 = vmatpush1.bf16.msra.mxu0 %v10621_v41  ;;  %13489 = vst [vmem:[#allocation53_spill] sm:$0xff] %v10633_v0  ;;  %v10636_v39 = vld [vmem:[#allocation10 + $0x55c] ss:$36 sps:$4 sm:$0xff]  }
 0x4ba   :  { %v3689_v59 = vpop.f32.mrf.mxu0  ;;  %4152 = vmatprep.subr.bf16.mxu0 %v10624_v32  ;;  %13490 = vst [vmem:[#allocation56_spill] sm:$0xff] %v10636_v39 }
 0x4bb   :  { %v3770_v11 = vpop.f32.mrf.mxu1  ;;  %v10639_v59 = vld [vmem:[#allocation10 + $0x558] ss:$36 sps:$4 sm:$0xff]  }
 0x4bc   :  { %13491 = vst [vmem:[#allocation57_spill] sm:$0xff] %v10639_v59  ;;  %v10645_v11 = vld [vmem:[#allocation10 + $0x510] ss:$36 sps:$4 sm:$0xff]  }
 0x4bd   :  { %v3771_v7 = vpop.f32.mrf.mxu1  ;;  %4153 = vmatpush1.bf16.msra.mxu0 %v10627_v47  ;;  %13493 = vst [vmem:[#allocation61_spill] sm:$0xff] %v10645_v11  ;;  %v3602_v47 = vld [vmem:[#allocation3 + $0x50] sm:$0xff] }
 0x4be   :  { %4154 = vmatprep.subr.bf16.mxu0 %v10630_v14  ;;  %v10642_v7 = vld [vmem:[#allocation10 + $0x514] ss:$36 sps:$4 sm:$0xff]   ;;  %v10648_v14 = vld [vmem:[#allocation10 + $0x4cc] ss:$36 sps:$4 sm:$0xff]   ;;  %v4043_v32 = vrot.slane %v3602_v47, 4 }
 0x4bf   :  { %13492 = vst [vmem:[#allocation60_spill] sm:$0xff] %v10642_v7  ;;  %13494 = vst [vmem:[#allocation62_spill] sm:$0xff] %v10648_v14 }
 0x4c1   :  { %4155 = vmatpush1.bf16.msra.mxu0 %v10633_v0  ;;  %v10651_v0 = vld [vmem:[#allocation10 + $0x4c8] ss:$36 sps:$4 sm:$0xff]  }
 0x4c2   :  { %4156 = vmatprep.subr.bf16.mxu0 %v10636_v39  ;;  %13495 = vst [vmem:[#allocation63_spill] sm:$0xff] %v10651_v0  ;;  %v10654_v39 = vld [vmem:[#allocation10 + $0x484] ss:$36 sps:$4 sm:$0xff]  }
 0x4c3   :  { %13496 = vst [vmem:[#allocation64_spill] sm:$0xff] %v10654_v39 }
 0x4c5   :  { %4157 = vmatpush1.bf16.msra.mxu0 %v10639_v59  ;;  %v10657_v59 = vld [vmem:[#allocation10 + $0x480] ss:$36 sps:$4 sm:$0xff]  }
 0x4c6   :  { %4158 = vmatprep.subr.bf16.mxu0 %v10642_v7  ;;  %13497 = vst [vmem:[#allocation65_spill] sm:$0xff] %v10657_v59  ;;  %v10660_v7 = vld [vmem:[#allocation10 + $0x204] ss:$36 sps:$4 sm:$0xff]  }
 0x4c7   :  { %13498 = vst [vmem:[#allocation66_spill] sm:$0xff] %v10660_v7 }
 0x4c9   :  { %4159 = vmatpush1.bf16.msra.mxu0 %v10645_v11  ;;  %v10663_v11 = vld [vmem:[#allocation3 + $0x58] sm:$0xff] }
 0x4ca   :  { %4160 = vmatprep.subr.bf16.mxu0 %v10648_v14  ;;  %v12859_v14 = vrot.slane %v10663_v11, 4 }
 0x4cd   :  { %4161 = vmatpush1.bf16.msra.mxu0 %v10651_v0  ;;  %v4045_v0 = vsel %vm3048_vm0, %v4043_v32, %v12859_v14 }
 0x4ce   :  { %4162 = vmatprep.subr.bf16.mxu0 %v10654_v39  ;;  %v4048_v30 = vunpack.c.l.bf16 %v4045_v0  ;;  %v4049_v24 = vunpack.c.h.bf16 %v4045_v0 }
 0x4d1   :  { %4163 = vmatpush1.bf16.msra.mxu0 %v10657_v59 }
 0x4d2   :  { %4189 = vmatprep.subr.bf16.mxu0 %v10660_v7 }
 0x4f4   :  { %v3725_v41 = vpop.f32.mrf.mxu0 }
 0x4f5   :  { %v3767_v39 = vadd.f32 %v3766_v50, %v3725_v41 }
 0x4f6   :  { %v3727_v5 = vpop.f32.mrf.mxu0 }
 0x4f7   :  { %v3769_v44 = vadd.f32 %v3768_v54, %v3727_v5  ;;  %v3807_v59 = vpop.f32.mrf.mxu1  ;;  %v3601_v54 = vld [vmem:[#allocation3 + $0x48] sm:$0xff] }
 0x4f8   :  { %v3729_v8 = vpop.f32.mrf.mxu0  ;;  %v4017_v14 = vunpack.c.l.bf16 %v3601_v54 }
 0x4f9   :  { %v4051_v20 = vadd.f32 %v4048_v30, %v3769_v44  ;;  %v3809_v18 = vpop.f32.mrf.mxu1  ;;  %v4018_v30 = vunpack.c.h.bf16 %v3601_v54 }
 0x4fa   :  { %v3730_v7 = vpop.f32.mrf.mxu0  ;;  %v4020_v8 = vadd.f32 %v4017_v14, %v10607_v15 }
 0x4fb   :  { %v3811_v45 = vpop.f32.mrf.mxu1 }
 0x4fc   :  { %v4021_v45 = vadd.f32 %v4018_v30, %v10619_v61  ;;  %v4019_v61 = vunpack.c.l.bf16 %v3602_v47 }
 0x4fd   :  { %v3812_v31 = vpop.f32.mrf.mxu1 }
 0x4fe   :  { %v7001_v31 = vmul.f32 -1.442695, %v4020_v8  ;;  %v7002_v44 = vmul.f32 -1.442695, %v4021_v45  ;;  %v4022_v14 = vadd.f32 %v4019_v61, %v3767_v39  ;;  %v3604_v45 = vld [vmem:[#allocation3 + $0x60] sm:$0xff] }
 0x500   :  { %8017 = vpow2.f32 %v7001_v31 }
 0x501   :  { %8019 = vpow2.f32 %v7002_v44 }
 0x50d   :  { %v8018_v0 = vpop.eup %8017 }
 0x50e   :  { %v4032_v7 = vadd.f32 1.0, %v8018_v0  ;;  %v4079_v0 = vunpack.c.h.bf16 %v3604_v45 }
 0x514   :  { %v3848_v42 = vpop.f32.mrf.mxu0 }
 0x515   :  { %v3849_v56 = vadd.f32 %v3848_v42, %v3807_v59  ;;  %v8020_v59 = vpop.eup %8019 }
 0x516   :  { %v3850_v63 = vpop.f32.mrf.mxu0  ;;  %v4033_v15 = vadd.f32 1.0, %v8020_v59 }
 0x517   :  { %v4052_v23 = vadd.f32 %v4049_v24, %v3849_v56  ;;  %v3851_v35 = vadd.f32 %v3850_v63, %v3809_v18  ;;  %v3930_v22 = vpop.f32.mrf.mxu1  ;;  %v7004_v56 = vmul.f32 -1.442695, %v4051_v20 }
 0x518   :  { %v3852_v60 = vpop.f32.mrf.mxu0 }
 0x519   :  { %v3932_v32 = vpop.f32.mrf.mxu1  ;;  %v7005_v18 = vmul.f32 -1.442695, %v4052_v23  ;;  %8021 = vpow2.f32 %v7004_v56 }
 0x51a   :  { %v3853_v41 = vpop.f32.mrf.mxu0 }
 0x51b   :  { %v3934_v50 = vpop.f32.mrf.mxu1  ;;  %8023 = vpow2.f32 %v7005_v18  ;;  %v4078_v18 = vunpack.c.l.bf16 %v3604_v45 }
 0x51c   :  { %8025 = vrcp.f32 %v4032_v7  ;;  %v7003_v50 = vmul.f32 -1.442695, %v4022_v14 }
 0x51d   :  { %v3935_v5 = vpop.f32.mrf.mxu1  ;;  %8027 = vrcp.f32 %v4033_v15 }
 0x51e   :  { %8029 = vpow2.f32 %v7003_v50 }
 0x526   :  { %v8022_v41 = vpop.eup %8021 }
 0x527   :  { %v4063_v8 = vadd.f32 1.0, %v8022_v41 }
 0x528   :  { %v8024_v5 = vpop.eup %8023 }
 0x529   :  { %v4064_v23 = vadd.f32 1.0, %v8024_v5  ;;  %8031 = vrcp.f32 %v4063_v8 }
 0x52b   :  { %8033 = vrcp.f32 %v4064_v23 }
 0x537   :  { %v10671_v42 = vpop.f32.mrf.mxu1 }
 0x539   :  { %v10673_v63 = vpop.f32.mrf.mxu1 }
 0x53b   :  { %v7172_v60 = vpop.f32.mrf.mxu1 }
 0x53c   :  { %v8026_v60 = vpop.eup %8025 }
 0x53d   :  { %v7173_v24 = vpop.f32.mrf.mxu1  ;;  %v8028_v39 = vpop.eup %8027 }
 0x53e   :  { %v8030_v50 = vpop.eup %8029 }
 0x53f   :  { %v8032_v5 = vpop.eup %8031 }
 0x540   :  { %v8034_v8 = vpop.eup %8033 }
 0x541   :  { %v4088_v45 = vsub.f32 1.0, %v8034_v8 }
 0x554   :  { %v3889_v54 = vpop.f32.mrf.mxu0 }
 0x555   :  { %v3931_v30 = vadd.f32 %v3930_v22, %v3889_v54  ;;  %v13499_v22 = vrot.slane %v10663_v11, 4  ;;  %v4034_v54 = vadd.f32 1.0, %v8030_v50  ;;  %v4093_v11 = vmul.f32 %v8032_v5, %v10244_v28 }
 0x556   :  { %v3891_v31 = vpop.f32.mrf.mxu0  ;;  %v7171_v28 = vadd.f32 %v10673_v63, %v10671_v42 }
 0x557   :  { %v4072_v20 = vadd.f32 %v3931_v30, %v9668_v13  ;;  %v3933_v44 = vadd.f32 %v3932_v32, %v3891_v31  ;;  %v4050_v7 = vunpack.c.l.bf16 %v13499_v22  ;;  %v4087_v30 = vsub.f32 1.0, %v8032_v5  ;;  %v3605_v22 = vld [vmem:[#allocation3 + $0x68] sm:$0xf]  ;;  %v10708_v5 = vld [vmem:[#allocation10 + $0x5f4] ss:$36 sps:$4 sm:$0xff]  }
 0x558   :  { %v3893_v24 = vpop.f32.mrf.mxu0 }
 0x559   :  { %v4075_v56 = vmul.f32 %v8026_v60, %v4072_v20  ;;  %v4073_v47 = vadd.f32 %v3933_v44, %v9671_v12  ;;  %v4053_v14 = vadd.f32 %v4050_v7, %v3851_v35  ;;  %v4094_v35 = vmul.f32 %v8034_v8, %v10246_v34  ;;  %v10711_v8 = vld [vmem:[#allocation10 + $0x5f0] ss:$36 sps:$4 sm:$0xff]  }
 0x55a   :  { %v3894_v59 = vpop.f32.mrf.mxu0 }
 0x55b   :  { %v4081_v15 = vadd.f32 %v4078_v18, %v4075_v56  ;;  %v4076_v61 = vmul.f32 %v8028_v39, %v4073_v47  ;;  %v7006_v32 = vmul.f32 -1.442695, %v4053_v14  ;;  %v10697_v59 = vld [vmem:[#allocation10 + $0x680] ss:$36 sps:$4 sm:$0xff]  }
 0x55d   :  { %8035 = vtanh.f32 %v4081_v15  ;;  %v4082_v41 = vadd.f32 %v4079_v0, %v4076_v61  ;;  %v10701_v15 = vld [vmem:[#allocation10 + $0x63c] ss:$36 sps:$4 sm:$0xff]  }
 0x55f   :  { %8037 = vtanh.f32 %v4082_v41  ;;  %v4080_v41 = vunpack.c.l.bf16 %v3605_v22 }
 0x560   :  { %8039 = vpow2.f32 %v7006_v32  ;;  %v10705_v32 = vld [vmem:[#allocation10 + $0x638] ss:$36 sps:$4 sm:$0xff]  }
 0x561   :  { %8041 = vrcp.f32 %v4034_v54 }
 0x56a   :  { %v8036_v31 = vpop.eup %8035 }
 0x56b   :  { %v4090_v23 = vmul.f32 %v8036_v31, %v4087_v30  ;;  %v10714_v30 = vld [vmem:[#allocation10 + $0x5ac] ss:$36 sps:$4 sm:$0xff]  }
 0x56c   :  { %v8038_v20 = vpop.eup %8037  ;;  %v10717_v31 = vld [vmem:[#allocation10 + $0x5a8] ss:$36 sps:$4 sm:$0xff]  }
 0x56d   :  { %v4091_v44 = vmul.f32 %v8038_v20, %v4088_v45  ;;  %v10681_v60 = vadd.f32 %v4093_v11, %v4090_v23  ;;  %v8040_v18 = vpop.eup %8039  ;;  %v10720_v45 = vld [vmem:[#allocation10 + $0x564] ss:$36 sps:$4 sm:$0xff]   ;;  %v10726_v20 = vld [vmem:[#allocation10 + $0x51c] ss:$36 sps:$4 sm:$0xff]  }
 0x56e   :  { %v4065_v34 = vadd.f32 1.0, %v8040_v18  ;;  %v8042_v63 = vpop.eup %8041  ;;  %v10723_v23 = vld [vmem:[#allocation10 + $0x560] ss:$36 sps:$4 sm:$0xff]  }
 0x56f   :  { %v10683_v24 = vadd.f32 %v4094_v35, %v4091_v44  ;;  %v10691_v47 = vpack.c.bf16 %v10681_v60, %v10681_v60  ;;  %v10729_v44 = vld [vmem:[#allocation10 + $0x518] ss:$36 sps:$4 sm:$0xff]  }
 0x570   :  { %8043 = vrcp.f32 %v4065_v34 }
 0x571   :  { %v10687_v56 = vpack.c.bf16 %v10683_v24, %v10683_v24 }
 0x573   :  { %4139 = vmatprep.mubr.bf16.mxu1 %v10687_v56 }
 0x574   :  { %v4011_v39 = vpop.f32.mrf.mxu0  ;;  %4140 = vmatmul.mubr.bf16.vlgmr.msra.gmra.mxu1 %v10691_v47 }
 0x575   :  { %v4012_v0 = vadd.f32 %v7171_v28, %v4011_v39  ;;  %4231 = vmatpush1.bf16.msra.mxu1 %v10697_v59  ;;  %4262 = vmatprep.mubr.bf16.mxu1 %v13182_v19  ;;  %v10732_v28 = vld [vmem:[#allocation10 + $0x4d4] ss:$36 sps:$4 sm:$0xff]  }
 0x576   :  { %v7421_v7 = vpop.f32.mrf.mxu0  ;;  %4232 = vmatprep.subr.bf16.mxu1 %v10701_v15 }
 0x577   :  { %v4074_v42 = vadd.f32 %v4012_v0, %v9691_v49  ;;  %v10736_v0 = vld [vmem:[#allocation10 + $0x4d0] ss:$36 sps:$4 sm:$0xff]  }
 0x578   :  { %v4014_v61 = vpop.f32.mrf.mxu0  ;;  %v10741_v7 = vld [vmem:[#allocation10 + $0x48c] ss:$36 sps:$4 sm:$0xff]  }
 0x579   :  { %v4077_v14 = vmul.f32 %v8042_v63, %v4074_v42  ;;  %4233 = vmatpush1.bf16.msra.mxu1 %v10705_v32  ;;  %v10748_v63 = vld [vmem:[#allocation10 + $0x488] ss:$36 sps:$4 sm:$0xff]  }
 0x57a   :  { %v7422_v50 = vpop.f32.mrf.mxu0  ;;  %4234 = vmatprep.subr.bf16.mxu1 %v10708_v5  ;;  %v10756_v61 = vld [vmem:[#allocation10 + $0x20c] ss:$36 sps:$4 sm:$0xff]  }
 0x57b   :  { %v4083_v54 = vadd.f32 %v4080_v41, %v4077_v14  ;;  %v10759_v14 = vld [vmem:[#allocation10 + $0x1bc] ss:$36 sps:$4 sm:$0xff]   ;;  %v10763_v41 = vld [vmem:[#allocation10 + $0x208] ss:$36 sps:$4 sm:$0xff]  }
 0x57c   :  { %v10767_v50 = vld [vmem:[#allocation10 + $0x1b8] ss:$36 sps:$4 sm:$0xff]  }
 0x57d   :  { %8045 = vtanh.f32 %v4083_v54  ;;  %4235 = vmatpush1.bf16.msra.mxu1 %v10711_v8  ;;  %v8044_v11 = vpop.eup %8043  ;;  %v10770_v54 = vld [vmem:[#allocation10 + $0x1c4] ss:$36 sps:$4 sm:$0xff]  }
 0x57e   :  { %4236 = vmatprep.subr.bf16.mxu1 %v10714_v30  ;;  %v4089_v35 = vsub.f32 1.0, %v8044_v11  ;;  %v4095_v34 = vmul.f32 %v8044_v11, %v10276_v36  ;;  %v10752_v36 = vld [vmem:[#allocation10 + $0x200] ss:$36 sps:$4 sm:$0xff]   ;;  %13500 = vst [vmem:[#allocation67_spill] sm:$0xff] %v10770_v54  ;;  %v10773_v11 = vld [vmem:[#allocation10 + $0x174] ss:$36 sps:$4 sm:$0xff]  }
 0x57f   :  { %13501 = vst [vmem:[#allocation68_spill] sm:$0xff] %v10773_v11 }
 0x581   :  { %4237 = vmatpush1.bf16.msra.mxu1 %v10717_v31 }
 0x582   :  { %4238 = vmatprep.subr.bf16.mxu1 %v10720_v45 }
 0x585   :  { %4239 = vmatpush1.bf16.msra.mxu1 %v10723_v23 }
 0x586   :  { %4240 = vmatprep.subr.bf16.mxu1 %v10726_v20 }
 0x589   :  { %4241 = vmatpush1.bf16.msra.mxu1 %v10729_v44 }
 0x58a   :  { %v8046_v18 = vpop.eup %8045  ;;  %4242 = vmatprep.subr.bf16.mxu1 %v10732_v28 }
 0x58b   :  { %v4092_v39 = vmul.f32 %v8046_v18, %v4089_v35  ;;  %v10776_v35 = vld [vmem:[#allocation10 + $0x1c0] ss:$36 sps:$4 sm:$0xff]   ;;  %v10779_v18 = vld [vmem:[#allocation10 + $0x170] ss:$36 sps:$4 sm:$0xff]  }
 0x58c   :  { %13502 = vst [vmem:[#allocation69_spill] sm:$0xff] %v10776_v35  ;;  %13503 = vst [vmem:[#allocation70_spill] sm:$0xff] %v10779_v18 }
 0x58d   :  { %4243 = vmatpush1.bf16.msra.mxu1 %v10736_v0  ;;  %v10739_v22 = vadd.f32 %v4095_v34, %v4092_v39  ;;  %v10782_v39 = vld [vmem:[#allocation10 + $0x17c] ss:$36 sps:$4 sm:$0xff]   ;;  %v10785_v34 = vld [vmem:[#allocation10 + $0x12c] ss:$36 sps:$4 sm:$0xff]  }
 0x58e   :  { %4244 = vmatprep.subr.bf16.mxu1 %v10741_v7  ;;  %13504 = vst [vmem:[#allocation71_spill] sm:$0xff] %v10782_v39  ;;  %13505 = vst [vmem:[#allocation72_spill] sm:$0xff] %v10785_v34 }
 0x58f   :  { %v10746_v42 = vpack.c.bf16 %v10739_v22, %v10739_v22 }
 0x591   :  { %4245 = vmatpush1.bf16.msra.mxu1 %v10748_v63  ;;  %4181 = vmatmul.mubr.bf16.vlgmr.msra.gmra.mxu0 %v10746_v42 }
 0x592   :  { %4190 = vmatpush1.bf16.msra.mxu0 %v10752_v36  ;;  %4221 = vmatprep.mubr.bf16.mxu0 %v10687_v56 }
 0x593   :  { %4271 = vmatprep.subr.bf16.mxu1 %v10756_v61  ;;  %4191 = vmatprep.subr.bf16.mxu0 %v10759_v14 }
 0x594   :  { %4263 = vmatmul.mubr.bf16.vlgmr.msra.gmra.mxu1 %v10746_v42 }
 0x595   :  { %4272 = vmatpush1.bf16.msra.mxu1 %v10763_v41  ;;  %4303 = vmatprep.mubr.bf16.mxu1 %v10687_v56 }
 0x596   :  { %4192 = vmatpush1.bf16.msra.mxu0 %v10767_v50  ;;  %4273 = vmatprep.subr.bf16.mxu1 %v10770_v54  ;;  %v10788_v54 = vld [vmem:[#allocation10 + $0x178] ss:$36 sps:$4 sm:$0xff]  }
 0x597   :  { %4193 = vmatprep.subr.bf16.mxu0 %v10773_v11  ;;  %13506 = vst [vmem:[#allocation73_spill] sm:$0xff] %v10788_v54  ;;  %v10791_v11 = vld [vmem:[#allocation10 + $0x128] ss:$36 sps:$4 sm:$0xff]  }
 0x598   :  { %13507 = vst [vmem:[#allocation74_spill] sm:$0xff] %v10791_v11 }
 0x599   :  { %4274 = vmatpush1.bf16.msra.mxu1 %v10776_v35  ;;  %v10794_v35 = vld [vmem:[#allocation10 + $0x134] ss:$36 sps:$4 sm:$0xff]  }
 0x59a   :  { %4194 = vmatpush1.bf16.msra.mxu0 %v10779_v18  ;;  %4275 = vmatprep.subr.bf16.mxu1 %v10782_v39  ;;  %13508 = vst [vmem:[#allocation75_spill] sm:$0xff] %v10794_v35  ;;  %v10797_v18 = vld [vmem:[#allocation10 + $0xe4] ss:$36 sps:$4 sm:$0xff]   ;;  %v10800_v39 = vld [vmem:[#allocation10 + $0x130] ss:$36 sps:$4 sm:$0xff]  }
 0x59b   :  { %4195 = vmatprep.subr.bf16.mxu0 %v10785_v34  ;;  %13509 = vst [vmem:[#allocation76_spill] sm:$0xff] %v10797_v18  ;;  %13510 = vst [vmem:[#allocation77_spill] sm:$0xff] %v10800_v39  ;;  %v10803_v34 = vld [vmem:[#allocation10 + $0xe0] ss:$36 sps:$4 sm:$0xff]  }
 0x59c   :  { %13511 = vst [vmem:[#allocation78_spill] sm:$0xff] %v10803_v34 }
 0x59d   :  { %4276 = vmatpush1.bf16.msra.mxu1 %v10788_v54  ;;  %v10806_v54 = vld [vmem:[#allocation10 + $0xec] ss:$36 sps:$4 sm:$0xff]  }
 0x59e   :  { %4196 = vmatpush1.bf16.msra.mxu0 %v10791_v11  ;;  %4277 = vmatprep.subr.bf16.mxu1 %v10794_v35  ;;  %13512 = vst [vmem:[#allocation79_spill] sm:$0xff] %v10806_v54  ;;  %v10809_v11 = vld [vmem:[#allocation10 + $0x9c] ss:$36 sps:$4 sm:$0xff]   ;;  %v10812_v35 = vld [vmem:[#allocation10 + $0xe8] ss:$36 sps:$4 sm:$0xff]  }
 0x59f   :  { %4197 = vmatprep.subr.bf16.mxu0 %v10797_v18  ;;  %13513 = vst [vmem:[#allocation80_spill] sm:$0xff] %v10809_v11  ;;  %13514 = vst [vmem:[#allocation81_spill] sm:$0xff] %v10812_v35  ;;  %v10815_v18 = vld [vmem:[#allocation10 + $0x98] ss:$36 sps:$4 sm:$0xff]  }
 0x5a0   :  { %13515 = vst [vmem:[#allocation82_spill] sm:$0xff] %v10815_v18 }
 0x5a1   :  { %4278 = vmatpush1.bf16.msra.mxu1 %v10800_v39  ;;  %v10818_v39 = vld [vmem:[#allocation10 + $0xa4] ss:$36 sps:$4 sm:$0xff]  }
 0x5a2   :  { %4198 = vmatpush1.bf16.msra.mxu0 %v10803_v34  ;;  %4279 = vmatprep.subr.bf16.mxu1 %v10806_v54  ;;  %13516 = vst [vmem:[#allocation83_spill] sm:$0xff] %v10818_v39  ;;  %v10821_v34 = vld [vmem:[#allocation10 + $0x54] ss:$36 sps:$4 sm:$0xff]   ;;  %v10824_v54 = vld [vmem:[#allocation10 + $0xa0] ss:$36 sps:$4 sm:$0xff]  }
 0x5a3   :  { %4199 = vmatprep.subr.bf16.mxu0 %v10809_v11  ;;  %13517 = vst [vmem:[#allocation84_spill] sm:$0xff] %v10821_v34  ;;  %13518 = vst [vmem:[#allocation85_spill] sm:$0xff] %v10824_v54  ;;  %v10827_v11 = vld [vmem:[#allocation10 + $0x50] ss:$36 sps:$4 sm:$0xff]  }
 0x5a4   :  { %13519 = vst [vmem:[#allocation86_spill] sm:$0xff] %v10827_v11 }
 0x5a5   :  { %4280 = vmatpush1.bf16.msra.mxu1 %v10812_v35  ;;  %v10830_v35 = vld [vmem:[#allocation10 + $0x5c] ss:$36 sps:$4 sm:$0xff]  }
 0x5a6   :  { %4200 = vmatpush1.bf16.msra.mxu0 %v10815_v18  ;;  %4281 = vmatprep.subr.bf16.mxu1 %v10818_v39  ;;  %13520 = vst [vmem:[#allocation87_spill] sm:$0xff] %v10830_v35  ;;  %v10833_v18 = vld [vmem:[#allocation10 + $0xc] ss:$36 sps:$4 sm:$0xff]   ;;  %v10836_v39 = vld [vmem:[#allocation10 + $0x58] ss:$36 sps:$4 sm:$0xff]  }
 0x5a7   :  { %4201 = vmatprep.subr.bf16.mxu0 %v10821_v34  ;;  %13521 = vst [vmem:[#allocation88_spill] sm:$0xff] %v10833_v18  ;;  %13522 = vst [vmem:[#allocation89_spill] sm:$0xff] %v10836_v39  ;;  %v10839_v34 = vld [vmem:[#allocation10 + $0x8] ss:$36 sps:$4 sm:$0xff]  }
 0x5a8   :  { %13523 = vst [vmem:[#allocation90_spill] sm:$0xff] %v10839_v34 }
 0x5a9   :  { %4282 = vmatpush1.bf16.msra.mxu1 %v10824_v54  ;;  %v10842_v54 = vld [vmem:[#allocation10 + $0x14] ss:$36 sps:$4 sm:$0xff]  }
 0x5aa   :  { %4202 = vmatpush1.bf16.msra.mxu0 %v10827_v11  ;;  %4283 = vmatprep.subr.bf16.mxu1 %v10830_v35  ;;  %13524 = vst [vmem:[#allocation91_spill] sm:$0xff] %v10842_v54  ;;  %v10845_v11 = vld [vmem:[#allocation10 + $0x444] ss:$36 sps:$4 sm:$0xff]   ;;  %v10848_v35 = vld [vmem:[#allocation10 + $0x10] ss:$36 sps:$4 sm:$0xff]  }
 0x5ab   :  { %4203 = vmatprep.subr.bf16.mxu0 %v10833_v18  ;;  %13525 = vst [vmem:[#allocation92_spill] sm:$0xff] %v10845_v11  ;;  %13526 = vst [vmem:[#allocation93_spill] sm:$0xff] %v10848_v35  ;;  %v10851_v18 = vld [vmem:[#allocation10 + $0x440] ss:$36 sps:$4 sm:$0xff]  }
 0x5ac   :  { %13527 = vst [vmem:[#allocation94_spill] sm:$0xff] %v10851_v18 }
 0x5ad   :  { %4284 = vmatpush1.bf16.msra.mxu1 %v10836_v39  ;;  %v10854_v39 = vld [vmem:[#allocation10 + $0x44c] ss:$36 sps:$4 sm:$0xff]  }
 0x5ae   :  { %4204 = vmatpush1.bf16.msra.mxu0 %v10839_v34  ;;  %4285 = vmatprep.subr.bf16.mxu1 %v10842_v54  ;;  %13528 = vst [vmem:[#allocation95_spill] sm:$0xff] %v10854_v39  ;;  %v10857_v34 = vld [vmem:[#allocation10 + $0x3fc] ss:$36 sps:$4 sm:$0xff]   ;;  %v10860_v54 = vld [vmem:[#allocation10 + $0x448] ss:$36 sps:$4 sm:$0xff]  }
 0x5af   :  { %4205 = vmatprep.subr.bf16.mxu0 %v10845_v11  ;;  %13529 = vst [vmem:[#allocation96_spill] sm:$0xff] %v10857_v34  ;;  %13530 = vst [vmem:[#allocation97_spill] sm:$0xff] %v10860_v54  ;;  %v10863_v11 = vld [vmem:[#allocation10 + $0x3f8] ss:$36 sps:$4 sm:$0xff]  }
 0x5b0   :  { %13531 = vst [vmem:[#allocation98_spill] sm:$0xff] %v10863_v11 }
 0x5b1   :  { %4286 = vmatpush1.bf16.msra.mxu1 %v10848_v35  ;;  %v10866_v35 = vld [vmem:[#allocation10 + $0x404] ss:$36 sps:$4 sm:$0xff]  }
 0x5b2   :  { %4206 = vmatpush2.bf16.msra.mxu0 %v10851_v18  ;;  %4287 = vmatprep.subr.bf16.mxu1 %v10854_v39  ;;  %13532 = vst [vmem:[#allocation99_spill] sm:$0xff] %v10866_v35  ;;  %v10869_v18 = vld [vmem:[#allocation10 + $0x3b4] ss:$36 sps:$4 sm:$0xff]   ;;  %v10872_v39 = vld [vmem:[#allocation10 + $0x400] ss:$36 sps:$4 sm:$0xff]  }
 0x5b3   :  { %4207 = vmatprep.subr.bf16.mxu0 %v10857_v34  ;;  %13533 = vst [vmem:[#allocation100_spill] sm:$0xff] %v10869_v18  ;;  %13534 = vst [vmem:[#allocation101_spill] sm:$0xff] %v10872_v39  ;;  %v10875_v34 = vld [vmem:[#allocation10 + $0x3b0] ss:$36 sps:$4 sm:$0xff]  }
 0x5b4   :  { %13535 = vst [vmem:[#allocation102_spill] sm:$0xff] %v10875_v34 }
 0x5b5   :  { %4288 = vmatpush2.bf16.msra.mxu1 %v10860_v54  ;;  %v10878_v54 = vld [vmem:[#allocation10 + $0x3bc] ss:$36 sps:$4 sm:$0xff]  }
 0x5b6   :  { %4208 = vmatpush2.bf16.msra.mxu0 %v10863_v11  ;;  %4289 = vmatprep.subr.bf16.mxu1 %v10866_v35  ;;  %13536 = vst [vmem:[#allocation103_spill] sm:$0xff] %v10878_v54  ;;  %v10881_v11 = vld [vmem:[#allocation10 + $0x36c] ss:$36 sps:$4 sm:$0xff]   ;;  %v10884_v35 = vld [vmem:[#allocation10 + $0x3b8] ss:$36 sps:$4 sm:$0xff]  }
 0x5b7   :  { %4209 = vmatprep.subr.bf16.mxu0 %v10869_v18  ;;  %13537 = vst [vmem:[#allocation104_spill] sm:$0xff] %v10881_v11  ;;  %13538 = vst [vmem:[#allocation105_spill] sm:$0xff] %v10884_v35  ;;  %v10887_v18 = vld [vmem:[#allocation10 + $0x368] ss:$36 sps:$4 sm:$0xff]  }
 0x5b8   :  { %13539 = vst [vmem:[#allocation106_spill] sm:$0xff] %v10887_v18 }
 0x5b9   :  { %4290 = vmatpush2.bf16.msra.mxu1 %v10872_v39  ;;  %v10890_v39 = vld [vmem:[#allocation10 + $0x374] ss:$36 sps:$4 sm:$0xff]  }
 0x5ba   :  { %4210 = vmatpush2.bf16.msra.mxu0 %v10875_v34  ;;  %4291 = vmatprep.subr.bf16.mxu1 %v10878_v54  ;;  %13540 = vst [vmem:[#allocation107_spill] sm:$0xff] %v10890_v39  ;;  %v10893_v34 = vld [vmem:[#allocation10 + $0x324] ss:$36 sps:$4 sm:$0xff]   ;;  %v10896_v54 = vld [vmem:[#allocation10 + $0x370] ss:$36 sps:$4 sm:$0xff]  }
 0x5bb   :  { %4211 = vmatprep.subr.bf16.mxu0 %v10881_v11  ;;  %13541 = vst [vmem:[#allocation108_spill] sm:$0xff] %v10893_v34  ;;  %13542 = vst [vmem:[#allocation109_spill] sm:$0xff] %v10896_v54  ;;  %v10899_v11 = vld [vmem:[#allocation10 + $0x320] ss:$36 sps:$4 sm:$0xff]  }
 0x5bc   :  { %13543 = vst [vmem:[#allocation110_spill] sm:$0xff] %v10899_v11 }
 0x5bd   :  { %4292 = vmatpush2.bf16.msra.mxu1 %v10884_v35  ;;  %v10902_v35 = vld [vmem:[#allocation10 + $0x32c] ss:$36 sps:$4 sm:$0xff]  }
 0x5be   :  { %4212 = vmatpush2.bf16.msra.mxu0 %v10887_v18  ;;  %4293 = vmatprep.subr.bf16.mxu1 %v10890_v39  ;;  %13544 = vst [vmem:[#allocation111_spill] sm:$0xff] %v10902_v35  ;;  %v10905_v18 = vld [vmem:[#allocation10 + $0x2dc] ss:$36 sps:$4 sm:$0xff]   ;;  %v10908_v39 = vld [vmem:[#allocation10 + $0x328] ss:$36 sps:$4 sm:$0xff]  }
 0x5bf   :  { %4213 = vmatprep.subr.bf16.mxu0 %v10893_v34  ;;  %13545 = vst [vmem:[#allocation112_spill] sm:$0xff] %v10905_v18  ;;  %13546 = vst [vmem:[#allocation113_spill] sm:$0xff] %v10908_v39  ;;  %v10911_v34 = vld [vmem:[#allocation10 + $0x2d8] ss:$36 sps:$4 sm:$0xff]  }
 0x5c0   :  { %13547 = vst [vmem:[#allocation114_spill] sm:$0xff] %v10911_v34 }
 0x5c1   :  { %4294 = vmatpush2.bf16.msra.mxu1 %v10896_v54  ;;  %v10914_v54 = vld [vmem:[#allocation10 + $0x2e4] ss:$36 sps:$4 sm:$0xff]  }
 0x5c2   :  { %4214 = vmatpush2.bf16.msra.mxu0 %v10899_v11  ;;  %4295 = vmatprep.subr.bf16.mxu1 %v10902_v35  ;;  %13548 = vst [vmem:[#allocation115_spill] sm:$0xff] %v10914_v54  ;;  %v10917_v11 = vld [vmem:[#allocation10 + $0x294] ss:$36 sps:$4 sm:$0xff]   ;;  %v10920_v35 = vld [vmem:[#allocation10 + $0x2e0] ss:$36 sps:$4 sm:$0xff]  }
 0x5c3   :  { %4215 = vmatprep.subr.bf16.mxu0 %v10905_v18  ;;  %13549 = vst [vmem:[#allocation116_spill] sm:$0xff] %v10917_v11  ;;  %13550 = vst [vmem:[#allocation117_spill] sm:$0xff] %v10920_v35  ;;  %v10923_v18 = vld [vmem:[#allocation10 + $0x290] ss:$36 sps:$4 sm:$0xff]  }
 0x5c4   :  { %13551 = vst [vmem:[#allocation118_spill] sm:$0xff] %v10923_v18 }
 0x5c5   :  { %4296 = vmatpush2.bf16.msra.mxu1 %v10908_v39  ;;  %v10926_v39 = vld [vmem:[#allocation10 + $0x29c] ss:$36 sps:$4 sm:$0xff]  }
 0x5c6   :  { %4216 = vmatpush2.bf16.msra.mxu0 %v10911_v34  ;;  %4297 = vmatprep.subr.bf16.mxu1 %v10914_v54  ;;  %13552 = vst [vmem:[#allocation119_spill] sm:$0xff] %v10926_v39  ;;  %v10929_v34 = vld [vmem:[#allocation10 + $0x24c] ss:$36 sps:$4 sm:$0xff]   ;;  %v10932_v54 = vld [vmem:[#allocation10 + $0x298] ss:$36 sps:$4 sm:$0xff]  }
 0x5c7   :  { %4217 = vmatprep.subr.bf16.mxu0 %v10917_v11  ;;  %13553 = vst [vmem:[#allocation120_spill] sm:$0xff] %v10929_v34  ;;  %13554 = vst [vmem:[#allocation121_spill] sm:$0xff] %v10932_v54  ;;  %v10935_v11 = vld [vmem:[#allocation10 + $0x248] ss:$36 sps:$4 sm:$0xff]  }
 0x5c8   :  { %13555 = vst [vmem:[#allocation122_spill] sm:$0xff] %v10935_v11 }
 0x5c9   :  { %4298 = vmatpush2.bf16.msra.mxu1 %v10920_v35  ;;  %v10938_v35 = vld [vmem:[#allocation10 + $0x254] ss:$36 sps:$4 sm:$0xff]  }
 0x5ca   :  { %4218 = vmatpush2.bf16.msra.mxu0 %v10923_v18  ;;  %4299 = vmatprep.subr.bf16.mxu1 %v10926_v39  ;;  %13556 = vst [vmem:[#allocation123_spill] sm:$0xff] %v10938_v35  ;;  %v10941_v18 = vld [vmem:[#allocation10 + $0x68c] ss:$36 sps:$4 sm:$0xff]  }
 0x5cb   :  { %4219 = vmatprep.subr.bf16.mxu0 %v10929_v34  ;;  %13557 = vst [vmem:[#allocation124_spill] sm:$0xff] %v10941_v18  ;;  %v10945_v39 = vld [vmem:[#allocation10 + $0x250] ss:$36 sps:$4 sm:$0xff]   ;;  %v10948_v34 = vld [vmem:[#allocation10 + $0x688] ss:$36 sps:$4 sm:$0xff]  }
 0x5cc   :  { %13558 = vst [vmem:[#allocation125_spill] sm:$0xff] %v10945_v39  ;;  %13559 = vst [vmem:[#allocation126_spill] sm:$0xff] %v10948_v34 }
 0x5cd   :  { %4300 = vmatpush2.bf16.msra.mxu1 %v10932_v54  ;;  %v10951_v54 = vld [vmem:[#allocation10 + $0x694] ss:$36 sps:$4 sm:$0xff]  }
 0x5ce   :  { %4220 = vmatpush2.bf16.msra.mxu0 %v10935_v11  ;;  %4301 = vmatprep.subr.bf16.mxu1 %v10938_v35  ;;  %13560 = vst [vmem:[#allocation127_spill] sm:$0xff] %v10951_v54  ;;  %v10954_v11 = vld [vmem:[#allocation10 + $0x644] ss:$36 sps:$4 sm:$0xff]   ;;  %v10975_v35 = vld [vmem:[#allocation10 + $0x5f8] ss:$36 sps:$4 sm:$0xff]  }
 0x5cf   :  { %4312 = vmatprep.subr.bf16.mxu0 %v10941_v18  ;;  %13561 = vst [vmem:[#allocation128_spill] sm:$0xff] %v10954_v11  ;;  %v10959_v18 = vld [vmem:[#allocation10 + $0x690] ss:$36 sps:$4 sm:$0xff]   ;;  %13567 = vst [vmem:[#allocation134_spill] sm:$0xff] %v10975_v35 }
 0x5d0   :  { %13562 = vst [vmem:[#allocation129_spill] sm:$0xff] %v10959_v18 }
 0x5d1   :  { %4222 = vmatmul.mubr.bf16.vlgmr.msra.gmra.mxu0 %v10691_v47  ;;  %4302 = vmatpush2.bf16.msra.mxu1 %v10945_v39  ;;  %v10963_v39 = vld [vmem:[#allocation10 + $0x640] ss:$36 sps:$4 sm:$0xff]  }
 0x5d2   :  { %4313 = vmatpush1.bf16.msra.mxu0 %v10948_v34  ;;  %4394 = vmatprep.subr.bf16.mxu1 %v10951_v54  ;;  %13563 = vst [vmem:[#allocation130_spill] sm:$0xff] %v10963_v39  ;;  %v10966_v34 = vld [vmem:[#allocation10 + $0x64c] ss:$36 sps:$4 sm:$0xff]   ;;  %v10969_v54 = vld [vmem:[#allocation10 + $0x5fc] ss:$36 sps:$4 sm:$0xff]  }
 0x5d3   :  { %4314 = vmatprep.subr.bf16.mxu0 %v10954_v11  ;;  %4344 = vmatprep.mubr.bf16.mxu0 %v13182_v19  ;;  %13564 = vst [vmem:[#allocation131_spill] sm:$0xff] %v10966_v34  ;;  %13565 = vst [vmem:[#allocation132_spill] sm:$0xff] %v10969_v54  ;;  %v10972_v11 = vld [vmem:[#allocation10 + $0x648] ss:$36 sps:$4 sm:$0xff]  }
 0x5d4   :  { %4304 = vmatmul.mubr.bf16.vlgmr.msra.gmra.mxu1 %v10691_v47  ;;  %13566 = vst [vmem:[#allocation133_spill] sm:$0xff] %v10972_v11 }
 0x5d5   :  { %4395 = vmatpush1.bf16.msra.mxu1 %v10959_v18  ;;  %4426 = vmatprep.mubr.bf16.mxu1 %v13182_v19  ;;  %v10978_v18 = vld [vmem:[#allocation10 + $0x604] ss:$36 sps:$4 sm:$0xff]  }
 0x5d6   :  { %4315 = vmatpush1.bf16.msra.mxu0 %v10963_v39  ;;  %4396 = vmatprep.subr.bf16.mxu1 %v10966_v34  ;;  %13568 = vst [vmem:[#allocation135_spill] sm:$0xff] %v10978_v18  ;;  %v10981_v39 = vld [vmem:[#allocation10 + $0x5b4] ss:$36 sps:$4 sm:$0xff]   ;;  %v10984_v34 = vld [vmem:[#allocation10 + $0x600] ss:$36 sps:$4 sm:$0xff]  }
 0x5d7   :  { %4316 = vmatprep.subr.bf16.mxu0 %v10969_v54  ;;  %13569 = vst [vmem:[#allocation136_spill] sm:$0xff] %v10981_v39  ;;  %13570 = vst [vmem:[#allocation137_spill] sm:$0xff] %v10984_v34  ;;  %v10987_v54 = vld [vmem:[#allocation10 + $0x5b0] ss:$36 sps:$4 sm:$0xff]  }
 0x5d8   :  { %13571 = vst [vmem:[#allocation138_spill] sm:$0xff] %v10987_v54 }
 0x5d9   :  { %4397 = vmatpush1.bf16.msra.mxu1 %v10972_v11  ;;  %v10990_v11 = vld [vmem:[#allocation10 + $0x5bc] ss:$36 sps:$4 sm:$0xff]  }
 0x5da   :  { %4317 = vmatpush1.bf16.msra.mxu0 %v10975_v35  ;;  %4398 = vmatprep.subr.bf16.mxu1 %v10978_v18  ;;  %13572 = vst [vmem:[#allocation139_spill] sm:$0xff] %v10990_v11  ;;  %v10993_v35 = vld [vmem:[#allocation10 + $0x56c] ss:$36 sps:$4 sm:$0xff]   ;;  %v10996_v18 = vld [vmem:[#allocation10 + $0x5b8] ss:$36 sps:$4 sm:$0xff]  }
 0x5db   :  { %4318 = vmatprep.subr.bf16.mxu0 %v10981_v39  ;;  %13573 = vst [vmem:[#allocation140_spill] sm:$0xff] %v10993_v35  ;;  %13574 = vst [vmem:[#allocation141_spill] sm:$0xff] %v10996_v18  ;;  %v10999_v39 = vld [vmem:[#allocation10 + $0x568] ss:$36 sps:$4 sm:$0xff]  }
 0x5dc   :  { %13575 = vst [vmem:[#allocation142_spill] sm:$0xff] %v10999_v39 }
 0x5dd   :  { %4399 = vmatpush1.bf16.msra.mxu1 %v10984_v34  ;;  %v11002_v34 = vld [vmem:[#allocation10 + $0x574] ss:$36 sps:$4 sm:$0xff]  }
 0x5de   :  { %4319 = vmatpush1.bf16.msra.mxu0 %v10987_v54  ;;  %4400 = vmatprep.subr.bf16.mxu1 %v10990_v11  ;;  %13576 = vst [vmem:[#allocation143_spill] sm:$0xff] %v11002_v34  ;;  %v11005_v54 = vld [vmem:[#allocation10 + $0x524] ss:$36 sps:$4 sm:$0xff]   ;;  %v11008_v11 = vld [vmem:[#allocation10 + $0x570] ss:$36 sps:$4 sm:$0xff]  }
 0x5df   :  { %4320 = vmatprep.subr.bf16.mxu0 %v10993_v35  ;;  %13577 = vst [vmem:[#allocation144_spill] sm:$0xff] %v11005_v54  ;;  %13578 = vst [vmem:[#allocation145_spill] sm:$0xff] %v11008_v11  ;;  %v11011_v35 = vld [vmem:[#allocation10 + $0x520] ss:$36 sps:$4 sm:$0xff]  }
 0x5e0   :  { %13579 = vst [vmem:[#allocation146_spill] sm:$0xff] %v11011_v35 }
 0x5e1   :  { %4401 = vmatpush1.bf16.msra.mxu1 %v10996_v18  ;;  %v11014_v18 = vld [vmem:[#allocation10 + $0x52c] ss:$36 sps:$4 sm:$0xff]  }
 0x5e2   :  { %4321 = vmatpush1.bf16.msra.mxu0 %v10999_v39  ;;  %4402 = vmatprep.subr.bf16.mxu1 %v11002_v34  ;;  %13580 = vst [vmem:[#allocation147_spill] sm:$0xff] %v11014_v18  ;;  %v11017_v39 = vld [vmem:[#allocation10 + $0x4dc] ss:$36 sps:$4 sm:$0xff]   ;;  %v11020_v34 = vld [vmem:[#allocation10 + $0x528] ss:$36 sps:$4 sm:$0xff]  }
 0x5e3   :  { %4322 = vmatprep.subr.bf16.mxu0 %v11005_v54  ;;  %13581 = vst [vmem:[#allocation148_spill] sm:$0xff] %v11017_v39  ;;  %13582 = vst [vmem:[#allocation149_spill] sm:$0xff] %v11020_v34  ;;  %v11023_v54 = vld [vmem:[#allocation10 + $0x4d8] ss:$36 sps:$4 sm:$0xff]  }
 0x5e4   :  { %13583 = vst [vmem:[#allocation150_spill] sm:$0xff] %v11023_v54 }
 0x5e5   :  { %4403 = vmatpush1.bf16.msra.mxu1 %v11008_v11  ;;  %v11026_v11 = vld [vmem:[#allocation10 + $0x4e4] ss:$36 sps:$4 sm:$0xff]  }
 0x5e6   :  { %4323 = vmatpush1.bf16.msra.mxu0 %v11011_v35  ;;  %4404 = vmatprep.subr.bf16.mxu1 %v11014_v18  ;;  %13584 = vst [vmem:[#allocation151_spill] sm:$0xff] %v11026_v11  ;;  %v11029_v35 = vld [vmem:[#allocation10 + $0x494] ss:$36 sps:$4 sm:$0xff]   ;;  %v11032_v18 = vld [vmem:[#allocation10 + $0x4e0] ss:$36 sps:$4 sm:$0xff]  }
 0x5e7   :  { %4324 = vmatprep.subr.bf16.mxu0 %v11017_v39  ;;  %13585 = vst [vmem:[#allocation152_spill] sm:$0xff] %v11029_v35  ;;  %13586 = vst [vmem:[#allocation153_spill] sm:$0xff] %v11032_v18  ;;  %v11035_v39 = vld [vmem:[#allocation10 + $0x490] ss:$36 sps:$4 sm:$0xff]  }
 0x5e8   :  { %13587 = vst [vmem:[#allocation154_spill] sm:$0xff] %v11035_v39 }
 0x5e9   :  { %4405 = vmatpush1.bf16.msra.mxu1 %v11020_v34  ;;  %v11038_v34 = vld [vmem:[#allocation10 + $0x49c] ss:$36 sps:$4 sm:$0xff]  }
 0x5ea   :  { %4325 = vmatpush1.bf16.msra.mxu0 %v11023_v54  ;;  %4406 = vmatprep.subr.bf16.mxu1 %v11026_v11  ;;  %13588 = vst [vmem:[#allocation155_spill] sm:$0xff] %v11038_v34  ;;  %v11041_v54 = vld [vmem:[#allocation10 + $0x214] ss:$36 sps:$4 sm:$0xff]  }
 0x5eb   :  { %4326 = vmatprep.subr.bf16.mxu0 %v11029_v35  ;;  %13589 = vst [vmem:[#allocation156_spill] sm:$0xff] %v11041_v54  ;;  %v11045_v11 = vld [vmem:[#allocation10 + $0x498] ss:$36 sps:$4 sm:$0xff]   ;;  %v11048_v35 = vld [vmem:[#allocation10 + $0x210] ss:$36 sps:$4 sm:$0xff]  }
 0x5ec   :  { %13590 = vst [vmem:[#allocation157_spill] sm:$0xff] %v11045_v11  ;;  %13591 = vst [vmem:[#allocation158_spill] sm:$0xff] %v11048_v35 }
 0x5ed   :  { %4407 = vmatpush1.bf16.msra.mxu1 %v11032_v18  ;;  %v11075_v18 = vld [vmem:[#allocation10 + $0x180] ss:$36 sps:$4 sm:$0xff]  }
 0x5ee   :  { %4327 = vmatpush1.bf16.msra.mxu0 %v11035_v39  ;;  %4408 = vmatprep.subr.bf16.mxu1 %v11038_v34  ;;  %v11052_v39 = vld [vmem:[#allocation10 + $0x458] ss:$36 sps:$4 sm:$0xff]   ;;  %v11055_v34 = vld [vmem:[#allocation10 + $0x1cc] ss:$36 sps:$4 sm:$0xff]   ;;  %13597 = vst [vmem:[#allocation164_spill] sm:$0xff] %v11075_v18 }
 0x5ef   :  { %4353 = vmatprep.subr.bf16.mxu0 %v11041_v54  ;;  %13592 = vst [vmem:[#allocation159_spill] sm:$0xff] %v11052_v39  ;;  %13593 = vst [vmem:[#allocation160_spill] sm:$0xff] %v11055_v34  ;;  %v11059_v54 = vld [vmem:[#allocation10 + $0x218] ss:$36 sps:$4 sm:$0xff]  }
 0x5f1   :  { %4345 = vmatmul.mubr.bf16.vlgmr.msra.gmra.mxu0 %v10746_v42  ;;  %4409 = vmatpush1.bf16.msra.mxu1 %v11045_v11  ;;  %v11063_v11 = vld [vmem:[#allocation10 + $0x1c8] ss:$36 sps:$4 sm:$0xff]  }
 0x5f2   :  { %4354 = vmatpush1.bf16.msra.mxu0 %v11048_v35  ;;  %4385 = vmatprep.mubr.bf16.mxu0 %v10687_v56  ;;  %13594 = vst [vmem:[#allocation161_spill] sm:$0xff] %v11063_v11  ;;  %v11066_v35 = vld [vmem:[#allocation10 + $0x410] ss:$36 sps:$4 sm:$0xff]  }
 0x5f3   :  { %7184 = vmatprep.subr.bf16.mxu1 %v11052_v39  ;;  %4355 = vmatprep.subr.bf16.mxu0 %v11055_v34  ;;  %13595 = vst [vmem:[#allocation162_spill] sm:$0xff] %v11066_v35  ;;  %v11069_v39 = vld [vmem:[#allocation10 + $0x184] ss:$36 sps:$4 sm:$0xff]   ;;  %v11072_v34 = vld [vmem:[#allocation10 + $0x1d0] ss:$36 sps:$4 sm:$0xff]  }
 0x5f4   :  { %4427 = vmatmul.mubr.bf16.vlgmr.msra.gmra.mxu1 %v10746_v42  ;;  %13596 = vst [vmem:[#allocation163_spill] sm:$0xff] %v11072_v34 }
 0x5f5   :  { %7185 = vmatpush3.bf16.msra.mxu1 %v11059_v54  ;;  %4467 = vmatprep.mubr.bf16.mxu1 %v10687_v56  ;;  %v11078_v56 = vld [vmem:[#allocation10 + $0x3c8] ss:$36 sps:$4 sm:$0xff]  }
 0x5f6   :  { %4356 = vmatpush1.bf16.msra.mxu0 %v11063_v11  ;;  %7186 = vmatprep.subr.bf16.mxu1 %v11066_v35  ;;  %v11081_v11 = vld [vmem:[#allocation10 + $0x13c] ss:$36 sps:$4 sm:$0xff]  }
 0x5f7   :  { %4357 = vmatprep.subr.bf16.mxu0 %v11069_v39  ;;  %13598 = vst [vmem:[#allocation165_spill] sm:$0xff] %v11081_v11  ;;  %v11085_v35 = vld [vmem:[#allocation10 + $0x138] ss:$36 sps:$4 sm:$0xff]  }
 0x5f9   :  { %7187 = vmatpush3.bf16.msra.mxu1 %v11072_v34  ;;  %v11089_v34 = vld [vmem:[#allocation10 + $0xf4] ss:$36 sps:$4 sm:$0xff]  }
 0x5fa   :  { %4358 = vmatpush1.bf16.msra.mxu0 %v11075_v18  ;;  %7188 = vmatprep.subr.bf16.mxu1 %v11078_v56  ;;  %v11093_v18 = vld [vmem:[#allocation10 + $0xf0] ss:$36 sps:$4 sm:$0xff]  }
 0x5fb   :  { %4359 = vmatprep.subr.bf16.mxu0 %v11081_v11  ;;  %v11097_v11 = vld [vmem:[#allocation10 + $0xac] ss:$36 sps:$4 sm:$0xff]  }
 0x5fd   :  { %7189 = vmatpush3.bf16.msra.mxu1 %v10403_v52  ;;  %v11101_v52 = vld [vmem:[#allocation10 + $0xa8] ss:$36 sps:$4 sm:$0xff]  }
 0x5fe   :  { %4360 = vmatpush1.bf16.msra.mxu0 %v11085_v35  ;;  %7190 = vmatprep.subr.bf16.mxu1 %v10407_v4  ;;  %v11105_v4 = vld [vmem:[#allocation10 + $0x64] ss:$36 sps:$4 sm:$0xff]  }
 0x5ff   :  { %4361 = vmatprep.subr.bf16.mxu0 %v11089_v34  ;;  %13599 = vst [vmem:[#allocation166_spill] sm:$0xff] %v11105_v4 }
 0x601   :  { %7191 = vmatpush3.bf16.msra.mxu1 %v10411_v33  ;;  %v11109_v33 = vld [vmem:[#allocation10 + $0x60] ss:$36 sps:$4 sm:$0xff]  }
 0x602   :  { %4362 = vmatpush1.bf16.msra.mxu0 %v11093_v18  ;;  %7192 = vmatprep.subr.bf16.mxu1 %v10415_v25  ;;  %13600 = vst [vmem:[#allocation167_spill] sm:$0xff] %v11109_v33  ;;  %v11113_v25 = vld [vmem:[#allocation10 + $0x1c] ss:$36 sps:$4 sm:$0xff]  }
 0x603   :  { %4363 = vmatprep.subr.bf16.mxu0 %v11097_v11  ;;  %13601 = vst [vmem:[#allocation168_spill] sm:$0xff] %v11113_v25 }
 0x605   :  { %7193 = vmatpush3.bf16.msra.mxu1 %v10419_v38  ;;  %v11117_v38 = vld [vmem:[#allocation10 + $0x18] ss:$36 sps:$4 sm:$0xff]  }
 0x606   :  { %4364 = vmatpush1.bf16.msra.mxu0 %v11101_v52  ;;  %7194 = vmatprep.subr.bf16.mxu1 %v10423_v16  ;;  %13602 = vst [vmem:[#allocation169_spill] sm:$0xff] %v11117_v38  ;;  %v11121_v16 = vld [vmem:[#allocation10 + $0x454] ss:$36 sps:$4 sm:$0xff]  }
 0x607   :  { %4365 = vmatprep.subr.bf16.mxu0 %v11105_v4  ;;  %13603 = vst [vmem:[#allocation170_spill] sm:$0xff] %v11121_v16 }
 0x609   :  { %7195 = vmatpush3.bf16.msra.mxu1 %v10427_v62  ;;  %v11125_v62 = vld [vmem:[#allocation10 + $0x450] ss:$36 sps:$4 sm:$0xff]  }
 0x60a   :  { %4366 = vmatpush1.bf16.msra.mxu0 %v11109_v33  ;;  %7196 = vmatprep.subr.bf16.mxu1 %v10431_v1  ;;  %13604 = vst [vmem:[#allocation171_spill] sm:$0xff] %v11125_v62  ;;  %v11129_v1 = vld [vmem:[#allocation10 + $0x40c] ss:$36 sps:$4 sm:$0xff]  }
 0x60b   :  { %4367 = vmatprep.subr.bf16.mxu0 %v11113_v25  ;;  %13605 = vst [vmem:[#allocation172_spill] sm:$0xff] %v11129_v1 }
 0x60d   :  { %7197 = vmatpush3.bf16.msra.mxu1 %v10435_v37  ;;  %v11134_v37 = vld [vmem:[#allocation10 + $0x408] ss:$36 sps:$4 sm:$0xff]  }
 0x60e   :  { %4368 = vmatpush1.bf16.msra.mxu0 %v11117_v38  ;;  %7198 = vmatprep.subr.bf16.mxu1 %v10439_v26  ;;  %13606 = vst [vmem:[#allocation173_spill] sm:$0xff] %v11134_v37  ;;  %v11138_v26 = vld [vmem:[#allocation10 + $0x3c4] ss:$36 sps:$4 sm:$0xff]  }
 0x60f   :  { %4369 = vmatprep.subr.bf16.mxu0 %v11121_v16  ;;  %13607 = vst [vmem:[#allocation174_spill] sm:$0xff] %v11138_v26 }
 0x611   :  { %7199 = vmatpush3.bf16.msra.mxu1 %v10443_v29  ;;  %v11142_v29 = vld [vmem:[#allocation10 + $0x3c0] ss:$36 sps:$4 sm:$0xff]  }
 0x612   :  { %4370 = vmatpush2.bf16.msra.mxu0 %v11125_v62  ;;  %4605 = vmatprep.subr.bf16.mxu1 %v10447_v53  ;;  %13608 = vst [vmem:[#allocation175_spill] sm:$0xff] %v11142_v29  ;;  %v11146_v53 = vld [vmem:[#allocation10 + $0x37c] ss:$36 sps:$4 sm:$0xff]  }
 0x613   :  { %4371 = vmatprep.subr.bf16.mxu0 %v11129_v1  ;;  %13609 = vst [vmem:[#allocation176_spill] sm:$0xff] %v11146_v53 }
 0x614   :  { %4468 = vmatmul.mubr.bf16.vlgmr.msra.gmra.mxu1 %v10691_v47 }
 0x615   :  { %4606 = vmatpush1.bf16.msra.mxu1 %v10452_v57  ;;  %v11150_v57 = vld [vmem:[#allocation10 + $0x378] ss:$36 sps:$4 sm:$0xff]  }
 0x616   :  { %4372 = vmatpush2.bf16.msra.mxu0 %v11134_v37  ;;  %4607 = vmatprep.subr.bf16.mxu1 %v10456_v46  ;;  %13610 = vst [vmem:[#allocation177_spill] sm:$0xff] %v11150_v57  ;;  %v11154_v46 = vld [vmem:[#allocation10 + $0x334] ss:$36 sps:$4 sm:$0xff]  }
 0x617   :  { %4373 = vmatprep.subr.bf16.mxu0 %v11138_v26  ;;  %13611 = vst [vmem:[#allocation178_spill] sm:$0xff] %v11154_v46 }
 0x619   :  { %4608 = vmatpush1.bf16.msra.mxu1 %v10460_v17  ;;  %v11158_v17 = vld [vmem:[#allocation10 + $0x330] ss:$36 sps:$4 sm:$0xff]  }
 0x61a   :  { %4374 = vmatpush2.bf16.msra.mxu0 %v11142_v29  ;;  %4609 = vmatprep.subr.bf16.mxu1 %v10464_v21  ;;  %13612 = vst [vmem:[#allocation179_spill] sm:$0xff] %v11158_v17  ;;  %v11162_v21 = vld [vmem:[#allocation10 + $0x2ec] ss:$36 sps:$4 sm:$0xff]  }
 0x61b   :  { %4375 = vmatprep.subr.bf16.mxu0 %v11146_v53  ;;  %13613 = vst [vmem:[#allocation180_spill] sm:$0xff] %v11162_v21 }
 0x61d   :  { %4610 = vmatpush1.bf16.msra.mxu1 %v10468_v55  ;;  %v13614_v55 = vld [vmem:[#allocation21_spill] sm:$0xff] }
 0x61e   :  { %4376 = vmatpush2.bf16.msra.mxu0 %v11150_v57  ;;  %4611 = vmatprep.subr.bf16.mxu1 %v10472_v2  ;;  %v13615_v2 = vld [vmem:[#allocation31_spill] sm:$0xff] }
 0x61f   :  { %4377 = vmatprep.subr.bf16.mxu0 %v11154_v46  ;;  %v13653_v46 = vld [vmem:[#allocation57_spill] sm:$0xff] }
 0x621   :  { %4612 = vmatpush1.bf16.msra.mxu1 %v10476_v9  ;;  %v13616_v9 = vld [vmem:[#allocation34_spill] sm:$0xff] }
 0x622   :  { %4378 = vmatpush2.bf16.msra.mxu0 %v11158_v17  ;;  %4613 = vmatprep.subr.bf16.mxu1 %v10480_v48  ;;  %v13617_v48 = vmov 0.0   ;;  %v13648_v17 = vld [vmem:[#allocation48_spill] sm:$0xff] }
 0x623   :  { %4379 = vmatprep.subr.bf16.mxu0 %v11162_v21 }
 0x625   :  { %4614 = vmatpush1.bf16.msra.mxu1 %v10484_v6  ;;  %v13618_v6 = vld [vmem:[#allocation22_spill] sm:$0xff] }
 0x626   :  { %4380 = vmatpush2.bf16.msra.mxu0 %v10487_v10  ;;  %4615 = vmatprep.subr.bf16.mxu1 %v10490_v27  ;;  %v13619_v10 = vld [vmem:[#allocation35_spill] sm:$0xff]  ;;  %v13620_v27 = vld [vmem:[#allocation38_spill] sm:$0xff] }
 0x627   :  { %4381 = vmatprep.subr.bf16.mxu0 %v10493_v40 }
 0x629   :  { %4616 = vmatpush1.bf16.msra.mxu1 %v10496_v58  ;;  %v13621_v58 = vld [vmem:[#allocation23_spill] sm:$0xff] }
 0x62a   :  { %4382 = vmatpush2.bf16.msra.mxu0 %v10499_v43  ;;  %4617 = vmatprep.subr.bf16.mxu1 %v10502_v3  ;;  %v13622_v43 = vld [vmem:[#allocation39_spill] sm:$0xff] }
 0x62b   :  { %4383 = vmatprep.subr.bf16.mxu0 %v10505_v51  ;;  %v13623_v51 = vld [vmem:[#allocation42_spill] sm:$0xff] }
 0x62d   :  { %4618 = vmatpush1.bf16.msra.mxu1 %v13614_v55  ;;  %v13624_v55 = vld [vmem:[#allocation24_spill] sm:$0xff] }
 0x62e   :  { %4384 = vmatpush2.bf16.msra.mxu0 %v13615_v2  ;;  %4619 = vmatprep.subr.bf16.mxu1 %v13616_v9  ;;  %v13625_v2 = vld [vmem:[#allocation43_spill] sm:$0xff] }
 0x62f   :  { %7423 = vmatprep.subr.bf16.mxu0 %v13617_v48 }
 0x631   :  { %4386 = vmatmul.mubr.bf16.vlgmr.msra.gmra.mxu0 %v10691_v47  ;;  %4620 = vmatpush1.bf16.msra.mxu1 %v13618_v6  ;;  %v13626_v6 = vld [vmem:[#allocation46_spill] sm:$0xff] }
 0x632   :  { %7424 = vmatpush3.bf16.msra.mxu0 %v13619_v10  ;;  %7439 = vmatprep.mubr.msk.bf16.mxu0 %vm9160_vm1, %v13617_v48  ;;  %v13627_v10 = vld [vmem:[#allocation25_spill] sm:$0xff] }
 0x633   :  { %7425 = vmatprep.subr.bf16.mxu0 %v13617_v48  ;;  %4621 = vmatprep.subr.bf16.mxu1 %v13620_v27  ;;  %v13628_v27 = vld [vmem:[#allocation47_spill] sm:$0xff] }
 0x634   :  { %v4141_v40 = vpop.f32.mrf.mxu1 }
 0x635   :  { %4622 = vmatpush2.bf16.msra.mxu1 %v13621_v58  ;;  %v13629_v58 = vld [vmem:[#allocation50_spill] sm:$0xff] }
 0x636   :  { %7426 = vmatpush3.bf16.msra.mxu0 %v13622_v43  ;;  %v4143_v3 = vpop.f32.mrf.mxu1  ;;  %4623 = vmatprep.subr.bf16.mxu1 %v13623_v51  ;;  %v13630_v43 = vld [vmem:[#allocation26_spill] sm:$0xff]  ;;  %v13631_v51 = vld [vmem:[#allocation51_spill] sm:$0xff] }
 0x637   :  { %7427 = vmatprep.subr.bf16.mxu0 %v13617_v48 }
 0x638   :  { %v4145_v47 = vpop.f32.mrf.mxu1 }
 0x639   :  { %4624 = vmatpush2.bf16.msra.mxu1 %v13624_v55  ;;  %v13632_v47 = vld [vmem:[#allocation54_spill] sm:$0xff]  ;;  %v13633_v55 = vld [vmem:[#allocation27_spill] sm:$0xff] }
 0x63a   :  { %7428 = vmatpush3.bf16.msra.mxu0 %v13625_v2  ;;  %v4146_v9 = vpop.f32.mrf.mxu1  ;;  %4625 = vmatprep.subr.bf16.mxu1 %v13626_v6  ;;  %v13634_v2 = vld [vmem:[#allocation55_spill] sm:$0xff]  ;;  %v13636_v6 = vld [vmem:[#allocation58_spill] sm:$0xff] }
 0x63b   :  { %7429 = vmatprep.subr.bf16.mxu0 %v13617_v48  ;;  %v13635_v9 = vld [vmem:[#allocation28_spill] sm:$0xff] }
 0x63d   :  { %4626 = vmatpush2.bf16.msra.mxu1 %v13627_v10  ;;  %v13637_v10 = vld [vmem:[#allocation29_spill] sm:$0xff] }
 0x63e   :  { %7430 = vmatpush3.bf16.msra.mxu0 %v13628_v27  ;;  %4627 = vmatprep.subr.bf16.mxu1 %v13629_v58  ;;  %v13638_v27 = vld [vmem:[#allocation59_spill] sm:$0xff]  ;;  %v13639_v58 = vld [vmem:[#allocation30_spill] sm:$0xff] }
 0x63f   :  { %7431 = vmatprep.subr.bf16.mxu0 %v13617_v48 }
 0x641   :  { %4628 = vmatpush2.bf16.msra.mxu1 %v13630_v43  ;;  %v13640_v43 = vld [vmem:[#allocation32_spill] sm:$0xff] }
 0x642   :  { %7432 = vmatpush3.bf16.msra.mxu0 %v13631_v51  ;;  %4629 = vmatprep.subr.bf16.mxu1 %v13632_v47  ;;  %v13641_v51 = vld [vmem:[#allocation33_spill] sm:$0xff]  ;;  %v13642_v47 = vld [vmem:[#allocation36_spill] sm:$0xff] }
 0x643   :  { %7433 = vmatprep.subr.bf16.mxu0 %v13617_v48 }
 0x645   :  { %4630 = vmatpush2.bf16.msra.mxu1 %v13633_v55 }
 0x646   :  { %7434 = vmatpush3.bf16.msra.mxu0 %v13634_v2  ;;  %4631 = vmatprep.subr.bf16.mxu1 %v13635_v9  ;;  %v13643_v2 = vld [vmem:[#allocation37_spill] sm:$0xff] }
 0x647   :  { %7435 = vmatprep.subr.bf16.mxu0 %v13617_v48 }
 0x649   :  { %4632 = vmatpush2.bf16.msra.mxu1 %v13636_v6  ;;  %v13644_v6 = vld [vmem:[#allocation40_spill] sm:$0xff] }
 0x64a   :  { %7436 = vmatpush3.bf16.msra.mxu0 %v13637_v10  ;;  %4633 = vmatprep.subr.bf16.mxu1 %v13638_v27  ;;  %v13645_v10 = vld [vmem:[#allocation41_spill] sm:$0xff] }
 0x64b   :  { %7437 = vmatprep.subr.bf16.mxu0 %v13617_v48  ;;  %v13646_v48 = vld [vmem:[#allocation44_spill] sm:$0xff] }
 0x64d   :  { %4634 = vmatpush2.bf16.msra.mxu1 %v13639_v58 }
 0x64e   :  { %7438 = vmatpush3.bf16.msra.mxu0 %v13640_v43  ;;  %4635 = vmatprep.subr.bf16.mxu1 %v13641_v51 }
 0x64f   :  { %4646 = vmatprep.subr.bf16.mxu0 %v13642_v47  ;;  %v13647_v47 = vld [vmem:[#allocation45_spill] sm:$0xff] }
 0x651   :  { %7440 = vmatmul.mubr.bf16.vlgmr.msra.gmra.mxu0 %v10746_v42  ;;  %v4182_v55 = vpop.f32.mrf.mxu0  ;;  %4636 = vmatpush2.bf16.msra.mxu1 %v13643_v2 }
 0x652   :  { %v4183_v9 = vadd.f32 %v4182_v55, %v4141_v40  ;;  %4647 = vmatpush1.bf16.msra.mxu0 %v13644_v6  ;;  %4728 = vmatprep.subr.bf16.mxu1 %v13645_v10  ;;  %v13649_v55 = vld [vmem:[#allocation49_spill] sm:$0xff]  ;;  %v13650_v6 = vld [vmem:[#allocation52_spill] sm:$0xff] }
 0x653   :  { %v4184_v27 = vpop.f32.mrf.mxu0  ;;  %4648 = vmatprep.subr.bf16.mxu0 %v13646_v48  ;;  %4678 = vmatprep.mubr.bf16.mxu0 %v13182_v19  ;;  %v13651_v10 = vld [vmem:[#allocation53_spill] sm:$0xff]  ;;  %v13652_v48 = vld [vmem:[#allocation56_spill] sm:$0xff] }
 0x654   :  { %v4185_v58 = vadd.f32 %v4184_v27, %v4143_v3  ;;  %v4264_v43 = vpop.f32.mrf.mxu1  ;;  %v13654_v3 = vld [vmem:[#allocation60_spill] sm:$0xff]  ;;  %v13655_v27 = vld [vmem:[#allocation61_spill] sm:$0xff] }
 0x655   :  { %v4186_v51 = vpop.f32.mrf.mxu0 }
 0x656   :  { %v4266_v21 = vpop.f32.mrf.mxu1  ;;  %4649 = vmatpush1.bf16.msra.mxu0 %v13647_v47  ;;  %v13656_v51 = vld [vmem:[#allocation62_spill] sm:$0xff]  ;;  %v13657_v47 = vld [vmem:[#allocation63_spill] sm:$0xff] }
 0x657   :  { %v4187_v42 = vpop.f32.mrf.mxu0  ;;  %4650 = vmatprep.subr.bf16.mxu0 %v13648_v17  ;;  %v13658_v17 = vld [vmem:[#allocation64_spill] sm:$0xff] }
 0x658   :  { %v4268_v2 = vpop.f32.mrf.mxu1  ;;  %v13659_v42 = vld [vmem:[#allocation65_spill] sm:$0xff] }
 0x659   :  { %v13660_v2 = vld [vmem:[#allocation66_spill] sm:$0xff] }
 0x65a   :  { %v4269_v40 = vpop.f32.mrf.mxu1  ;;  %4651 = vmatpush1.bf16.msra.mxu0 %v13649_v55  ;;  %v4100_v55 = vld [vmem:[#allocation3 + $0x74] sm:$0xff] }
 0x65b   :  { %4652 = vmatprep.subr.bf16.mxu0 %v13650_v6  ;;  %v11232_v40 = vld [vmem:[#allocation3 + $0x7c] sm:$0xff] }
 0x65c   :  { %v12975_v6 = vrot.slane %v11232_v40, 4 }
 0x65e   :  { %4653 = vmatpush1.bf16.msra.mxu0 %v13651_v10 }
 0x65f   :  { %4654 = vmatprep.subr.bf16.mxu0 %v13652_v48 }
 0x662   :  { %4655 = vmatpush1.bf16.msra.mxu0 %v13653_v46  ;;  %v4541_v46 = vrot.slane %v4100_v55, 4 }
 0x663   :  { %4656 = vmatprep.subr.bf16.mxu0 %v13654_v3 }
 0x664   :  { %v4543_v48 = vsel %vm3048_vm0, %v4541_v46, %v12975_v6 }
 0x665   :  { %v4547_v62 = vunpack.c.h.bf16 %v4543_v48 }
 0x666   :  { %4657 = vmatpush1.bf16.msra.mxu0 %v13655_v27 }
 0x667   :  { %4658 = vmatprep.subr.bf16.mxu0 %v13656_v51 }
 0x66a   :  { %4659 = vmatpush1.bf16.msra.mxu0 %v13657_v47  ;;  %v4546_v47 = vunpack.c.l.bf16 %v4543_v48 }
 0x66b   :  { %4660 = vmatprep.subr.bf16.mxu0 %v13658_v17 }
 0x66e   :  { %4661 = vmatpush1.bf16.msra.mxu0 %v13659_v42 }
 0x66f   :  { %4687 = vmatprep.subr.bf16.mxu0 %v13660_v2 }
 0x691   :  { %v4223_v10 = vpop.f32.mrf.mxu0 }
 0x692   :  { %v4265_v3 = vadd.f32 %v4264_v43, %v4223_v10 }
 0x693   :  { %v4225_v27 = vpop.f32.mrf.mxu0 }
 0x694   :  { %v4267_v51 = vadd.f32 %v4266_v21, %v4225_v27  ;;  %v4305_v17 = vpop.f32.mrf.mxu1  ;;  %v4099_v27 = vld [vmem:[#allocation3 + $0x6c] sm:$0xff] }
 0x695   :  { %v4227_v57 = vpop.f32.mrf.mxu0  ;;  %v4515_v6 = vunpack.c.l.bf16 %v4099_v27 }
 0x696   :  { %v4549_v42 = vadd.f32 %v4546_v47, %v4267_v51  ;;  %v4307_v53 = vpop.f32.mrf.mxu1  ;;  %v4516_v51 = vunpack.c.h.bf16 %v4099_v27 }
 0x697   :  { %v4228_v2 = vpop.f32.mrf.mxu0  ;;  %v4518_v57 = vadd.f32 %v4515_v6, %v4183_v9 }
 0x698   :  { %v4309_v29 = vpop.f32.mrf.mxu1  ;;  %v4519_v47 = vadd.f32 %v4516_v51, %v4185_v58  ;;  %v4517_v58 = vunpack.c.l.bf16 %v4100_v55 }
 0x699   :  { %v7007_v2 = vmul.f32 -1.442695, %v4518_v57 }
 0x69a   :  { %v4310_v26 = vpop.f32.mrf.mxu1  ;;  %v7008_v29 = vmul.f32 -1.442695, %v4519_v47  ;;  %v4520_v6 = vadd.f32 %v4517_v58, %v4265_v3  ;;  %v4102_v47 = vld [vmem:[#allocation3 + $0x84] sm:$0xff] }
 0x69b   :  { %8047 = vpow2.f32 %v7007_v2 }
 0x69c   :  { %8049 = vpow2.f32 %v7008_v29 }
 0x6b1   :  { %v4346_v37 = vpop.f32.mrf.mxu0 }
 0x6b2   :  { %v4347_v1 = vadd.f32 %v4346_v37, %v4305_v17 }
 0x6b3   :  { %v4348_v16 = vpop.f32.mrf.mxu0 }
 0x6b4   :  { %v4550_v38 = vadd.f32 %v4547_v62, %v4347_v1  ;;  %v4349_v25 = vadd.f32 %v4348_v16, %v4307_v53  ;;  %v4428_v33 = vpop.f32.mrf.mxu1  ;;  %v8048_v53 = vpop.eup %8047 }
 0x6b5   :  { %v4350_v4 = vpop.f32.mrf.mxu0  ;;  %v8050_v48 = vpop.eup %8049  ;;  %v4530_v17 = vadd.f32 1.0, %v8048_v53  ;;  %v4577_v53 = vunpack.c.h.bf16 %v4102_v47 }
 0x6b6   :  { %v4430_v46 = vpop.f32.mrf.mxu1  ;;  %v7010_v4 = vmul.f32 -1.442695, %v4549_v42  ;;  %v7011_v1 = vmul.f32 -1.442695, %v4550_v38  ;;  %v4531_v9 = vadd.f32 1.0, %v8050_v48 }
 0x6b7   :  { %v4351_v43 = vpop.f32.mrf.mxu0 }
 0x6b8   :  { %v4432_v10 = vpop.f32.mrf.mxu1  ;;  %8051 = vpow2.f32 %v7010_v4 }
 0x6b9   :  { %8053 = vpow2.f32 %v7011_v1  ;;  %v7009_v10 = vmul.f32 -1.442695, %v4520_v6  ;;  %v4576_v1 = vunpack.c.l.bf16 %v4102_v47 }
 0x6ba   :  { %v4433_v21 = vpop.f32.mrf.mxu1  ;;  %8055 = vrcp.f32 %v4530_v17 }
 0x6bb   :  { %8057 = vrcp.f32 %v4531_v9 }
 0x6bc   :  { %8059 = vpow2.f32 %v7009_v10 }
 0x6c5   :  { %v8052_v43 = vpop.eup %8051 }
 0x6c6   :  { %v8054_v21 = vpop.eup %8053  ;;  %v4561_v57 = vadd.f32 1.0, %v8052_v43 }
 0x6c7   :  { %v4562_v38 = vadd.f32 1.0, %v8054_v21 }
 0x6c8   :  { %8061 = vrcp.f32 %v4561_v57 }
 0x6c9   :  { %8063 = vrcp.f32 %v4562_v38 }
 0x6d4   :  { %v11238_v26 = vpop.f32.mrf.mxu1 }
 0x6d6   :  { %v11240_v37 = vpop.f32.mrf.mxu1 }
 0x6d8   :  { %v7203_v16 = vpop.f32.mrf.mxu1 }
 0x6d9   :  { %v8056_v16 = vpop.eup %8055 }
 0x6da   :  { %v7204_v62 = vpop.f32.mrf.mxu1  ;;  %v8058_v3 = vpop.eup %8057 }
 0x6db   :  { %v8060_v10 = vpop.eup %8059 }
 0x6dc   :  { %v8062_v21 = vpop.eup %8061 }
 0x6dd   :  { %v8064_v57 = vpop.eup %8063 }
 0x6de   :  { %v4586_v47 = vsub.f32 1.0, %v8064_v57 }
 0x6f1   :  { %v4387_v27 = vpop.f32.mrf.mxu0 }
 0x6f2   :  { %v4429_v51 = vadd.f32 %v4428_v33, %v4387_v27  ;;  %v13661_v33 = vrot.slane %v11232_v40, 4  ;;  %v4532_v27 = vadd.f32 1.0, %v8060_v10  ;;  %v4591_v40 = vmul.f32 %v8062_v21, %v10681_v60  ;;  %v13677_v10 = vld [vmem:[#allocation82_spill] sm:$0xff] }
 0x6f3   :  { %v4389_v2 = vpop.f32.mrf.mxu0  ;;  %v7202_v60 = vadd.f32 %v11240_v37, %v11238_v26 }
 0x6f4   :  { %v4570_v42 = vadd.f32 %v4429_v51, %v9668_v13  ;;  %v4431_v29 = vadd.f32 %v4430_v46, %v4389_v2  ;;  %v4548_v17 = vunpack.c.l.bf16 %v13661_v33  ;;  %v4585_v51 = vsub.f32 1.0, %v8062_v21  ;;  %v13678_v21 = vld [vmem:[#allocation83_spill] sm:$0xff] }
 0x6f5   :  { %v4391_v62 = vpop.f32.mrf.mxu0 }
 0x6f6   :  { %v4573_v4 = vmul.f32 %v8056_v16, %v4570_v42  ;;  %v4571_v55 = vadd.f32 %v4431_v29, %v9671_v12  ;;  %v4551_v6 = vadd.f32 %v4548_v17, %v4349_v25  ;;  %v4592_v25 = vmul.f32 %v8064_v57, %v10683_v24  ;;  %v13680_v57 = vld [vmem:[#allocation85_spill] sm:$0xff] }
 0x6f7   :  { %v4392_v48 = vpop.f32.mrf.mxu0 }
 0x6f8   :  { %v4579_v9 = vadd.f32 %v4576_v1, %v4573_v4  ;;  %v4574_v58 = vmul.f32 %v8058_v3, %v4571_v55  ;;  %v7012_v46 = vmul.f32 -1.442695, %v4551_v6  ;;  %v4103_v48 = vld [vmem:[#allocation3 + $0x8c] sm:$0xf] }
 0x6f9   :  { %v4578_v37 = vunpack.c.l.bf16 %v4103_v48  ;;  %v13694_v48 = vld [vmem:[#allocation99_spill] sm:$0xff] }
 0x6fa   :  { %8065 = vtanh.f32 %v4579_v9  ;;  %v4580_v43 = vadd.f32 %v4577_v53, %v4574_v58 }
 0x6fc   :  { %8067 = vtanh.f32 %v4580_v43 }
 0x6fd   :  { %8069 = vpow2.f32 %v7012_v46  ;;  %v13676_v46 = vld [vmem:[#allocation81_spill] sm:$0xff] }
 0x6fe   :  { %8071 = vrcp.f32 %v4532_v27  ;;  %v13679_v27 = vld [vmem:[#allocation84_spill] sm:$0xff] }
 0x707   :  { %v8066_v2 = vpop.eup %8065 }
 0x708   :  { %v4588_v38 = vmul.f32 %v8066_v2, %v4585_v51  ;;  %v13681_v51 = vld [vmem:[#allocation86_spill] sm:$0xff]  ;;  %v13682_v2 = vld [vmem:[#allocation87_spill] sm:$0xff] }
 0x709   :  { %v8068_v42 = vpop.eup %8067 }
 0x70a   :  { %v4589_v29 = vmul.f32 %v8068_v42, %v4586_v47  ;;  %v11248_v16 = vadd.f32 %v4591_v40, %v4588_v38  ;;  %v8070_v1 = vpop.eup %8069  ;;  %v13683_v47 = vld [vmem:[#allocation88_spill] sm:$0xff]  ;;  %v13684_v38 = vld [vmem:[#allocation89_spill] sm:$0xff]  ;;  %v13685_v40 = vld [vmem:[#allocation90_spill] sm:$0xff] }
 0x70b   :  { %v4563_v24 = vadd.f32 1.0, %v8070_v1  ;;  %v8072_v9 = vpop.eup %8071  ;;  %v13686_v42 = vld [vmem:[#allocation91_spill] sm:$0xff]  ;;  %v13689_v1 = vld [vmem:[#allocation94_spill] sm:$0xff] }
 0x70c   :  { %v11250_v62 = vadd.f32 %v4592_v25, %v4589_v29  ;;  %v11258_v55 = vpack.c.bf16 %v11248_v16, %v11248_v16  ;;  %v13687_v29 = vld [vmem:[#allocation92_spill] sm:$0xff]  ;;  %v13688_v25 = vld [vmem:[#allocation93_spill] sm:$0xff] }
 0x70d   :  { %8073 = vrcp.f32 %v4563_v24  ;;  %v13692_v24 = vld [vmem:[#allocation97_spill] sm:$0xff] }
 0x70e   :  { %v11254_v4 = vpack.c.bf16 %v11250_v62, %v11250_v62 }
 0x710   :  { %4637 = vmatprep.mubr.bf16.mxu1 %v11254_v4 }
 0x711   :  { %v4509_v3 = vpop.f32.mrf.mxu0  ;;  %4638 = vmatmul.mubr.bf16.vlgmr.msra.gmra.mxu1 %v11258_v55 }
 0x712   :  { %v4510_v53 = vadd.f32 %v7202_v60, %v4509_v3  ;;  %4729 = vmatpush1.bf16.msra.mxu1 %v10697_v59  ;;  %4760 = vmatprep.mubr.bf16.mxu1 %v13182_v19  ;;  %v13690_v60 = vld [vmem:[#allocation95_spill] sm:$0xff]  ;;  %v13691_v3 = vld [vmem:[#allocation96_spill] sm:$0xff] }
 0x713   :  { %v7441_v33 = vpop.f32.mrf.mxu0  ;;  %4730 = vmatprep.subr.bf16.mxu1 %v10701_v15 }
 0x714   :  { %v4572_v17 = vadd.f32 %v4510_v53, %v9691_v49  ;;  %v13693_v53 = vld [vmem:[#allocation98_spill] sm:$0xff]  ;;  %v13695_v33 = vld [vmem:[#allocation100_spill] sm:$0xff] }
 0x715   :  { %v4512_v58 = vpop.f32.mrf.mxu0 }
 0x716   :  { %v4575_v26 = vmul.f32 %v8072_v9, %v4572_v17  ;;  %4731 = vmatpush1.bf16.msra.mxu1 %v10705_v32  ;;  %v13696_v17 = vld [vmem:[#allocation101_spill] sm:$0xff]  ;;  %v13697_v9 = vld [vmem:[#allocation102_spill] sm:$0xff]  ;;  %v13698_v58 = vld [vmem:[#allocation103_spill] sm:$0xff] }
 0x717   :  { %v7442_v6 = vpop.f32.mrf.mxu0  ;;  %4732 = vmatprep.subr.bf16.mxu1 %v10708_v5 }
 0x718   :  { %v4581_v43 = vadd.f32 %v4578_v37, %v4575_v26  ;;  %v13699_v26 = vld [vmem:[#allocation104_spill] sm:$0xff]  ;;  %v13700_v37 = vld [vmem:[#allocation105_spill] sm:$0xff]  ;;  %v13701_v6 = vld [vmem:[#allocation106_spill] sm:$0xff] }
 0x71a   :  { %8075 = vtanh.f32 %v4581_v43  ;;  %4733 = vmatpush1.bf16.msra.mxu1 %v10711_v8  ;;  %v8074_v59 = vpop.eup %8073  ;;  %v13702_v43 = vld [vmem:[#allocation107_spill] sm:$0xff] }
 0x71b   :  { %4734 = vmatprep.subr.bf16.mxu1 %v10714_v30  ;;  %v4587_v15 = vsub.f32 1.0, %v8074_v59  ;;  %v4593_v8 = vmul.f32 %v8074_v59, %v10739_v22  ;;  %v13668_v22 = vld [vmem:[#allocation73_spill] sm:$0xff]  ;;  %v13703_v59 = vld [vmem:[#allocation108_spill] sm:$0xff] }
 0x71e   :  { %4735 = vmatpush1.bf16.msra.mxu1 %v10717_v31 }
 0x71f   :  { %4736 = vmatprep.subr.bf16.mxu1 %v10720_v45  ;;  %v13662_v45 = vld [vmem:[#allocation67_spill] sm:$0xff] }
 0x722   :  { %4737 = vmatpush1.bf16.msra.mxu1 %v10723_v23  ;;  %v13663_v23 = vld [vmem:[#allocation68_spill] sm:$0xff] }
 0x723   :  { %4738 = vmatprep.subr.bf16.mxu1 %v10726_v20  ;;  %v13664_v20 = vld [vmem:[#allocation69_spill] sm:$0xff] }
 0x726   :  { %4739 = vmatpush1.bf16.msra.mxu1 %v10729_v44  ;;  %v13665_v44 = vld [vmem:[#allocation70_spill] sm:$0xff] }
 0x727   :  { %v8076_v32 = vpop.eup %8075  ;;  %4740 = vmatprep.subr.bf16.mxu1 %v10732_v28  ;;  %v13666_v28 = vld [vmem:[#allocation71_spill] sm:$0xff] }
 0x728   :  { %v4590_v5 = vmul.f32 %v8076_v32, %v4587_v15  ;;  %v13704_v15 = vld [vmem:[#allocation109_spill] sm:$0xff]  ;;  %v13705_v32 = vld [vmem:[#allocation110_spill] sm:$0xff] }
 0x72a   :  { %4741 = vmatpush1.bf16.msra.mxu1 %v10736_v0  ;;  %v11280_v30 = vadd.f32 %v4593_v8, %v4590_v5  ;;  %v13667_v0 = vld [vmem:[#allocation72_spill] sm:$0xff]  ;;  %v13706_v5 = vld [vmem:[#allocation111_spill] sm:$0xff] }
 0x72b   :  { %4742 = vmatprep.subr.bf16.mxu1 %v10741_v7  ;;  %v13669_v7 = vld [vmem:[#allocation74_spill] sm:$0xff]  ;;  %v13707_v8 = vld [vmem:[#allocation112_spill] sm:$0xff] }
 0x72c   :  { %v11285_v31 = vpack.c.bf16 %v11280_v30, %v11280_v30 }
 0x72e   :  { %4743 = vmatpush1.bf16.msra.mxu1 %v10748_v63  ;;  %4679 = vmatmul.mubr.bf16.vlgmr.msra.gmra.mxu0 %v11285_v31  ;;  %v13670_v63 = vld [vmem:[#allocation75_spill] sm:$0xff] }
 0x72f   :  { %4688 = vmatpush1.bf16.msra.mxu0 %v10752_v36  ;;  %4719 = vmatprep.mubr.bf16.mxu0 %v11254_v4  ;;  %v13671_v36 = vld [vmem:[#allocation76_spill] sm:$0xff] }
 0x730   :  { %4769 = vmatprep.subr.bf16.mxu1 %v10756_v61  ;;  %4689 = vmatprep.subr.bf16.mxu0 %v10759_v14  ;;  %v13672_v61 = vld [vmem:[#allocation77_spill] sm:$0xff]  ;;  %v13673_v14 = vld [vmem:[#allocation78_spill] sm:$0xff] }
 0x731   :  { %4761 = vmatmul.mubr.bf16.vlgmr.msra.gmra.mxu1 %v11285_v31 }
 0x732   :  { %4770 = vmatpush1.bf16.msra.mxu1 %v10763_v41  ;;  %4801 = vmatprep.mubr.bf16.mxu1 %v11254_v4  ;;  %v13674_v41 = vld [vmem:[#allocation79_spill] sm:$0xff] }
 0x733   :  { %4690 = vmatpush1.bf16.msra.mxu0 %v10767_v50  ;;  %4771 = vmatprep.subr.bf16.mxu1 %v13662_v45  ;;  %v13675_v50 = vld [vmem:[#allocation80_spill] sm:$0xff]  ;;  %v13708_v45 = vld [vmem:[#allocation113_spill] sm:$0xff] }
 0x734   :  { %4691 = vmatprep.subr.bf16.mxu0 %v13663_v23  ;;  %v13709_v23 = vld [vmem:[#allocation114_spill] sm:$0xff] }
 0x736   :  { %4772 = vmatpush1.bf16.msra.mxu1 %v13664_v20  ;;  %v13710_v20 = vld [vmem:[#allocation115_spill] sm:$0xff] }
 0x737   :  { %4692 = vmatpush1.bf16.msra.mxu0 %v13665_v44  ;;  %4773 = vmatprep.subr.bf16.mxu1 %v13666_v28  ;;  %v13711_v44 = vld [vmem:[#allocation116_spill] sm:$0xff]  ;;  %v13712_v28 = vld [vmem:[#allocation117_spill] sm:$0xff] }
 0x738   :  { %4693 = vmatprep.subr.bf16.mxu0 %v13667_v0  ;;  %v13713_v0 = vld [vmem:[#allocation118_spill] sm:$0xff] }
 0x73a   :  { %4774 = vmatpush1.bf16.msra.mxu1 %v13668_v22  ;;  %v13714_v22 = vld [vmem:[#allocation119_spill] sm:$0xff] }
 0x73b   :  { %4694 = vmatpush1.bf16.msra.mxu0 %v13669_v7  ;;  %4775 = vmatprep.subr.bf16.mxu1 %v13670_v63  ;;  %v13715_v7 = vld [vmem:[#allocation120_spill] sm:$0xff]  ;;  %v13716_v63 = vld [vmem:[#allocation121_spill] sm:$0xff] }
 0x73c   :  { %4695 = vmatprep.subr.bf16.mxu0 %v13671_v36  ;;  %v13717_v36 = vld [vmem:[#allocation122_spill] sm:$0xff] }
 0x73e   :  { %4776 = vmatpush1.bf16.msra.mxu1 %v13672_v61  ;;  %v13718_v61 = vld [vmem:[#allocation123_spill] sm:$0xff] }
 0x73f   :  { %4696 = vmatpush1.bf16.msra.mxu0 %v13673_v14  ;;  %4777 = vmatprep.subr.bf16.mxu1 %v13674_v41  ;;  %v13719_v14 = vld [vmem:[#allocation124_spill] sm:$0xff]  ;;  %v13720_v41 = vld [vmem:[#allocation125_spill] sm:$0xff] }
 0x740   :  { %4697 = vmatprep.subr.bf16.mxu0 %v13675_v50  ;;  %v13721_v50 = vld [vmem:[#allocation126_spill] sm:$0xff] }
 0x742   :  { %4778 = vmatpush1.bf16.msra.mxu1 %v13676_v46  ;;  %v13722_v46 = vld [vmem:[#allocation127_spill] sm:$0xff] }
 0x743   :  { %4698 = vmatpush1.bf16.msra.mxu0 %v13677_v10  ;;  %4779 = vmatprep.subr.bf16.mxu1 %v13678_v21  ;;  %v13723_v10 = vld [vmem:[#allocation128_spill] sm:$0xff]  ;;  %v13724_v21 = vld [vmem:[#allocation129_spill] sm:$0xff] }
 0x744   :  { %4699 = vmatprep.subr.bf16.mxu0 %v13679_v27  ;;  %v13725_v27 = vld [vmem:[#allocation130_spill] sm:$0xff] }
 0x746   :  { %4780 = vmatpush1.bf16.msra.mxu1 %v13680_v57  ;;  %v13726_v57 = vld [vmem:[#allocation131_spill] sm:$0xff] }
 0x747   :  { %4700 = vmatpush1.bf16.msra.mxu0 %v13681_v51  ;;  %4781 = vmatprep.subr.bf16.mxu1 %v13682_v2  ;;  %v13727_v51 = vld [vmem:[#allocation132_spill] sm:$0xff]  ;;  %v13728_v2 = vld [vmem:[#allocation133_spill] sm:$0xff] }
 0x748   :  { %4701 = vmatprep.subr.bf16.mxu0 %v13683_v47  ;;  %v13729_v47 = vld [vmem:[#allocation134_spill] sm:$0xff] }
 0x74a   :  { %4782 = vmatpush1.bf16.msra.mxu1 %v13684_v38  ;;  %v13730_v38 = vld [vmem:[#allocation135_spill] sm:$0xff] }
 0x74b   :  { %4702 = vmatpush1.bf16.msra.mxu0 %v13685_v40  ;;  %4783 = vmatprep.subr.bf16.mxu1 %v13686_v42  ;;  %v13731_v40 = vld [vmem:[#allocation136_spill] sm:$0xff]  ;;  %v13732_v42 = vld [vmem:[#allocation137_spill] sm:$0xff] }
 0x74c   :  { %4703 = vmatprep.subr.bf16.mxu0 %v13687_v29  ;;  %v13733_v29 = vld [vmem:[#allocation138_spill] sm:$0xff] }
 0x74e   :  { %4784 = vmatpush1.bf16.msra.mxu1 %v13688_v25  ;;  %v13734_v25 = vld [vmem:[#allocation139_spill] sm:$0xff] }
 0x74f   :  { %4704 = vmatpush2.bf16.msra.mxu0 %v13689_v1  ;;  %4785 = vmatprep.subr.bf16.mxu1 %v13690_v60  ;;  %v13735_v1 = vld [vmem:[#allocation140_spill] sm:$0xff]  ;;  %v13736_v60 = vld [vmem:[#allocation141_spill] sm:$0xff] }
 0x750   :  { %4705 = vmatprep.subr.bf16.mxu0 %v13691_v3  ;;  %v13737_v3 = vld [vmem:[#allocation142_spill] sm:$0xff] }
 0x752   :  { %4786 = vmatpush2.bf16.msra.mxu1 %v13692_v24  ;;  %v13738_v24 = vld [vmem:[#allocation143_spill] sm:$0xff] }
 0x753   :  { %4706 = vmatpush2.bf16.msra.mxu0 %v13693_v53  ;;  %4787 = vmatprep.subr.bf16.mxu1 %v13694_v48  ;;  %v13739_v53 = vld [vmem:[#allocation144_spill] sm:$0xff]  ;;  %v13740_v48 = vld [vmem:[#allocation145_spill] sm:$0xff] }
 0x754   :  { %4707 = vmatprep.subr.bf16.mxu0 %v13695_v33  ;;  %v13741_v33 = vld [vmem:[#allocation146_spill] sm:$0xff] }
 0x756   :  { %4788 = vmatpush2.bf16.msra.mxu1 %v13696_v17  ;;  %v13742_v17 = vld [vmem:[#allocation147_spill] sm:$0xff] }
 0x757   :  { %4708 = vmatpush2.bf16.msra.mxu0 %v13697_v9  ;;  %4789 = vmatprep.subr.bf16.mxu1 %v13698_v58  ;;  %v13743_v9 = vld [vmem:[#allocation148_spill] sm:$0xff]  ;;  %v13744_v58 = vld [vmem:[#allocation149_spill] sm:$0xff] }
 0x758   :  { %4709 = vmatprep.subr.bf16.mxu0 %v13699_v26  ;;  %v13745_v26 = vld [vmem:[#allocation150_spill] sm:$0xff] }
 0x75a   :  { %4790 = vmatpush2.bf16.msra.mxu1 %v13700_v37  ;;  %v13746_v37 = vld [vmem:[#allocation151_spill] sm:$0xff] }
 0x75b   :  { %4710 = vmatpush2.bf16.msra.mxu0 %v13701_v6  ;;  %4791 = vmatprep.subr.bf16.mxu1 %v13702_v43  ;;  %v13747_v6 = vld [vmem:[#allocation152_spill] sm:$0xff]  ;;  %v13748_v43 = vld [vmem:[#allocation153_spill] sm:$0xff] }
 0x75c   :  { %4711 = vmatprep.subr.bf16.mxu0 %v13703_v59  ;;  %v13749_v59 = vld [vmem:[#allocation154_spill] sm:$0xff] }
 0x75e   :  { %4792 = vmatpush2.bf16.msra.mxu1 %v13704_v15  ;;  %v13750_v15 = vld [vmem:[#allocation155_spill] sm:$0xff] }
 0x75f   :  { %4712 = vmatpush2.bf16.msra.mxu0 %v13705_v32  ;;  %4793 = vmatprep.subr.bf16.mxu1 %v13706_v5  ;;  %v13751_v32 = vld [vmem:[#allocation156_spill] sm:$0xff]  ;;  %v13752_v5 = vld [vmem:[#allocation157_spill] sm:$0xff] }
 0x760   :  { %4713 = vmatprep.subr.bf16.mxu0 %v13707_v8  ;;  %v13753_v8 = vld [vmem:[#allocation158_spill] sm:$0xff] }
 0x762   :  { %4794 = vmatpush2.bf16.msra.mxu1 %v13708_v45  ;;  %v13754_v45 = vld [vmem:[#allocation159_spill] sm:$0xff] }
 0x763   :  { %4714 = vmatpush2.bf16.msra.mxu0 %v13709_v23  ;;  %4795 = vmatprep.subr.bf16.mxu1 %v13710_v20  ;;  %v13755_v23 = vld [vmem:[#allocation160_spill] sm:$0xff]  ;;  %v13756_v20 = vld [vmem:[#allocation161_spill] sm:$0xff] }
 0x764   :  { %4715 = vmatprep.subr.bf16.mxu0 %v13711_v44  ;;  %v13757_v44 = vld [vmem:[#allocation162_spill] sm:$0xff] }
 0x766   :  { %4796 = vmatpush2.bf16.msra.mxu1 %v13712_v28  ;;  %v13758_v28 = vld [vmem:[#allocation163_spill] sm:$0xff] }
 0x767   :  { %4716 = vmatpush2.bf16.msra.mxu0 %v13713_v0  ;;  %4797 = vmatprep.subr.bf16.mxu1 %v13714_v22  ;;  %v13759_v0 = vld [vmem:[#allocation164_spill] sm:$0xff]  ;;  %v13760_v22 = vld [vmem:[#allocation165_spill] sm:$0xff] }
 0x768   :  { %4717 = vmatprep.subr.bf16.mxu0 %v13715_v7  ;;  %v11407_v7 = vld [vmem:[#allocation10 + $0x188] ss:$36 sps:$4 sm:$0xff]  }
 0x76a   :  { %4798 = vmatpush2.bf16.msra.mxu1 %v13716_v63  ;;  %v11431_v63 = vld [vmem:[#allocation10 + $0xb0] ss:$36 sps:$4 sm:$0xff]  }
 0x76b   :  { %4718 = vmatpush2.bf16.msra.mxu0 %v13717_v36  ;;  %4799 = vmatprep.subr.bf16.mxu1 %v13718_v61  ;;  %v11435_v36 = vld [vmem:[#allocation10 + $0x2a8] ss:$36 sps:$4 sm:$0xff]  }
 0x76c   :  { %4810 = vmatprep.subr.bf16.mxu0 %v13719_v14  ;;  %v11439_v61 = vld [vmem:[#allocation10 + $0x68] ss:$36 sps:$4 sm:$0xff]   ;;  %v11443_v14 = vld [vmem:[#allocation10 + $0x260] ss:$36 sps:$4 sm:$0xff]  }
 0x76e   :  { %4720 = vmatmul.mubr.bf16.vlgmr.msra.gmra.mxu0 %v11258_v55  ;;  %4800 = vmatpush2.bf16.msra.mxu1 %v13720_v41  ;;  %v13765_v41 = vld [vmem:[#allocation170_spill] sm:$0xff] }
 0x76f   :  { %4811 = vmatpush1.bf16.msra.mxu0 %v13721_v50  ;;  %4892 = vmatprep.subr.bf16.mxu1 %v13722_v46  ;;  %v11447_v50 = vld [vmem:[#allocation10 + $0x20] ss:$36 sps:$4 sm:$0xff]  }
 0x770   :  { %4812 = vmatprep.subr.bf16.mxu0 %v13723_v10  ;;  %4842 = vmatprep.mubr.bf16.mxu0 %v13182_v19  ;;  %v13766_v46 = vld [vmem:[#allocation171_spill] sm:$0xff] }
 0x771   :  { %4802 = vmatmul.mubr.bf16.vlgmr.msra.gmra.mxu1 %v11258_v55  ;;  %v11451_v10 = vld [vmem:[#allocation10 + $0x1fc] ss:$36 sps:$4 sm:$0xff]  }
 0x772   :  { %4893 = vmatpush1.bf16.msra.mxu1 %v13724_v21  ;;  %4924 = vmatprep.mubr.bf16.mxu1 %v13182_v19  ;;  %v13767_v21 = vld [vmem:[#allocation172_spill] sm:$0xff] }
 0x773   :  { %4813 = vmatpush1.bf16.msra.mxu0 %v13725_v27  ;;  %4894 = vmatprep.subr.bf16.mxu1 %v13726_v57  ;;  %v11456_v27 = vld [vmem:[#allocation10 + $0x1f8] ss:$36 sps:$4 sm:$0xff]   ;;  %v13768_v57 = vld [vmem:[#allocation173_spill] sm:$0xff] }
 0x774   :  { %4814 = vmatprep.subr.bf16.mxu0 %v13727_v51  ;;  %v11460_v51 = vld [vmem:[#allocation10 + $0x1b4] ss:$36 sps:$4 sm:$0xff]  }
 0x776   :  { %4895 = vmatpush1.bf16.msra.mxu1 %v13728_v2  ;;  %v13769_v2 = vld [vmem:[#allocation174_spill] sm:$0xff] }
 0x777   :  { %4815 = vmatpush1.bf16.msra.mxu0 %v13729_v47  ;;  %4896 = vmatprep.subr.bf16.mxu1 %v13730_v38  ;;  %v11464_v47 = vld [vmem:[#allocation10 + $0x1b0] ss:$36 sps:$4 sm:$0xff]   ;;  %v13770_v38 = vld [vmem:[#allocation175_spill] sm:$0xff] }
 0x778   :  { %4816 = vmatprep.subr.bf16.mxu0 %v13731_v40  ;;  %v11468_v40 = vld [vmem:[#allocation10 + $0x16c] ss:$36 sps:$4 sm:$0xff]  }
 0x77a   :  { %4897 = vmatpush1.bf16.msra.mxu1 %v13732_v42  ;;  %v13771_v42 = vld [vmem:[#allocation176_spill] sm:$0xff] }
 0x77b   :  { %4817 = vmatpush1.bf16.msra.mxu0 %v13733_v29  ;;  %4898 = vmatprep.subr.bf16.mxu1 %v13734_v25  ;;  %v11472_v29 = vld [vmem:[#allocation10 + $0x168] ss:$36 sps:$4 sm:$0xff]  }
 0x77c   :  { %4818 = vmatprep.subr.bf16.mxu0 %v13735_v1  ;;  %v13772_v25 = vld [vmem:[#allocation177_spill] sm:$0xff] }
 0x77d   :  { %v11476_v1 = vld [vmem:[#allocation10 + $0x124] ss:$36 sps:$4 sm:$0xff]  }
 0x77e   :  { %4899 = vmatpush1.bf16.msra.mxu1 %v13736_v60  ;;  %v13773_v60 = vld [vmem:[#allocation178_spill] sm:$0xff] }
 0x77f   :  { %4819 = vmatpush1.bf16.msra.mxu0 %v13737_v3  ;;  %4900 = vmatprep.subr.bf16.mxu1 %v13738_v24  ;;  %v11480_v3 = vld [vmem:[#allocation10 + $0x120] ss:$36 sps:$4 sm:$0xff]  }
 0x780   :  { %4820 = vmatprep.subr.bf16.mxu0 %v13739_v53  ;;  %v13774_v24 = vld [vmem:[#allocation179_spill] sm:$0xff] }
 0x781   :  { %v11484_v53 = vld [vmem:[#allocation10 + $0xdc] ss:$36 sps:$4 sm:$0xff]  }
 0x782   :  { %4901 = vmatpush1.bf16.msra.mxu1 %v13740_v48  ;;  %v13775_v48 = vld [vmem:[#allocation180_spill] sm:$0xff] }
 0x783   :  { %4821 = vmatpush1.bf16.msra.mxu0 %v13741_v33  ;;  %4902 = vmatprep.subr.bf16.mxu1 %v13742_v17  ;;  %v11488_v33 = vld [vmem:[#allocation10 + $0xd8] ss:$36 sps:$4 sm:$0xff]   ;;  %v11491_v17 = vld [vmem:[#allocation10 + $0x2e8] ss:$36 sps:$4 sm:$0xff]  }
 0x784   :  { %4822 = vmatprep.subr.bf16.mxu0 %v13743_v9  ;;  %v11494_v9 = vld [vmem:[#allocation10 + $0x94] ss:$36 sps:$4 sm:$0xff]  }
 0x786   :  { %4903 = vmatpush1.bf16.msra.mxu1 %v13744_v58  ;;  %v11497_v58 = vld [vmem:[#allocation10 + $0x2a4] ss:$36 sps:$4 sm:$0xff]  }
 0x787   :  { %4823 = vmatpush1.bf16.msra.mxu0 %v13745_v26  ;;  %4904 = vmatprep.subr.bf16.mxu1 %v13746_v37  ;;  %v11500_v26 = vld [vmem:[#allocation10 + $0x90] ss:$36 sps:$4 sm:$0xff]   ;;  %v11503_v37 = vld [vmem:[#allocation10 + $0x2a0] ss:$36 sps:$4 sm:$0xff]  }
 0x788   :  { %4824 = vmatprep.subr.bf16.mxu0 %v13747_v6  ;;  %v11506_v6 = vld [vmem:[#allocation10 + $0x4c] ss:$36 sps:$4 sm:$0xff]  }
 0x78a   :  { %4905 = vmatpush1.bf16.msra.mxu1 %v13748_v43  ;;  %v11509_v43 = vld [vmem:[#allocation10 + $0x25c] ss:$36 sps:$4 sm:$0xff]  }
 0x78b   :  { %4825 = vmatpush1.bf16.msra.mxu0 %v13749_v59  ;;  %4906 = vmatprep.subr.bf16.mxu1 %v13750_v15  ;;  %v11512_v59 = vld [vmem:[#allocation10 + $0x48] ss:$36 sps:$4 sm:$0xff]   ;;  %v11515_v15 = vld [vmem:[#allocation10 + $0x258] ss:$36 sps:$4 sm:$0xff]  }
 0x78c   :  { %4851 = vmatprep.subr.bf16.mxu0 %v13751_v32  ;;  %13776 = vst [vmem:[#allocation21_spill] sm:$0xff] %v11512_v59  ;;  %13777 = vst [vmem:[#allocation31_spill] sm:$0xff] %v11515_v15  ;;  %v11518_v32 = vld [vmem:[#allocation10 + $0x4] ss:$36 sps:$4 sm:$0xff]  }
 0x78d   :  { %13778 = vst [vmem:[#allocation34_spill] sm:$0xff] %v11518_v32 }
 0x78e   :  { %4843 = vmatmul.mubr.bf16.vlgmr.msra.gmra.mxu0 %v11285_v31  ;;  %4907 = vmatpush1.bf16.msra.mxu1 %v13752_v5  ;;  %v13779_v5 = vmov 0.0  }
 0x78f   :  { %4852 = vmatpush1.bf16.msra.mxu0 %v13753_v8  ;;  %4883 = vmatprep.mubr.bf16.mxu0 %v11254_v4  ;;  %v11523_v8 = vld [vmem:[#allocation10] ss:$36 sps:$4 sm:$0xff]  }
 0x790   :  { %7215 = vmatprep.subr.bf16.mxu1 %v13754_v45  ;;  %4853 = vmatprep.subr.bf16.mxu0 %v13755_v23  ;;  %13780 = vst [vmem:[#allocation22_spill] sm:$0xff] %v11523_v8  ;;  %v11526_v45 = vld [vmem:[#allocation10 + $0x698] ss:$36 sps:$4 sm:$0xff]  }
 0x791   :  { %4925 = vmatmul.mubr.bf16.vlgmr.msra.gmra.mxu1 %v11285_v31  ;;  %13781 = vst [vmem:[#allocation35_spill] sm:$0xff] %v11526_v45  ;;  %v11532_v23 = vld [vmem:[#allocation10 + $0x43c] ss:$36 sps:$4 sm:$0xff]  }
 0x792   :  { %7216 = vmatpush3.bf16.msra.mxu1 %v11059_v54  ;;  %4965 = vmatprep.mubr.bf16.mxu1 %v11254_v4  ;;  %v11411_v54 = vld [vmem:[#allocation10 + $0x380] ss:$36 sps:$4 sm:$0xff]   ;;  %v11423_v4 = vld [vmem:[#allocation10 + $0xf8] ss:$36 sps:$4 sm:$0xff]   ;;  %13782 = vst [vmem:[#allocation38_spill] sm:$0xff] %v11532_v23 }
 0x793   :  { %4854 = vmatpush1.bf16.msra.mxu0 %v13756_v20  ;;  %7217 = vmatprep.subr.bf16.mxu1 %v13757_v44  ;;  %v11535_v44 = vld [vmem:[#allocation10 + $0x438] ss:$36 sps:$4 sm:$0xff]  }
 0x794   :  { %4855 = vmatprep.subr.bf16.mxu0 %v11069_v39  ;;  %v11415_v39 = vld [vmem:[#allocation10 + $0x140] ss:$36 sps:$4 sm:$0xff]   ;;  %13783 = vst [vmem:[#allocation23_spill] sm:$0xff] %v11535_v44 }
 0x796   :  { %7218 = vmatpush3.bf16.msra.mxu1 %v13758_v28 }
 0x797   :  { %4856 = vmatpush1.bf16.msra.mxu0 %v13759_v0  ;;  %7219 = vmatprep.subr.bf16.mxu1 %v11078_v56  ;;  %v11419_v56 = vld [vmem:[#allocation10 + $0x338] ss:$36 sps:$4 sm:$0xff]  }
 0x798   :  { %4857 = vmatprep.subr.bf16.mxu0 %v13760_v22  ;;  %v11541_v0 = vld [vmem:[#allocation10 + $0x3f4] ss:$36 sps:$4 sm:$0xff]  }
 0x799   :  { %13785 = vst [vmem:[#allocation42_spill] sm:$0xff] %v11541_v0 }
 0x79a   :  { %7220 = vmatpush3.bf16.msra.mxu1 %v11407_v7 }
 0x79b   :  { %4858 = vmatpush1.bf16.msra.mxu0 %v11085_v35  ;;  %7221 = vmatprep.subr.bf16.mxu1 %v11411_v54  ;;  %v11427_v35 = vld [vmem:[#allocation10 + $0x2f0] ss:$36 sps:$4 sm:$0xff]  }
 0x79c   :  { %4859 = vmatprep.subr.bf16.mxu0 %v11089_v34  ;;  %v13761_v34 = vld [vmem:[#allocation166_spill] sm:$0xff] }
 0x79e   :  { %7222 = vmatpush3.bf16.msra.mxu1 %v11415_v39 }
 0x79f   :  { %4860 = vmatpush1.bf16.msra.mxu0 %v11093_v18  ;;  %7223 = vmatprep.subr.bf16.mxu1 %v11419_v56  ;;  %v13762_v18 = vld [vmem:[#allocation167_spill] sm:$0xff] }
 0x7a0   :  { %4861 = vmatprep.subr.bf16.mxu0 %v11097_v11  ;;  %v13763_v11 = vld [vmem:[#allocation168_spill] sm:$0xff] }
 0x7a2   :  { %7224 = vmatpush3.bf16.msra.mxu1 %v11423_v4 }
 0x7a3   :  { %4862 = vmatpush1.bf16.msra.mxu0 %v11101_v52  ;;  %7225 = vmatprep.subr.bf16.mxu1 %v11427_v35  ;;  %v13764_v52 = vld [vmem:[#allocation169_spill] sm:$0xff] }
 0x7a4   :  { %4863 = vmatprep.subr.bf16.mxu0 %v13761_v34  ;;  %v11545_v34 = vld [vmem:[#allocation10 + $0x3f0] ss:$36 sps:$4 sm:$0xff]  }
 0x7a5   :  { %13786 = vst [vmem:[#allocation24_spill] sm:$0xff] %v11545_v34 }
 0x7a6   :  { %7226 = vmatpush3.bf16.msra.mxu1 %v11431_v63 }
 0x7a7   :  { %4864 = vmatpush1.bf16.msra.mxu0 %v13762_v18  ;;  %7227 = vmatprep.subr.bf16.mxu1 %v11435_v36  ;;  %v11548_v18 = vld [vmem:[#allocation10 + $0x608] ss:$36 sps:$4 sm:$0xff]  }
 0x7a8   :  { %4865 = vmatprep.subr.bf16.mxu0 %v13763_v11  ;;  %13787 = vst [vmem:[#allocation43_spill] sm:$0xff] %v11548_v18 }
 0x7aa   :  { %7228 = vmatpush3.bf16.msra.mxu1 %v11439_v61 }
 0x7ab   :  { %4866 = vmatpush1.bf16.msra.mxu0 %v13764_v52  ;;  %7229 = vmatprep.subr.bf16.mxu1 %v11443_v14  ;;  %v11551_v52 = vld [vmem:[#allocation10 + $0x3ac] ss:$36 sps:$4 sm:$0xff]  }
 0x7ac   :  { %4867 = vmatprep.subr.bf16.mxu0 %v13765_v41  ;;  %13788 = vst [vmem:[#allocation46_spill] sm:$0xff] %v11551_v52  ;;  %v11555_v41 = vld [vmem:[#allocation10 + $0x3a8] ss:$36 sps:$4 sm:$0xff]  }
 0x7ad   :  { %13789 = vst [vmem:[#allocation25_spill] sm:$0xff] %v11555_v41 }
 0x7ae   :  { %7230 = vmatpush3.bf16.msra.mxu1 %v11447_v50 }
 0x7af   :  { %4868 = vmatpush2.bf16.msra.mxu0 %v13766_v46  ;;  %5103 = vmatprep.subr.bf16.mxu1 %v11451_v10  ;;  %v11558_v46 = vld [vmem:[#allocation10 + $0x5c0] ss:$36 sps:$4 sm:$0xff]  }
 0x7b0   :  { %4869 = vmatprep.subr.bf16.mxu0 %v13767_v21  ;;  %13790 = vst [vmem:[#allocation47_spill] sm:$0xff] %v11558_v46  ;;  %v11561_v21 = vld [vmem:[#allocation10 + $0x364] ss:$36 sps:$4 sm:$0xff]  }
 0x7b1   :  { %4966 = vmatmul.mubr.bf16.vlgmr.msra.gmra.mxu1 %v11258_v55  ;;  %13791 = vst [vmem:[#allocation50_spill] sm:$0xff] %v11561_v21 }
 0x7b2   :  { %5104 = vmatpush1.bf16.msra.mxu1 %v11456_v27 }
 0x7b3   :  { %4870 = vmatpush2.bf16.msra.mxu0 %v13768_v57  ;;  %5105 = vmatprep.subr.bf16.mxu1 %v11460_v51  ;;  %v11565_v57 = vld [vmem:[#allocation10 + $0x360] ss:$36 sps:$4 sm:$0xff]  }
 0x7b4   :  { %4871 = vmatprep.subr.bf16.mxu0 %v13769_v2  ;;  %13792 = vst [vmem:[#allocation26_spill] sm:$0xff] %v11565_v57  ;;  %v11568_v2 = vld [vmem:[#allocation10 + $0x578] ss:$36 sps:$4 sm:$0xff]  }
 0x7b5   :  { %13793 = vst [vmem:[#allocation51_spill] sm:$0xff] %v11568_v2 }
 0x7b6   :  { %5106 = vmatpush1.bf16.msra.mxu1 %v11464_v47 }
 0x7b7   :  { %4872 = vmatpush2.bf16.msra.mxu0 %v13770_v38  ;;  %5107 = vmatprep.subr.bf16.mxu1 %v11468_v40  ;;  %v11571_v38 = vld [vmem:[#allocation10 + $0x31c] ss:$36 sps:$4 sm:$0xff]  }
 0x7b8   :  { %4873 = vmatprep.subr.bf16.mxu0 %v13771_v42  ;;  %13794 = vst [vmem:[#allocation54_spill] sm:$0xff] %v11571_v38  ;;  %v11575_v42 = vld [vmem:[#allocation10 + $0x318] ss:$36 sps:$4 sm:$0xff]  }
 0x7b9   :  { %13795 = vst [vmem:[#allocation27_spill] sm:$0xff] %v11575_v42 }
 0x7ba   :  { %5108 = vmatpush1.bf16.msra.mxu1 %v11472_v29 }
 0x7bb   :  { %4874 = vmatpush2.bf16.msra.mxu0 %v13772_v25  ;;  %5109 = vmatprep.subr.bf16.mxu1 %v11476_v1  ;;  %v11578_v25 = vld [vmem:[#allocation10 + $0x530] ss:$36 sps:$4 sm:$0xff]  }
 0x7bc   :  { %4875 = vmatprep.subr.bf16.mxu0 %v13773_v60  ;;  %13796 = vst [vmem:[#allocation55_spill] sm:$0xff] %v11578_v25  ;;  %v11581_v60 = vld [vmem:[#allocation10 + $0x2d4] ss:$36 sps:$4 sm:$0xff]  }
 0x7bd   :  { %13797 = vst [vmem:[#allocation28_spill] sm:$0xff] %v11581_v60 }
 0x7be   :  { %5110 = vmatpush1.bf16.msra.mxu1 %v11480_v3 }
 0x7bf   :  { %4876 = vmatpush2.bf16.msra.mxu0 %v13774_v24  ;;  %5111 = vmatprep.subr.bf16.mxu1 %v11484_v53  ;;  %v11585_v24 = vld [vmem:[#allocation10 + $0x2d0] ss:$36 sps:$4 sm:$0xff]  }
 0x7c0   :  { %4877 = vmatprep.subr.bf16.mxu0 %v13775_v48  ;;  %13798 = vst [vmem:[#allocation58_spill] sm:$0xff] %v11585_v24  ;;  %v11588_v48 = vld [vmem:[#allocation10 + $0x4e8] ss:$36 sps:$4 sm:$0xff]  }
 0x7c1   :  { %13799 = vst [vmem:[#allocation29_spill] sm:$0xff] %v11588_v48 }
 0x7c2   :  { %5112 = vmatpush1.bf16.msra.mxu1 %v11488_v33 }
 0x7c3   :  { %4878 = vmatpush2.bf16.msra.mxu0 %v11491_v17  ;;  %5113 = vmatprep.subr.bf16.mxu1 %v11494_v9 }
 0x7c4   :  { %4879 = vmatprep.subr.bf16.mxu0 %v11497_v58 }
 0x7c6   :  { %5114 = vmatpush1.bf16.msra.mxu1 %v11500_v26 }
 0x7c7   :  { %4880 = vmatpush2.bf16.msra.mxu0 %v11503_v37  ;;  %5115 = vmatprep.subr.bf16.mxu1 %v11506_v6 }
 0x7c8   :  { %4881 = vmatprep.subr.bf16.mxu0 %v11509_v43 }
 0x7ca   :  { %5116 = vmatpush1.bf16.msra.mxu1 %v11512_v59 }
 0x7cb   :  { %4882 = vmatpush2.bf16.msra.mxu0 %v11515_v15  ;;  %5117 = vmatprep.subr.bf16.mxu1 %v11518_v32 }
 0x7cc   :  { %7443 = vmatprep.subr.bf16.mxu0 %v13779_v5 }
 0x7ce   :  { %4884 = vmatmul.mubr.bf16.vlgmr.msra.gmra.mxu0 %v11258_v55  ;;  %5118 = vmatpush1.bf16.msra.mxu1 %v11523_v8  ;;  %v11538_v55 = vld [vmem:[#allocation10 + $0x650] ss:$36 sps:$4 sm:$0xff]  }
 0x7cf   :  { %7444 = vmatpush3.bf16.msra.mxu0 %v11526_v45  ;;  %7459 = vmatprep.mubr.msk.bf16.mxu0 %vm9160_vm1, %v13779_v5  ;;  %13784 = vst [vmem:[#allocation39_spill] sm:$0xff] %v11538_v55 }
 0x7d0   :  { %7445 = vmatprep.subr.bf16.mxu0 %v13779_v5  ;;  %5119 = vmatprep.subr.bf16.mxu1 %v11532_v23 }
 0x7d1   :  { %v4639_v20 = vpop.f32.mrf.mxu1 }
 0x7d2   :  { %5120 = vmatpush2.bf16.msra.mxu1 %v11535_v44 }
 0x7d3   :  { %7446 = vmatpush3.bf16.msra.mxu0 %v11538_v55  ;;  %v4641_v28 = vpop.f32.mrf.mxu1  ;;  %5121 = vmatprep.subr.bf16.mxu1 %v11541_v0 }
 0x7d4   :  { %7447 = vmatprep.subr.bf16.mxu0 %v13779_v5 }
 0x7d5   :  { %v4643_v22 = vpop.f32.mrf.mxu1 }
 0x7d6   :  { %5122 = vmatpush2.bf16.msra.mxu1 %v11545_v34  ;;  %v11591_v22 = vld [vmem:[#allocation10 + $0x28c] ss:$36 sps:$4 sm:$0xff]  }
 0x7d7   :  { %7448 = vmatpush3.bf16.msra.mxu0 %v11548_v18  ;;  %v4644_v11 = vpop.f32.mrf.mxu1  ;;  %5123 = vmatprep.subr.bf16.mxu1 %v11551_v52  ;;  %13800 = vst [vmem:[#allocation59_spill] sm:$0xff] %v11591_v22 }
 0x7d8   :  { %7449 = vmatprep.subr.bf16.mxu0 %v13779_v5  ;;  %v11595_v11 = vld [vmem:[#allocation10 + $0x288] ss:$36 sps:$4 sm:$0xff]  }
 0x7d9   :  { %13801 = vst [vmem:[#allocation30_spill] sm:$0xff] %v11595_v11 }
 0x7da   :  { %5124 = vmatpush2.bf16.msra.mxu1 %v11555_v41 }
 0x7db   :  { %7450 = vmatpush3.bf16.msra.mxu0 %v11558_v46  ;;  %5125 = vmatprep.subr.bf16.mxu1 %v11561_v21  ;;  %v11631_v21 = vld [vmem:[#allocation10 + $0x5e8] ss:$36 sps:$4 sm:$0xff]  }
 0x7dc   :  { %7451 = vmatprep.subr.bf16.mxu0 %v13779_v5  ;;  %13811 = vst [vmem:[#allocation49_spill] sm:$0xff] %v11631_v21 }
 0x7de   :  { %5126 = vmatpush2.bf16.msra.mxu1 %v11565_v57 }
 0x7df   :  { %7452 = vmatpush3.bf16.msra.mxu0 %v11568_v2  ;;  %5127 = vmatprep.subr.bf16.mxu1 %v11571_v38  ;;  %v11619_v38 = vld [vmem:[#allocation10 + $0x634] ss:$36 sps:$4 sm:$0xff]   ;;  %v11628_v2 = vld [vmem:[#allocation10 + $0x5ec] ss:$36 sps:$4 sm:$0xff]  }
 0x7e0   :  { %7453 = vmatprep.subr.bf16.mxu0 %v13779_v5  ;;  %13808 = vst [vmem:[#allocation44_spill] sm:$0xff] %v11619_v38  ;;  %13810 = vst [vmem:[#allocation48_spill] sm:$0xff] %v11628_v2 }
 0x7e2   :  { %5128 = vmatpush2.bf16.msra.mxu1 %v11575_v42  ;;  %v11613_v42 = vld [vmem:[#allocation10 + $0x678] ss:$36 sps:$4 sm:$0xff]  }
 0x7e3   :  { %7454 = vmatpush3.bf16.msra.mxu0 %v11578_v25  ;;  %5129 = vmatprep.subr.bf16.mxu1 %v11581_v60  ;;  %v11598_v60 = vld [vmem:[#allocation10 + $0x4a0] ss:$36 sps:$4 sm:$0xff]   ;;  %13806 = vst [vmem:[#allocation40_spill] sm:$0xff] %v11613_v42 }
 0x7e4   :  { %7455 = vmatprep.subr.bf16.mxu0 %v13779_v5  ;;  %13802 = vst [vmem:[#allocation32_spill] sm:$0xff] %v11598_v60  ;;  %v11601_v25 = vld [vmem:[#allocation10 + $0x244] ss:$36 sps:$4 sm:$0xff]  }
 0x7e5   :  { %13803 = vst [vmem:[#allocation33_spill] sm:$0xff] %v11601_v25 }
 0x7e6   :  { %5130 = vmatpush2.bf16.msra.mxu1 %v11585_v24  ;;  %v11604_v24 = vld [vmem:[#allocation10 + $0x67c] ss:$36 sps:$4 sm:$0xff]  }
 0x7e7   :  { %7456 = vmatpush3.bf16.msra.mxu0 %v11588_v48  ;;  %5131 = vmatprep.subr.bf16.mxu1 %v11591_v22  ;;  %13804 = vst [vmem:[#allocation36_spill] sm:$0xff] %v11604_v24  ;;  %v11608_v48 = vld [vmem:[#allocation10 + $0x240] ss:$36 sps:$4 sm:$0xff]  }
 0x7e8   :  { %7457 = vmatprep.subr.bf16.mxu0 %v13779_v5  ;;  %13805 = vst [vmem:[#allocation37_spill] sm:$0xff] %v11608_v48 }
 0x7ea   :  { %5132 = vmatpush2.bf16.msra.mxu1 %v11595_v11 }
 0x7eb   :  { %7458 = vmatpush3.bf16.msra.mxu0 %v11598_v60  ;;  %5133 = vmatprep.subr.bf16.mxu1 %v11601_v25  ;;  %v11616_v60 = vld [vmem:[#allocation10 + $0x684] ss:$36 sps:$4 sm:$0xff]  }
 0x7ec   :  { %5144 = vmatprep.subr.bf16.mxu0 %v11604_v24  ;;  %13807 = vst [vmem:[#allocation41_spill] sm:$0xff] %v11616_v60  ;;  %v11625_v24 = vld [vmem:[#allocation10 + $0x630] ss:$36 sps:$4 sm:$0xff]  }
 0x7ed   :  { %13809 = vst [vmem:[#allocation45_spill] sm:$0xff] %v11625_v24 }
 0x7ee   :  { %7460 = vmatmul.mubr.bf16.vlgmr.msra.gmra.mxu0 %v11285_v31  ;;  %v4680_v22 = vpop.f32.mrf.mxu0  ;;  %5134 = vmatpush2.bf16.msra.mxu1 %v11608_v48 }
 0x7ef   :  { %v11611_v11 = vadd.f32 %v4680_v22, %v4639_v20  ;;  %5145 = vmatpush1.bf16.msra.mxu0 %v11613_v42  ;;  %5226 = vmatprep.subr.bf16.mxu1 %v11616_v60 }
 0x7f0   :  { %v4682_v25 = vpop.f32.mrf.mxu0  ;;  %5146 = vmatprep.subr.bf16.mxu0 %v11619_v38  ;;  %5176 = vmatprep.mubr.bf16.mxu0 %v13182_v19 }
 0x7f1   :  { %v11623_v31 = vadd.f32 %v4682_v25, %v4641_v28  ;;  %v4762_v48 = vpop.f32.mrf.mxu1  ;;  %v11634_v28 = vld [vmem:[#allocation10 + $0x5a4] ss:$36 sps:$4 sm:$0xff]  }
 0x7f2   :  { %v4684_v20 = vpop.f32.mrf.mxu0  ;;  %13812 = vst [vmem:[#allocation52_spill] sm:$0xff] %v11634_v28  ;;  %v11637_v25 = vld [vmem:[#allocation10 + $0x5a0] ss:$36 sps:$4 sm:$0xff]  }
 0x7f3   :  { %v4764_v22 = vpop.f32.mrf.mxu1  ;;  %5147 = vmatpush1.bf16.msra.mxu0 %v11625_v24  ;;  %13813 = vst [vmem:[#allocation53_spill] sm:$0xff] %v11637_v25  ;;  %v11640_v20 = vld [vmem:[#allocation10 + $0x55c] ss:$36 sps:$4 sm:$0xff]  }
 0x7f4   :  { %v4685_v42 = vpop.f32.mrf.mxu0  ;;  %5148 = vmatprep.subr.bf16.mxu0 %v11628_v2  ;;  %13814 = vst [vmem:[#allocation56_spill] sm:$0xff] %v11640_v20 }
 0x7f5   :  { %v4766_v60 = vpop.f32.mrf.mxu1  ;;  %v11643_v42 = vld [vmem:[#allocation10 + $0x558] ss:$36 sps:$4 sm:$0xff]  }
 0x7f6   :  { %13815 = vst [vmem:[#allocation57_spill] sm:$0xff] %v11643_v42  ;;  %v11649_v60 = vld [vmem:[#allocation10 + $0x510] ss:$36 sps:$4 sm:$0xff]  }
 0x7f7   :  { %v4767_v57 = vpop.f32.mrf.mxu1  ;;  %5149 = vmatpush1.bf16.msra.mxu0 %v11631_v21  ;;  %13817 = vst [vmem:[#allocation61_spill] sm:$0xff] %v11649_v60  ;;  %v4598_v21 = vld [vmem:[#allocation3 + $0x98] sm:$0xff] }
 0x7f8   :  { %5150 = vmatprep.subr.bf16.mxu0 %v11634_v28  ;;  %v11646_v57 = vld [vmem:[#allocation10 + $0x514] ss:$36 sps:$4 sm:$0xff]   ;;  %v11652_v28 = vld [vmem:[#allocation10 + $0x4cc] ss:$36 sps:$4 sm:$0xff]   ;;  %v5039_v2 = vrot.slane %v4598_v21, 4 }
 0x7f9   :  { %13816 = vst [vmem:[#allocation60_spill] sm:$0xff] %v11646_v57  ;;  %13818 = vst [vmem:[#allocation62_spill] sm:$0xff] %v11652_v28 }
 0x7fb   :  { %5151 = vmatpush1.bf16.msra.mxu0 %v11637_v25  ;;  %v11655_v25 = vld [vmem:[#allocation10 + $0x4c8] ss:$36 sps:$4 sm:$0xff]  }
 0x7fc   :  { %5152 = vmatprep.subr.bf16.mxu0 %v11640_v20  ;;  %13819 = vst [vmem:[#allocation63_spill] sm:$0xff] %v11655_v25  ;;  %v11658_v20 = vld [vmem:[#allocation10 + $0x484] ss:$36 sps:$4 sm:$0xff]  }
 0x7fd   :  { %13820 = vst [vmem:[#allocation64_spill] sm:$0xff] %v11658_v20 }
 0x7ff   :  { %5153 = vmatpush1.bf16.msra.mxu0 %v11643_v42  ;;  %v11661_v42 = vld [vmem:[#allocation10 + $0x480] ss:$36 sps:$4 sm:$0xff]  }
 0x800   :  { %5154 = vmatprep.subr.bf16.mxu0 %v11646_v57  ;;  %13821 = vst [vmem:[#allocation65_spill] sm:$0xff] %v11661_v42  ;;  %v11664_v57 = vld [vmem:[#allocation10 + $0x204] ss:$36 sps:$4 sm:$0xff]  }
 0x801   :  { %13822 = vst [vmem:[#allocation66_spill] sm:$0xff] %v11664_v57 }
 0x803   :  { %5155 = vmatpush1.bf16.msra.mxu0 %v11649_v60  ;;  %v11667_v60 = vld [vmem:[#allocation3 + $0xa0] sm:$0xff] }
 0x804   :  { %5156 = vmatprep.subr.bf16.mxu0 %v11652_v28  ;;  %v13023_v28 = vrot.slane %v11667_v60, 4 }
 0x807   :  { %5157 = vmatpush1.bf16.msra.mxu0 %v11655_v25  ;;  %v5041_v25 = vsel %vm3048_vm0, %v5039_v2, %v13023_v28 }
 0x808   :  { %5158 = vmatprep.subr.bf16.mxu0 %v11658_v20  ;;  %v5044_v41 = vunpack.c.l.bf16 %v5041_v25  ;;  %v5045_v45 = vunpack.c.h.bf16 %v5041_v25 }
 0x80b   :  { %5159 = vmatpush1.bf16.msra.mxu0 %v11661_v42 }
 0x80c   :  { %5185 = vmatprep.subr.bf16.mxu0 %v11664_v57 }
 0x82e   :  { %v4721_v24 = vpop.f32.mrf.mxu0 }
 0x82f   :  { %v4763_v20 = vadd.f32 %v4762_v48, %v4721_v24 }
 0x830   :  { %v4723_v38 = vpop.f32.mrf.mxu0 }
 0x831   :  { %v4765_v46 = vadd.f32 %v4764_v22, %v4723_v38  ;;  %v4803_v42 = vpop.f32.mrf.mxu1  ;;  %v4597_v22 = vld [vmem:[#allocation3 + $0x90] sm:$0xff] }
 0x832   :  { %v4725_v52 = vpop.f32.mrf.mxu0  ;;  %v5013_v28 = vunpack.c.l.bf16 %v4597_v22 }
 0x833   :  { %v5047_v18 = vadd.f32 %v5044_v41, %v4765_v46  ;;  %v4805_v34 = vpop.f32.mrf.mxu1  ;;  %v5014_v41 = vunpack.c.h.bf16 %v4597_v22 }
 0x834   :  { %v4726_v57 = vpop.f32.mrf.mxu0  ;;  %v5016_v52 = vadd.f32 %v5013_v28, %v11611_v11 }
 0x835   :  { %v4807_v0 = vpop.f32.mrf.mxu1 }
 0x836   :  { %v5017_v0 = vadd.f32 %v5014_v41, %v11623_v31  ;;  %v5015_v31 = vunpack.c.l.bf16 %v4598_v21 }
 0x837   :  { %v4808_v55 = vpop.f32.mrf.mxu1 }
 0x838   :  { %v7013_v55 = vmul.f32 -1.442695, %v5016_v52  ;;  %v7014_v46 = vmul.f32 -1.442695, %v5017_v0  ;;  %v5018_v28 = vadd.f32 %v5015_v31, %v4763_v20  ;;  %v4600_v0 = vld [vmem:[#allocation3 + $0xa8] sm:$0xff] }
 0x83a   :  { %8077 = vpow2.f32 %v7013_v55 }
 0x83b   :  { %8079 = vpow2.f32 %v7014_v46 }
 0x847   :  { %v8078_v25 = vpop.eup %8077 }
 0x848   :  { %v5028_v57 = vadd.f32 1.0, %v8078_v25  ;;  %v5075_v25 = vunpack.c.h.bf16 %v4600_v0 }
 0x84e   :  { %v4844_v44 = vpop.f32.mrf.mxu0 }
 0x84f   :  { %v4845_v23 = vadd.f32 %v4844_v44, %v4803_v42  ;;  %v8080_v42 = vpop.eup %8079 }
 0x850   :  { %v4846_v8 = vpop.f32.mrf.mxu0  ;;  %v5029_v11 = vadd.f32 1.0, %v8080_v42 }
 0x851   :  { %v5048_v5 = vadd.f32 %v5045_v45, %v4845_v23  ;;  %v4847_v32 = vadd.f32 %v4846_v8, %v4805_v34  ;;  %v4926_v15 = vpop.f32.mrf.mxu1  ;;  %v7016_v23 = vmul.f32 -1.442695, %v5047_v18 }
 0x852   :  { %v4848_v59 = vpop.f32.mrf.mxu0 }
 0x853   :  { %v4928_v2 = vpop.f32.mrf.mxu1  ;;  %v7017_v34 = vmul.f32 -1.442695, %v5048_v5  ;;  %8081 = vpow2.f32 %v7016_v23 }
 0x854   :  { %v4849_v24 = vpop.f32.mrf.mxu0 }
 0x855   :  { %v4930_v48 = vpop.f32.mrf.mxu1  ;;  %8083 = vpow2.f32 %v7017_v34  ;;  %v5074_v34 = vunpack.c.l.bf16 %v4600_v0 }
 0x856   :  { %8085 = vrcp.f32 %v5028_v57  ;;  %v7015_v48 = vmul.f32 -1.442695, %v5018_v28 }
 0x857   :  { %v4931_v38 = vpop.f32.mrf.mxu1  ;;  %8087 = vrcp.f32 %v5029_v11 }
 0x858   :  { %8089 = vpow2.f32 %v7015_v48 }
 0x860   :  { %v8082_v24 = vpop.eup %8081 }
 0x861   :  { %v5059_v52 = vadd.f32 1.0, %v8082_v24 }
 0x862   :  { %v8084_v38 = vpop.eup %8083 }
 0x863   :  { %v5060_v5 = vadd.f32 1.0, %v8084_v38  ;;  %8091 = vrcp.f32 %v5059_v52 }
 0x865   :  { %8093 = vrcp.f32 %v5060_v5 }
 0x871   :  { %v11675_v44 = vpop.f32.mrf.mxu1 }
 0x873   :  { %v11677_v8 = vpop.f32.mrf.mxu1 }
 0x875   :  { %v7234_v59 = vpop.f32.mrf.mxu1 }
 0x876   :  { %v8086_v59 = vpop.eup %8085 }
 0x877   :  { %v7235_v45 = vpop.f32.mrf.mxu1  ;;  %v8088_v20 = vpop.eup %8087 }
 0x878   :  { %v8090_v48 = vpop.eup %8089 }
 0x879   :  { %v8092_v38 = vpop.eup %8091 }
 0x87a   :  { %v8094_v52 = vpop.eup %8093 }
 0x87b   :  { %v5084_v0 = vsub.f32 1.0, %v8094_v52 }
 0x88e   :  { %v4885_v22 = vpop.f32.mrf.mxu0 }
 0x88f   :  { %v4927_v41 = vadd.f32 %v4926_v15, %v4885_v22  ;;  %v13823_v15 = vrot.slane %v11667_v60, 4  ;;  %v5030_v22 = vadd.f32 1.0, %v8090_v48  ;;  %v5089_v60 = vmul.f32 %v8092_v38, %v11248_v16 }
 0x890   :  { %v4887_v55 = vpop.f32.mrf.mxu0  ;;  %v7233_v16 = vadd.f32 %v11677_v8, %v11675_v44 }
 0x891   :  { %v5068_v18 = vadd.f32 %v4927_v41, %v9668_v13  ;;  %v4929_v46 = vadd.f32 %v4928_v2, %v4887_v55  ;;  %v5046_v57 = vunpack.c.l.bf16 %v13823_v15  ;;  %v5083_v41 = vsub.f32 1.0, %v8092_v38  ;;  %v4601_v15 = vld [vmem:[#allocation3 + $0xb0] sm:$0xf]  ;;  %v11712_v38 = vld [vmem:[#allocation10 + $0x5f4] ss:$36 sps:$4 sm:$0xff]  }
 0x892   :  { %v4889_v45 = vpop.f32.mrf.mxu0 }
 0x893   :  { %v5071_v23 = vmul.f32 %v8086_v59, %v5068_v18  ;;  %v5069_v21 = vadd.f32 %v4929_v46, %v9671_v12  ;;  %v5049_v28 = vadd.f32 %v5046_v57, %v4847_v32  ;;  %v5090_v32 = vmul.f32 %v8094_v52, %v11250_v62  ;;  %v11715_v52 = vld [vmem:[#allocation10 + $0x5f0] ss:$36 sps:$4 sm:$0xff]  }
 0x894   :  { %v4890_v42 = vpop.f32.mrf.mxu0 }
 0x895   :  { %v5077_v11 = vadd.f32 %v5074_v34, %v5071_v23  ;;  %v5072_v31 = vmul.f32 %v8088_v20, %v5069_v21  ;;  %v7018_v2 = vmul.f32 -1.442695, %v5049_v28  ;;  %v11701_v42 = vld [vmem:[#allocation10 + $0x680] ss:$36 sps:$4 sm:$0xff]  }
 0x897   :  { %8095 = vtanh.f32 %v5077_v11  ;;  %v5078_v24 = vadd.f32 %v5075_v25, %v5072_v31  ;;  %v11705_v11 = vld [vmem:[#allocation10 + $0x63c] ss:$36 sps:$4 sm:$0xff]  }
 0x899   :  { %8097 = vtanh.f32 %v5078_v24  ;;  %v5076_v24 = vunpack.c.l.bf16 %v4601_v15 }
 0x89a   :  { %8099 = vpow2.f32 %v7018_v2  ;;  %v11709_v2 = vld [vmem:[#allocation10 + $0x638] ss:$36 sps:$4 sm:$0xff]  }
 0x89b   :  { %8101 = vrcp.f32 %v5030_v22 }
 0x8a4   :  { %v8096_v55 = vpop.eup %8095 }
 0x8a5   :  { %v5086_v5 = vmul.f32 %v8096_v55, %v5083_v41  ;;  %v11718_v41 = vld [vmem:[#allocation10 + $0x5ac] ss:$36 sps:$4 sm:$0xff]  }
 0x8a6   :  { %v8098_v18 = vpop.eup %8097  ;;  %v11721_v55 = vld [vmem:[#allocation10 + $0x5a8] ss:$36 sps:$4 sm:$0xff]  }
 0x8a7   :  { %v5087_v46 = vmul.f32 %v8098_v18, %v5084_v0  ;;  %v11685_v59 = vadd.f32 %v5089_v60, %v5086_v5  ;;  %v8100_v34 = vpop.eup %8099  ;;  %v11724_v0 = vld [vmem:[#allocation10 + $0x564] ss:$36 sps:$4 sm:$0xff]   ;;  %v11730_v18 = vld [vmem:[#allocation10 + $0x51c] ss:$36 sps:$4 sm:$0xff]  }
 0x8a8   :  { %v5061_v62 = vadd.f32 1.0, %v8100_v34  ;;  %v8102_v8 = vpop.eup %8101  ;;  %v11727_v5 = vld [vmem:[#allocation10 + $0x560] ss:$36 sps:$4 sm:$0xff]  }
 0x8a9   :  { %v11687_v45 = vadd.f32 %v5090_v32, %v5087_v46  ;;  %v11695_v21 = vpack.c.bf16 %v11685_v59, %v11685_v59  ;;  %v11733_v46 = vld [vmem:[#allocation10 + $0x518] ss:$36 sps:$4 sm:$0xff]  }
 0x8aa   :  { %8103 = vrcp.f32 %v5061_v62 }
 0x8ab   :  { %v11691_v23 = vpack.c.bf16 %v11687_v45, %v11687_v45 }
 0x8ad   :  { %5135 = vmatprep.mubr.bf16.mxu1 %v11691_v23 }
 0x8ae   :  { %v5007_v20 = vpop.f32.mrf.mxu0  ;;  %5136 = vmatmul.mubr.bf16.vlgmr.msra.gmra.mxu1 %v11695_v21 }
 0x8af   :  { %v5008_v25 = vadd.f32 %v7233_v16, %v5007_v20  ;;  %5227 = vmatpush1.bf16.msra.mxu1 %v11701_v42  ;;  %5258 = vmatprep.mubr.bf16.mxu1 %v13182_v19  ;;  %v11736_v16 = vld [vmem:[#allocation10 + $0x4d4] ss:$36 sps:$4 sm:$0xff]  }
 0x8b0   :  { %v7461_v57 = vpop.f32.mrf.mxu0  ;;  %5228 = vmatprep.subr.bf16.mxu1 %v11705_v11 }
 0x8b1   :  { %v5070_v44 = vadd.f32 %v5008_v25, %v9691_v49  ;;  %v11740_v25 = vld [vmem:[#allocation10 + $0x4d0] ss:$36 sps:$4 sm:$0xff]  }
 0x8b2   :  { %v5010_v31 = vpop.f32.mrf.mxu0  ;;  %v11745_v57 = vld [vmem:[#allocation10 + $0x48c] ss:$36 sps:$4 sm:$0xff]  }
 0x8b3   :  { %v5073_v28 = vmul.f32 %v8102_v8, %v5070_v44  ;;  %5229 = vmatpush1.bf16.msra.mxu1 %v11709_v2  ;;  %v11752_v8 = vld [vmem:[#allocation10 + $0x488] ss:$36 sps:$4 sm:$0xff]  }
 0x8b4   :  { %v7462_v48 = vpop.f32.mrf.mxu0  ;;  %5230 = vmatprep.subr.bf16.mxu1 %v11712_v38  ;;  %v11760_v31 = vld [vmem:[#allocation10 + $0x20c] ss:$36 sps:$4 sm:$0xff]  }
 0x8b5   :  { %v5079_v22 = vadd.f32 %v5076_v24, %v5073_v28  ;;  %v11763_v28 = vld [vmem:[#allocation10 + $0x1bc] ss:$36 sps:$4 sm:$0xff]   ;;  %v11767_v24 = vld [vmem:[#allocation10 + $0x208] ss:$36 sps:$4 sm:$0xff]  }
 0x8b6   :  { %v11771_v48 = vld [vmem:[#allocation10 + $0x1b8] ss:$36 sps:$4 sm:$0xff]  }
 0x8b7   :  { %8105 = vtanh.f32 %v5079_v22  ;;  %5231 = vmatpush1.bf16.msra.mxu1 %v11715_v52  ;;  %v8104_v60 = vpop.eup %8103  ;;  %v11774_v22 = vld [vmem:[#allocation10 + $0x1c4] ss:$36 sps:$4 sm:$0xff]  }
 0x8b8   :  { %5232 = vmatprep.subr.bf16.mxu1 %v11718_v41  ;;  %v5085_v32 = vsub.f32 1.0, %v8104_v60  ;;  %v5091_v62 = vmul.f32 %v8104_v60, %v11280_v30  ;;  %v11756_v30 = vld [vmem:[#allocation10 + $0x200] ss:$36 sps:$4 sm:$0xff]   ;;  %13824 = vst [vmem:[#allocation67_spill] sm:$0xff] %v11774_v22  ;;  %v11777_v60 = vld [vmem:[#allocation10 + $0x174] ss:$36 sps:$4 sm:$0xff]  }
 0x8b9   :  { %13825 = vst [vmem:[#allocation68_spill] sm:$0xff] %v11777_v60 }
 0x8bb   :  { %5233 = vmatpush1.bf16.msra.mxu1 %v11721_v55 }
 0x8bc   :  { %5234 = vmatprep.subr.bf16.mxu1 %v11724_v0 }
 0x8bf   :  { %5235 = vmatpush1.bf16.msra.mxu1 %v11727_v5 }
 0x8c0   :  { %5236 = vmatprep.subr.bf16.mxu1 %v11730_v18 }
 0x8c3   :  { %5237 = vmatpush1.bf16.msra.mxu1 %v11733_v46 }
 0x8c4   :  { %v8106_v34 = vpop.eup %8105  ;;  %5238 = vmatprep.subr.bf16.mxu1 %v11736_v16 }
 0x8c5   :  { %v5088_v20 = vmul.f32 %v8106_v34, %v5085_v32  ;;  %v11780_v32 = vld [vmem:[#allocation10 + $0x1c0] ss:$36 sps:$4 sm:$0xff]   ;;  %v11783_v34 = vld [vmem:[#allocation10 + $0x170] ss:$36 sps:$4 sm:$0xff]  }
 0x8c6   :  { %13826 = vst [vmem:[#allocation69_spill] sm:$0xff] %v11780_v32  ;;  %13827 = vst [vmem:[#allocation70_spill] sm:$0xff] %v11783_v34 }
 0x8c7   :  { %5239 = vmatpush1.bf16.msra.mxu1 %v11740_v25  ;;  %v11743_v15 = vadd.f32 %v5091_v62, %v5088_v20  ;;  %v11786_v20 = vld [vmem:[#allocation10 + $0x17c] ss:$36 sps:$4 sm:$0xff]   ;;  %v11789_v62 = vld [vmem:[#allocation10 + $0x12c] ss:$36 sps:$4 sm:$0xff]  }
 0x8c8   :  { %5240 = vmatprep.subr.bf16.mxu1 %v11745_v57  ;;  %13828 = vst [vmem:[#allocation71_spill] sm:$0xff] %v11786_v20  ;;  %13829 = vst [vmem:[#allocation72_spill] sm:$0xff] %v11789_v62 }
 0x8c9   :  { %v11750_v44 = vpack.c.bf16 %v11743_v15, %v11743_v15 }
 0x8cb   :  { %5241 = vmatpush1.bf16.msra.mxu1 %v11752_v8  ;;  %5177 = vmatmul.mubr.bf16.vlgmr.msra.gmra.mxu0 %v11750_v44 }
 0x8cc   :  { %5186 = vmatpush1.bf16.msra.mxu0 %v11756_v30  ;;  %5217 = vmatprep.mubr.bf16.mxu0 %v11691_v23 }
 0x8cd   :  { %5267 = vmatprep.subr.bf16.mxu1 %v11760_v31  ;;  %5187 = vmatprep.subr.bf16.mxu0 %v11763_v28 }
 0x8ce   :  { %5259 = vmatmul.mubr.bf16.vlgmr.msra.gmra.mxu1 %v11750_v44 }
 0x8cf   :  { %5268 = vmatpush1.bf16.msra.mxu1 %v11767_v24  ;;  %5299 = vmatprep.mubr.bf16.mxu1 %v11691_v23 }
 0x8d0   :  { %5188 = vmatpush1.bf16.msra.mxu0 %v11771_v48  ;;  %5269 = vmatprep.subr.bf16.mxu1 %v11774_v22  ;;  %v11792_v22 = vld [vmem:[#allocation10 + $0x178] ss:$36 sps:$4 sm:$0xff]  }
 0x8d1   :  { %5189 = vmatprep.subr.bf16.mxu0 %v11777_v60  ;;  %13830 = vst [vmem:[#allocation73_spill] sm:$0xff] %v11792_v22  ;;  %v11795_v60 = vld [vmem:[#allocation10 + $0x128] ss:$36 sps:$4 sm:$0xff]  }
 0x8d2   :  { %13831 = vst [vmem:[#allocation74_spill] sm:$0xff] %v11795_v60 }
 0x8d3   :  { %5270 = vmatpush1.bf16.msra.mxu1 %v11780_v32  ;;  %v11798_v32 = vld [vmem:[#allocation10 + $0x134] ss:$36 sps:$4 sm:$0xff]  }
 0x8d4   :  { %5190 = vmatpush1.bf16.msra.mxu0 %v11783_v34  ;;  %5271 = vmatprep.subr.bf16.mxu1 %v11786_v20  ;;  %13832 = vst [vmem:[#allocation75_spill] sm:$0xff] %v11798_v32  ;;  %v11801_v34 = vld [vmem:[#allocation10 + $0xe4] ss:$36 sps:$4 sm:$0xff]   ;;  %v11804_v20 = vld [vmem:[#allocation10 + $0x130] ss:$36 sps:$4 sm:$0xff]  }
 0x8d5   :  { %5191 = vmatprep.subr.bf16.mxu0 %v11789_v62  ;;  %13833 = vst [vmem:[#allocation76_spill] sm:$0xff] %v11801_v34  ;;  %13834 = vst [vmem:[#allocation77_spill] sm:$0xff] %v11804_v20  ;;  %v11807_v62 = vld [vmem:[#allocation10 + $0xe0] ss:$36 sps:$4 sm:$0xff]  }
 0x8d6   :  { %13835 = vst [vmem:[#allocation78_spill] sm:$0xff] %v11807_v62 }
 0x8d7   :  { %5272 = vmatpush1.bf16.msra.mxu1 %v11792_v22  ;;  %v11810_v22 = vld [vmem:[#allocation10 + $0xec] ss:$36 sps:$4 sm:$0xff]  }
 0x8d8   :  { %5192 = vmatpush1.bf16.msra.mxu0 %v11795_v60  ;;  %5273 = vmatprep.subr.bf16.mxu1 %v11798_v32  ;;  %13836 = vst [vmem:[#allocation79_spill] sm:$0xff] %v11810_v22  ;;  %v11813_v60 = vld [vmem:[#allocation10 + $0x9c] ss:$36 sps:$4 sm:$0xff]   ;;  %v11816_v32 = vld [vmem:[#allocation10 + $0xe8] ss:$36 sps:$4 sm:$0xff]  }
 0x8d9   :  { %5193 = vmatprep.subr.bf16.mxu0 %v11801_v34  ;;  %13837 = vst [vmem:[#allocation80_spill] sm:$0xff] %v11813_v60  ;;  %13838 = vst [vmem:[#allocation81_spill] sm:$0xff] %v11816_v32  ;;  %v11819_v34 = vld [vmem:[#allocation10 + $0x98] ss:$36 sps:$4 sm:$0xff]  }
 0x8da   :  { %13839 = vst [vmem:[#allocation82_spill] sm:$0xff] %v11819_v34 }
 0x8db   :  { %5274 = vmatpush1.bf16.msra.mxu1 %v11804_v20  ;;  %v11822_v20 = vld [vmem:[#allocation10 + $0xa4] ss:$36 sps:$4 sm:$0xff]  }
 0x8dc   :  { %5194 = vmatpush1.bf16.msra.mxu0 %v11807_v62  ;;  %5275 = vmatprep.subr.bf16.mxu1 %v11810_v22  ;;  %13840 = vst [vmem:[#allocation83_spill] sm:$0xff] %v11822_v20  ;;  %v11825_v62 = vld [vmem:[#allocation10 + $0x54] ss:$36 sps:$4 sm:$0xff]   ;;  %v11828_v22 = vld [vmem:[#allocation10 + $0xa0] ss:$36 sps:$4 sm:$0xff]  }
 0x8dd   :  { %5195 = vmatprep.subr.bf16.mxu0 %v11813_v60  ;;  %13841 = vst [vmem:[#allocation84_spill] sm:$0xff] %v11825_v62  ;;  %13842 = vst [vmem:[#allocation85_spill] sm:$0xff] %v11828_v22  ;;  %v11831_v60 = vld [vmem:[#allocation10 + $0x50] ss:$36 sps:$4 sm:$0xff]  }
 0x8de   :  { %13843 = vst [vmem:[#allocation86_spill] sm:$0xff] %v11831_v60 }
 0x8df   :  { %5276 = vmatpush1.bf16.msra.mxu1 %v11816_v32  ;;  %v11834_v32 = vld [vmem:[#allocation10 + $0x5c] ss:$36 sps:$4 sm:$0xff]  }
 0x8e0   :  { %5196 = vmatpush1.bf16.msra.mxu0 %v11819_v34  ;;  %5277 = vmatprep.subr.bf16.mxu1 %v11822_v20  ;;  %13844 = vst [vmem:[#allocation87_spill] sm:$0xff] %v11834_v32  ;;  %v11837_v34 = vld [vmem:[#allocation10 + $0xc] ss:$36 sps:$4 sm:$0xff]   ;;  %v11840_v20 = vld [vmem:[#allocation10 + $0x58] ss:$36 sps:$4 sm:$0xff]  }
 0x8e1   :  { %5197 = vmatprep.subr.bf16.mxu0 %v11825_v62  ;;  %13845 = vst [vmem:[#allocation88_spill] sm:$0xff] %v11837_v34  ;;  %13846 = vst [vmem:[#allocation89_spill] sm:$0xff] %v11840_v20  ;;  %v11843_v62 = vld [vmem:[#allocation10 + $0x8] ss:$36 sps:$4 sm:$0xff]  }
 0x8e2   :  { %13847 = vst [vmem:[#allocation90_spill] sm:$0xff] %v11843_v62 }
 0x8e3   :  { %5278 = vmatpush1.bf16.msra.mxu1 %v11828_v22  ;;  %v11846_v22 = vld [vmem:[#allocation10 + $0x14] ss:$36 sps:$4 sm:$0xff]  }
 0x8e4   :  { %5198 = vmatpush1.bf16.msra.mxu0 %v11831_v60  ;;  %5279 = vmatprep.subr.bf16.mxu1 %v11834_v32  ;;  %13848 = vst [vmem:[#allocation91_spill] sm:$0xff] %v11846_v22  ;;  %v11849_v60 = vld [vmem:[#allocation10 + $0x444] ss:$36 sps:$4 sm:$0xff]   ;;  %v11852_v32 = vld [vmem:[#allocation10 + $0x10] ss:$36 sps:$4 sm:$0xff]  }
 0x8e5   :  { %5199 = vmatprep.subr.bf16.mxu0 %v11837_v34  ;;  %13849 = vst [vmem:[#allocation92_spill] sm:$0xff] %v11849_v60  ;;  %13850 = vst [vmem:[#allocation93_spill] sm:$0xff] %v11852_v32  ;;  %v11855_v34 = vld [vmem:[#allocation10 + $0x440] ss:$36 sps:$4 sm:$0xff]  }
 0x8e6   :  { %13851 = vst [vmem:[#allocation94_spill] sm:$0xff] %v11855_v34 }
 0x8e7   :  { %5280 = vmatpush1.bf16.msra.mxu1 %v11840_v20  ;;  %v11858_v20 = vld [vmem:[#allocation10 + $0x44c] ss:$36 sps:$4 sm:$0xff]  }
 0x8e8   :  { %5200 = vmatpush1.bf16.msra.mxu0 %v11843_v62  ;;  %5281 = vmatprep.subr.bf16.mxu1 %v11846_v22  ;;  %13852 = vst [vmem:[#allocation95_spill] sm:$0xff] %v11858_v20  ;;  %v11861_v62 = vld [vmem:[#allocation10 + $0x3fc] ss:$36 sps:$4 sm:$0xff]   ;;  %v11864_v22 = vld [vmem:[#allocation10 + $0x448] ss:$36 sps:$4 sm:$0xff]  }
 0x8e9   :  { %5201 = vmatprep.subr.bf16.mxu0 %v11849_v60  ;;  %13853 = vst [vmem:[#allocation96_spill] sm:$0xff] %v11861_v62  ;;  %13854 = vst [vmem:[#allocation97_spill] sm:$0xff] %v11864_v22  ;;  %v11867_v60 = vld [vmem:[#allocation10 + $0x3f8] ss:$36 sps:$4 sm:$0xff]  }
 0x8ea   :  { %13855 = vst [vmem:[#allocation98_spill] sm:$0xff] %v11867_v60 }
 0x8eb   :  { %5282 = vmatpush1.bf16.msra.mxu1 %v11852_v32  ;;  %v11870_v32 = vld [vmem:[#allocation10 + $0x404] ss:$36 sps:$4 sm:$0xff]  }
 0x8ec   :  { %5202 = vmatpush2.bf16.msra.mxu0 %v11855_v34  ;;  %5283 = vmatprep.subr.bf16.mxu1 %v11858_v20  ;;  %13856 = vst [vmem:[#allocation99_spill] sm:$0xff] %v11870_v32  ;;  %v11873_v34 = vld [vmem:[#allocation10 + $0x3b4] ss:$36 sps:$4 sm:$0xff]   ;;  %v11876_v20 = vld [vmem:[#allocation10 + $0x400] ss:$36 sps:$4 sm:$0xff]  }
 0x8ed   :  { %5203 = vmatprep.subr.bf16.mxu0 %v11861_v62  ;;  %13857 = vst [vmem:[#allocation100_spill] sm:$0xff] %v11873_v34  ;;  %13858 = vst [vmem:[#allocation101_spill] sm:$0xff] %v11876_v20  ;;  %v11879_v62 = vld [vmem:[#allocation10 + $0x3b0] ss:$36 sps:$4 sm:$0xff]  }
 0x8ee   :  { %13859 = vst [vmem:[#allocation102_spill] sm:$0xff] %v11879_v62 }
 0x8ef   :  { %5284 = vmatpush2.bf16.msra.mxu1 %v11864_v22  ;;  %v11882_v22 = vld [vmem:[#allocation10 + $0x3bc] ss:$36 sps:$4 sm:$0xff]  }
 0x8f0   :  { %5204 = vmatpush2.bf16.msra.mxu0 %v11867_v60  ;;  %5285 = vmatprep.subr.bf16.mxu1 %v11870_v32  ;;  %13860 = vst [vmem:[#allocation103_spill] sm:$0xff] %v11882_v22  ;;  %v11885_v60 = vld [vmem:[#allocation10 + $0x36c] ss:$36 sps:$4 sm:$0xff]   ;;  %v11888_v32 = vld [vmem:[#allocation10 + $0x3b8] ss:$36 sps:$4 sm:$0xff]  }
 0x8f1   :  { %5205 = vmatprep.subr.bf16.mxu0 %v11873_v34  ;;  %13861 = vst [vmem:[#allocation104_spill] sm:$0xff] %v11885_v60  ;;  %13862 = vst [vmem:[#allocation105_spill] sm:$0xff] %v11888_v32  ;;  %v11891_v34 = vld [vmem:[#allocation10 + $0x368] ss:$36 sps:$4 sm:$0xff]  }
 0x8f2   :  { %13863 = vst [vmem:[#allocation106_spill] sm:$0xff] %v11891_v34 }
 0x8f3   :  { %5286 = vmatpush2.bf16.msra.mxu1 %v11876_v20  ;;  %v11894_v20 = vld [vmem:[#allocation10 + $0x374] ss:$36 sps:$4 sm:$0xff]  }
 0x8f4   :  { %5206 = vmatpush2.bf16.msra.mxu0 %v11879_v62  ;;  %5287 = vmatprep.subr.bf16.mxu1 %v11882_v22  ;;  %13864 = vst [vmem:[#allocation107_spill] sm:$0xff] %v11894_v20  ;;  %v11897_v62 = vld [vmem:[#allocation10 + $0x324] ss:$36 sps:$4 sm:$0xff]   ;;  %v11900_v22 = vld [vmem:[#allocation10 + $0x370] ss:$36 sps:$4 sm:$0xff]  }
 0x8f5   :  { %5207 = vmatprep.subr.bf16.mxu0 %v11885_v60  ;;  %13865 = vst [vmem:[#allocation108_spill] sm:$0xff] %v11897_v62  ;;  %13866 = vst [vmem:[#allocation109_spill] sm:$0xff] %v11900_v22  ;;  %v11903_v60 = vld [vmem:[#allocation10 + $0x320] ss:$36 sps:$4 sm:$0xff]  }
 0x8f6   :  { %13867 = vst [vmem:[#allocation110_spill] sm:$0xff] %v11903_v60 }
 0x8f7   :  { %5288 = vmatpush2.bf16.msra.mxu1 %v11888_v32  ;;  %v11906_v32 = vld [vmem:[#allocation10 + $0x32c] ss:$36 sps:$4 sm:$0xff]  }
 0x8f8   :  { %5208 = vmatpush2.bf16.msra.mxu0 %v11891_v34  ;;  %5289 = vmatprep.subr.bf16.mxu1 %v11894_v20  ;;  %13868 = vst [vmem:[#allocation111_spill] sm:$0xff] %v11906_v32  ;;  %v11909_v34 = vld [vmem:[#allocation10 + $0x2dc] ss:$36 sps:$4 sm:$0xff]   ;;  %v11912_v20 = vld [vmem:[#allocation10 + $0x328] ss:$36 sps:$4 sm:$0xff]  }
 0x8f9   :  { %5209 = vmatprep.subr.bf16.mxu0 %v11897_v62  ;;  %13869 = vst [vmem:[#allocation112_spill] sm:$0xff] %v11909_v34  ;;  %13870 = vst [vmem:[#allocation113_spill] sm:$0xff] %v11912_v20  ;;  %v11915_v62 = vld [vmem:[#allocation10 + $0x2d8] ss:$36 sps:$4 sm:$0xff]  }
 0x8fa   :  { %13871 = vst [vmem:[#allocation114_spill] sm:$0xff] %v11915_v62 }
 0x8fb   :  { %5290 = vmatpush2.bf16.msra.mxu1 %v11900_v22  ;;  %v11918_v22 = vld [vmem:[#allocation10 + $0x2e4] ss:$36 sps:$4 sm:$0xff]  }
 0x8fc   :  { %5210 = vmatpush2.bf16.msra.mxu0 %v11903_v60  ;;  %5291 = vmatprep.subr.bf16.mxu1 %v11906_v32  ;;  %13872 = vst [vmem:[#allocation115_spill] sm:$0xff] %v11918_v22  ;;  %v11921_v60 = vld [vmem:[#allocation10 + $0x294] ss:$36 sps:$4 sm:$0xff]   ;;  %v11924_v32 = vld [vmem:[#allocation10 + $0x2e0] ss:$36 sps:$4 sm:$0xff]  }
 0x8fd   :  { %5211 = vmatprep.subr.bf16.mxu0 %v11909_v34  ;;  %13873 = vst [vmem:[#allocation116_spill] sm:$0xff] %v11921_v60  ;;  %13874 = vst [vmem:[#allocation117_spill] sm:$0xff] %v11924_v32  ;;  %v11927_v34 = vld [vmem:[#allocation10 + $0x290] ss:$36 sps:$4 sm:$0xff]  }
 0x8fe   :  { %13875 = vst [vmem:[#allocation118_spill] sm:$0xff] %v11927_v34 }
 0x8ff   :  { %5292 = vmatpush2.bf16.msra.mxu1 %v11912_v20  ;;  %v11930_v20 = vld [vmem:[#allocation10 + $0x29c] ss:$36 sps:$4 sm:$0xff]  }
 0x900   :  { %5212 = vmatpush2.bf16.msra.mxu0 %v11915_v62  ;;  %5293 = vmatprep.subr.bf16.mxu1 %v11918_v22  ;;  %13876 = vst [vmem:[#allocation119_spill] sm:$0xff] %v11930_v20  ;;  %v11933_v62 = vld [vmem:[#allocation10 + $0x24c] ss:$36 sps:$4 sm:$0xff]   ;;  %v11936_v22 = vld [vmem:[#allocation10 + $0x298] ss:$36 sps:$4 sm:$0xff]  }
 0x901   :  { %5213 = vmatprep.subr.bf16.mxu0 %v11921_v60  ;;  %13877 = vst [vmem:[#allocation120_spill] sm:$0xff] %v11933_v62  ;;  %13878 = vst [vmem:[#allocation121_spill] sm:$0xff] %v11936_v22  ;;  %v11939_v60 = vld [vmem:[#allocation10 + $0x248] ss:$36 sps:$4 sm:$0xff]  }
 0x902   :  { %13879 = vst [vmem:[#allocation122_spill] sm:$0xff] %v11939_v60 }
 0x903   :  { %5294 = vmatpush2.bf16.msra.mxu1 %v11924_v32  ;;  %v11942_v32 = vld [vmem:[#allocation10 + $0x254] ss:$36 sps:$4 sm:$0xff]  }
 0x904   :  { %5214 = vmatpush2.bf16.msra.mxu0 %v11927_v34  ;;  %5295 = vmatprep.subr.bf16.mxu1 %v11930_v20  ;;  %13880 = vst [vmem:[#allocation123_spill] sm:$0xff] %v11942_v32  ;;  %v11945_v34 = vld [vmem:[#allocation10 + $0x68c] ss:$36 sps:$4 sm:$0xff]  }
 0x905   :  { %5215 = vmatprep.subr.bf16.mxu0 %v11933_v62  ;;  %13881 = vst [vmem:[#allocation124_spill] sm:$0xff] %v11945_v34  ;;  %v11949_v20 = vld [vmem:[#allocation10 + $0x250] ss:$36 sps:$4 sm:$0xff]   ;;  %v11952_v62 = vld [vmem:[#allocation10 + $0x688] ss:$36 sps:$4 sm:$0xff]  }
 0x906   :  { %13882 = vst [vmem:[#allocation125_spill] sm:$0xff] %v11949_v20  ;;  %13883 = vst [vmem:[#allocation126_spill] sm:$0xff] %v11952_v62 }
 0x907   :  { %5296 = vmatpush2.bf16.msra.mxu1 %v11936_v22  ;;  %v11955_v22 = vld [vmem:[#allocation10 + $0x694] ss:$36 sps:$4 sm:$0xff]  }
 0x908   :  { %5216 = vmatpush2.bf16.msra.mxu0 %v11939_v60  ;;  %5297 = vmatprep.subr.bf16.mxu1 %v11942_v32  ;;  %13884 = vst [vmem:[#allocation127_spill] sm:$0xff] %v11955_v22  ;;  %v11958_v60 = vld [vmem:[#allocation10 + $0x644] ss:$36 sps:$4 sm:$0xff]   ;;  %v11979_v32 = vld [vmem:[#allocation10 + $0x5f8] ss:$36 sps:$4 sm:$0xff]  }
 0x909   :  { %5308 = vmatprep.subr.bf16.mxu0 %v11945_v34  ;;  %13885 = vst [vmem:[#allocation128_spill] sm:$0xff] %v11958_v60  ;;  %v11963_v34 = vld [vmem:[#allocation10 + $0x690] ss:$36 sps:$4 sm:$0xff]   ;;  %13891 = vst [vmem:[#allocation134_spill] sm:$0xff] %v11979_v32 }
 0x90a   :  { %13886 = vst [vmem:[#allocation129_spill] sm:$0xff] %v11963_v34 }
 0x90b   :  { %5218 = vmatmul.mubr.bf16.vlgmr.msra.gmra.mxu0 %v11695_v21  ;;  %5298 = vmatpush2.bf16.msra.mxu1 %v11949_v20  ;;  %v11967_v20 = vld [vmem:[#allocation10 + $0x640] ss:$36 sps:$4 sm:$0xff]  }
 0x90c   :  { %5309 = vmatpush1.bf16.msra.mxu0 %v11952_v62  ;;  %5390 = vmatprep.subr.bf16.mxu1 %v11955_v22  ;;  %13887 = vst [vmem:[#allocation130_spill] sm:$0xff] %v11967_v20  ;;  %v11970_v62 = vld [vmem:[#allocation10 + $0x64c] ss:$36 sps:$4 sm:$0xff]   ;;  %v11973_v22 = vld [vmem:[#allocation10 + $0x5fc] ss:$36 sps:$4 sm:$0xff]  }
 0x90d   :  { %5310 = vmatprep.subr.bf16.mxu0 %v11958_v60  ;;  %5340 = vmatprep.mubr.bf16.mxu0 %v13182_v19  ;;  %13888 = vst [vmem:[#allocation131_spill] sm:$0xff] %v11970_v62  ;;  %13889 = vst [vmem:[#allocation132_spill] sm:$0xff] %v11973_v22  ;;  %v11976_v60 = vld [vmem:[#allocation10 + $0x648] ss:$36 sps:$4 sm:$0xff]  }
 0x90e   :  { %5300 = vmatmul.mubr.bf16.vlgmr.msra.gmra.mxu1 %v11695_v21  ;;  %13890 = vst [vmem:[#allocation133_spill] sm:$0xff] %v11976_v60 }
 0x90f   :  { %5391 = vmatpush1.bf16.msra.mxu1 %v11963_v34  ;;  %5422 = vmatprep.mubr.bf16.mxu1 %v13182_v19  ;;  %v11982_v34 = vld [vmem:[#allocation10 + $0x604] ss:$36 sps:$4 sm:$0xff]  }
 0x910   :  { %5311 = vmatpush1.bf16.msra.mxu0 %v11967_v20  ;;  %5392 = vmatprep.subr.bf16.mxu1 %v11970_v62  ;;  %13892 = vst [vmem:[#allocation135_spill] sm:$0xff] %v11982_v34  ;;  %v11985_v20 = vld [vmem:[#allocation10 + $0x5b4] ss:$36 sps:$4 sm:$0xff]   ;;  %v11988_v62 = vld [vmem:[#allocation10 + $0x600] ss:$36 sps:$4 sm:$0xff]  }
 0x911   :  { %5312 = vmatprep.subr.bf16.mxu0 %v11973_v22  ;;  %13893 = vst [vmem:[#allocation136_spill] sm:$0xff] %v11985_v20  ;;  %13894 = vst [vmem:[#allocation137_spill] sm:$0xff] %v11988_v62  ;;  %v11991_v22 = vld [vmem:[#allocation10 + $0x5b0] ss:$36 sps:$4 sm:$0xff]  }
 0x912   :  { %13895 = vst [vmem:[#allocation138_spill] sm:$0xff] %v11991_v22 }
 0x913   :  { %5393 = vmatpush1.bf16.msra.mxu1 %v11976_v60  ;;  %v11994_v60 = vld [vmem:[#allocation10 + $0x5bc] ss:$36 sps:$4 sm:$0xff]  }
 0x914   :  { %5313 = vmatpush1.bf16.msra.mxu0 %v11979_v32  ;;  %5394 = vmatprep.subr.bf16.mxu1 %v11982_v34  ;;  %13896 = vst [vmem:[#allocation139_spill] sm:$0xff] %v11994_v60  ;;  %v11997_v32 = vld [vmem:[#allocation10 + $0x56c] ss:$36 sps:$4 sm:$0xff]   ;;  %v12000_v34 = vld [vmem:[#allocation10 + $0x5b8] ss:$36 sps:$4 sm:$0xff]  }
 0x915   :  { %5314 = vmatprep.subr.bf16.mxu0 %v11985_v20  ;;  %13897 = vst [vmem:[#allocation140_spill] sm:$0xff] %v11997_v32  ;;  %13898 = vst [vmem:[#allocation141_spill] sm:$0xff] %v12000_v34  ;;  %v12003_v20 = vld [vmem:[#allocation10 + $0x568] ss:$36 sps:$4 sm:$0xff]  }
 0x916   :  { %13899 = vst [vmem:[#allocation142_spill] sm:$0xff] %v12003_v20 }
 0x917   :  { %5395 = vmatpush1.bf16.msra.mxu1 %v11988_v62  ;;  %v12006_v62 = vld [vmem:[#allocation10 + $0x574] ss:$36 sps:$4 sm:$0xff]  }
 0x918   :  { %5315 = vmatpush1.bf16.msra.mxu0 %v11991_v22  ;;  %5396 = vmatprep.subr.bf16.mxu1 %v11994_v60  ;;  %13900 = vst [vmem:[#allocation143_spill] sm:$0xff] %v12006_v62  ;;  %v12009_v22 = vld [vmem:[#allocation10 + $0x524] ss:$36 sps:$4 sm:$0xff]   ;;  %v12012_v60 = vld [vmem:[#allocation10 + $0x570] ss:$36 sps:$4 sm:$0xff]  }
 0x919   :  { %5316 = vmatprep.subr.bf16.mxu0 %v11997_v32  ;;  %13901 = vst [vmem:[#allocation144_spill] sm:$0xff] %v12009_v22  ;;  %13902 = vst [vmem:[#allocation145_spill] sm:$0xff] %v12012_v60  ;;  %v12015_v32 = vld [vmem:[#allocation10 + $0x520] ss:$36 sps:$4 sm:$0xff]  }
 0x91a   :  { %13903 = vst [vmem:[#allocation146_spill] sm:$0xff] %v12015_v32 }
 0x91b   :  { %5397 = vmatpush1.bf16.msra.mxu1 %v12000_v34  ;;  %v12018_v34 = vld [vmem:[#allocation10 + $0x52c] ss:$36 sps:$4 sm:$0xff]  }
 0x91c   :  { %5317 = vmatpush1.bf16.msra.mxu0 %v12003_v20  ;;  %5398 = vmatprep.subr.bf16.mxu1 %v12006_v62  ;;  %13904 = vst [vmem:[#allocation147_spill] sm:$0xff] %v12018_v34  ;;  %v12021_v20 = vld [vmem:[#allocation10 + $0x4dc] ss:$36 sps:$4 sm:$0xff]   ;;  %v12024_v62 = vld [vmem:[#allocation10 + $0x528] ss:$36 sps:$4 sm:$0xff]  }
 0x91d   :  { %5318 = vmatprep.subr.bf16.mxu0 %v12009_v22  ;;  %13905 = vst [vmem:[#allocation148_spill] sm:$0xff] %v12021_v20  ;;  %13906 = vst [vmem:[#allocation149_spill] sm:$0xff] %v12024_v62  ;;  %v12027_v22 = vld [vmem:[#allocation10 + $0x4d8] ss:$36 sps:$4 sm:$0xff]  }
 0x91e   :  { %13907 = vst [vmem:[#allocation150_spill] sm:$0xff] %v12027_v22 }
 0x91f   :  { %5399 = vmatpush1.bf16.msra.mxu1 %v12012_v60  ;;  %v12030_v60 = vld [vmem:[#allocation10 + $0x4e4] ss:$36 sps:$4 sm:$0xff]  }
 0x920   :  { %5319 = vmatpush1.bf16.msra.mxu0 %v12015_v32  ;;  %5400 = vmatprep.subr.bf16.mxu1 %v12018_v34  ;;  %13908 = vst [vmem:[#allocation151_spill] sm:$0xff] %v12030_v60  ;;  %v12033_v32 = vld [vmem:[#allocation10 + $0x494] ss:$36 sps:$4 sm:$0xff]   ;;  %v12036_v34 = vld [vmem:[#allocation10 + $0x4e0] ss:$36 sps:$4 sm:$0xff]  }
 0x921   :  { %5320 = vmatprep.subr.bf16.mxu0 %v12021_v20  ;;  %13909 = vst [vmem:[#allocation152_spill] sm:$0xff] %v12033_v32  ;;  %13910 = vst [vmem:[#allocation153_spill] sm:$0xff] %v12036_v34  ;;  %v12039_v20 = vld [vmem:[#allocation10 + $0x490] ss:$36 sps:$4 sm:$0xff]  }
 0x922   :  { %13911 = vst [vmem:[#allocation154_spill] sm:$0xff] %v12039_v20 }
 0x923   :  { %5401 = vmatpush1.bf16.msra.mxu1 %v12024_v62  ;;  %v12042_v62 = vld [vmem:[#allocation10 + $0x49c] ss:$36 sps:$4 sm:$0xff]  }
 0x924   :  { %5321 = vmatpush1.bf16.msra.mxu0 %v12027_v22  ;;  %5402 = vmatprep.subr.bf16.mxu1 %v12030_v60  ;;  %13912 = vst [vmem:[#allocation155_spill] sm:$0xff] %v12042_v62  ;;  %v12045_v22 = vld [vmem:[#allocation10 + $0x214] ss:$36 sps:$4 sm:$0xff]  }
 0x925   :  { %5322 = vmatprep.subr.bf16.mxu0 %v12033_v32  ;;  %13913 = vst [vmem:[#allocation156_spill] sm:$0xff] %v12045_v22  ;;  %v12049_v60 = vld [vmem:[#allocation10 + $0x498] ss:$36 sps:$4 sm:$0xff]   ;;  %v12052_v32 = vld [vmem:[#allocation10 + $0x210] ss:$36 sps:$4 sm:$0xff]  }
 0x926   :  { %13914 = vst [vmem:[#allocation157_spill] sm:$0xff] %v12049_v60  ;;  %13915 = vst [vmem:[#allocation158_spill] sm:$0xff] %v12052_v32 }
 0x927   :  { %5403 = vmatpush1.bf16.msra.mxu1 %v12036_v34  ;;  %v12079_v34 = vld [vmem:[#allocation10 + $0x180] ss:$36 sps:$4 sm:$0xff]  }
 0x928   :  { %5323 = vmatpush1.bf16.msra.mxu0 %v12039_v20  ;;  %5404 = vmatprep.subr.bf16.mxu1 %v12042_v62  ;;  %v12056_v20 = vld [vmem:[#allocation10 + $0x458] ss:$36 sps:$4 sm:$0xff]   ;;  %v12059_v62 = vld [vmem:[#allocation10 + $0x1cc] ss:$36 sps:$4 sm:$0xff]   ;;  %13921 = vst [vmem:[#allocation164_spill] sm:$0xff] %v12079_v34 }
 0x929   :  { %5349 = vmatprep.subr.bf16.mxu0 %v12045_v22  ;;  %13916 = vst [vmem:[#allocation159_spill] sm:$0xff] %v12056_v20  ;;  %13917 = vst [vmem:[#allocation160_spill] sm:$0xff] %v12059_v62  ;;  %v12063_v22 = vld [vmem:[#allocation10 + $0x218] ss:$36 sps:$4 sm:$0xff]  }
 0x92b   :  { %5341 = vmatmul.mubr.bf16.vlgmr.msra.gmra.mxu0 %v11750_v44  ;;  %5405 = vmatpush1.bf16.msra.mxu1 %v12049_v60  ;;  %v12067_v60 = vld [vmem:[#allocation10 + $0x1c8] ss:$36 sps:$4 sm:$0xff]  }
 0x92c   :  { %5350 = vmatpush1.bf16.msra.mxu0 %v12052_v32  ;;  %5381 = vmatprep.mubr.bf16.mxu0 %v11691_v23  ;;  %13918 = vst [vmem:[#allocation161_spill] sm:$0xff] %v12067_v60  ;;  %v12070_v32 = vld [vmem:[#allocation10 + $0x410] ss:$36 sps:$4 sm:$0xff]  }
 0x92d   :  { %7246 = vmatprep.subr.bf16.mxu1 %v12056_v20  ;;  %5351 = vmatprep.subr.bf16.mxu0 %v12059_v62  ;;  %13919 = vst [vmem:[#allocation162_spill] sm:$0xff] %v12070_v32  ;;  %v12073_v20 = vld [vmem:[#allocation10 + $0x184] ss:$36 sps:$4 sm:$0xff]   ;;  %v12076_v62 = vld [vmem:[#allocation10 + $0x1d0] ss:$36 sps:$4 sm:$0xff]  }
 0x92e   :  { %5423 = vmatmul.mubr.bf16.vlgmr.msra.gmra.mxu1 %v11750_v44  ;;  %13920 = vst [vmem:[#allocation163_spill] sm:$0xff] %v12076_v62 }
 0x92f   :  { %7247 = vmatpush3.bf16.msra.mxu1 %v12063_v22  ;;  %5463 = vmatprep.mubr.bf16.mxu1 %v11691_v23  ;;  %v12082_v23 = vld [vmem:[#allocation10 + $0x3c8] ss:$36 sps:$4 sm:$0xff]  }
 0x930   :  { %5352 = vmatpush1.bf16.msra.mxu0 %v12067_v60  ;;  %7248 = vmatprep.subr.bf16.mxu1 %v12070_v32  ;;  %v12085_v60 = vld [vmem:[#allocation10 + $0x13c] ss:$36 sps:$4 sm:$0xff]  }
 0x931   :  { %5353 = vmatprep.subr.bf16.mxu0 %v12073_v20  ;;  %13922 = vst [vmem:[#allocation165_spill] sm:$0xff] %v12085_v60  ;;  %v12089_v32 = vld [vmem:[#allocation10 + $0x138] ss:$36 sps:$4 sm:$0xff]  }
 0x933   :  { %7249 = vmatpush3.bf16.msra.mxu1 %v12076_v62  ;;  %v12093_v62 = vld [vmem:[#allocation10 + $0xf4] ss:$36 sps:$4 sm:$0xff]  }
 0x934   :  { %5354 = vmatpush1.bf16.msra.mxu0 %v12079_v34  ;;  %7250 = vmatprep.subr.bf16.mxu1 %v12082_v23  ;;  %v12097_v34 = vld [vmem:[#allocation10 + $0xf0] ss:$36 sps:$4 sm:$0xff]  }
 0x935   :  { %5355 = vmatprep.subr.bf16.mxu0 %v12085_v60  ;;  %v12101_v60 = vld [vmem:[#allocation10 + $0xac] ss:$36 sps:$4 sm:$0xff]  }
 0x937   :  { %7251 = vmatpush3.bf16.msra.mxu1 %v11407_v7  ;;  %v12105_v7 = vld [vmem:[#allocation10 + $0xa8] ss:$36 sps:$4 sm:$0xff]  }
 0x938   :  { %5356 = vmatpush1.bf16.msra.mxu0 %v12089_v32  ;;  %7252 = vmatprep.subr.bf16.mxu1 %v11411_v54  ;;  %v12109_v54 = vld [vmem:[#allocation10 + $0x64] ss:$36 sps:$4 sm:$0xff]  }
 0x939   :  { %5357 = vmatprep.subr.bf16.mxu0 %v12093_v62  ;;  %13923 = vst [vmem:[#allocation166_spill] sm:$0xff] %v12109_v54 }
 0x93b   :  { %7253 = vmatpush3.bf16.msra.mxu1 %v11415_v39  ;;  %v12113_v39 = vld [vmem:[#allocation10 + $0x60] ss:$36 sps:$4 sm:$0xff]  }
 0x93c   :  { %5358 = vmatpush1.bf16.msra.mxu0 %v12097_v34  ;;  %7254 = vmatprep.subr.bf16.mxu1 %v11419_v56  ;;  %13924 = vst [vmem:[#allocation167_spill] sm:$0xff] %v12113_v39  ;;  %v12117_v56 = vld [vmem:[#allocation10 + $0x1c] ss:$36 sps:$4 sm:$0xff]  }
 0x93d   :  { %5359 = vmatprep.subr.bf16.mxu0 %v12101_v60  ;;  %13925 = vst [vmem:[#allocation168_spill] sm:$0xff] %v12117_v56 }
 0x93f   :  { %7255 = vmatpush3.bf16.msra.mxu1 %v11423_v4  ;;  %v12121_v4 = vld [vmem:[#allocation10 + $0x18] ss:$36 sps:$4 sm:$0xff]  }
 0x940   :  { %5360 = vmatpush1.bf16.msra.mxu0 %v12105_v7  ;;  %7256 = vmatprep.subr.bf16.mxu1 %v11427_v35  ;;  %13926 = vst [vmem:[#allocation169_spill] sm:$0xff] %v12121_v4  ;;  %v12125_v35 = vld [vmem:[#allocation10 + $0x454] ss:$36 sps:$4 sm:$0xff]  }
 0x941   :  { %5361 = vmatprep.subr.bf16.mxu0 %v12109_v54  ;;  %13927 = vst [vmem:[#allocation170_spill] sm:$0xff] %v12125_v35 }
 0x943   :  { %7257 = vmatpush3.bf16.msra.mxu1 %v11431_v63  ;;  %v12129_v63 = vld [vmem:[#allocation10 + $0x450] ss:$36 sps:$4 sm:$0xff]  }
 0x944   :  { %5362 = vmatpush1.bf16.msra.mxu0 %v12113_v39  ;;  %7258 = vmatprep.subr.bf16.mxu1 %v11435_v36  ;;  %13928 = vst [vmem:[#allocation171_spill] sm:$0xff] %v12129_v63  ;;  %v12133_v36 = vld [vmem:[#allocation10 + $0x40c] ss:$36 sps:$4 sm:$0xff]  }
 0x945   :  { %5363 = vmatprep.subr.bf16.mxu0 %v12117_v56  ;;  %13929 = vst [vmem:[#allocation172_spill] sm:$0xff] %v12133_v36 }
 0x947   :  { %7259 = vmatpush3.bf16.msra.mxu1 %v11439_v61  ;;  %v12138_v61 = vld [vmem:[#allocation10 + $0x408] ss:$36 sps:$4 sm:$0xff]  }
 0x948   :  { %5364 = vmatpush1.bf16.msra.mxu0 %v12121_v4  ;;  %7260 = vmatprep.subr.bf16.mxu1 %v11443_v14  ;;  %13930 = vst [vmem:[#allocation173_spill] sm:$0xff] %v12138_v61  ;;  %v12142_v14 = vld [vmem:[#allocation10 + $0x3c4] ss:$36 sps:$4 sm:$0xff]  }
 0x949   :  { %5365 = vmatprep.subr.bf16.mxu0 %v12125_v35  ;;  %13931 = vst [vmem:[#allocation174_spill] sm:$0xff] %v12142_v14 }
 0x94b   :  { %7261 = vmatpush3.bf16.msra.mxu1 %v11447_v50  ;;  %v12146_v50 = vld [vmem:[#allocation10 + $0x3c0] ss:$36 sps:$4 sm:$0xff]  }
 0x94c   :  { %5366 = vmatpush2.bf16.msra.mxu0 %v12129_v63  ;;  %5601 = vmatprep.subr.bf16.mxu1 %v11451_v10  ;;  %13932 = vst [vmem:[#allocation175_spill] sm:$0xff] %v12146_v50  ;;  %v12150_v10 = vld [vmem:[#allocation10 + $0x37c] ss:$36 sps:$4 sm:$0xff]  }
 0x94d   :  { %5367 = vmatprep.subr.bf16.mxu0 %v12133_v36  ;;  %13933 = vst [vmem:[#allocation176_spill] sm:$0xff] %v12150_v10 }
 0x94e   :  { %5464 = vmatmul.mubr.bf16.vlgmr.msra.gmra.mxu1 %v11695_v21 }
 0x94f   :  { %5602 = vmatpush1.bf16.msra.mxu1 %v11456_v27  ;;  %v12154_v27 = vld [vmem:[#allocation10 + $0x378] ss:$36 sps:$4 sm:$0xff]  }
 0x950   :  { %5368 = vmatpush2.bf16.msra.mxu0 %v12138_v61  ;;  %5603 = vmatprep.subr.bf16.mxu1 %v11460_v51  ;;  %13934 = vst [vmem:[#allocation177_spill] sm:$0xff] %v12154_v27  ;;  %v12158_v51 = vld [vmem:[#allocation10 + $0x334] ss:$36 sps:$4 sm:$0xff]  }
 0x951   :  { %5369 = vmatprep.subr.bf16.mxu0 %v12142_v14  ;;  %13935 = vst [vmem:[#allocation178_spill] sm:$0xff] %v12158_v51 }
 0x953   :  { %5604 = vmatpush1.bf16.msra.mxu1 %v11464_v47  ;;  %v12162_v47 = vld [vmem:[#allocation10 + $0x330] ss:$36 sps:$4 sm:$0xff]  }
 0x954   :  { %5370 = vmatpush2.bf16.msra.mxu0 %v12146_v50  ;;  %5605 = vmatprep.subr.bf16.mxu1 %v11468_v40  ;;  %13936 = vst [vmem:[#allocation179_spill] sm:$0xff] %v12162_v47  ;;  %v12166_v40 = vld [vmem:[#allocation10 + $0x2ec] ss:$36 sps:$4 sm:$0xff]  }
 0x955   :  { %5371 = vmatprep.subr.bf16.mxu0 %v12150_v10  ;;  %13937 = vst [vmem:[#allocation180_spill] sm:$0xff] %v12166_v40 }
 0x957   :  { %5606 = vmatpush1.bf16.msra.mxu1 %v11472_v29  ;;  %v13938_v29 = vld [vmem:[#allocation21_spill] sm:$0xff] }
 0x958   :  { %5372 = vmatpush2.bf16.msra.mxu0 %v12154_v27  ;;  %5607 = vmatprep.subr.bf16.mxu1 %v11476_v1  ;;  %v13939_v1 = vld [vmem:[#allocation31_spill] sm:$0xff] }
 0x959   :  { %5373 = vmatprep.subr.bf16.mxu0 %v12158_v51  ;;  %v13977_v51 = vld [vmem:[#allocation57_spill] sm:$0xff] }
 0x95b   :  { %5608 = vmatpush1.bf16.msra.mxu1 %v11480_v3  ;;  %v13940_v3 = vld [vmem:[#allocation34_spill] sm:$0xff] }
 0x95c   :  { %5374 = vmatpush2.bf16.msra.mxu0 %v12162_v47  ;;  %5609 = vmatprep.subr.bf16.mxu1 %v11484_v53  ;;  %v13941_v53 = vmov 0.0   ;;  %v13972_v47 = vld [vmem:[#allocation48_spill] sm:$0xff] }
 0x95d   :  { %5375 = vmatprep.subr.bf16.mxu0 %v12166_v40 }
 0x95f   :  { %5610 = vmatpush1.bf16.msra.mxu1 %v11488_v33  ;;  %v13942_v33 = vld [vmem:[#allocation22_spill] sm:$0xff] }
 0x960   :  { %5376 = vmatpush2.bf16.msra.mxu0 %v11491_v17  ;;  %5611 = vmatprep.subr.bf16.mxu1 %v11494_v9  ;;  %v13943_v17 = vld [vmem:[#allocation35_spill] sm:$0xff]  ;;  %v13944_v9 = vld [vmem:[#allocation38_spill] sm:$0xff] }
 0x961   :  { %5377 = vmatprep.subr.bf16.mxu0 %v11497_v58 }
 0x963   :  { %5612 = vmatpush1.bf16.msra.mxu1 %v11500_v26  ;;  %v13945_v26 = vld [vmem:[#allocation23_spill] sm:$0xff] }
 0x964   :  { %5378 = vmatpush2.bf16.msra.mxu0 %v11503_v37  ;;  %5613 = vmatprep.subr.bf16.mxu1 %v11506_v6  ;;  %v13946_v37 = vld [vmem:[#allocation39_spill] sm:$0xff] }
 0x965   :  { %5379 = vmatprep.subr.bf16.mxu0 %v11509_v43  ;;  %v13947_v43 = vld [vmem:[#allocation42_spill] sm:$0xff] }
 0x967   :  { %5614 = vmatpush1.bf16.msra.mxu1 %v13938_v29  ;;  %v13948_v29 = vld [vmem:[#allocation24_spill] sm:$0xff] }
 0x968   :  { %5380 = vmatpush2.bf16.msra.mxu0 %v13939_v1  ;;  %5615 = vmatprep.subr.bf16.mxu1 %v13940_v3  ;;  %v13949_v1 = vld [vmem:[#allocation43_spill] sm:$0xff] }
 0x969   :  { %7463 = vmatprep.subr.bf16.mxu0 %v13941_v53 }
 0x96b   :  { %5382 = vmatmul.mubr.bf16.vlgmr.msra.gmra.mxu0 %v11695_v21  ;;  %5616 = vmatpush1.bf16.msra.mxu1 %v13942_v33  ;;  %v13950_v33 = vld [vmem:[#allocation46_spill] sm:$0xff] }
 0x96c   :  { %7464 = vmatpush3.bf16.msra.mxu0 %v13943_v17  ;;  %7479 = vmatprep.mubr.msk.bf16.mxu0 %vm9160_vm1, %v13941_v53  ;;  %v13951_v17 = vld [vmem:[#allocation25_spill] sm:$0xff] }
 0x96d   :  { %7465 = vmatprep.subr.bf16.mxu0 %v13941_v53  ;;  %5617 = vmatprep.subr.bf16.mxu1 %v13944_v9  ;;  %v13952_v9 = vld [vmem:[#allocation47_spill] sm:$0xff] }
 0x96e   :  { %v5137_v58 = vpop.f32.mrf.mxu1 }
 0x96f   :  { %5618 = vmatpush2.bf16.msra.mxu1 %v13945_v26  ;;  %v13953_v26 = vld [vmem:[#allocation50_spill] sm:$0xff] }
 0x970   :  { %7466 = vmatpush3.bf16.msra.mxu0 %v13946_v37  ;;  %v5139_v6 = vpop.f32.mrf.mxu1  ;;  %5619 = vmatprep.subr.bf16.mxu1 %v13947_v43  ;;  %v13954_v37 = vld [vmem:[#allocation26_spill] sm:$0xff]  ;;  %v13955_v43 = vld [vmem:[#allocation51_spill] sm:$0xff] }
 0x971   :  { %7467 = vmatprep.subr.bf16.mxu0 %v13941_v53 }
 0x972   :  { %v5141_v21 = vpop.f32.mrf.mxu1 }
 0x973   :  { %5620 = vmatpush2.bf16.msra.mxu1 %v13948_v29  ;;  %v13956_v21 = vld [vmem:[#allocation54_spill] sm:$0xff]  ;;  %v13957_v29 = vld [vmem:[#allocation27_spill] sm:$0xff] }
 0x974   :  { %7468 = vmatpush3.bf16.msra.mxu0 %v13949_v1  ;;  %v5142_v3 = vpop.f32.mrf.mxu1  ;;  %5621 = vmatprep.subr.bf16.mxu1 %v13950_v33  ;;  %v13958_v1 = vld [vmem:[#allocation55_spill] sm:$0xff]  ;;  %v13960_v33 = vld [vmem:[#allocation58_spill] sm:$0xff] }
 0x975   :  { %7469 = vmatprep.subr.bf16.mxu0 %v13941_v53  ;;  %v13959_v3 = vld [vmem:[#allocation28_spill] sm:$0xff] }
 0x977   :  { %5622 = vmatpush2.bf16.msra.mxu1 %v13951_v17  ;;  %v13961_v17 = vld [vmem:[#allocation29_spill] sm:$0xff] }
 0x978   :  { %7470 = vmatpush3.bf16.msra.mxu0 %v13952_v9  ;;  %5623 = vmatprep.subr.bf16.mxu1 %v13953_v26  ;;  %v13962_v9 = vld [vmem:[#allocation59_spill] sm:$0xff]  ;;  %v13963_v26 = vld [vmem:[#allocation30_spill] sm:$0xff] }
 0x979   :  { %7471 = vmatprep.subr.bf16.mxu0 %v13941_v53 }
 0x97b   :  { %5624 = vmatpush2.bf16.msra.mxu1 %v13954_v37  ;;  %v13964_v37 = vld [vmem:[#allocation32_spill] sm:$0xff] }
 0x97c   :  { %7472 = vmatpush3.bf16.msra.mxu0 %v13955_v43  ;;  %5625 = vmatprep.subr.bf16.mxu1 %v13956_v21  ;;  %v13965_v43 = vld [vmem:[#allocation33_spill] sm:$0xff]  ;;  %v13966_v21 = vld [vmem:[#allocation36_spill] sm:$0xff] }
 0x97d   :  { %7473 = vmatprep.subr.bf16.mxu0 %v13941_v53 }
 0x97f   :  { %5626 = vmatpush2.bf16.msra.mxu1 %v13957_v29 }
 0x980   :  { %7474 = vmatpush3.bf16.msra.mxu0 %v13958_v1  ;;  %5627 = vmatprep.subr.bf16.mxu1 %v13959_v3  ;;  %v13967_v1 = vld [vmem:[#allocation37_spill] sm:$0xff] }
 0x981   :  { %7475 = vmatprep.subr.bf16.mxu0 %v13941_v53 }
 0x983   :  { %5628 = vmatpush2.bf16.msra.mxu1 %v13960_v33  ;;  %v13968_v33 = vld [vmem:[#allocation40_spill] sm:$0xff] }
 0x984   :  { %7476 = vmatpush3.bf16.msra.mxu0 %v13961_v17  ;;  %5629 = vmatprep.subr.bf16.mxu1 %v13962_v9  ;;  %v13969_v17 = vld [vmem:[#allocation41_spill] sm:$0xff] }
 0x985   :  { %7477 = vmatprep.subr.bf16.mxu0 %v13941_v53  ;;  %v13970_v53 = vld [vmem:[#allocation44_spill] sm:$0xff] }
 0x987   :  { %5630 = vmatpush2.bf16.msra.mxu1 %v13963_v26 }
 0x988   :  { %7478 = vmatpush3.bf16.msra.mxu0 %v13964_v37  ;;  %5631 = vmatprep.subr.bf16.mxu1 %v13965_v43 }
 0x989   :  { %5642 = vmatprep.subr.bf16.mxu0 %v13966_v21  ;;  %v13971_v21 = vld [vmem:[#allocation45_spill] sm:$0xff] }
 0x98b   :  { %7480 = vmatmul.mubr.bf16.vlgmr.msra.gmra.mxu0 %v11750_v44  ;;  %v5178_v29 = vpop.f32.mrf.mxu0  ;;  %5632 = vmatpush2.bf16.msra.mxu1 %v13967_v1 }
 0x98c   :  { %v5179_v3 = vadd.f32 %v5178_v29, %v5137_v58  ;;  %5643 = vmatpush1.bf16.msra.mxu0 %v13968_v33  ;;  %5724 = vmatprep.subr.bf16.mxu1 %v13969_v17  ;;  %v13973_v29 = vld [vmem:[#allocation49_spill] sm:$0xff]  ;;  %v13974_v33 = vld [vmem:[#allocation52_spill] sm:$0xff] }
 0x98d   :  { %v5180_v9 = vpop.f32.mrf.mxu0  ;;  %5644 = vmatprep.subr.bf16.mxu0 %v13970_v53  ;;  %5674 = vmatprep.mubr.bf16.mxu0 %v13182_v19  ;;  %v13975_v17 = vld [vmem:[#allocation53_spill] sm:$0xff]  ;;  %v13976_v53 = vld [vmem:[#allocation56_spill] sm:$0xff] }
 0x98e   :  { %v5181_v26 = vadd.f32 %v5180_v9, %v5139_v6  ;;  %v5260_v37 = vpop.f32.mrf.mxu1  ;;  %v13978_v6 = vld [vmem:[#allocation60_spill] sm:$0xff]  ;;  %v13979_v9 = vld [vmem:[#allocation61_spill] sm:$0xff] }
 0x98f   :  { %v5182_v43 = vpop.f32.mrf.mxu0 }
 0x990   :  { %v5262_v40 = vpop.f32.mrf.mxu1  ;;  %5645 = vmatpush1.bf16.msra.mxu0 %v13971_v21  ;;  %v13980_v43 = vld [vmem:[#allocation62_spill] sm:$0xff]  ;;  %v13981_v21 = vld [vmem:[#allocation63_spill] sm:$0xff] }
 0x991   :  { %v5183_v44 = vpop.f32.mrf.mxu0  ;;  %5646 = vmatprep.subr.bf16.mxu0 %v13972_v47  ;;  %v13982_v47 = vld [vmem:[#allocation64_spill] sm:$0xff] }
 0x992   :  { %v5264_v1 = vpop.f32.mrf.mxu1  ;;  %v13983_v44 = vld [vmem:[#allocation65_spill] sm:$0xff] }
 0x993   :  { %v13984_v1 = vld [vmem:[#allocation66_spill] sm:$0xff] }
 0x994   :  { %v5265_v58 = vpop.f32.mrf.mxu1  ;;  %5647 = vmatpush1.bf16.msra.mxu0 %v13973_v29  ;;  %v5096_v29 = vld [vmem:[#allocation3 + $0xbc] sm:$0xff] }
 0x995   :  { %5648 = vmatprep.subr.bf16.mxu0 %v13974_v33  ;;  %v12236_v58 = vld [vmem:[#allocation3 + $0xc4] sm:$0xff] }
 0x996   :  { %v13139_v33 = vrot.slane %v12236_v58, 4 }
 0x998   :  { %5649 = vmatpush1.bf16.msra.mxu0 %v13975_v17 }
 0x999   :  { %5650 = vmatprep.subr.bf16.mxu0 %v13976_v53 }
 0x99c   :  { %5651 = vmatpush1.bf16.msra.mxu0 %v13977_v51  ;;  %v5537_v51 = vrot.slane %v5096_v29, 4 }
 0x99d   :  { %5652 = vmatprep.subr.bf16.mxu0 %v13978_v6 }
 0x99e   :  { %v5539_v53 = vsel %vm3048_vm0, %v5537_v51, %v13139_v33 }
 0x99f   :  { %v5543_v63 = vunpack.c.h.bf16 %v5539_v53 }
 0x9a0   :  { %5653 = vmatpush1.bf16.msra.mxu0 %v13979_v9 }
 0x9a1   :  { %5654 = vmatprep.subr.bf16.mxu0 %v13980_v43 }
 0x9a4   :  { %5655 = vmatpush1.bf16.msra.mxu0 %v13981_v21  ;;  %v5542_v21 = vunpack.c.l.bf16 %v5539_v53 }
 0x9a5   :  { %5656 = vmatprep.subr.bf16.mxu0 %v13982_v47 }
 0x9a8   :  { %5657 = vmatpush1.bf16.msra.mxu0 %v13983_v44 }
 0x9a9   :  { %5683 = vmatprep.subr.bf16.mxu0 %v13984_v1 }
 0x9cb   :  { %v5219_v17 = vpop.f32.mrf.mxu0 }
 0x9cc   :  { %v5261_v6 = vadd.f32 %v5260_v37, %v5219_v17 }
 0x9cd   :  { %v5221_v9 = vpop.f32.mrf.mxu0 }
 0x9ce   :  { %v5263_v43 = vadd.f32 %v5262_v40, %v5221_v9  ;;  %v5301_v47 = vpop.f32.mrf.mxu1  ;;  %v5095_v9 = vld [vmem:[#allocation3 + $0xb4] sm:$0xff] }
 0x9cf   :  { %v5223_v27 = vpop.f32.mrf.mxu0  ;;  %v5511_v33 = vunpack.c.l.bf16 %v5095_v9 }
 0x9d0   :  { %v5545_v44 = vadd.f32 %v5542_v21, %v5263_v43  ;;  %v5303_v10 = vpop.f32.mrf.mxu1  ;;  %v5512_v43 = vunpack.c.h.bf16 %v5095_v9 }
 0x9d1   :  { %v5224_v1 = vpop.f32.mrf.mxu0  ;;  %v5514_v27 = vadd.f32 %v5511_v33, %v5179_v3 }
 0x9d2   :  { %v5305_v50 = vpop.f32.mrf.mxu1  ;;  %v5515_v21 = vadd.f32 %v5512_v43, %v5181_v26  ;;  %v5513_v26 = vunpack.c.l.bf16 %v5096_v29 }
 0x9d3   :  { %v7019_v1 = vmul.f32 -1.442695, %v5514_v27 }
 0x9d4   :  { %v5306_v14 = vpop.f32.mrf.mxu1  ;;  %v7020_v50 = vmul.f32 -1.442695, %v5515_v21  ;;  %v5516_v33 = vadd.f32 %v5513_v26, %v5261_v6  ;;  %v5098_v21 = vld [vmem:[#allocation3 + $0xcc] sm:$0xff] }
 0x9d5   :  { %8107 = vpow2.f32 %v7019_v1 }
 0x9d6   :  { %8109 = vpow2.f32 %v7020_v50 }
 0x9eb   :  { %v5342_v61 = vpop.f32.mrf.mxu0 }
 0x9ec   :  { %v5343_v36 = vadd.f32 %v5342_v61, %v5301_v47 }
 0x9ed   :  { %v5344_v35 = vpop.f32.mrf.mxu0 }
 0x9ee   :  { %v5546_v4 = vadd.f32 %v5543_v63, %v5343_v36  ;;  %v5345_v56 = vadd.f32 %v5344_v35, %v5303_v10  ;;  %v5424_v39 = vpop.f32.mrf.mxu1  ;;  %v8108_v10 = vpop.eup %8107 }
 0x9ef   :  { %v5346_v54 = vpop.f32.mrf.mxu0  ;;  %v8110_v53 = vpop.eup %8109  ;;  %v5526_v47 = vadd.f32 1.0, %v8108_v10  ;;  %v5573_v10 = vunpack.c.h.bf16 %v5098_v21 }
 0x9f0   :  { %v5426_v51 = vpop.f32.mrf.mxu1  ;;  %v7022_v54 = vmul.f32 -1.442695, %v5545_v44  ;;  %v7023_v36 = vmul.f32 -1.442695, %v5546_v4  ;;  %v5527_v3 = vadd.f32 1.0, %v8110_v53 }
 0x9f1   :  { %v5347_v37 = vpop.f32.mrf.mxu0 }
 0x9f2   :  { %v5428_v17 = vpop.f32.mrf.mxu1  ;;  %8111 = vpow2.f32 %v7022_v54 }
 0x9f3   :  { %8113 = vpow2.f32 %v7023_v36  ;;  %v7021_v17 = vmul.f32 -1.442695, %v5516_v33  ;;  %v5572_v36 = vunpack.c.l.bf16 %v5098_v21 }
 0x9f4   :  { %v5429_v40 = vpop.f32.mrf.mxu1  ;;  %8115 = vrcp.f32 %v5526_v47 }
 0x9f5   :  { %8117 = vrcp.f32 %v5527_v3 }
 0x9f6   :  { %8119 = vpow2.f32 %v7021_v17 }
 0x9ff   :  { %v8112_v37 = vpop.eup %8111 }
 0xa00   :  { %v8114_v40 = vpop.eup %8113  ;;  %v5557_v27 = vadd.f32 1.0, %v8112_v37 }
 0xa01   :  { %v5558_v4 = vadd.f32 1.0, %v8114_v40 }
 0xa02   :  { %8121 = vrcp.f32 %v5557_v27 }
 0xa03   :  { %8123 = vrcp.f32 %v5558_v4 }
 0xa0e   :  { %v12242_v14 = vpop.f32.mrf.mxu1 }
 0xa10   :  { %v12244_v61 = vpop.f32.mrf.mxu1 }
 0xa12   :  { %v7265_v35 = vpop.f32.mrf.mxu1 }
 0xa13   :  { %v8116_v35 = vpop.eup %8115 }
 0xa14   :  { %v7266_v63 = vpop.f32.mrf.mxu1  ;;  %v8118_v6 = vpop.eup %8117 }
 0xa15   :  { %v8120_v17 = vpop.eup %8119 }
 0xa16   :  { %v8122_v40 = vpop.eup %8121 }
 0xa17   :  { %v8124_v27 = vpop.eup %8123 }
 0xa18   :  { %v5582_v21 = vsub.f32 1.0, %v8124_v27 }
 0xa2b   :  { %v5383_v9 = vpop.f32.mrf.mxu0 }
 0xa2c   :  { %v5425_v43 = vadd.f32 %v5424_v39, %v5383_v9  ;;  %v13985_v39 = vrot.slane %v12236_v58, 4  ;;  %v5528_v9 = vadd.f32 1.0, %v8120_v17  ;;  %v5587_v58 = vmul.f32 %v8122_v40, %v11685_v59  ;;  %v14001_v17 = vld [vmem:[#allocation82_spill] sm:$0xff] }
 0xa2d   :  { %v5385_v1 = vpop.f32.mrf.mxu0  ;;  %v7264_v59 = vadd.f32 %v12244_v61, %v12242_v14 }
 0xa2e   :  { %v5566_v44 = vadd.f32 %v5425_v43, %v9668_v13  ;;  %v5427_v50 = vadd.f32 %v5426_v51, %v5385_v1  ;;  %v5544_v47 = vunpack.c.l.bf16 %v13985_v39  ;;  %v5581_v43 = vsub.f32 1.0, %v8122_v40  ;;  %v14002_v40 = vld [vmem:[#allocation83_spill] sm:$0xff] }
 0xa2f   :  { %v5387_v63 = vpop.f32.mrf.mxu0 }
 0xa30   :  { %v5569_v54 = vmul.f32 %v8116_v35, %v5566_v44  ;;  %v5567_v29 = vadd.f32 %v5427_v50, %v9671_v12  ;;  %v5547_v33 = vadd.f32 %v5544_v47, %v5345_v56  ;;  %v5588_v56 = vmul.f32 %v8124_v27, %v11687_v45  ;;  %v14004_v27 = vld [vmem:[#allocation85_spill] sm:$0xff] }
 0xa31   :  { %v5388_v53 = vpop.f32.mrf.mxu0 }
 0xa32   :  { %v5575_v3 = vadd.f32 %v5572_v36, %v5569_v54  ;;  %v5570_v26 = vmul.f32 %v8118_v6, %v5567_v29  ;;  %v7024_v51 = vmul.f32 -1.442695, %v5547_v33  ;;  %v5099_v53 = vld [vmem:[#allocation3 + $0xd4] sm:$0xf] }
 0xa33   :  { %v5574_v61 = vunpack.c.l.bf16 %v5099_v53  ;;  %v14018_v53 = vld [vmem:[#allocation99_spill] sm:$0xff] }
 0xa34   :  { %8125 = vtanh.f32 %v5575_v3  ;;  %v5576_v37 = vadd.f32 %v5573_v10, %v5570_v26 }
 0xa36   :  { %8127 = vtanh.f32 %v5576_v37 }
 0xa37   :  { %8129 = vpow2.f32 %v7024_v51  ;;  %v14000_v51 = vld [vmem:[#allocation81_spill] sm:$0xff] }
 0xa38   :  { %8131 = vrcp.f32 %v5528_v9  ;;  %v14003_v9 = vld [vmem:[#allocation84_spill] sm:$0xff] }
 0xa41   :  { %v8126_v1 = vpop.eup %8125 }
 0xa42   :  { %v5584_v4 = vmul.f32 %v8126_v1, %v5581_v43  ;;  %v14005_v43 = vld [vmem:[#allocation86_spill] sm:$0xff]  ;;  %v14006_v1 = vld [vmem:[#allocation87_spill] sm:$0xff] }
 0xa43   :  { %v8128_v44 = vpop.eup %8127 }
 0xa44   :  { %v5585_v50 = vmul.f32 %v8128_v44, %v5582_v21  ;;  %v12252_v35 = vadd.f32 %v5587_v58, %v5584_v4  ;;  %v8130_v36 = vpop.eup %8129  ;;  %v14007_v21 = vld [vmem:[#allocation88_spill] sm:$0xff]  ;;  %v14008_v4 = vld [vmem:[#allocation89_spill] sm:$0xff]  ;;  %v14009_v58 = vld [vmem:[#allocation90_spill] sm:$0xff] }
 0xa45   :  { %v5559_v45 = vadd.f32 1.0, %v8130_v36  ;;  %v8132_v3 = vpop.eup %8131  ;;  %v14010_v44 = vld [vmem:[#allocation91_spill] sm:$0xff]  ;;  %v14013_v36 = vld [vmem:[#allocation94_spill] sm:$0xff] }
 0xa46   :  { %v12254_v63 = vadd.f32 %v5588_v56, %v5585_v50  ;;  %v12262_v29 = vpack.c.bf16 %v12252_v35, %v12252_v35  ;;  %v14011_v50 = vld [vmem:[#allocation92_spill] sm:$0xff]  ;;  %v14012_v56 = vld [vmem:[#allocation93_spill] sm:$0xff] }
 0xa47   :  { %8133 = vrcp.f32 %v5559_v45  ;;  %v14016_v45 = vld [vmem:[#allocation97_spill] sm:$0xff] }
 0xa48   :  { %v12258_v54 = vpack.c.bf16 %v12254_v63, %v12254_v63 }
 0xa4a   :  { %5633 = vmatprep.mubr.bf16.mxu1 %v12258_v54 }
 0xa4b   :  { %v5505_v6 = vpop.f32.mrf.mxu0  ;;  %5634 = vmatmul.mubr.bf16.vlgmr.msra.gmra.mxu1 %v12262_v29 }
 0xa4c   :  { %v5506_v10 = vadd.f32 %v7264_v59, %v5505_v6  ;;  %5725 = vmatpush1.bf16.msra.mxu1 %v11701_v42  ;;  %5756 = vmatprep.mubr.bf16.mxu1 %v13182_v19  ;;  %v14014_v59 = vld [vmem:[#allocation95_spill] sm:$0xff]  ;;  %v14015_v6 = vld [vmem:[#allocation96_spill] sm:$0xff] }
 0xa4d   :  { %v7481_v39 = vpop.f32.mrf.mxu0  ;;  %5726 = vmatprep.subr.bf16.mxu1 %v11705_v11 }
 0xa4e   :  { %v5568_v47 = vadd.f32 %v5506_v10, %v9691_v49  ;;  %v14017_v10 = vld [vmem:[#allocation98_spill] sm:$0xff]  ;;  %v14019_v39 = vld [vmem:[#allocation100_spill] sm:$0xff] }
 0xa4f   :  { %v5508_v26 = vpop.f32.mrf.mxu0 }
 0xa50   :  { %v5571_v14 = vmul.f32 %v8132_v3, %v5568_v47  ;;  %5727 = vmatpush1.bf16.msra.mxu1 %v11709_v2  ;;  %v14020_v47 = vld [vmem:[#allocation101_spill] sm:$0xff]  ;;  %v14021_v3 = vld [vmem:[#allocation102_spill] sm:$0xff]  ;;  %v14022_v26 = vld [vmem:[#allocation103_spill] sm:$0xff] }
 0xa51   :  { %v7482_v33 = vpop.f32.mrf.mxu0  ;;  %5728 = vmatprep.subr.bf16.mxu1 %v11712_v38 }
 0xa52   :  { %v5577_v37 = vadd.f32 %v5574_v61, %v5571_v14  ;;  %v14023_v14 = vld [vmem:[#allocation104_spill] sm:$0xff]  ;;  %v14024_v61 = vld [vmem:[#allocation105_spill] sm:$0xff]  ;;  %v14025_v33 = vld [vmem:[#allocation106_spill] sm:$0xff] }
 0xa54   :  { %8135 = vtanh.f32 %v5577_v37  ;;  %5729 = vmatpush1.bf16.msra.mxu1 %v11715_v52  ;;  %v8134_v42 = vpop.eup %8133  ;;  %v14026_v37 = vld [vmem:[#allocation107_spill] sm:$0xff] }
 0xa55   :  { %5730 = vmatprep.subr.bf16.mxu1 %v11718_v41  ;;  %v5583_v11 = vsub.f32 1.0, %v8134_v42  ;;  %v5589_v52 = vmul.f32 %v8134_v42, %v11743_v15  ;;  %v13992_v15 = vld [vmem:[#allocation73_spill] sm:$0xff]  ;;  %v14027_v42 = vld [vmem:[#allocation108_spill] sm:$0xff] }
 0xa58   :  { %5731 = vmatpush1.bf16.msra.mxu1 %v11721_v55 }
 0xa59   :  { %5732 = vmatprep.subr.bf16.mxu1 %v11724_v0  ;;  %v13986_v0 = vld [vmem:[#allocation67_spill] sm:$0xff] }
 0xa5c   :  { %5733 = vmatpush1.bf16.msra.mxu1 %v11727_v5  ;;  %v13987_v5 = vld [vmem:[#allocation68_spill] sm:$0xff] }
 0xa5d   :  { %5734 = vmatprep.subr.bf16.mxu1 %v11730_v18  ;;  %v13988_v18 = vld [vmem:[#allocation69_spill] sm:$0xff] }
 0xa60   :  { %5735 = vmatpush1.bf16.msra.mxu1 %v11733_v46  ;;  %v13989_v46 = vld [vmem:[#allocation70_spill] sm:$0xff] }
 0xa61   :  { %v8136_v2 = vpop.eup %8135  ;;  %5736 = vmatprep.subr.bf16.mxu1 %v11736_v16  ;;  %v13990_v16 = vld [vmem:[#allocation71_spill] sm:$0xff] }
 0xa62   :  { %v5586_v38 = vmul.f32 %v8136_v2, %v5583_v11  ;;  %v14028_v11 = vld [vmem:[#allocation109_spill] sm:$0xff]  ;;  %v14029_v2 = vld [vmem:[#allocation110_spill] sm:$0xff] }
 0xa64   :  { %5737 = vmatpush1.bf16.msra.mxu1 %v11740_v25  ;;  %v12284_v41 = vadd.f32 %v5589_v52, %v5586_v38  ;;  %v13991_v25 = vld [vmem:[#allocation72_spill] sm:$0xff]  ;;  %v14030_v38 = vld [vmem:[#allocation111_spill] sm:$0xff] }
 0xa65   :  { %5738 = vmatprep.subr.bf16.mxu1 %v11745_v57  ;;  %v13993_v57 = vld [vmem:[#allocation74_spill] sm:$0xff]  ;;  %v14031_v52 = vld [vmem:[#allocation112_spill] sm:$0xff] }
 0xa66   :  { %v12289_v55 = vpack.c.bf16 %v12284_v41, %v12284_v41 }
 0xa68   :  { %5739 = vmatpush1.bf16.msra.mxu1 %v11752_v8  ;;  %5675 = vmatmul.mubr.bf16.vlgmr.msra.gmra.mxu0 %v12289_v55  ;;  %v13994_v8 = vld [vmem:[#allocation75_spill] sm:$0xff] }
 0xa69   :  { %5684 = vmatpush1.bf16.msra.mxu0 %v11756_v30  ;;  %5715 = vmatprep.mubr.bf16.mxu0 %v12258_v54  ;;  %v13995_v30 = vld [vmem:[#allocation76_spill] sm:$0xff] }
 0xa6a   :  { %5765 = vmatprep.subr.bf16.mxu1 %v11760_v31  ;;  %5685 = vmatprep.subr.bf16.mxu0 %v11763_v28  ;;  %v13996_v31 = vld [vmem:[#allocation77_spill] sm:$0xff]  ;;  %v13997_v28 = vld [vmem:[#allocation78_spill] sm:$0xff] }
 0xa6b   :  { %5757 = vmatmul.mubr.bf16.vlgmr.msra.gmra.mxu1 %v12289_v55 }
 0xa6c   :  { %5766 = vmatpush1.bf16.msra.mxu1 %v11767_v24  ;;  %5797 = vmatprep.mubr.bf16.mxu1 %v12258_v54  ;;  %v13998_v24 = vld [vmem:[#allocation79_spill] sm:$0xff] }
 0xa6d   :  { %5686 = vmatpush1.bf16.msra.mxu0 %v11771_v48  ;;  %5767 = vmatprep.subr.bf16.mxu1 %v13986_v0  ;;  %v13999_v48 = vld [vmem:[#allocation80_spill] sm:$0xff]  ;;  %v14032_v0 = vld [vmem:[#allocation113_spill] sm:$0xff] }
 0xa6e   :  { %5687 = vmatprep.subr.bf16.mxu0 %v13987_v5  ;;  %v14033_v5 = vld [vmem:[#allocation114_spill] sm:$0xff] }
 0xa70   :  { %5768 = vmatpush1.bf16.msra.mxu1 %v13988_v18  ;;  %v14034_v18 = vld [vmem:[#allocation115_spill] sm:$0xff] }
 0xa71   :  { %5688 = vmatpush1.bf16.msra.mxu0 %v13989_v46  ;;  %5769 = vmatprep.subr.bf16.mxu1 %v13990_v16  ;;  %v14035_v46 = vld [vmem:[#allocation116_spill] sm:$0xff]  ;;  %v14036_v16 = vld [vmem:[#allocation117_spill] sm:$0xff] }
 0xa72   :  { %5689 = vmatprep.subr.bf16.mxu0 %v13991_v25  ;;  %v14037_v25 = vld [vmem:[#allocation118_spill] sm:$0xff] }
 0xa74   :  { %5770 = vmatpush1.bf16.msra.mxu1 %v13992_v15  ;;  %v14038_v15 = vld [vmem:[#allocation119_spill] sm:$0xff] }
 0xa75   :  { %5690 = vmatpush1.bf16.msra.mxu0 %v13993_v57  ;;  %5771 = vmatprep.subr.bf16.mxu1 %v13994_v8  ;;  %v14039_v57 = vld [vmem:[#allocation120_spill] sm:$0xff]  ;;  %v14040_v8 = vld [vmem:[#allocation121_spill] sm:$0xff] }
 0xa76   :  { %5691 = vmatprep.subr.bf16.mxu0 %v13995_v30  ;;  %v14041_v30 = vld [vmem:[#allocation122_spill] sm:$0xff] }
 0xa78   :  { %5772 = vmatpush1.bf16.msra.mxu1 %v13996_v31  ;;  %v14042_v31 = vld [vmem:[#allocation123_spill] sm:$0xff] }
 0xa79   :  { %5692 = vmatpush1.bf16.msra.mxu0 %v13997_v28  ;;  %5773 = vmatprep.subr.bf16.mxu1 %v13998_v24  ;;  %v14043_v28 = vld [vmem:[#allocation124_spill] sm:$0xff]  ;;  %v14044_v24 = vld [vmem:[#allocation125_spill] sm:$0xff] }
 0xa7a   :  { %5693 = vmatprep.subr.bf16.mxu0 %v13999_v48  ;;  %v14045_v48 = vld [vmem:[#allocation126_spill] sm:$0xff] }
 0xa7c   :  { %5774 = vmatpush1.bf16.msra.mxu1 %v14000_v51  ;;  %v14046_v51 = vld [vmem:[#allocation127_spill] sm:$0xff] }
 0xa7d   :  { %5694 = vmatpush1.bf16.msra.mxu0 %v14001_v17  ;;  %5775 = vmatprep.subr.bf16.mxu1 %v14002_v40  ;;  %v14047_v17 = vld [vmem:[#allocation128_spill] sm:$0xff]  ;;  %v14048_v40 = vld [vmem:[#allocation129_spill] sm:$0xff] }
 0xa7e   :  { %5695 = vmatprep.subr.bf16.mxu0 %v14003_v9  ;;  %v14049_v9 = vld [vmem:[#allocation130_spill] sm:$0xff] }
 0xa80   :  { %5776 = vmatpush1.bf16.msra.mxu1 %v14004_v27  ;;  %v14050_v27 = vld [vmem:[#allocation131_spill] sm:$0xff] }
 0xa81   :  { %5696 = vmatpush1.bf16.msra.mxu0 %v14005_v43  ;;  %5777 = vmatprep.subr.bf16.mxu1 %v14006_v1  ;;  %v14051_v43 = vld [vmem:[#allocation132_spill] sm:$0xff]  ;;  %v14052_v1 = vld [vmem:[#allocation133_spill] sm:$0xff] }
 0xa82   :  { %5697 = vmatprep.subr.bf16.mxu0 %v14007_v21  ;;  %v14053_v21 = vld [vmem:[#allocation134_spill] sm:$0xff] }
 0xa84   :  { %5778 = vmatpush1.bf16.msra.mxu1 %v14008_v4  ;;  %v14054_v4 = vld [vmem:[#allocation135_spill] sm:$0xff] }
 0xa85   :  { %5698 = vmatpush1.bf16.msra.mxu0 %v14009_v58  ;;  %5779 = vmatprep.subr.bf16.mxu1 %v14010_v44  ;;  %v14055_v58 = vld [vmem:[#allocation136_spill] sm:$0xff]  ;;  %v14056_v44 = vld [vmem:[#allocation137_spill] sm:$0xff] }
 0xa86   :  { %5699 = vmatprep.subr.bf16.mxu0 %v14011_v50  ;;  %v14057_v50 = vld [vmem:[#allocation138_spill] sm:$0xff] }
 0xa88   :  { %5780 = vmatpush1.bf16.msra.mxu1 %v14012_v56  ;;  %v14058_v56 = vld [vmem:[#allocation139_spill] sm:$0xff] }
 0xa89   :  { %5700 = vmatpush2.bf16.msra.mxu0 %v14013_v36  ;;  %5781 = vmatprep.subr.bf16.mxu1 %v14014_v59  ;;  %v14059_v36 = vld [vmem:[#allocation140_spill] sm:$0xff]  ;;  %v14060_v59 = vld [vmem:[#allocation141_spill] sm:$0xff] }
 0xa8a   :  { %5701 = vmatprep.subr.bf16.mxu0 %v14015_v6  ;;  %v14061_v6 = vld [vmem:[#allocation142_spill] sm:$0xff] }
 0xa8c   :  { %5782 = vmatpush2.bf16.msra.mxu1 %v14016_v45  ;;  %v14062_v45 = vld [vmem:[#allocation143_spill] sm:$0xff] }
 0xa8d   :  { %5702 = vmatpush2.bf16.msra.mxu0 %v14017_v10  ;;  %5783 = vmatprep.subr.bf16.mxu1 %v14018_v53  ;;  %v14063_v10 = vld [vmem:[#allocation144_spill] sm:$0xff]  ;;  %v14064_v53 = vld [vmem:[#allocation145_spill] sm:$0xff] }
 0xa8e   :  { %5703 = vmatprep.subr.bf16.mxu0 %v14019_v39  ;;  %v14065_v39 = vld [vmem:[#allocation146_spill] sm:$0xff] }
 0xa90   :  { %5784 = vmatpush2.bf16.msra.mxu1 %v14020_v47  ;;  %v14066_v47 = vld [vmem:[#allocation147_spill] sm:$0xff] }
 0xa91   :  { %5704 = vmatpush2.bf16.msra.mxu0 %v14021_v3  ;;  %5785 = vmatprep.subr.bf16.mxu1 %v14022_v26  ;;  %v14067_v3 = vld [vmem:[#allocation148_spill] sm:$0xff]  ;;  %v14068_v26 = vld [vmem:[#allocation149_spill] sm:$0xff] }
 0xa92   :  { %5705 = vmatprep.subr.bf16.mxu0 %v14023_v14  ;;  %v14069_v14 = vld [vmem:[#allocation150_spill] sm:$0xff] }
 0xa94   :  { %5786 = vmatpush2.bf16.msra.mxu1 %v14024_v61  ;;  %v14070_v61 = vld [vmem:[#allocation151_spill] sm:$0xff] }
 0xa95   :  { %5706 = vmatpush2.bf16.msra.mxu0 %v14025_v33  ;;  %5787 = vmatprep.subr.bf16.mxu1 %v14026_v37  ;;  %v14071_v33 = vld [vmem:[#allocation152_spill] sm:$0xff]  ;;  %v14072_v37 = vld [vmem:[#allocation153_spill] sm:$0xff] }
 0xa96   :  { %5707 = vmatprep.subr.bf16.mxu0 %v14027_v42  ;;  %v14073_v42 = vld [vmem:[#allocation154_spill] sm:$0xff] }
 0xa98   :  { %5788 = vmatpush2.bf16.msra.mxu1 %v14028_v11  ;;  %v14074_v11 = vld [vmem:[#allocation155_spill] sm:$0xff] }
 0xa99   :  { %5708 = vmatpush2.bf16.msra.mxu0 %v14029_v2  ;;  %5789 = vmatprep.subr.bf16.mxu1 %v14030_v38  ;;  %v14075_v2 = vld [vmem:[#allocation156_spill] sm:$0xff]  ;;  %v14076_v38 = vld [vmem:[#allocation157_spill] sm:$0xff] }
 0xa9a   :  { %5709 = vmatprep.subr.bf16.mxu0 %v14031_v52  ;;  %v14077_v52 = vld [vmem:[#allocation158_spill] sm:$0xff] }
 0xa9c   :  { %5790 = vmatpush2.bf16.msra.mxu1 %v14032_v0  ;;  %v14078_v0 = vld [vmem:[#allocation159_spill] sm:$0xff] }
 0xa9d   :  { %5710 = vmatpush2.bf16.msra.mxu0 %v14033_v5  ;;  %5791 = vmatprep.subr.bf16.mxu1 %v14034_v18  ;;  %v14079_v5 = vld [vmem:[#allocation160_spill] sm:$0xff]  ;;  %v14080_v18 = vld [vmem:[#allocation161_spill] sm:$0xff] }
 0xa9e   :  { %5711 = vmatprep.subr.bf16.mxu0 %v14035_v46  ;;  %v14081_v46 = vld [vmem:[#allocation162_spill] sm:$0xff] }
 0xaa0   :  { %5792 = vmatpush2.bf16.msra.mxu1 %v14036_v16  ;;  %v14082_v16 = vld [vmem:[#allocation163_spill] sm:$0xff] }
 0xaa1   :  { %5712 = vmatpush2.bf16.msra.mxu0 %v14037_v25  ;;  %5793 = vmatprep.subr.bf16.mxu1 %v14038_v15  ;;  %v14083_v25 = vld [vmem:[#allocation164_spill] sm:$0xff]  ;;  %v14084_v15 = vld [vmem:[#allocation165_spill] sm:$0xff] }
 0xaa2   :  { %5713 = vmatprep.subr.bf16.mxu0 %v14039_v57  ;;  %v12411_v57 = vld [vmem:[#allocation10 + $0x188] ss:$36 sps:$4 sm:$0xff]  }
 0xaa4   :  { %5794 = vmatpush2.bf16.msra.mxu1 %v14040_v8  ;;  %v12435_v8 = vld [vmem:[#allocation10 + $0xb0] ss:$36 sps:$4 sm:$0xff]  }
 0xaa5   :  { %5714 = vmatpush2.bf16.msra.mxu0 %v14041_v30  ;;  %5795 = vmatprep.subr.bf16.mxu1 %v14042_v31  ;;  %v12439_v30 = vld [vmem:[#allocation10 + $0x2a8] ss:$36 sps:$4 sm:$0xff]  }
 0xaa6   :  { %5806 = vmatprep.subr.bf16.mxu0 %v14043_v28  ;;  %v12443_v31 = vld [vmem:[#allocation10 + $0x68] ss:$36 sps:$4 sm:$0xff]   ;;  %v12447_v28 = vld [vmem:[#allocation10 + $0x260] ss:$36 sps:$4 sm:$0xff]  }
 0xaa8   :  { %5716 = vmatmul.mubr.bf16.vlgmr.msra.gmra.mxu0 %v12262_v29  ;;  %5796 = vmatpush2.bf16.msra.mxu1 %v14044_v24  ;;  %v14089_v24 = vld [vmem:[#allocation170_spill] sm:$0xff] }
 0xaa9   :  { %5807 = vmatpush1.bf16.msra.mxu0 %v14045_v48  ;;  %5888 = vmatprep.subr.bf16.mxu1 %v14046_v51  ;;  %v12451_v48 = vld [vmem:[#allocation10 + $0x20] ss:$36 sps:$4 sm:$0xff]  }
 0xaaa   :  { %5808 = vmatprep.subr.bf16.mxu0 %v14047_v17  ;;  %5838 = vmatprep.mubr.bf16.mxu0 %v13182_v19  ;;  %v14090_v51 = vld [vmem:[#allocation171_spill] sm:$0xff] }
 0xaab   :  { %5798 = vmatmul.mubr.bf16.vlgmr.msra.gmra.mxu1 %v12262_v29  ;;  %v8836_v17 = vld [vmem:[#allocation10 + $0x1fc] ss:$36 sps:$4 sm:$0xff]  }
 0xaac   :  { %5889 = vmatpush1.bf16.msra.mxu1 %v14048_v40  ;;  %5920 = vmatprep.mubr.bf16.mxu1 %v13182_v19  ;;  %v14091_v40 = vld [vmem:[#allocation172_spill] sm:$0xff] }
 0xaad   :  { %5809 = vmatpush1.bf16.msra.mxu0 %v14049_v9  ;;  %5890 = vmatprep.subr.bf16.mxu1 %v14050_v27  ;;  %v8837_v9 = vld [vmem:[#allocation10 + $0x1f8] ss:$36 sps:$4 sm:$0xff]   ;;  %v14092_v27 = vld [vmem:[#allocation173_spill] sm:$0xff] }
 0xaae   :  { %5810 = vmatprep.subr.bf16.mxu0 %v14051_v43  ;;  %v8838_v43 = vld [vmem:[#allocation10 + $0x1b4] ss:$36 sps:$4 sm:$0xff]  }
 0xab0   :  { %5891 = vmatpush1.bf16.msra.mxu1 %v14052_v1  ;;  %v14093_v1 = vld [vmem:[#allocation174_spill] sm:$0xff] }
 0xab1   :  { %5811 = vmatpush1.bf16.msra.mxu0 %v14053_v21  ;;  %5892 = vmatprep.subr.bf16.mxu1 %v14054_v4  ;;  %v8839_v21 = vld [vmem:[#allocation10 + $0x1b0] ss:$36 sps:$4 sm:$0xff]   ;;  %v14094_v4 = vld [vmem:[#allocation175_spill] sm:$0xff] }
 0xab2   :  { %5812 = vmatprep.subr.bf16.mxu0 %v14055_v58  ;;  %v8840_v58 = vld [vmem:[#allocation10 + $0x16c] ss:$36 sps:$4 sm:$0xff]  }
 0xab4   :  { %5893 = vmatpush1.bf16.msra.mxu1 %v14056_v44  ;;  %v14095_v44 = vld [vmem:[#allocation176_spill] sm:$0xff] }
 0xab5   :  { %5813 = vmatpush1.bf16.msra.mxu0 %v14057_v50  ;;  %5894 = vmatprep.subr.bf16.mxu1 %v14058_v56  ;;  %v8841_v50 = vld [vmem:[#allocation10 + $0x168] ss:$36 sps:$4 sm:$0xff]  }
 0xab6   :  { %5814 = vmatprep.subr.bf16.mxu0 %v14059_v36  ;;  %v14096_v56 = vld [vmem:[#allocation177_spill] sm:$0xff] }
 0xab7   :  { %v8842_v36 = vld [vmem:[#allocation10 + $0x124] ss:$36 sps:$4 sm:$0xff]  }
 0xab8   :  { %5895 = vmatpush1.bf16.msra.mxu1 %v14060_v59  ;;  %v14097_v59 = vld [vmem:[#allocation178_spill] sm:$0xff] }
 0xab9   :  { %5815 = vmatpush1.bf16.msra.mxu0 %v14061_v6  ;;  %5896 = vmatprep.subr.bf16.mxu1 %v14062_v45  ;;  %v8843_v6 = vld [vmem:[#allocation10 + $0x120] ss:$36 sps:$4 sm:$0xff]  }
 0xaba   :  { %5816 = vmatprep.subr.bf16.mxu0 %v14063_v10  ;;  %v14098_v45 = vld [vmem:[#allocation179_spill] sm:$0xff] }
 0xabb   :  { %v8844_v10 = vld [vmem:[#allocation10 + $0xdc] ss:$36 sps:$4 sm:$0xff]  }
 0xabc   :  { %5897 = vmatpush1.bf16.msra.mxu1 %v14064_v53  ;;  %v14099_v53 = vld [vmem:[#allocation180_spill] sm:$0xff] }
 0xabd   :  { %5817 = vmatpush1.bf16.msra.mxu0 %v14065_v39  ;;  %5898 = vmatprep.subr.bf16.mxu1 %v14066_v47  ;;  %v8845_v39 = vld [vmem:[#allocation10 + $0xd8] ss:$36 sps:$4 sm:$0xff]   ;;  %v12465_v47 = vld [vmem:[#allocation10 + $0x2e8] ss:$36 sps:$4 sm:$0xff]  }
 0xabe   :  { %5818 = vmatprep.subr.bf16.mxu0 %v14067_v3  ;;  %v8847_v3 = vld [vmem:[#allocation10 + $0x94] ss:$36 sps:$4 sm:$0xff]  }
 0xac0   :  { %5899 = vmatpush1.bf16.msra.mxu1 %v14068_v26  ;;  %v12468_v26 = vld [vmem:[#allocation10 + $0x2a4] ss:$36 sps:$4 sm:$0xff]  }
 0xac1   :  { %5819 = vmatpush1.bf16.msra.mxu0 %v14069_v14  ;;  %5900 = vmatprep.subr.bf16.mxu1 %v14070_v61  ;;  %v8849_v14 = vld [vmem:[#allocation10 + $0x90] ss:$36 sps:$4 sm:$0xff]   ;;  %v12471_v61 = vld [vmem:[#allocation10 + $0x2a0] ss:$36 sps:$4 sm:$0xff]  }
 0xac2   :  { %5820 = vmatprep.subr.bf16.mxu0 %v14071_v33  ;;  %v8851_v33 = vld [vmem:[#allocation10 + $0x4c] ss:$36 sps:$4 sm:$0xff]  }
 0xac4   :  { %5901 = vmatpush1.bf16.msra.mxu1 %v14072_v37  ;;  %v12474_v37 = vld [vmem:[#allocation10 + $0x25c] ss:$36 sps:$4 sm:$0xff]  }
 0xac5   :  { %5821 = vmatpush1.bf16.msra.mxu0 %v14073_v42  ;;  %5902 = vmatprep.subr.bf16.mxu1 %v14074_v11  ;;  %v8853_v42 = vld [vmem:[#allocation10 + $0x48] ss:$36 sps:$4 sm:$0xff]   ;;  %v12477_v11 = vld [vmem:[#allocation10 + $0x258] ss:$36 sps:$4 sm:$0xff]  }
 0xac6   :  { %5847 = vmatprep.subr.bf16.mxu0 %v14075_v2  ;;  %v8855_v2 = vld [vmem:[#allocation10 + $0x4] ss:$36 sps:$4 sm:$0xff]  }
 0xac8   :  { %5839 = vmatmul.mubr.bf16.vlgmr.msra.gmra.mxu0 %v12289_v55  ;;  %5903 = vmatpush1.bf16.msra.mxu1 %v14076_v38  ;;  %v14100_v38 = vmov 0.0  }
 0xac9   :  { %5848 = vmatpush1.bf16.msra.mxu0 %v14077_v52  ;;  %5879 = vmatprep.mubr.bf16.mxu0 %v12258_v54  ;;  %v8856_v52 = vld [vmem:[#allocation10] ss:$36 sps:$4 sm:$0xff]  }
 0xaca   :  { %7277 = vmatprep.subr.bf16.mxu1 %v14078_v0  ;;  %5849 = vmatprep.subr.bf16.mxu0 %v14079_v5  ;;  %v12482_v0 = vld [vmem:[#allocation10 + $0x698] ss:$36 sps:$4 sm:$0xff]  }
 0xacb   :  { %5921 = vmatmul.mubr.bf16.vlgmr.msra.gmra.mxu1 %v12289_v55  ;;  %v8858_v5 = vld [vmem:[#allocation10 + $0x43c] ss:$36 sps:$4 sm:$0xff]  }
 0xacc   :  { %7278 = vmatpush3.bf16.msra.mxu1 %v12063_v22  ;;  %5961 = vmatprep.mubr.bf16.mxu1 %v12258_v54  ;;  %v12415_v22 = vld [vmem:[#allocation10 + $0x380] ss:$36 sps:$4 sm:$0xff]   ;;  %v12427_v54 = vld [vmem:[#allocation10 + $0xf8] ss:$36 sps:$4 sm:$0xff]  }
 0xacd   :  { %5850 = vmatpush1.bf16.msra.mxu0 %v14080_v18  ;;  %7279 = vmatprep.subr.bf16.mxu1 %v14081_v46  ;;  %v8859_v46 = vld [vmem:[#allocation10 + $0x438] ss:$36 sps:$4 sm:$0xff]  }
 0xace   :  { %5851 = vmatprep.subr.bf16.mxu0 %v12073_v20  ;;  %v12419_v20 = vld [vmem:[#allocation10 + $0x140] ss:$36 sps:$4 sm:$0xff]  }
 0xad0   :  { %7280 = vmatpush3.bf16.msra.mxu1 %v14082_v16  ;;  %v12488_v16 = vld [vmem:[#allocation10 + $0x650] ss:$36 sps:$4 sm:$0xff]  }
 0xad1   :  { %5852 = vmatpush1.bf16.msra.mxu0 %v14083_v25  ;;  %7281 = vmatprep.subr.bf16.mxu1 %v12082_v23  ;;  %v12423_v23 = vld [vmem:[#allocation10 + $0x338] ss:$36 sps:$4 sm:$0xff]  }
 0xad2   :  { %5853 = vmatprep.subr.bf16.mxu0 %v14084_v15  ;;  %v8861_v25 = vld [vmem:[#allocation10 + $0x3f4] ss:$36 sps:$4 sm:$0xff]  }
 0xad4   :  { %7282 = vmatpush3.bf16.msra.mxu1 %v12411_v57 }
 0xad5   :  { %5854 = vmatpush1.bf16.msra.mxu0 %v12089_v32  ;;  %7283 = vmatprep.subr.bf16.mxu1 %v12415_v22  ;;  %v12431_v32 = vld [vmem:[#allocation10 + $0x2f0] ss:$36 sps:$4 sm:$0xff]  }
 0xad6   :  { %5855 = vmatprep.subr.bf16.mxu0 %v12093_v62  ;;  %v14085_v62 = vld [vmem:[#allocation166_spill] sm:$0xff] }
 0xad8   :  { %7284 = vmatpush3.bf16.msra.mxu1 %v12419_v20 }
 0xad9   :  { %5856 = vmatpush1.bf16.msra.mxu0 %v12097_v34  ;;  %7285 = vmatprep.subr.bf16.mxu1 %v12423_v23  ;;  %v14086_v34 = vld [vmem:[#allocation167_spill] sm:$0xff] }
 0xada   :  { %5857 = vmatprep.subr.bf16.mxu0 %v12101_v60  ;;  %v14087_v60 = vld [vmem:[#allocation168_spill] sm:$0xff] }
 0xadc   :  { %7286 = vmatpush3.bf16.msra.mxu1 %v12427_v54 }
 0xadd   :  { %5858 = vmatpush1.bf16.msra.mxu0 %v12105_v7  ;;  %7287 = vmatprep.subr.bf16.mxu1 %v12431_v32  ;;  %v14088_v7 = vld [vmem:[#allocation169_spill] sm:$0xff] }
 0xade   :  { %5859 = vmatprep.subr.bf16.mxu0 %v14085_v62  ;;  %v8862_v62 = vld [vmem:[#allocation10 + $0x3f0] ss:$36 sps:$4 sm:$0xff]  }
 0xae0   :  { %7288 = vmatpush3.bf16.msra.mxu1 %v12435_v8 }
 0xae1   :  { %5860 = vmatpush1.bf16.msra.mxu0 %v14086_v34  ;;  %7289 = vmatprep.subr.bf16.mxu1 %v12439_v30  ;;  %v12492_v34 = vld [vmem:[#allocation10 + $0x608] ss:$36 sps:$4 sm:$0xff]  }
 0xae2   :  { %5861 = vmatprep.subr.bf16.mxu0 %v14087_v60 }
 0xae4   :  { %7290 = vmatpush3.bf16.msra.mxu1 %v12443_v31 }
 0xae5   :  { %5862 = vmatpush1.bf16.msra.mxu0 %v14088_v7  ;;  %7291 = vmatprep.subr.bf16.mxu1 %v12447_v28  ;;  %v8864_v7 = vld [vmem:[#allocation10 + $0x3ac] ss:$36 sps:$4 sm:$0xff]  }
 0xae6   :  { %5863 = vmatprep.subr.bf16.mxu0 %v14089_v24  ;;  %v8865_v24 = vld [vmem:[#allocation10 + $0x3a8] ss:$36 sps:$4 sm:$0xff]  }
 0xae8   :  { %7292 = vmatpush3.bf16.msra.mxu1 %v12451_v48 }
 0xae9   :  { %5864 = vmatpush2.bf16.msra.mxu0 %v14090_v51  ;;  %6099 = vmatprep.subr.bf16.mxu1 %v8836_v17  ;;  %v12496_v51 = vld [vmem:[#allocation10 + $0x5c0] ss:$36 sps:$4 sm:$0xff]  }
 0xaea   :  { %5865 = vmatprep.subr.bf16.mxu0 %v14091_v40  ;;  %v8867_v17 = vld [vmem:[#allocation10 + $0x364] ss:$36 sps:$4 sm:$0xff]  }
 0xaeb   :  { %5962 = vmatmul.mubr.bf16.vlgmr.msra.gmra.mxu1 %v12262_v29  ;;  %v8868_v40 = vld [vmem:[#allocation10 + $0x360] ss:$36 sps:$4 sm:$0xff]  }
 0xaec   :  { %6100 = vmatpush1.bf16.msra.mxu1 %v8837_v9  ;;  %v12500_v9 = vld [vmem:[#allocation10 + $0x578] ss:$36 sps:$4 sm:$0xff]  }
 0xaed   :  { %5866 = vmatpush2.bf16.msra.mxu0 %v14092_v27  ;;  %6101 = vmatprep.subr.bf16.mxu1 %v8838_v43  ;;  %v8870_v27 = vld [vmem:[#allocation10 + $0x31c] ss:$36 sps:$4 sm:$0xff]  }
 0xaee   :  { %5867 = vmatprep.subr.bf16.mxu0 %v14093_v1  ;;  %v8871_v43 = vld [vmem:[#allocation10 + $0x318] ss:$36 sps:$4 sm:$0xff]   ;;  %v12504_v1 = vld [vmem:[#allocation10 + $0x530] ss:$36 sps:$4 sm:$0xff]  }
 0xaf0   :  { %6102 = vmatpush1.bf16.msra.mxu1 %v8839_v21  ;;  %v8873_v21 = vld [vmem:[#allocation10 + $0x2d4] ss:$36 sps:$4 sm:$0xff]  }
 0xaf1   :  { %5868 = vmatpush2.bf16.msra.mxu0 %v14094_v4  ;;  %6103 = vmatprep.subr.bf16.mxu1 %v8840_v58  ;;  %v8874_v4 = vld [vmem:[#allocation10 + $0x2d0] ss:$36 sps:$4 sm:$0xff]   ;;  %v12508_v58 = vld [vmem:[#allocation10 + $0x4e8] ss:$36 sps:$4 sm:$0xff]  }
 0xaf2   :  { %5869 = vmatprep.subr.bf16.mxu0 %v14095_v44  ;;  %v8876_v44 = vld [vmem:[#allocation10 + $0x28c] ss:$36 sps:$4 sm:$0xff]  }
 0xaf4   :  { %6104 = vmatpush1.bf16.msra.mxu1 %v8841_v50  ;;  %v8877_v50 = vld [vmem:[#allocation10 + $0x288] ss:$36 sps:$4 sm:$0xff]  }
 0xaf5   :  { %5870 = vmatpush2.bf16.msra.mxu0 %v14096_v56  ;;  %6105 = vmatprep.subr.bf16.mxu1 %v8842_v36  ;;  %v12512_v56 = vld [vmem:[#allocation10 + $0x4a0] ss:$36 sps:$4 sm:$0xff]  }
 0xaf6   :  { %5871 = vmatprep.subr.bf16.mxu0 %v14097_v59  ;;  %v8879_v36 = vld [vmem:[#allocation10 + $0x244] ss:$36 sps:$4 sm:$0xff]   ;;  %v8880_v59 = vld [vmem:[#allocation10 + $0x67c] ss:$36 sps:$4 sm:$0xff]  }
 0xaf8   :  { %6106 = vmatpush1.bf16.msra.mxu1 %v8843_v6 }
 0xaf9   :  { %5872 = vmatpush2.bf16.msra.mxu0 %v14098_v45  ;;  %6107 = vmatprep.subr.bf16.mxu1 %v8844_v10  ;;  %v8881_v45 = vld [vmem:[#allocation10 + $0x240] ss:$36 sps:$4 sm:$0xff]  }
 0xafa   :  { %5873 = vmatprep.subr.bf16.mxu0 %v14099_v53  ;;  %v8882_v53 = vld [vmem:[#allocation10 + $0x678] ss:$36 sps:$4 sm:$0xff]  }
 0xafc   :  { %6108 = vmatpush1.bf16.msra.mxu1 %v8845_v39  ;;  %v8883_v39 = vld [vmem:[#allocation10 + $0x684] ss:$36 sps:$4 sm:$0xff]  }
 0xafd   :  { %5874 = vmatpush2.bf16.msra.mxu0 %v12465_v47  ;;  %6109 = vmatprep.subr.bf16.mxu1 %v8847_v3 }
 0xafe   :  { %5875 = vmatprep.subr.bf16.mxu0 %v12468_v26 }
 0xb00   :  { %6110 = vmatpush1.bf16.msra.mxu1 %v8849_v14  ;;  %v8884_v14 = vld [vmem:[#allocation10 + $0x634] ss:$36 sps:$4 sm:$0xff]  }
 0xb01   :  { %5876 = vmatpush2.bf16.msra.mxu0 %v12471_v61  ;;  %6111 = vmatprep.subr.bf16.mxu1 %v8851_v33 }
 0xb02   :  { %5877 = vmatprep.subr.bf16.mxu0 %v12474_v37 }
 0xb04   :  { %6112 = vmatpush1.bf16.msra.mxu1 %v8853_v42 }
 0xb05   :  { %5878 = vmatpush2.bf16.msra.mxu0 %v12477_v11  ;;  %6113 = vmatprep.subr.bf16.mxu1 %v8855_v2 }
 0xb06   :  { %7483 = vmatprep.subr.bf16.mxu0 %v14100_v38 }
 0xb08   :  { %5880 = vmatmul.mubr.bf16.vlgmr.msra.gmra.mxu0 %v12262_v29  ;;  %6114 = vmatpush1.bf16.msra.mxu1 %v8856_v52 }
 0xb09   :  { %7484 = vmatpush3.bf16.msra.mxu0 %v12482_v0  ;;  %7499 = vmatprep.mubr.msk.bf16.mxu0 %vm9160_vm1, %v14100_v38 }
 0xb0a   :  { %7485 = vmatprep.subr.bf16.mxu0 %v14100_v38  ;;  %6115 = vmatprep.subr.bf16.mxu1 %v8858_v5 }
 0xb0b   :  { %v5635_v18 = vpop.f32.mrf.mxu1 }
 0xb0c   :  { %6116 = vmatpush2.bf16.msra.mxu1 %v8859_v46  ;;  %v8886_v46 = vld [vmem:[#allocation10 + $0x5ec] ss:$36 sps:$4 sm:$0xff]  }
 0xb0d   :  { %7486 = vmatpush3.bf16.msra.mxu0 %v12488_v16  ;;  %v5637_v29 = vpop.f32.mrf.mxu1  ;;  %6117 = vmatprep.subr.bf16.mxu1 %v8861_v25 }
 0xb0e   :  { %7487 = vmatprep.subr.bf16.mxu0 %v14100_v38 }
 0xb0f   :  { %v5639_v15 = vpop.f32.mrf.mxu1 }
 0xb10   :  { %6118 = vmatpush2.bf16.msra.mxu1 %v8862_v62  ;;  %v8887_v15 = vld [vmem:[#allocation10 + $0x5e8] ss:$36 sps:$4 sm:$0xff]  }
 0xb11   :  { %7488 = vmatpush3.bf16.msra.mxu0 %v12492_v34  ;;  %v5640_v60 = vpop.f32.mrf.mxu1  ;;  %6119 = vmatprep.subr.bf16.mxu1 %v8864_v7  ;;  %v8888_v62 = vld [vmem:[#allocation10 + $0x5a4] ss:$36 sps:$4 sm:$0xff]   ;;  %v8890_v7 = vld [vmem:[#allocation10 + $0x55c] ss:$36 sps:$4 sm:$0xff]  }
 0xb12   :  { %7489 = vmatprep.subr.bf16.mxu0 %v14100_v38  ;;  %v8889_v60 = vld [vmem:[#allocation10 + $0x5a0] ss:$36 sps:$4 sm:$0xff]  }
 0xb14   :  { %6120 = vmatpush2.bf16.msra.mxu1 %v8865_v24  ;;  %v8892_v24 = vld [vmem:[#allocation10 + $0x514] ss:$36 sps:$4 sm:$0xff]  }
 0xb15   :  { %7490 = vmatpush3.bf16.msra.mxu0 %v12496_v51  ;;  %6121 = vmatprep.subr.bf16.mxu1 %v8867_v17  ;;  %v8893_v17 = vld [vmem:[#allocation10 + $0x510] ss:$36 sps:$4 sm:$0xff]  }
 0xb16   :  { %7491 = vmatprep.subr.bf16.mxu0 %v14100_v38 }
 0xb18   :  { %6122 = vmatpush2.bf16.msra.mxu1 %v8868_v40  ;;  %v8894_v40 = vld [vmem:[#allocation10 + $0x4cc] ss:$36 sps:$4 sm:$0xff]  }
 0xb19   :  { %7492 = vmatpush3.bf16.msra.mxu0 %v12500_v9  ;;  %6123 = vmatprep.subr.bf16.mxu1 %v8870_v27  ;;  %v8895_v27 = vld [vmem:[#allocation10 + $0x4c8] ss:$36 sps:$4 sm:$0xff]  }
 0xb1a   :  { %7493 = vmatprep.subr.bf16.mxu0 %v14100_v38 }
 0xb1c   :  { %6124 = vmatpush2.bf16.msra.mxu1 %v8871_v43  ;;  %v8896_v43 = vld [vmem:[#allocation10 + $0x484] ss:$36 sps:$4 sm:$0xff]  }
 0xb1d   :  { %7494 = vmatpush3.bf16.msra.mxu0 %v12504_v1  ;;  %6125 = vmatprep.subr.bf16.mxu1 %v8873_v21  ;;  %v8897_v21 = vld [vmem:[#allocation10 + $0x480] ss:$36 sps:$4 sm:$0xff]  }
 0xb1e   :  { %7495 = vmatprep.subr.bf16.mxu0 %v14100_v38 }
 0xb20   :  { %6126 = vmatpush2.bf16.msra.mxu1 %v8874_v4  ;;  %v8898_v4 = vld [vmem:[#allocation10 + $0x204] ss:$36 sps:$4 sm:$0xff]  }
 0xb21   :  { %7496 = vmatpush3.bf16.msra.mxu0 %v12508_v58  ;;  %6127 = vmatprep.subr.bf16.mxu1 %v8876_v44  ;;  %v12521_v44 = vld [vmem:[#allocation3 + $0xe8] sm:$0xff] }
 0xb22   :  { %7497 = vmatprep.subr.bf16.mxu0 %v14100_v38 }
 0xb24   :  { %6128 = vmatpush2.bf16.msra.mxu1 %v8877_v50  ;;  %v5594_v50 = vld [vmem:[#allocation3 + $0xe0] sm:$0xff] }
 0xb25   :  { %7498 = vmatpush3.bf16.msra.mxu0 %v12512_v56  ;;  %6129 = vmatprep.subr.bf16.mxu1 %v8879_v36  ;;  %v6036_v36 = vrot.slane %v12521_v44, 4 }
 0xb26   :  { %6140 = vmatprep.subr.bf16.mxu0 %v8880_v59  ;;  %v6035_v59 = vrot.slane %v5594_v50, 4 }
 0xb28   :  { %7500 = vmatmul.mubr.bf16.vlgmr.msra.gmra.mxu0 %v12289_v55  ;;  %v5676_v6 = vpop.f32.mrf.mxu0  ;;  %6130 = vmatpush2.bf16.msra.mxu1 %v8881_v45  ;;  %v8885_v55 = vld [vmem:[#allocation10 + $0x630] ss:$36 sps:$4 sm:$0xff]   ;;  %v6037_v45 = vsel %vm3048_vm0, %v6035_v59, %v6036_v36 }
 0xb29   :  { %v12516_v10 = vadd.f32 %v5676_v6, %v5635_v18  ;;  %6141 = vmatpush1.bf16.msra.mxu0 %v8882_v53  ;;  %6222 = vmatprep.subr.bf16.mxu1 %v8883_v39 }
 0xb2a   :  { %v5678_v3 = vpop.f32.mrf.mxu0  ;;  %6142 = vmatprep.subr.bf16.mxu0 %v8884_v14  ;;  %6172 = vmatprep.mubr.bf16.mxu0 %v13182_v19  ;;  %v6040_v14 = vunpack.c.l.bf16 %v6037_v45 }
 0xb2b   :  { %v12519_v33 = vadd.f32 %v5678_v3, %v5637_v29  ;;  %v5758_v42 = vpop.f32.mrf.mxu1  ;;  %v8891_v29 = vld [vmem:[#allocation10 + $0x558] ss:$36 sps:$4 sm:$0xff]  }
 0xb2c   :  { %v5680_v2 = vpop.f32.mrf.mxu0 }
 0xb2d   :  { %v5760_v52 = vpop.f32.mrf.mxu1  ;;  %6143 = vmatpush1.bf16.msra.mxu0 %v8885_v55 }
 0xb2e   :  { %v5681_v5 = vpop.f32.mrf.mxu0  ;;  %6144 = vmatprep.subr.bf16.mxu0 %v8886_v46 }
 0xb2f   :  { %v5762_v18 = vpop.f32.mrf.mxu1 }
 0xb31   :  { %v5763_v25 = vpop.f32.mrf.mxu1  ;;  %6145 = vmatpush1.bf16.msra.mxu0 %v8887_v15 }
 0xb32   :  { %6146 = vmatprep.subr.bf16.mxu0 %v8888_v62 }
 0xb35   :  { %6147 = vmatpush1.bf16.msra.mxu0 %v8889_v60 }
 0xb36   :  { %6148 = vmatprep.subr.bf16.mxu0 %v8890_v7  ;;  %v6041_v7 = vunpack.c.h.bf16 %v6037_v45 }
 0xb39   :  { %6149 = vmatpush1.bf16.msra.mxu0 %v8891_v29 }
 0xb3a   :  { %6150 = vmatprep.subr.bf16.mxu0 %v8892_v24 }
 0xb3d   :  { %6151 = vmatpush1.bf16.msra.mxu0 %v8893_v17 }
 0xb3e   :  { %6152 = vmatprep.subr.bf16.mxu0 %v8894_v40 }
 0xb41   :  { %6153 = vmatpush1.bf16.msra.mxu0 %v8895_v27 }
 0xb42   :  { %6154 = vmatprep.subr.bf16.mxu0 %v8896_v43 }
 0xb45   :  { %6155 = vmatpush1.bf16.msra.mxu0 %v8897_v21 }
 0xb46   :  { %6181 = vmatprep.subr.bf16.mxu0 %v8898_v4  ;;  %v5593_v4 = vld [vmem:[#allocation3 + $0xd8] sm:$0xff] }
 0xb47   :  { %v6009_v59 = vunpack.c.l.bf16 %v5593_v4 }
 0xb68   :  { %v5717_v6 = vpop.f32.mrf.mxu0 }
 0xb69   :  { %v5759_v53 = vadd.f32 %v5758_v42, %v5717_v6  ;;  %v6012_v6 = vadd.f32 %v6009_v59, %v12516_v10 }
 0xb6a   :  { %v5719_v39 = vpop.f32.mrf.mxu0 }
 0xb6b   :  { %v5761_v3 = vadd.f32 %v5760_v52, %v5719_v39  ;;  %v5799_v2 = vpop.f32.mrf.mxu1  ;;  %v6010_v39 = vunpack.c.h.bf16 %v5593_v4 }
 0xb6c   :  { %v5721_v55 = vpop.f32.mrf.mxu0 }
 0xb6d   :  { %v6043_v5 = vadd.f32 %v6040_v14, %v5761_v3  ;;  %v5801_v46 = vpop.f32.mrf.mxu1  ;;  %v6013_v3 = vadd.f32 %v6010_v39, %v12519_v33  ;;  %v7025_v14 = vmul.f32 -1.442695, %v6012_v6  ;;  %v6011_v33 = vunpack.c.l.bf16 %v5594_v50  ;;  %v5596_v6 = vld [vmem:[#allocation3 + $0xf0] sm:$0xff] }
 0xb6e   :  { %v5722_v18 = vpop.f32.mrf.mxu0 }
 0xb6f   :  { %v5803_v25 = vpop.f32.mrf.mxu1  ;;  %v7026_v55 = vmul.f32 -1.442695, %v6013_v3  ;;  %8137 = vpow2.f32 %v7025_v14 }
 0xb70   :  { %v7028_v25 = vmul.f32 -1.442695, %v6043_v5 }
 0xb71   :  { %v5804_v15 = vpop.f32.mrf.mxu1  ;;  %8139 = vpow2.f32 %v7026_v55 }
 0xb72   :  { %8141 = vpow2.f32 %v7028_v25  ;;  %v6071_v25 = vunpack.c.h.bf16 %v5596_v6 }
 0xb88   :  { %v5840_v62 = vpop.f32.mrf.mxu0 }
 0xb89   :  { %v5841_v60 = vadd.f32 %v5840_v62, %v5799_v2  ;;  %v8138_v62 = vpop.eup %8137 }
 0xb8a   :  { %v5842_v29 = vpop.f32.mrf.mxu0 }
 0xb8b   :  { %v6044_v24 = vadd.f32 %v6041_v7, %v5841_v60  ;;  %v5843_v17 = vadd.f32 %v5842_v29, %v5801_v46  ;;  %v5922_v40 = vpop.f32.mrf.mxu1  ;;  %v8140_v60 = vpop.eup %8139  ;;  %v6024_v7 = vadd.f32 1.0, %v8138_v62  ;;  %v6014_v29 = vadd.f32 %v6011_v33, %v5759_v53 }
 0xb8c   :  { %v5844_v27 = vpop.f32.mrf.mxu0  ;;  %v6025_v10 = vadd.f32 1.0, %v8140_v60 }
 0xb8d   :  { %v5924_v43 = vpop.f32.mrf.mxu1  ;;  %v7029_v15 = vmul.f32 -1.442695, %v6044_v24  ;;  %v8142_v27 = vpop.eup %8141 }
 0xb8e   :  { %v5845_v42 = vpop.f32.mrf.mxu0  ;;  %v6055_v4 = vadd.f32 1.0, %v8142_v27 }
 0xb8f   :  { %v5926_v21 = vpop.f32.mrf.mxu1  ;;  %8143 = vpow2.f32 %v7029_v15  ;;  %v7027_v42 = vmul.f32 -1.442695, %v6014_v29 }
 0xb90   :  { %8145 = vrcp.f32 %v6024_v7 }
 0xb91   :  { %v5927_v52 = vpop.f32.mrf.mxu1  ;;  %8147 = vrcp.f32 %v6025_v10 }
 0xb92   :  { %8149 = vpow2.f32 %v7027_v42 }
 0xb93   :  { %8151 = vrcp.f32 %v6055_v4 }
 0xb9c   :  { %v8144_v21 = vpop.eup %8143 }
 0xb9d   :  { %v6056_v5 = vadd.f32 1.0, %v8144_v21  ;;  %v8146_v14 = vpop.eup %8145 }
 0xb9e   :  { %v8148_v53 = vpop.eup %8147 }
 0xb9f   :  { %8153 = vrcp.f32 %v6056_v5  ;;  %v8150_v33 = vpop.eup %8149 }
 0xba0   :  { %v8152_v29 = vpop.eup %8151  ;;  %v6026_v27 = vadd.f32 1.0, %v8150_v33  ;;  %v8903_v33 = vld [vmem:[#allocation10 + $0x5f0] ss:$36 sps:$4 sm:$0xff]  }
 0xba1   :  { %v6079_v21 = vsub.f32 1.0, %v8152_v29  ;;  %v6085_v44 = vmul.f32 %v8152_v29, %v12252_v35  ;;  %v8904_v29 = vld [vmem:[#allocation10 + $0x5ac] ss:$36 sps:$4 sm:$0xff]  }
 0xbab   :  { %v12529_v45 = vpop.f32.mrf.mxu1 }
 0xbac   :  { %v8154_v42 = vpop.eup %8153 }
 0xbad   :  { %v12531_v2 = vpop.f32.mrf.mxu1  ;;  %v6080_v4 = vsub.f32 1.0, %v8154_v42 }
 0xbae   :  { %v7295_v35 = vadd.f32 %v12531_v2, %v12529_v45 }
 0xbaf   :  { %v7296_v46 = vpop.f32.mrf.mxu1 }
 0xbb1   :  { %v7297_v18 = vpop.f32.mrf.mxu1 }
 0xbb2   :  { %v6070_v18 = vunpack.c.l.bf16 %v5596_v6 }
 0xbc8   :  { %v5881_v52 = vpop.f32.mrf.mxu0 }
 0xbc9   :  { %v5923_v59 = vadd.f32 %v5922_v40, %v5881_v52  ;;  %v6042_v40 = vunpack.c.l.bf16 %v6036_v36 }
 0xbca   :  { %v5883_v39 = vpop.f32.mrf.mxu0 }
 0xbcb   :  { %v6064_v24 = vadd.f32 %v5923_v59, %v9668_v13  ;;  %v5925_v3 = vadd.f32 %v5924_v43, %v5883_v39  ;;  %v6045_v7 = vadd.f32 %v6042_v40, %v5843_v17  ;;  %v6086_v17 = vmul.f32 %v8154_v42, %v12254_v63  ;;  %v8906_v42 = vld [vmem:[#allocation10 + $0x564] ss:$36 sps:$4 sm:$0xff]  }
 0xbcc   :  { %v5885_v55 = vpop.f32.mrf.mxu0 }
 0xbcd   :  { %v6067_v46 = vmul.f32 %v8146_v14, %v6064_v24  ;;  %v6065_v50 = vadd.f32 %v5925_v3, %v9671_v12  ;;  %v7030_v43 = vmul.f32 -1.442695, %v6045_v7 }
 0xbce   :  { %v5886_v15 = vpop.f32.mrf.mxu0 }
 0xbcf   :  { %v6073_v62 = vadd.f32 %v6070_v18, %v6067_v46  ;;  %v6068_v60 = vmul.f32 %v8148_v53, %v6065_v50  ;;  %v8899_v18 = vld [vmem:[#allocation10 + $0x680] ss:$36 sps:$4 sm:$0xff]   ;;  %v5597_v50 = vld [vmem:[#allocation3 + $0xf8] sm:$0xf] }
 0xbd0   :  { %v6072_v2 = vunpack.c.l.bf16 %v5597_v50  ;;  %v8914_v50 = vld [vmem:[#allocation10 + $0x200] ss:$36 sps:$4 sm:$0xff]  }
 0xbd1   :  { %8155 = vtanh.f32 %v6073_v62  ;;  %v6074_v10 = vadd.f32 %v6071_v25, %v6068_v60  ;;  %v8900_v25 = vld [vmem:[#allocation10 + $0x63c] ss:$36 sps:$4 sm:$0xff]  }
 0xbd2   :  { %v8901_v60 = vld [vmem:[#allocation10 + $0x638] ss:$36 sps:$4 sm:$0xff]  }
 0xbd3   :  { %8157 = vtanh.f32 %v6074_v10  ;;  %v8902_v10 = vld [vmem:[#allocation10 + $0x5f4] ss:$36 sps:$4 sm:$0xff]  }
 0xbd4   :  { %8159 = vpow2.f32 %v7030_v43 }
 0xbd5   :  { %8161 = vrcp.f32 %v6026_v27  ;;  %v8905_v27 = vld [vmem:[#allocation10 + $0x5a8] ss:$36 sps:$4 sm:$0xff]  }
 0xbde   :  { %v8156_v52 = vpop.eup %8155 }
 0xbdf   :  { %v6082_v59 = vmul.f32 %v8156_v52, %v6079_v21  ;;  %v8907_v21 = vld [vmem:[#allocation10 + $0x560] ss:$36 sps:$4 sm:$0xff]  }
 0xbe0   :  { %v8158_v36 = vpop.eup %8157 }
 0xbe1   :  { %v6083_v6 = vmul.f32 %v8158_v36, %v6080_v4  ;;  %v12539_v39 = vadd.f32 %v6085_v44, %v6082_v59  ;;  %v8160_v3 = vpop.eup %8159  ;;  %v8908_v4 = vld [vmem:[#allocation10 + $0x51c] ss:$36 sps:$4 sm:$0xff]  }
 0xbe2   :  { %v6057_v63 = vadd.f32 1.0, %v8160_v3  ;;  %v8162_v40 = vpop.eup %8161  ;;  %v8909_v59 = vld [vmem:[#allocation10 + $0x518] ss:$36 sps:$4 sm:$0xff]  }
 0xbe3   :  { %v12541_v5 = vadd.f32 %v6086_v17, %v6083_v6  ;;  %v12549_v14 = vpack.c.bf16 %v12539_v39, %v12539_v39  ;;  %v8910_v6 = vld [vmem:[#allocation10 + $0x4d4] ss:$36 sps:$4 sm:$0xff]  }
 0xbe4   :  { %8163 = vrcp.f32 %v6057_v63  ;;  %v8912_v63 = vld [vmem:[#allocation10 + $0x48c] ss:$36 sps:$4 sm:$0xff]  }
 0xbe5   :  { %v12545_v24 = vpack.c.bf16 %v12541_v5, %v12541_v5 }
 0xbe7   :  { %6131 = vmatprep.mubr.bf16.mxu1 %v12545_v24 }
 0xbe8   :  { %v6003_v55 = vpop.f32.mrf.mxu0  ;;  %6132 = vmatmul.mubr.bf16.vlgmr.msra.gmra.mxu1 %v12549_v14 }
 0xbe9   :  { %v6004_v46 = vadd.f32 %v7295_v35, %v6003_v55  ;;  %6223 = vmatpush1.bf16.msra.mxu1 %v8899_v18  ;;  %6254 = vmatprep.mubr.bf16.mxu1 %v13182_v19  ;;  %v8911_v35 = vld [vmem:[#allocation10 + $0x4d0] ss:$36 sps:$4 sm:$0xff]   ;;  %v8913_v18 = vld [vmem:[#allocation10 + $0x488] ss:$36 sps:$4 sm:$0xff]  }
 0xbea   :  { %v7501_v53 = vpop.f32.mrf.mxu0  ;;  %6224 = vmatprep.subr.bf16.mxu1 %v8900_v25  ;;  %v8917_v25 = vld [vmem:[#allocation10 + $0x208] ss:$36 sps:$4 sm:$0xff]  }
 0xbeb   :  { %v6066_v15 = vadd.f32 %v6004_v46, %v9691_v49  ;;  %v8915_v53 = vld [vmem:[#allocation10 + $0x20c] ss:$36 sps:$4 sm:$0xff]  }
 0xbec   :  { %v6006_v62 = vpop.f32.mrf.mxu0 }
 0xbed   :  { %v6069_v45 = vmul.f32 %v8162_v40, %v6066_v15  ;;  %6225 = vmatpush1.bf16.msra.mxu1 %v8901_v60  ;;  %v8918_v15 = vld [vmem:[#allocation10 + $0x1b8] ss:$36 sps:$4 sm:$0xff]   ;;  %v8919_v40 = vld [vmem:[#allocation10 + $0x1c4] ss:$36 sps:$4 sm:$0xff]  }
 0xbee   :  { %v7502_v7 = vpop.f32.mrf.mxu0  ;;  %6226 = vmatprep.subr.bf16.mxu1 %v8902_v10  ;;  %v8920_v62 = vld [vmem:[#allocation10 + $0x174] ss:$36 sps:$4 sm:$0xff]   ;;  %v8923_v60 = vld [vmem:[#allocation10 + $0x17c] ss:$36 sps:$4 sm:$0xff]  }
 0xbef   :  { %v6075_v43 = vadd.f32 %v6072_v2, %v6069_v45  ;;  %v8921_v45 = vld [vmem:[#allocation10 + $0x1c0] ss:$36 sps:$4 sm:$0xff]   ;;  %v8922_v2 = vld [vmem:[#allocation10 + $0x170] ss:$36 sps:$4 sm:$0xff]   ;;  %v8925_v10 = vld [vmem:[#allocation10 + $0x178] ss:$36 sps:$4 sm:$0xff]  }
 0xbf0   :  { %v8924_v7 = vld [vmem:[#allocation10 + $0x12c] ss:$36 sps:$4 sm:$0xff]  }
 0xbf1   :  { %8165 = vtanh.f32 %v6075_v43  ;;  %6227 = vmatpush1.bf16.msra.mxu1 %v8903_v33  ;;  %v8164_v52 = vpop.eup %8163  ;;  %v8926_v43 = vld [vmem:[#allocation10 + $0x128] ss:$36 sps:$4 sm:$0xff]   ;;  %v8927_v33 = vld [vmem:[#allocation10 + $0x134] ss:$36 sps:$4 sm:$0xff]  }
 0xbf2   :  { %6228 = vmatprep.subr.bf16.mxu1 %v8904_v29  ;;  %v6081_v44 = vsub.f32 1.0, %v8164_v52  ;;  %v6087_v3 = vmul.f32 %v8164_v52, %v12284_v41  ;;  %v8916_v41 = vld [vmem:[#allocation10 + $0x1bc] ss:$36 sps:$4 sm:$0xff]   ;;  %v8928_v29 = vld [vmem:[#allocation10 + $0xe4] ss:$36 sps:$4 sm:$0xff]  }
 0xbf3   :  { %v8932_v52 = vld [vmem:[#allocation10 + $0x9c] ss:$36 sps:$4 sm:$0xff]  }
 0xbf5   :  { %6229 = vmatpush1.bf16.msra.mxu1 %v8905_v27  ;;  %v8929_v27 = vld [vmem:[#allocation10 + $0x130] ss:$36 sps:$4 sm:$0xff]  }
 0xbf6   :  { %6230 = vmatprep.subr.bf16.mxu1 %v8906_v42  ;;  %v8930_v42 = vld [vmem:[#allocation10 + $0xe0] ss:$36 sps:$4 sm:$0xff]  }
 0xbf9   :  { %6231 = vmatpush1.bf16.msra.mxu1 %v8907_v21  ;;  %v8931_v21 = vld [vmem:[#allocation10 + $0xec] ss:$36 sps:$4 sm:$0xff]  }
 0xbfa   :  { %6232 = vmatprep.subr.bf16.mxu1 %v8908_v4  ;;  %v8933_v4 = vld [vmem:[#allocation10 + $0xe8] ss:$36 sps:$4 sm:$0xff]  }
 0xbfd   :  { %6233 = vmatpush1.bf16.msra.mxu1 %v8909_v59  ;;  %v8934_v59 = vld [vmem:[#allocation10 + $0x98] ss:$36 sps:$4 sm:$0xff]  }
 0xbfe   :  { %v8166_v36 = vpop.eup %8165  ;;  %6234 = vmatprep.subr.bf16.mxu1 %v8910_v6  ;;  %v8937_v6 = vld [vmem:[#allocation10 + $0xa0] ss:$36 sps:$4 sm:$0xff]  }
 0xbff   :  { %v6084_v17 = vmul.f32 %v8166_v36, %v6081_v44  ;;  %v8935_v44 = vld [vmem:[#allocation10 + $0xa4] ss:$36 sps:$4 sm:$0xff]   ;;  %v8936_v36 = vld [vmem:[#allocation10 + $0x54] ss:$36 sps:$4 sm:$0xff]  }
 0xc01   :  { %6235 = vmatpush1.bf16.msra.mxu1 %v8911_v35  ;;  %v12558_v55 = vadd.f32 %v6087_v3, %v6084_v17  ;;  %v8938_v17 = vld [vmem:[#allocation10 + $0x50] ss:$36 sps:$4 sm:$0xff]   ;;  %v8939_v3 = vld [vmem:[#allocation10 + $0x5c] ss:$36 sps:$4 sm:$0xff]  }
 0xc02   :  { %6236 = vmatprep.subr.bf16.mxu1 %v8912_v63  ;;  %v8940_v35 = vld [vmem:[#allocation10 + $0xc] ss:$36 sps:$4 sm:$0xff]   ;;  %v8941_v63 = vld [vmem:[#allocation10 + $0x58] ss:$36 sps:$4 sm:$0xff]  }
 0xc03   :  { %v12562_v46 = vpack.c.bf16 %v12558_v55, %v12558_v55 }
 0xc05   :  { %6237 = vmatpush1.bf16.msra.mxu1 %v8913_v18  ;;  %6173 = vmatmul.mubr.bf16.vlgmr.msra.gmra.mxu0 %v12562_v46  ;;  %v8942_v18 = vld [vmem:[#allocation10 + $0x8] ss:$36 sps:$4 sm:$0xff]  }
 0xc06   :  { %6182 = vmatpush1.bf16.msra.mxu0 %v8914_v50  ;;  %6213 = vmatprep.mubr.bf16.mxu0 %v12545_v24  ;;  %v8943_v50 = vld [vmem:[#allocation10 + $0x14] ss:$36 sps:$4 sm:$0xff]  }
 0xc07   :  { %6263 = vmatprep.subr.bf16.mxu1 %v8915_v53  ;;  %6183 = vmatprep.subr.bf16.mxu0 %v8916_v41  ;;  %v8944_v53 = vld [vmem:[#allocation10 + $0x444] ss:$36 sps:$4 sm:$0xff]   ;;  %v8945_v41 = vld [vmem:[#allocation10 + $0x10] ss:$36 sps:$4 sm:$0xff]  }
 0xc08   :  { %6255 = vmatmul.mubr.bf16.vlgmr.msra.gmra.mxu1 %v12562_v46 }
 0xc09   :  { %6264 = vmatpush1.bf16.msra.mxu1 %v8917_v25  ;;  %6295 = vmatprep.mubr.bf16.mxu1 %v12545_v24  ;;  %v8946_v25 = vld [vmem:[#allocation10 + $0x440] ss:$36 sps:$4 sm:$0xff]  }
 0xc0a   :  { %6184 = vmatpush1.bf16.msra.mxu0 %v8918_v15  ;;  %6265 = vmatprep.subr.bf16.mxu1 %v8919_v40  ;;  %v8947_v15 = vld [vmem:[#allocation10 + $0x44c] ss:$36 sps:$4 sm:$0xff]   ;;  %v8948_v40 = vld [vmem:[#allocation10 + $0x3fc] ss:$36 sps:$4 sm:$0xff]  }
 0xc0b   :  { %6185 = vmatprep.subr.bf16.mxu0 %v8920_v62  ;;  %v8949_v62 = vld [vmem:[#allocation10 + $0x448] ss:$36 sps:$4 sm:$0xff]  }
 0xc0d   :  { %6266 = vmatpush1.bf16.msra.mxu1 %v8921_v45  ;;  %v8950_v45 = vld [vmem:[#allocation10 + $0x3f8] ss:$36 sps:$4 sm:$0xff]  }
 0xc0e   :  { %6186 = vmatpush1.bf16.msra.mxu0 %v8922_v2  ;;  %6267 = vmatprep.subr.bf16.mxu1 %v8923_v60  ;;  %v8951_v2 = vld [vmem:[#allocation10 + $0x404] ss:$36 sps:$4 sm:$0xff]   ;;  %v8952_v60 = vld [vmem:[#allocation10 + $0x3b4] ss:$36 sps:$4 sm:$0xff]  }
 0xc0f   :  { %6187 = vmatprep.subr.bf16.mxu0 %v8924_v7  ;;  %v8953_v7 = vld [vmem:[#allocation10 + $0x400] ss:$36 sps:$4 sm:$0xff]  }
 0xc11   :  { %6268 = vmatpush1.bf16.msra.mxu1 %v8925_v10  ;;  %v8954_v10 = vld [vmem:[#allocation10 + $0x3b0] ss:$36 sps:$4 sm:$0xff]  }
 0xc12   :  { %6188 = vmatpush1.bf16.msra.mxu0 %v8926_v43  ;;  %6269 = vmatprep.subr.bf16.mxu1 %v8927_v33  ;;  %v8955_v43 = vld [vmem:[#allocation10 + $0x3bc] ss:$36 sps:$4 sm:$0xff]   ;;  %v8956_v33 = vld [vmem:[#allocation10 + $0x36c] ss:$36 sps:$4 sm:$0xff]  }
 0xc13   :  { %6189 = vmatprep.subr.bf16.mxu0 %v8928_v29  ;;  %v8957_v29 = vld [vmem:[#allocation10 + $0x3b8] ss:$36 sps:$4 sm:$0xff]  }
 0xc15   :  { %6270 = vmatpush1.bf16.msra.mxu1 %v8929_v27  ;;  %v8958_v27 = vld [vmem:[#allocation10 + $0x368] ss:$36 sps:$4 sm:$0xff]  }
 0xc16   :  { %6190 = vmatpush1.bf16.msra.mxu0 %v8930_v42  ;;  %6271 = vmatprep.subr.bf16.mxu1 %v8931_v21  ;;  %v8959_v42 = vld [vmem:[#allocation10 + $0x374] ss:$36 sps:$4 sm:$0xff]   ;;  %v8960_v21 = vld [vmem:[#allocation10 + $0x324] ss:$36 sps:$4 sm:$0xff]  }
 0xc17   :  { %6191 = vmatprep.subr.bf16.mxu0 %v8932_v52  ;;  %v8961_v52 = vld [vmem:[#allocation10 + $0x370] ss:$36 sps:$4 sm:$0xff]  }
 0xc19   :  { %6272 = vmatpush1.bf16.msra.mxu1 %v8933_v4  ;;  %v8962_v4 = vld [vmem:[#allocation10 + $0x320] ss:$36 sps:$4 sm:$0xff]  }
 0xc1a   :  { %6192 = vmatpush1.bf16.msra.mxu0 %v8934_v59  ;;  %6273 = vmatprep.subr.bf16.mxu1 %v8935_v44  ;;  %v8963_v59 = vld [vmem:[#allocation10 + $0x32c] ss:$36 sps:$4 sm:$0xff]   ;;  %v8964_v44 = vld [vmem:[#allocation10 + $0x2dc] ss:$36 sps:$4 sm:$0xff]  }
 0xc1b   :  { %6193 = vmatprep.subr.bf16.mxu0 %v8936_v36  ;;  %v8965_v36 = vld [vmem:[#allocation10 + $0x328] ss:$36 sps:$4 sm:$0xff]  }
 0xc1d   :  { %6274 = vmatpush1.bf16.msra.mxu1 %v8937_v6  ;;  %v8966_v6 = vld [vmem:[#allocation10 + $0x2d8] ss:$36 sps:$4 sm:$0xff]  }
 0xc1e   :  { %6194 = vmatpush1.bf16.msra.mxu0 %v8938_v17  ;;  %6275 = vmatprep.subr.bf16.mxu1 %v8939_v3  ;;  %v8967_v17 = vld [vmem:[#allocation10 + $0x2e4] ss:$36 sps:$4 sm:$0xff]   ;;  %v8968_v3 = vld [vmem:[#allocation10 + $0x294] ss:$36 sps:$4 sm:$0xff]  }
 0xc1f   :  { %6195 = vmatprep.subr.bf16.mxu0 %v8940_v35  ;;  %v8969_v35 = vld [vmem:[#allocation10 + $0x2e0] ss:$36 sps:$4 sm:$0xff]  }
 0xc21   :  { %6276 = vmatpush1.bf16.msra.mxu1 %v8941_v63  ;;  %v8970_v63 = vld [vmem:[#allocation10 + $0x290] ss:$36 sps:$4 sm:$0xff]  }
 0xc22   :  { %6196 = vmatpush1.bf16.msra.mxu0 %v8942_v18  ;;  %6277 = vmatprep.subr.bf16.mxu1 %v8943_v50  ;;  %v8971_v18 = vld [vmem:[#allocation10 + $0x29c] ss:$36 sps:$4 sm:$0xff]   ;;  %v8972_v50 = vld [vmem:[#allocation10 + $0x24c] ss:$36 sps:$4 sm:$0xff]  }
 0xc23   :  { %6197 = vmatprep.subr.bf16.mxu0 %v8944_v53  ;;  %v8973_v53 = vld [vmem:[#allocation10 + $0x298] ss:$36 sps:$4 sm:$0xff]  }
 0xc25   :  { %6278 = vmatpush1.bf16.msra.mxu1 %v8945_v41  ;;  %v8974_v41 = vld [vmem:[#allocation10 + $0x248] ss:$36 sps:$4 sm:$0xff]  }
 0xc26   :  { %6198 = vmatpush2.bf16.msra.mxu0 %v8946_v25  ;;  %6279 = vmatprep.subr.bf16.mxu1 %v8947_v15  ;;  %v8975_v25 = vld [vmem:[#allocation10 + $0x254] ss:$36 sps:$4 sm:$0xff]   ;;  %v8976_v15 = vld [vmem:[#allocation10 + $0x68c] ss:$36 sps:$4 sm:$0xff]  }
 0xc27   :  { %6199 = vmatprep.subr.bf16.mxu0 %v8948_v40  ;;  %v8977_v40 = vld [vmem:[#allocation10 + $0x250] ss:$36 sps:$4 sm:$0xff]  }
 0xc29   :  { %6280 = vmatpush2.bf16.msra.mxu1 %v8949_v62  ;;  %v8978_v62 = vld [vmem:[#allocation10 + $0x688] ss:$36 sps:$4 sm:$0xff]  }
 0xc2a   :  { %6200 = vmatpush2.bf16.msra.mxu0 %v8950_v45  ;;  %6281 = vmatprep.subr.bf16.mxu1 %v8951_v2  ;;  %v8979_v45 = vld [vmem:[#allocation10 + $0x694] ss:$36 sps:$4 sm:$0xff]   ;;  %v8980_v2 = vld [vmem:[#allocation10 + $0x644] ss:$36 sps:$4 sm:$0xff]  }
 0xc2b   :  { %6201 = vmatprep.subr.bf16.mxu0 %v8952_v60  ;;  %v8981_v60 = vld [vmem:[#allocation10 + $0x690] ss:$36 sps:$4 sm:$0xff]  }
 0xc2d   :  { %6282 = vmatpush2.bf16.msra.mxu1 %v8953_v7  ;;  %v8982_v7 = vld [vmem:[#allocation10 + $0x640] ss:$36 sps:$4 sm:$0xff]  }
 0xc2e   :  { %6202 = vmatpush2.bf16.msra.mxu0 %v8954_v10  ;;  %6283 = vmatprep.subr.bf16.mxu1 %v8955_v43  ;;  %v8983_v10 = vld [vmem:[#allocation10 + $0x64c] ss:$36 sps:$4 sm:$0xff]   ;;  %v8984_v43 = vld [vmem:[#allocation10 + $0x5fc] ss:$36 sps:$4 sm:$0xff]  }
 0xc2f   :  { %6203 = vmatprep.subr.bf16.mxu0 %v8956_v33  ;;  %v8985_v33 = vld [vmem:[#allocation10 + $0x648] ss:$36 sps:$4 sm:$0xff]  }
 0xc31   :  { %6284 = vmatpush2.bf16.msra.mxu1 %v8957_v29  ;;  %v8986_v29 = vld [vmem:[#allocation10 + $0x5f8] ss:$36 sps:$4 sm:$0xff]  }
 0xc32   :  { %6204 = vmatpush2.bf16.msra.mxu0 %v8958_v27  ;;  %6285 = vmatprep.subr.bf16.mxu1 %v8959_v42  ;;  %v8987_v27 = vld [vmem:[#allocation10 + $0x604] ss:$36 sps:$4 sm:$0xff]   ;;  %v8988_v42 = vld [vmem:[#allocation10 + $0x5b4] ss:$36 sps:$4 sm:$0xff]  }
 0xc33   :  { %6205 = vmatprep.subr.bf16.mxu0 %v8960_v21  ;;  %v8989_v21 = vld [vmem:[#allocation10 + $0x600] ss:$36 sps:$4 sm:$0xff]  }
 0xc35   :  { %6286 = vmatpush2.bf16.msra.mxu1 %v8961_v52  ;;  %v8990_v52 = vld [vmem:[#allocation10 + $0x5b0] ss:$36 sps:$4 sm:$0xff]  }
 0xc36   :  { %6206 = vmatpush2.bf16.msra.mxu0 %v8962_v4  ;;  %6287 = vmatprep.subr.bf16.mxu1 %v8963_v59  ;;  %v8991_v4 = vld [vmem:[#allocation10 + $0x5bc] ss:$36 sps:$4 sm:$0xff]  }
 0xc37   :  { %6207 = vmatprep.subr.bf16.mxu0 %v8964_v44  ;;  %v8993_v59 = vld [vmem:[#allocation10 + $0x5b8] ss:$36 sps:$4 sm:$0xff]   ;;  %v8994_v44 = vld [vmem:[#allocation10 + $0x568] ss:$36 sps:$4 sm:$0xff]  }
 0xc39   :  { %6288 = vmatpush2.bf16.msra.mxu1 %v8965_v36  ;;  %v8995_v36 = vld [vmem:[#allocation10 + $0x574] ss:$36 sps:$4 sm:$0xff]  }
 0xc3a   :  { %6208 = vmatpush2.bf16.msra.mxu0 %v8966_v6  ;;  %6289 = vmatprep.subr.bf16.mxu1 %v8967_v17  ;;  %v8996_v6 = vld [vmem:[#allocation10 + $0x524] ss:$36 sps:$4 sm:$0xff]   ;;  %v8997_v17 = vld [vmem:[#allocation10 + $0x570] ss:$36 sps:$4 sm:$0xff]  }
 0xc3b   :  { %6209 = vmatprep.subr.bf16.mxu0 %v8968_v3  ;;  %v8998_v3 = vld [vmem:[#allocation10 + $0x520] ss:$36 sps:$4 sm:$0xff]  }
 0xc3d   :  { %6290 = vmatpush2.bf16.msra.mxu1 %v8969_v35  ;;  %v8999_v35 = vld [vmem:[#allocation10 + $0x52c] ss:$36 sps:$4 sm:$0xff]  }
 0xc3e   :  { %6210 = vmatpush2.bf16.msra.mxu0 %v8970_v63  ;;  %6291 = vmatprep.subr.bf16.mxu1 %v8971_v18  ;;  %v9000_v63 = vld [vmem:[#allocation10 + $0x4dc] ss:$36 sps:$4 sm:$0xff]   ;;  %v9001_v18 = vld [vmem:[#allocation10 + $0x528] ss:$36 sps:$4 sm:$0xff]  }
 0xc3f   :  { %6211 = vmatprep.subr.bf16.mxu0 %v8972_v50  ;;  %v9002_v50 = vld [vmem:[#allocation10 + $0x4d8] ss:$36 sps:$4 sm:$0xff]  }
 0xc41   :  { %6292 = vmatpush2.bf16.msra.mxu1 %v8973_v53  ;;  %v9003_v53 = vld [vmem:[#allocation10 + $0x4e4] ss:$36 sps:$4 sm:$0xff]  }
 0xc42   :  { %6212 = vmatpush2.bf16.msra.mxu0 %v8974_v41  ;;  %6293 = vmatprep.subr.bf16.mxu1 %v8975_v25  ;;  %v9004_v41 = vld [vmem:[#allocation10 + $0x494] ss:$36 sps:$4 sm:$0xff]   ;;  %v9005_v25 = vld [vmem:[#allocation10 + $0x4e0] ss:$36 sps:$4 sm:$0xff]  }
 0xc43   :  { %6304 = vmatprep.subr.bf16.mxu0 %v8976_v15  ;;  %v9006_v15 = vld [vmem:[#allocation10 + $0x490] ss:$36 sps:$4 sm:$0xff]  }
 0xc45   :  { %6214 = vmatmul.mubr.bf16.vlgmr.msra.gmra.mxu0 %v12549_v14  ;;  %6294 = vmatpush2.bf16.msra.mxu1 %v8977_v40  ;;  %v9007_v40 = vld [vmem:[#allocation10 + $0x49c] ss:$36 sps:$4 sm:$0xff]  }
 0xc46   :  { %6305 = vmatpush1.bf16.msra.mxu0 %v8978_v62  ;;  %6386 = vmatprep.subr.bf16.mxu1 %v8979_v45  ;;  %v9008_v62 = vld [vmem:[#allocation10 + $0x214] ss:$36 sps:$4 sm:$0xff]  }
 0xc47   :  { %6306 = vmatprep.subr.bf16.mxu0 %v8980_v2  ;;  %6336 = vmatprep.mubr.bf16.mxu0 %v13182_v19  ;;  %v9009_v45 = vld [vmem:[#allocation10 + $0x498] ss:$36 sps:$4 sm:$0xff]   ;;  %v9010_v2 = vld [vmem:[#allocation10 + $0x210] ss:$36 sps:$4 sm:$0xff]  }
 0xc48   :  { %6296 = vmatmul.mubr.bf16.vlgmr.msra.gmra.mxu1 %v12549_v14 }
 0xc49   :  { %6387 = vmatpush1.bf16.msra.mxu1 %v8981_v60  ;;  %6418 = vmatprep.mubr.bf16.mxu1 %v13182_v19  ;;  %v8992_v19 = vld [vmem:[#allocation10 + $0x56c] ss:$36 sps:$4 sm:$0xff]   ;;  %v9011_v60 = vld [vmem:[#allocation10 + $0x458] ss:$36 sps:$4 sm:$0xff]  }
 0xc4a   :  { %6307 = vmatpush1.bf16.msra.mxu0 %v8982_v7  ;;  %6388 = vmatprep.subr.bf16.mxu1 %v8983_v10  ;;  %v9012_v7 = vld [vmem:[#allocation10 + $0x1cc] ss:$36 sps:$4 sm:$0xff]   ;;  %v9013_v10 = vld [vmem:[#allocation10 + $0x218] ss:$36 sps:$4 sm:$0xff]  }
 0xc4b   :  { %6308 = vmatprep.subr.bf16.mxu0 %v8984_v43  ;;  %v9014_v43 = vld [vmem:[#allocation10 + $0x1c8] ss:$36 sps:$4 sm:$0xff]  }
 0xc4d   :  { %6389 = vmatpush1.bf16.msra.mxu1 %v8985_v33  ;;  %v9015_v33 = vld [vmem:[#allocation10 + $0x410] ss:$36 sps:$4 sm:$0xff]  }
 0xc4e   :  { %6309 = vmatpush1.bf16.msra.mxu0 %v8986_v29  ;;  %6390 = vmatprep.subr.bf16.mxu1 %v8987_v27  ;;  %v9016_v29 = vld [vmem:[#allocation10 + $0x184] ss:$36 sps:$4 sm:$0xff]   ;;  %v9017_v27 = vld [vmem:[#allocation10 + $0x1d0] ss:$36 sps:$4 sm:$0xff]  }
 0xc4f   :  { %6310 = vmatprep.subr.bf16.mxu0 %v8988_v42  ;;  %v9018_v42 = vld [vmem:[#allocation10 + $0x180] ss:$36 sps:$4 sm:$0xff]  }
 0xc51   :  { %6391 = vmatpush1.bf16.msra.mxu1 %v8989_v21  ;;  %v9019_v21 = vld [vmem:[#allocation10 + $0x3c8] ss:$36 sps:$4 sm:$0xff]  }
 0xc52   :  { %6311 = vmatpush1.bf16.msra.mxu0 %v8990_v52  ;;  %6392 = vmatprep.subr.bf16.mxu1 %v8991_v4  ;;  %v9020_v52 = vld [vmem:[#allocation10 + $0x13c] ss:$36 sps:$4 sm:$0xff]  }
 0xc53   :  { %6312 = vmatprep.subr.bf16.mxu0 %v8992_v19  ;;  %v9021_v4 = vld [vmem:[#allocation10 + $0x138] ss:$36 sps:$4 sm:$0xff]   ;;  %v9023_v19 = vld [vmem:[#allocation10 + $0xf0] ss:$36 sps:$4 sm:$0xff]  }
 0xc55   :  { %6393 = vmatpush1.bf16.msra.mxu1 %v8993_v59  ;;  %v9024_v59 = vld [vmem:[#allocation10 + $0xac] ss:$36 sps:$4 sm:$0xff]  }
 0xc56   :  { %6313 = vmatpush1.bf16.msra.mxu0 %v8994_v44  ;;  %6394 = vmatprep.subr.bf16.mxu1 %v8995_v36  ;;  %v9025_v44 = vld [vmem:[#allocation10 + $0xa8] ss:$36 sps:$4 sm:$0xff]  }
 0xc57   :  { %6314 = vmatprep.subr.bf16.mxu0 %v8996_v6  ;;  %v9032_v36 = vld [vmem:[#allocation10 + $0x40c] ss:$36 sps:$4 sm:$0xff]   ;;  %v9035_v6 = vld [vmem:[#allocation10 + $0x3c0] ss:$36 sps:$4 sm:$0xff]  }
 0xc59   :  { %6395 = vmatpush1.bf16.msra.mxu1 %v8997_v17  ;;  %v9037_v17 = vld [vmem:[#allocation10 + $0x378] ss:$36 sps:$4 sm:$0xff]  }
 0xc5a   :  { %6315 = vmatpush1.bf16.msra.mxu0 %v8998_v3  ;;  %6396 = vmatprep.subr.bf16.mxu1 %v8999_v35  ;;  %v9039_v3 = vld [vmem:[#allocation10 + $0x330] ss:$36 sps:$4 sm:$0xff]  }
 0xc5b   :  { %6316 = vmatprep.subr.bf16.mxu0 %v9000_v63 }
 0xc5d   :  { %6397 = vmatpush1.bf16.msra.mxu1 %v9001_v18  ;;  %v12613_v18 = vld [vmem:[#allocation3 + $0x10c] sm:$0xff] }
 0xc5e   :  { %6317 = vmatpush1.bf16.msra.mxu0 %v9002_v50  ;;  %6398 = vmatprep.subr.bf16.mxu1 %v9003_v53  ;;  %v6092_v50 = vld [vmem:[#allocation3 + $0x104] sm:$0xff] }
 0xc5f   :  { %6318 = vmatprep.subr.bf16.mxu0 %v9004_v41 }
 0xc61   :  { %6399 = vmatpush1.bf16.msra.mxu1 %v9005_v25 }
 0xc62   :  { %6319 = vmatpush1.bf16.msra.mxu0 %v9006_v15  ;;  %6400 = vmatprep.subr.bf16.mxu1 %v9007_v40 }
 0xc63   :  { %6345 = vmatprep.subr.bf16.mxu0 %v9008_v62 }
 0xc65   :  { %6337 = vmatmul.mubr.bf16.vlgmr.msra.gmra.mxu0 %v12562_v46  ;;  %6401 = vmatpush1.bf16.msra.mxu1 %v9009_v45 }
 0xc66   :  { %6346 = vmatpush1.bf16.msra.mxu0 %v9010_v2  ;;  %6377 = vmatprep.mubr.bf16.mxu0 %v12545_v24 }
 0xc67   :  { %7308 = vmatprep.subr.bf16.mxu1 %v9011_v60  ;;  %6347 = vmatprep.subr.bf16.mxu0 %v9012_v7 }
 0xc68   :  { %6419 = vmatmul.mubr.bf16.vlgmr.msra.gmra.mxu1 %v12562_v46 }
 0xc69   :  { %7309 = vmatpush3.bf16.msra.mxu1 %v9013_v10  ;;  %6459 = vmatprep.mubr.bf16.mxu1 %v12545_v24  ;;  %v9022_v24 = vld [vmem:[#allocation10 + $0xf4] ss:$36 sps:$4 sm:$0xff]  }
 0xc6a   :  { %6348 = vmatpush1.bf16.msra.mxu0 %v9014_v43  ;;  %7310 = vmatprep.subr.bf16.mxu1 %v9015_v33 }
 0xc6b   :  { %6349 = vmatprep.subr.bf16.mxu0 %v9016_v29 }
 0xc6d   :  { %7311 = vmatpush3.bf16.msra.mxu1 %v9017_v27 }
 0xc6e   :  { %6350 = vmatpush1.bf16.msra.mxu0 %v9018_v42  ;;  %7312 = vmatprep.subr.bf16.mxu1 %v9019_v21 }
 0xc6f   :  { %6351 = vmatprep.subr.bf16.mxu0 %v9020_v52 }
 0xc71   :  { %7313 = vmatpush3.bf16.msra.mxu1 %v12411_v57  ;;  %v9026_v57 = vld [vmem:[#allocation10 + $0x64] ss:$36 sps:$4 sm:$0xff]  }
 0xc72   :  { %6352 = vmatpush1.bf16.msra.mxu0 %v9021_v4  ;;  %7314 = vmatprep.subr.bf16.mxu1 %v12415_v22  ;;  %v9027_v22 = vld [vmem:[#allocation10 + $0x60] ss:$36 sps:$4 sm:$0xff]  }
 0xc73   :  { %6353 = vmatprep.subr.bf16.mxu0 %v9022_v24 }
 0xc75   :  { %7315 = vmatpush3.bf16.msra.mxu1 %v12419_v20  ;;  %v9028_v20 = vld [vmem:[#allocation10 + $0x1c] ss:$36 sps:$4 sm:$0xff]  }
 0xc76   :  { %6354 = vmatpush1.bf16.msra.mxu0 %v9023_v19  ;;  %7316 = vmatprep.subr.bf16.mxu1 %v12423_v23  ;;  %v9029_v23 = vld [vmem:[#allocation10 + $0x18] ss:$36 sps:$4 sm:$0xff]  }
 0xc77   :  { %6355 = vmatprep.subr.bf16.mxu0 %v9024_v59 }
 0xc79   :  { %7317 = vmatpush3.bf16.msra.mxu1 %v12427_v54  ;;  %v9030_v54 = vld [vmem:[#allocation10 + $0x454] ss:$36 sps:$4 sm:$0xff]  }
 0xc7a   :  { %6356 = vmatpush1.bf16.msra.mxu0 %v9025_v44  ;;  %7318 = vmatprep.subr.bf16.mxu1 %v12431_v32  ;;  %v9031_v32 = vld [vmem:[#allocation10 + $0x450] ss:$36 sps:$4 sm:$0xff]  }
 0xc7b   :  { %6357 = vmatprep.subr.bf16.mxu0 %v9026_v57  ;;  %v6091_v57 = vld [vmem:[#allocation3 + $0xfc] sm:$0xff] }
 0xc7d   :  { %7319 = vmatpush3.bf16.msra.mxu1 %v12435_v8  ;;  %v9033_v8 = vld [vmem:[#allocation10 + $0x408] ss:$36 sps:$4 sm:$0xff]  }
 0xc7e   :  { %6358 = vmatpush1.bf16.msra.mxu0 %v9027_v22  ;;  %7320 = vmatprep.subr.bf16.mxu1 %v12439_v30  ;;  %v9034_v30 = vld [vmem:[#allocation10 + $0x3c4] ss:$36 sps:$4 sm:$0xff]   ;;  %v6507_v22 = vunpack.c.l.bf16 %v6091_v57 }
 0xc7f   :  { %6359 = vmatprep.subr.bf16.mxu0 %v9028_v20 }
 0xc81   :  { %7321 = vmatpush3.bf16.msra.mxu1 %v12443_v31  ;;  %v9036_v31 = vld [vmem:[#allocation10 + $0x37c] ss:$36 sps:$4 sm:$0xff]  }
 0xc82   :  { %6360 = vmatpush1.bf16.msra.mxu0 %v9029_v23  ;;  %7322 = vmatprep.subr.bf16.mxu1 %v12447_v28  ;;  %v9038_v28 = vld [vmem:[#allocation10 + $0x334] ss:$36 sps:$4 sm:$0xff]   ;;  %v6508_v23 = vunpack.c.h.bf16 %v6091_v57  ;;  %v14102_v57 = vld [vmem:[#allocation20_spill] sm:$0xff] }
 0xc83   :  { %6361 = vmatprep.subr.bf16.mxu0 %v9030_v54 }
 0xc85   :  { %7323 = vmatpush3.bf16.msra.mxu1 %v12451_v48  ;;  %v9040_v48 = vld [vmem:[#allocation10 + $0x2ec] ss:$36 sps:$4 sm:$0xff]  }
 0xc86   :  { %6362 = vmatpush2.bf16.msra.mxu0 %v9031_v32 }
 0xc87   :  { %6363 = vmatprep.subr.bf16.mxu0 %v9032_v36 }
 0xc88   :  { %6460 = vmatmul.mubr.bf16.vlgmr.msra.gmra.mxu1 %v12549_v14 }
 0xc8a   :  { %6364 = vmatpush2.bf16.msra.mxu0 %v9033_v8 }
 0xc8b   :  { %6365 = vmatprep.subr.bf16.mxu0 %v9034_v30 }
 0xc8e   :  { %6366 = vmatpush2.bf16.msra.mxu0 %v9035_v6 }
 0xc8f   :  { %6367 = vmatprep.subr.bf16.mxu0 %v9036_v31 }
 0xc92   :  { %6368 = vmatpush2.bf16.msra.mxu0 %v9037_v17 }
 0xc93   :  { %6369 = vmatprep.subr.bf16.mxu0 %v9038_v28 }
 0xc96   :  { %6370 = vmatpush2.bf16.msra.mxu0 %v9039_v3 }
 0xc97   :  { %6371 = vmatprep.subr.bf16.mxu0 %v9040_v48 }
 0xc9a   :  { %6372 = vmatpush2.bf16.msra.mxu0 %v12465_v47 }
 0xc9b   :  { %6373 = vmatprep.subr.bf16.mxu0 %v12468_v26 }
 0xc9e   :  { %6374 = vmatpush2.bf16.msra.mxu0 %v12471_v61 }
 0xc9f   :  { %6375 = vmatprep.subr.bf16.mxu0 %v12474_v37 }
 0xca2   :  { %6376 = vmatpush2.bf16.msra.mxu0 %v12477_v11 }
 0xca3   :  { %7503 = vmatprep.subr.bf16.mxu0 %v14100_v38 }
 0xca5   :  { %6378 = vmatmul.mubr.bf16.vlgmr.msra.gmra.mxu0 %v12549_v14 }
 0xca6   :  { %7504 = vmatpush3.bf16.msra.mxu0 %v12482_v0  ;;  %7519 = vmatprep.mubr.msk.bf16.mxu0 %vm9160_vm1, %v14100_v38 }
 0xca7   :  { %7505 = vmatprep.subr.bf16.mxu0 %v14100_v38 }
 0xca8   :  { %v6133_v47 = vpop.f32.mrf.mxu1 }
 0xcaa   :  { %7506 = vmatpush3.bf16.msra.mxu0 %v12488_v16  ;;  %v6135_v26 = vpop.f32.mrf.mxu1 }
 0xcab   :  { %7507 = vmatprep.subr.bf16.mxu0 %v14100_v38 }
 0xcac   :  { %v6137_v61 = vpop.f32.mrf.mxu1 }
 0xcad   :  { %v6509_v61 = vunpack.c.l.bf16 %v6092_v50 }
 0xcae   :  { %7508 = vmatpush3.bf16.msra.mxu0 %v12492_v34  ;;  %v6138_v37 = vpop.f32.mrf.mxu1 }
 0xcaf   :  { %7509 = vmatprep.subr.bf16.mxu0 %v14100_v38 }
 0xcb2   :  { %7510 = vmatpush3.bf16.msra.mxu0 %v12496_v51 }
 0xcb3   :  { %7511 = vmatprep.subr.bf16.mxu0 %v14100_v38 }
 0xcb6   :  { %7512 = vmatpush3.bf16.msra.mxu0 %v12500_v9 }
 0xcb7   :  { %7513 = vmatprep.subr.bf16.mxu0 %v14100_v38 }
 0xcba   :  { %7514 = vmatpush3.bf16.msra.mxu0 %v12504_v1 }
 0xcbb   :  { %7515 = vmatprep.subr.bf16.mxu0 %v14100_v38 }
 0xcbe   :  { %7516 = vmatpush3.bf16.msra.mxu0 %v12508_v58  ;;  %v6534_v58 = vrot.slane %v12613_v18, 4 }
 0xcbf   :  { %7517 = vmatprep.subr.bf16.mxu0 %v14100_v38  ;;  %v6533_v38 = vrot.slane %v6092_v50, 4 }
 0xcc2   :  { %7518 = vmatpush3.bf16.msra.mxu0 %v12512_v56  ;;  %v6535_v56 = vsel %vm3048_vm0, %v6533_v38, %v6534_v58 }
 0xcc3   :  { %v6538_v15 = vunpack.c.l.bf16 %v6535_v56  ;;  %v6539_v29 = vunpack.c.h.bf16 %v6535_v56 }
 0xcc5   :  { %7520 = vmatmul.mubr.bf16.vlgmr.msra.gmra.mxu0 %v12562_v46  ;;  %v6174_v11 = vpop.f32.mrf.mxu0 }
 0xcc6   :  { %v6175_v0 = vadd.f32 %v6174_v11, %v6133_v47 }
 0xcc7   :  { %v6176_v16 = vpop.f32.mrf.mxu0 }
 0xcc8   :  { %v6177_v34 = vadd.f32 %v6176_v16, %v6135_v26  ;;  %v6256_v51 = vpop.f32.mrf.mxu1  ;;  %v6510_v20 = vadd.f32 %v6507_v22, %v6175_v0 }
 0xcc9   :  { %v6178_v9 = vpop.f32.mrf.mxu0 }
 0xcca   :  { %v6258_v14 = vpop.f32.mrf.mxu1  ;;  %v6511_v54 = vadd.f32 %v6508_v23, %v6177_v34  ;;  %v7031_v32 = vmul.f32 -1.442695, %v6510_v20 }
 0xccb   :  { %v6179_v35 = vpop.f32.mrf.mxu0 }
 0xccc   :  { %v6260_v63 = vpop.f32.mrf.mxu1  ;;  %v7032_v36 = vmul.f32 -1.442695, %v6511_v54  ;;  %8167 = vpow2.f32 %v7031_v32 }
 0xcce   :  { %v6261_v1 = vpop.f32.mrf.mxu1  ;;  %8169 = vpow2.f32 %v7032_v36 }
 0xcd9   :  { %v8168_v3 = vpop.eup %8167 }
 0xcda   :  { %v6522_v47 = vadd.f32 1.0, %v8168_v3 }
 0xcdb   :  { %v8170_v48 = vpop.eup %8169 }
 0xcdc   :  { %v6523_v26 = vadd.f32 1.0, %v8170_v48 }
 0xd05   :  { %v6215_v53 = vpop.f32.mrf.mxu0 }
 0xd06   :  { %v6257_v46 = vadd.f32 %v6256_v51, %v6215_v53 }
 0xd07   :  { %v6217_v41 = vpop.f32.mrf.mxu0 }
 0xd08   :  { %v6259_v25 = vadd.f32 %v6258_v14, %v6217_v41  ;;  %v6297_v40 = vpop.f32.mrf.mxu1  ;;  %v6512_v37 = vadd.f32 %v6509_v61, %v6257_v46  ;;  %v6094_v14 = vld [vmem:[#allocation3 + $0x114] sm:$0xff] }
 0xd09   :  { %v6219_v62 = vpop.f32.mrf.mxu0 }
 0xd0a   :  { %v6541_v45 = vadd.f32 %v6538_v15, %v6259_v25  ;;  %v6299_v2 = vpop.f32.mrf.mxu1  ;;  %v7033_v0 = vmul.f32 -1.442695, %v6512_v37  ;;  %v6568_v25 = vunpack.c.l.bf16 %v6094_v14  ;;  %v6569_v15 = vunpack.c.h.bf16 %v6094_v14 }
 0xd0b   :  { %v6220_v60 = vpop.f32.mrf.mxu0  ;;  %v6540_v62 = vunpack.c.l.bf16 %v6534_v58 }
 0xd0c   :  { %v6301_v7 = vpop.f32.mrf.mxu1  ;;  %v7034_v17 = vmul.f32 -1.442695, %v6541_v45 }
 0xd0e   :  { %v6302_v10 = vpop.f32.mrf.mxu1  ;;  %8171 = vpow2.f32 %v7034_v17 }
 0xd1b   :  { %v8172_v11 = vpop.eup %8171 }
 0xd1c   :  { %v6553_v51 = vadd.f32 1.0, %v8172_v11 }
 0xd25   :  { %v6338_v43 = vpop.f32.mrf.mxu0 }
 0xd26   :  { %v6339_v33 = vadd.f32 %v6338_v43, %v6297_v40 }
 0xd27   :  { %v6340_v27 = vpop.f32.mrf.mxu0 }
 0xd28   :  { %v6542_v42 = vadd.f32 %v6539_v29, %v6339_v33  ;;  %v6341_v21 = vadd.f32 %v6340_v27, %v6299_v2  ;;  %v6420_v52 = vpop.f32.mrf.mxu1  ;;  %v6595_v27 = vld [vmem:[%s12647_s5] sm:$0x7]  ;;  %s9161_s5 = smov [#allocation13]  }
 0xd29   :  { %v6342_v4 = vpop.f32.mrf.mxu0  ;;  %v6604_v22 = vrot.slane %v6595_v27, %v14102_v57  ;;  %s6645_s26 = sshll.u32 %s9161_s5, 4  ;;  %s6646_s26 = int_to_ptr.vmem [resolvable:$true] %s6645_s26 }
 0xd2a   :  { %v6422_v24 = vpop.f32.mrf.mxu1  ;;  %v7035_v28 = vmul.f32 -1.442695, %v6542_v42  ;;  %v6543_v60 = vadd.f32 %v6540_v62, %v6341_v21  ;;  %v14101_v4 = vld [vmem:[#allocation18_spill] sm:$0xff]  ;;  %s9121_s27 = scalar_lea.vmem %s6646_s26, 128  ;;  %p9126_p7 = scmp.lt.s32.totalorder %s6646_s26, %s6646_s26 }
 0xd2b   :  { %v6343_v19 = vpop.f32.mrf.mxu0  ;;  %p9122_p6 = scmp.ne.s32.totalorder %s6646_s26, %s9121_s27  ;;  %p9127_p8 = scmp.lt.s32.totalorder %s9121_s27, %s9121_s27 }
 0xd2c   :  { %v6424_v59 = vpop.f32.mrf.mxu1  ;;  %8173 = vpow2.f32 %v7035_v28  ;;  %v7036_v7 = vmul.f32 -1.442695, %v6543_v60  ;;  %v6095_v28 = vld [vmem:[#allocation3 + $0x11c] sm:$0xf] }
 0xd2d   :  { %8175 = vrcp.f32 %v6522_v47  ;;  %v6570_v61 = vunpack.c.l.bf16 %v6095_v28  ;;  %p9128_p9 = por %p9127_p8, %p9126_p7 }
 0xd2e   :  { %v6425_v44 = vpop.f32.mrf.mxu1  ;;  %8177 = vrcp.f32 %v6523_v26 }
 0xd2f   :  { %8179 = vpow2.f32 %v7033_v0  ;;  %p9129_p10 = pnand %p9128_p9, %p9122_p6 }
 0xd30   :  { %8181 = vrcp.f32 %v6553_v51  ;;  %v14103_v51 = vld [vmem:[#allocation19_spill] sm:$0xff] }
 0xd39   :  { %v8174_v16 = vpop.eup %8173 }
 0xd3a   :  { %v6554_v63 = vadd.f32 1.0, %v8174_v16  ;;  %v8176_v53 = vpop.eup %8175 }
 0xd3b   :  { %v8178_v46 = vpop.eup %8177 }
 0xd3c   :  { %8183 = vrcp.f32 %v6554_v63  ;;  %v8180_v10 = vpop.eup %8179 }
 0xd3d   :  { %v8182_v43 = vpop.eup %8181  ;;  %v6524_v33 = vadd.f32 1.0, %v8180_v10 }
 0xd3e   :  { %v6583_v21 = vmul.f32 %v8182_v43, %v12539_v39 }
 0xd48   :  { %v12619_v8 = vpop.f32.mrf.mxu1 }
 0xd49   :  { %v8184_v29 = vpop.eup %8183 }
 0xd4a   :  { %v12621_v30 = vpop.f32.mrf.mxu1  ;;  %v6578_v18 = vsub.f32 1.0, %v8184_v29  ;;  %v6584_v59 = vmul.f32 %v8184_v29, %v12541_v5 }
 0xd4b   :  { %v7326_v36 = vadd.f32 %v12621_v30, %v12619_v8 }
 0xd4c   :  { %v7327_v6 = vpop.f32.mrf.mxu1 }
 0xd4e   :  { %v7328_v31 = vpop.f32.mrf.mxu1 }
 0xd65   :  { %v6379_v34 = vpop.f32.mrf.mxu0 }
 0xd66   :  { %v6421_v9 = vadd.f32 %v6420_v52, %v6379_v34 }
 0xd67   :  { %v6381_v35 = vpop.f32.mrf.mxu0 }
 0xd68   :  { %v6562_v1 = vadd.f32 %v6421_v9, %v9668_v13  ;;  %v6423_v38 = vadd.f32 %v6422_v24, %v6381_v35  ;;  %v6600_v24 = vrot.slane %v6595_v27, %v14101_v4  ;;  %v6608_v9 = vrot.slane %v6595_v27, %v14103_v51 }
 0xd69   :  { %v6383_v56 = vpop.f32.mrf.mxu0 }
 0xd6a   :  { %v6565_v41 = vmul.f32 %v8176_v53, %v6562_v1  ;;  %v6563_v50 = vadd.f32 %v6423_v38, %v9671_v12  ;;  %v6577_v12 = vsub.f32 1.0, %v8182_v43 }
 0xd6b   :  { %v6384_v40 = vpop.f32.mrf.mxu0 }
 0xd6c   :  { %v6571_v45 = vadd.f32 %v6568_v25, %v6565_v41  ;;  %v6566_v2 = vmul.f32 %v8178_v46, %v6563_v50 }
 0xd6e   :  { %8185 = vtanh.f32 %v6571_v45  ;;  %v6572_v13 = vadd.f32 %v6569_v15, %v6566_v2 }
 0xd70   :  { %8187 = vtanh.f32 %v6572_v13 }
 0xd71   :  { %8189 = vpow2.f32 %v7036_v7 }
 0xd72   :  { %8191 = vrcp.f32 %v6524_v33 }
 0xd7b   :  { %v8186_v42 = vpop.eup %8185 }
 0xd7c   :  { %v6580_v58 = vmul.f32 %v8186_v42, %v6577_v12 }
 0xd7d   :  { %v8188_v52 = vpop.eup %8187 }
 0xd7e   :  { %v6581_v19 = vmul.f32 %v8188_v52, %v6578_v18  ;;  %v6586_v44 = vadd.f32 %v6583_v21, %v6580_v58  ;;  %v8190_v32 = vpop.eup %8189 }
 0xd7f   :  { %v6555_v17 = vadd.f32 1.0, %v8190_v32  ;;  %v8192_v47 = vpop.eup %8191 }
 0xd80   :  { %v6587_v20 = vadd.f32 %v6584_v59, %v6581_v19  ;;  %v6612_v23 = vmul.f32 %v6600_v24, %v6586_v44 }
 0xd81   :  { %8193 = vrcp.f32 %v6555_v17 }
 0xd82   :  { %v6613_v54 = vmul.f32 %v6604_v22, %v6587_v20 }
 0xd84   :  { %v6615_v6 = vadd.f32 %v6613_v54, %v6612_v23 }
 0xd85   :  { %v6501_v31 = vpop.f32.mrf.mxu0 }
 0xd86   :  { %v6502_v39 = vadd.f32 %v7326_v36, %v6501_v31 }
 0xd87   :  { %v7521_v3 = vpop.f32.mrf.mxu0 }
 0xd88   :  { %v6564_v48 = vadd.f32 %v6502_v39, %v9691_v49  ;;  %v7037_v49 = vld [vmem:[#allocation4] ss:$0 sm:$0xff] }
 0xd89   :  { %v6504_v5 = vpop.f32.mrf.mxu0 }
 0xd8a   :  { %v6567_v26 = vmul.f32 %v8192_v47, %v6564_v48 }
 0xd8b   :  { %v7522_v37 = vpop.f32.mrf.mxu0 }
 0xd8c   :  { %v6573_v11 = vadd.f32 %v6570_v61, %v6567_v26 }
 0xd8e   :  { %8195 = vtanh.f32 %v6573_v11  ;;  %v8194_v0 = vpop.eup %8193 }
 0xd8f   :  { %v6579_v16 = vsub.f32 1.0, %v8194_v0  ;;  %v6585_v30 = vmul.f32 %v8194_v0, %v12558_v55 }
 0xd9b   :  { %v8196_v34 = vpop.eup %8195 }
 0xd9c   :  { %v6582_v8 = vmul.f32 %v8196_v34, %v6579_v16 }
 0xd9e   :  { %v6588_v14 = vadd.f32 %v6585_v30, %v6582_v8 }
 0xda0   :  { %v6614_v35 = vmul.f32 %v6608_v9, %v6588_v14 }
 0xda2   :  { %v6616_v63 = vadd.f32 %v6615_v6, %v6614_v35 }
 0xda4   :  { %6617 = vadd.xlane.f32.xlu0 %v6616_v63 }
 0xe2d   :  { %v6618_v1 = vpop.xlane.xlu0 %6617 }
 0xe2e   :  { %v6626_v38 = vadd.f32 %v7037_v49, %v6618_v1 }
 0xe30   :  { %v7038_v53 = vmul.f32 -1.442695, %v6626_v38 }
 0xe32   :  { %8197 = vpow2.f32 %v7038_v53 }
 0xe3f   :  { %v8198_v56 = vpop.eup %8197 }
 0xe40   :  { %v6630_v41 = vadd.f32 1.0, %v8198_v56 }
 0xe42   :  { %8199 = vrcp.f32 %v6630_v41 }
 0xe4f   :  { %v8200_v25 = vpop.eup %8199 }
 0xe50   :  { %6635 = vperm.xlu0 %7536, %v8200_v25  }
 0xecb   :  { %v6636_v55 = vpop.permute.xlu0 %6635 }
 0xecc   :  { %6638 = vst [vmem:[#allocation13] sm:$0xff] %v6636_v55 }
 0xecd   :  { %9132 = shalt.err (!%p9129_p10)
}
 0xece   :  { %6648 = dma.vmem_to_hbm [thread:$0]  %s6646_s26, 128, %s12649_s7, [#allocation7]  }
 0xecf   :  { %9147 = dma.done.wait [#allocation7], 128  }
 0xed0   :  { %9148 = vsyncadd [#allocation7], 4294967168 }
 0xed1   :  { %6652 = vsyncpa [#allocation6], 1 }
 0xed2   :  { %6653 = vsyncpa [#allocation9], 1 }
 0xed3   :  { %6654 = vsyncpa [#allocation12], 1 }
 0xed4   :  { %6655 = vsyncpa [#allocation7], 1 }

</bundles_post_ra>
